<compile_context>
chip_gen: v6e
topology: v6e:2x2x1
jax: 0.10.0
libtpu: 0.0.40
codegen_flags: <defaults>
</compile_context>

<pallas_src>
import functools

import numpy as np
import jax
import jax.numpy as jnp
from jax.experimental import pallas as pl
from jax.experimental.pallas import tpu as pltpu


# ---------------------------------------------------------------------------
# Fused Pallas kernel: conv1 + LReLU + conv2 + BatchNorm + LReLU + conv3
# ---------------------------------------------------------------------------
def _disc_fused_kernel(xph_ref, s1_ref, w1_ref, b1_ref, s2_ref, w2_ref,
                       gamma_ref, beta_ref, w3_ref, b3_ref, o_ref,
                       *, batch, eps, slope):
    B = batch
    cin = w1_ref.shape[1]
    c1 = w1_ref.shape[2]
    c2 = w2_ref.shape[2]
    m1 = s1_ref.shape[1]          # conv1 output rows per batch (8*8 = 64)
    m2 = s2_ref.shape[1]          # conv2 output rows per batch (4*4 = 16)
    f32 = jnp.float32

    # ---- conv1 (4x4, stride 2, pad 1) + bias + LeakyReLU -------------------
    # In-kernel im2col as a kh*kw tap loop.  For tap (i, j) = (2*ai+pi, 2*aj+pj)
    # the needed rows live in the (pi, pj) phase image of the padded input; the
    # (ai, aj) shift is a 0/1 selection matmul (exact), then a bf16 MXU matmul
    # against the per-tap weight with f32 accumulation.
    acc1 = jnp.zeros((B, m1, c1), f32)
    for i in range(4):
        for j in range(4):
            pi, ai = i % 2, i // 2
            pj, aj = j % 2, j // 2
            sel = jnp.broadcast_to(s1_ref[ai * 2 + aj], (B,) + s1_ref.shape[1:])
            src = xph_ref[pi, pj]                                   # (B, 81, Cin) bf16
            g = jnp.einsum('brm,bmc->brc', sel, src,
                           preferred_element_type=f32).astype(jnp.bfloat16)
            w = jnp.broadcast_to(w1_ref[i * 4 + j], (B,) + w1_ref.shape[1:])
            acc1 = acc1 + jnp.einsum('brc,bcd->brd', g, w,
                                     preferred_element_type=f32)
    y1 = acc1 + b1_ref[...]                                         # (B, 64, C1) f32
    y1 = jnp.where(y1 >= 0, y1, slope * y1)                         # LeakyReLU(0.2)
    y1 = y1.astype(jnp.bfloat16)                                    # stays in VMEM

    # ---- conv2 (4x4, stride 2, pad 1) -- bias dropped (cancelled by BN) ----
    # Same tap-gather structure; all-zero selection rows reproduce conv2's
    # zero-padding ring exactly.
    acc2 = jnp.zeros((B, m2, c2), f32)
    for t in range(16):
        sel = jnp.broadcast_to(s2_ref[t], (B,) + s2_ref.shape[1:])
        g = jnp.einsum('brm,bmc->brc', sel, y1,
                       preferred_element_type=f32).astype(jnp.bfloat16)
        w = jnp.broadcast_to(w2_ref[t], (B,) + w2_ref.shape[1:])
        acc2 = acc2 + jnp.einsum('brc,bcd->brd', g, w,
                                 preferred_element_type=f32)

    # ---- BatchNorm2d (training-mode batch statistics) + LeakyReLU ----------
    cnt = float(B * m2)
    mean = jnp.sum(jnp.sum(acc2, axis=1, keepdims=True),
                   axis=0, keepdims=True) / cnt                     # (1, 1, C2)
    d = acc2 - mean
    var = jnp.sum(jnp.sum(d * d, axis=1, keepdims=True),
                  axis=0, keepdims=True) / cnt
    yn = d * jax.lax.rsqrt(var + eps)
    yn = yn * gamma_ref[...] + beta_ref[...]
    yn = jnp.where(yn >= 0, yn, slope * yn)                         # (B, 16, C2) f32

    # ---- conv3 (4x4, stride 1, no pad) == full reduction over the 4x4 map --
    # VPU multiply + lane/row reductions instead of a 1-column MXU matmul.
    prod = yn * w3_ref[...][None]                                   # (B, 16, C2)
    per_pos = jnp.sum(prod, axis=2)                                 # lane reduce
    tot = jnp.sum(per_pos, axis=1)                                  # (B,)
    # Lane-dense store: (1, B) with the batch on the lane axis.
    o_ref[...] = (tot[None, :] + b3_ref[...]).astype(o_ref.dtype)


# ---------------------------------------------------------------------------
# Parameters (incl. the constant tap-gather matrices) and wrapper
# ---------------------------------------------------------------------------
def init_params(key, in_channels=3, base=16):
    c1, c2 = base, base * 2
    ks = jax.random.split(key, 5)
    w1 = jax.random.normal(ks[0], (c1, in_channels, 4, 4), jnp.float32) * 0.05
    b1 = jax.random.normal(ks[1], (c1,), jnp.float32) * 0.05
    w2 = jax.random.normal(ks[2], (c2, c1, 4, 4), jnp.float32) * 0.05
    # conv2 bias omitted: a pre-BatchNorm per-channel constant is cancelled exactly
    # by the batch-mean subtraction, so the forward output is bit-identical.
    w3 = jax.random.normal(ks[3], (1, c2, 4, 4), jnp.float32) * 0.05
    b3 = jax.random.normal(ks[4], (1,), jnp.float32) * 0.05

    # Per-tap conv weights, (kh*kw, Cin, Cout), bf16 for the MXU.
    w1taps = jnp.transpose(w1, (2, 3, 1, 0)).reshape(16, in_channels, c1)
    w2taps = jnp.transpose(w2, (2, 3, 1, 0)).reshape(16, c1, c2)
    # conv3 weight as (position = oy*4+ox, C2), f32 for the VPU epilogue.
    w3r = jnp.transpose(w3[0], (1, 2, 0)).reshape(16, c2)

    # conv1 tap-gather matrices over the mod-2 phase-split padded input:
    #   S1[ai*2+aj][oy*8+ox, (oy+ai)*9+(ox+aj)] = 1
    s1 = np.zeros((4, 64, 81), np.float32)
    for ai in range(2):
        for aj in range(2):
            for oy in range(8):
                for ox in range(8):
                    s1[ai * 2 + aj, oy * 8 + ox, (oy + ai) * 9 + (ox + aj)] = 1.0

    # conv2 tap-gather matrices over the flattened 8x8 conv1 map.  All-zero rows
    # correspond to conv2's 1-pixel zero-padding ring.
    s2 = np.zeros((16, 16, 64), np.float32)
    for i in range(4):
        for j in range(4):
            for oy2 in range(4):
                for ox2 in range(4):
                    oy1, ox1 = 2 * oy2 + i - 1, 2 * ox2 + j - 1
                    if 0 <= oy1 < 8 and 0 <= ox1 < 8:
                        s2[i * 4 + j, oy2 * 4 + ox2, oy1 * 8 + ox1] = 1.0

    return {
        "w1taps": w1taps.astype(jnp.bfloat16),
        "b1": b1.reshape(1, 1, c1),
        "w2taps": w2taps.astype(jnp.bfloat16),
        "gamma": jnp.ones((1, 1, c2), jnp.float32),     # BatchNorm2d defaults
        "beta": jnp.zeros((1, 1, c2), jnp.float32),
        "w3r": w3r,
        "b3": b3.reshape(1, 1),
        "s1": jnp.asarray(s1, jnp.bfloat16),
        "s2": jnp.asarray(s2, jnp.bfloat16),
    }


def discriminator_forward(x_nchw, params):
    B, cin, H, W = x_nchw.shape
    assert (H, W) == (16, 16), "fused conv3 assumes a 4x4 post-conv2 map (16x16 input)"
    c1 = params["w1taps"].shape[2]
    c2 = params["w2taps"].shape[2]

    # Minimal wrapper glue: NCHW -> NHWC, zero-pad, mod-2 phase split, bf16 cast.
    # The phase split is a pure re-layout of the padded input (1x byte count) --
    # it replaces the old 16x-duplicated wrapper-side im2col slab.
    x = jnp.transpose(x_nchw, (0, 2, 3, 1))
    xp = jnp.pad(x, ((0, 0), (1, 1), (1, 1), (0, 0)))                 # (B, 18, 18, Cin)
    xph = xp.reshape(B, 9, 2, 9, 2, cin).transpose(2, 4, 0, 1, 3, 5)  # (2,2,B,9,9,Cin)
    xph = xph.reshape(2, 2, B, 81, cin).astype(jnp.bfloat16)

    operands = (xph, params["s1"], params["w1taps"], params["b1"],
                params["s2"], params["w2taps"], params["gamma"], params["beta"],
                params["w3r"], params["b3"])

    m1, k1 = params["s1"].shape[1], params["s1"].shape[2]
    m2 = params["s2"].shape[1]
    flops = 2 * B * 16 * (m1 * k1 * cin + m1 * cin * c1 + m2 * m1 * c1 + m2 * c1 * c2)
    bytes_accessed = sum(int(np.prod(a.shape)) * a.dtype.itemsize for a in operands)
    bytes_accessed += B * 4

    vmem_spec = pl.BlockSpec(memory_space=pltpu.MemorySpace.VMEM)
    out = pl.pallas_call(
        functools.partial(_disc_fused_kernel, batch=B, eps=1e-5, slope=0.2),
        out_shape=jax.ShapeDtypeStruct((1, B), jnp.float32),
        in_specs=[vmem_spec] * len(operands),
        out_specs=vmem_spec,
        cost_estimate=pl.CostEstimate(flops=flops, transcendentals=c2,
                                      bytes_accessed=bytes_accessed),
    )(*operands)

    return out[0].reshape(B, 1, 1, 1)                                # NCHW (B,1,1,1)


# ---------------------------------------------------------------------------
# Pure-JAX reference (mirrors the kernel's bf16 quantization points)
# ---------------------------------------------------------------------------
def reference_forward(x_nchw, params, eps=1e-5, slope=0.2):
    B = x_nchw.shape[0]
    cin = x_nchw.shape[1]
    c1 = params["w1taps"].shape[2]
    c2 = params["w2taps"].shape[2]
    dn = ("NHWC", "HWIO", "NHWC")

    x = jnp.transpose(x_nchw, (0, 2, 3, 1))
    xq = x.astype(jnp.bfloat16).astype(jnp.float32)
    w1 = params["w1taps"].reshape(4, 4, cin, c1).astype(jnp.float32)
    y1 = jax.lax.conv_general_dilated(xq, w1, (2, 2), [(1, 1), (1, 1)],
                                      dimension_numbers=dn)
    y1 = y1 + params["b1"].reshape(1, 1, 1, c1)
    y1 = jnp.where(y1 >= 0, y1, slope * y1)
    y1 = y1.astype(jnp.bfloat16).astype(jnp.float32)

    w2 = params["w2taps"].reshape(4, 4, c1, c2).astype(jnp.float32)
    z2 = jax.lax.conv_general_dilated(y1, w2, (2, 2), [(1, 1), (1, 1)],
                                      dimension_numbers=dn)
    # conv2 bias omitted: exactly cancelled by the BatchNorm mean subtraction.
    mean = jnp.mean(z2, axis=(0, 1, 2), keepdims=True)
    var = jnp.mean((z2 - mean) ** 2, axis=(0, 1, 2), keepdims=True)
    yn = (z2 - mean) * jax.lax.rsqrt(var + eps)
    yn = yn * params["gamma"].reshape(1, 1, 1, c2) + params["beta"].reshape(1, 1, 1, c2)
    yn = jnp.where(yn >= 0, yn, slope * yn)

    w3 = params["w3r"].reshape(4, 4, c2)
    out = jnp.einsum("bhwc,hwc->b", yn, w3) + params["b3"].reshape(())
    return out.reshape(B, 1, 1, 1)


if __name__ == "__main__":
    IN_CHANNELS, BASE, B = 4, 16, 2                    # small synthetic config
    key = jax.random.PRNGKey(0)
    kx, kp = jax.random.split(key)
    x = jax.random.normal(kx, (B, IN_CHANNELS, 16, 16), jnp.float32)  # NCHW
    params = init_params(kp, IN_CHANNELS, BASE)

    fwd = jax.jit(discriminator_forward)
    out = jax.block_until_ready(fwd(x, params))

    ref = jax.block_until_ready(reference_forward(x, params))
    assert out.shape == (B, 1, 1, 1), out.shape
    assert bool(jnp.all(jnp.isfinite(out)))
    assert bool(jnp.allclose(out, ref, atol=2e-2, rtol=2e-2)), (out.ravel(), ref.ravel())
    print("KERNEL_OK")
</pallas_src>

<mosaic_0001>
module attributes {stable_mosaic.version = 11 : i64} {
  func.func @_disc_fused_kernel(%arg0: memref<2x2x2x81x4xbf16, #tpu.memory_space<vmem>>, %arg1: memref<4x64x81xbf16, #tpu.memory_space<vmem>>, %arg2: memref<16x4x16xbf16, #tpu.memory_space<vmem>>, %arg3: memref<1x1x16xf32, #tpu.memory_space<vmem>>, %arg4: memref<16x16x64xbf16, #tpu.memory_space<vmem>>, %arg5: memref<16x16x32xbf16, #tpu.memory_space<vmem>>, %arg6: memref<1x1x32xf32, #tpu.memory_space<vmem>>, %arg7: memref<1x1x32xf32, #tpu.memory_space<vmem>>, %arg8: memref<16x32xf32, #tpu.memory_space<vmem>>, %arg9: memref<1x1xf32, #tpu.memory_space<vmem>>, %arg10: memref<1x2xf32, #tpu.memory_space<vmem>>) attributes {dimension_semantics = [], scalar_prefetch = 0 : i64, scratch_operands = 0 : i64, tpu.core_type = #tpu.core_type<tc>} {
    %cst = arith.constant 0.000000e+00 : f32
    %0 = vector.broadcast %cst : f32 to vector<2x64x16xf32>
    %c0 = arith.constant 0 : index
    %c0_0 = arith.constant 0 : index
    %c0_1 = arith.constant 0 : index
    %1 = vector.load %arg1[%c0, %c0_0, %c0_1] : memref<4x64x81xbf16, #tpu.memory_space<vmem>>, vector<1x64x81xbf16>
    %2 = vector.shape_cast %1 : vector<1x64x81xbf16> to vector<64x81xbf16>
    %3 = vector.shape_cast %2 : vector<64x81xbf16> to vector<1x64x81xbf16>
    %4 = vector.broadcast %3 : vector<1x64x81xbf16> to vector<2x64x81xbf16>
    %c0_2 = arith.constant 0 : index
    %c0_3 = arith.constant 0 : index
    %c0_4 = arith.constant 0 : index
    %c0_5 = arith.constant 0 : index
    %c0_6 = arith.constant 0 : index
    %5 = vector.load %arg0[%c0_2, %c0_3, %c0_4, %c0_5, %c0_6] : memref<2x2x2x81x4xbf16, #tpu.memory_space<vmem>>, vector<1x1x2x81x4xbf16>
    %6 = vector.shape_cast %5 : vector<1x1x2x81x4xbf16> to vector<2x81x4xbf16>
    "tpu.trace_start"() <{level = 10 : i32, message = "brm,bmc->brc"}> : () -> ()
    %cst_7 = arith.constant dense<0.000000e+00> : vector<2x64x4xf32>
    %7 = tpu.matmul %4, %6, %cst_7 {dimension_numbers = #tpu.dot_dimension_numbers<[2], [1], [1], [2], [0, 0, 0, 1, 1, 2], [0], [0]>} : vector<2x64x81xbf16>, vector<2x81x4xbf16>, vector<2x64x4xf32> -> vector<2x64x4xf32>
    "tpu.trace_stop"() : () -> ()
    %8 = arith.truncf %7 : vector<2x64x4xf32> to vector<2x64x4xbf16>
    %c0_8 = arith.constant 0 : index
    %c0_9 = arith.constant 0 : index
    %c0_10 = arith.constant 0 : index
    %9 = vector.load %arg2[%c0_8, %c0_9, %c0_10] : memref<16x4x16xbf16, #tpu.memory_space<vmem>>, vector<1x4x16xbf16>
    %10 = vector.shape_cast %9 : vector<1x4x16xbf16> to vector<4x16xbf16>
    %11 = vector.shape_cast %10 : vector<4x16xbf16> to vector<1x4x16xbf16>
    %12 = vector.broadcast %11 : vector<1x4x16xbf16> to vector<2x4x16xbf16>
    "tpu.trace_start"() <{level = 10 : i32, message = "brc,bcd->brd"}> : () -> ()
    %cst_11 = arith.constant dense<0.000000e+00> : vector<2x64x16xf32>
    %13 = tpu.matmul %8, %12, %cst_11 {dimension_numbers = #tpu.dot_dimension_numbers<[2], [1], [1], [2], [0, 0, 0, 1, 1, 2], [0], [0]>} : vector<2x64x4xbf16>, vector<2x4x16xbf16>, vector<2x64x16xf32> -> vector<2x64x16xf32>
    "tpu.trace_stop"() : () -> ()
    %14 = arith.addf %0, %13 : vector<2x64x16xf32>
    %c0_12 = arith.constant 0 : index
    %c0_13 = arith.constant 0 : index
    %c0_14 = arith.constant 0 : index
    %15 = vector.load %arg1[%c0_12, %c0_13, %c0_14] : memref<4x64x81xbf16, #tpu.memory_space<vmem>>, vector<1x64x81xbf16>
    %16 = vector.shape_cast %15 : vector<1x64x81xbf16> to vector<64x81xbf16>
    %17 = vector.shape_cast %16 : vector<64x81xbf16> to vector<1x64x81xbf16>
    %18 = vector.broadcast %17 : vector<1x64x81xbf16> to vector<2x64x81xbf16>
    %c0_15 = arith.constant 0 : index
    %c1 = arith.constant 1 : index
    %c0_16 = arith.constant 0 : index
    %c0_17 = arith.constant 0 : index
    %c0_18 = arith.constant 0 : index
    %19 = vector.load %arg0[%c0_15, %c1, %c0_16, %c0_17, %c0_18] : memref<2x2x2x81x4xbf16, #tpu.memory_space<vmem>>, vector<1x1x2x81x4xbf16>
    %20 = vector.shape_cast %19 : vector<1x1x2x81x4xbf16> to vector<2x81x4xbf16>
    "tpu.trace_start"() <{level = 10 : i32, message = "brm,bmc->brc"}> : () -> ()
    %cst_19 = arith.constant dense<0.000000e+00> : vector<2x64x4xf32>
    %21 = tpu.matmul %18, %20, %cst_19 {dimension_numbers = #tpu.dot_dimension_numbers<[2], [1], [1], [2], [0, 0, 0, 1, 1, 2], [0], [0]>} : vector<2x64x81xbf16>, vector<2x81x4xbf16>, vector<2x64x4xf32> -> vector<2x64x4xf32>
    "tpu.trace_stop"() : () -> ()
    %22 = arith.truncf %21 : vector<2x64x4xf32> to vector<2x64x4xbf16>
    %c1_20 = arith.constant 1 : index
    %c0_21 = arith.constant 0 : index
    %c0_22 = arith.constant 0 : index
    %23 = vector.load %arg2[%c1_20, %c0_21, %c0_22] : memref<16x4x16xbf16, #tpu.memory_space<vmem>>, vector<1x4x16xbf16>
    %24 = vector.shape_cast %23 : vector<1x4x16xbf16> to vector<4x16xbf16>
    %25 = vector.shape_cast %24 : vector<4x16xbf16> to vector<1x4x16xbf16>
    %26 = vector.broadcast %25 : vector<1x4x16xbf16> to vector<2x4x16xbf16>
    "tpu.trace_start"() <{level = 10 : i32, message = "brc,bcd->brd"}> : () -> ()
    %cst_23 = arith.constant dense<0.000000e+00> : vector<2x64x16xf32>
    %27 = tpu.matmul %22, %26, %cst_23 {dimension_numbers = #tpu.dot_dimension_numbers<[2], [1], [1], [2], [0, 0, 0, 1, 1, 2], [0], [0]>} : vector<2x64x4xbf16>, vector<2x4x16xbf16>, vector<2x64x16xf32> -> vector<2x64x16xf32>
    "tpu.trace_stop"() : () -> ()
    %28 = arith.addf %14, %27 : vector<2x64x16xf32>
    %c1_24 = arith.constant 1 : index
    %c0_25 = arith.constant 0 : index
    %c0_26 = arith.constant 0 : index
    %29 = vector.load %arg1[%c1_24, %c0_25, %c0_26] : memref<4x64x81xbf16, #tpu.memory_space<vmem>>, vector<1x64x81xbf16>
    %30 = vector.shape_cast %29 : vector<1x64x81xbf16> to vector<64x81xbf16>
    %31 = vector.shape_cast %30 : vector<64x81xbf16> to vector<1x64x81xbf16>
    %32 = vector.broadcast %31 : vector<1x64x81xbf16> to vector<2x64x81xbf16>
    %c0_27 = arith.constant 0 : index
    %c0_28 = arith.constant 0 : index
    %c0_29 = arith.constant 0 : index
    %c0_30 = arith.constant 0 : index
    %c0_31 = arith.constant 0 : index
    %33 = vector.load %arg0[%c0_27, %c0_28, %c0_29, %c0_30, %c0_31] : memref<2x2x2x81x4xbf16, #tpu.memory_space<vmem>>, vector<1x1x2x81x4xbf16>
    %34 = vector.shape_cast %33 : vector<1x1x2x81x4xbf16> to vector<2x81x4xbf16>
    "tpu.trace_start"() <{level = 10 : i32, message = "brm,bmc->brc"}> : () -> ()
    %cst_32 = arith.constant dense<0.000000e+00> : vector<2x64x4xf32>
    %35 = tpu.matmul %32, %34, %cst_32 {dimension_numbers = #tpu.dot_dimension_numbers<[2], [1], [1], [2], [0, 0, 0, 1, 1, 2], [0], [0]>} : vector<2x64x81xbf16>, vector<2x81x4xbf16>, vector<2x64x4xf32> -> vector<2x64x4xf32>
    "tpu.trace_stop"() : () -> ()
    %36 = arith.truncf %35 : vector<2x64x4xf32> to vector<2x64x4xbf16>
    %c2 = arith.constant 2 : index
    %c0_33 = arith.constant 0 : index
    %c0_34 = arith.constant 0 : index
    %37 = vector.load %arg2[%c2, %c0_33, %c0_34] : memref<16x4x16xbf16, #tpu.memory_space<vmem>>, vector<1x4x16xbf16>
    %38 = vector.shape_cast %37 : vector<1x4x16xbf16> to vector<4x16xbf16>
    %39 = vector.shape_cast %38 : vector<4x16xbf16> to vector<1x4x16xbf16>
    %40 = vector.broadcast %39 : vector<1x4x16xbf16> to vector<2x4x16xbf16>
    "tpu.trace_start"() <{level = 10 : i32, message = "brc,bcd->brd"}> : () -> ()
    %cst_35 = arith.constant dense<0.000000e+00> : vector<2x64x16xf32>
    %41 = tpu.matmul %36, %40, %cst_35 {dimension_numbers = #tpu.dot_dimension_numbers<[2], [1], [1], [2], [0, 0, 0, 1, 1, 2], [0], [0]>} : vector<2x64x4xbf16>, vector<2x4x16xbf16>, vector<2x64x16xf32> -> vector<2x64x16xf32>
    "tpu.trace_stop"() : () -> ()
    %42 = arith.addf %28, %41 : vector<2x64x16xf32>
    %c1_36 = arith.constant 1 : index
    %c0_37 = arith.constant 0 : index
    %c0_38 = arith.constant 0 : index
    %43 = vector.load %arg1[%c1_36, %c0_37, %c0_38] : memref<4x64x81xbf16, #tpu.memory_space<vmem>>, vector<1x64x81xbf16>
    %44 = vector.shape_cast %43 : vector<1x64x81xbf16> to vector<64x81xbf16>
    %45 = vector.shape_cast %44 : vector<64x81xbf16> to vector<1x64x81xbf16>
    %46 = vector.broadcast %45 : vector<1x64x81xbf16> to vector<2x64x81xbf16>
    %c0_39 = arith.constant 0 : index
    %c1_40 = arith.constant 1 : index
    %c0_41 = arith.constant 0 : index
    %c0_42 = arith.constant 0 : index
    %c0_43 = arith.constant 0 : index
    %47 = vector.load %arg0[%c0_39, %c1_40, %c0_41, %c0_42, %c0_43] : memref<2x2x2x81x4xbf16, #tpu.memory_space<vmem>>, vector<1x1x2x81x4xbf16>
    %48 = vector.shape_cast %47 : vector<1x1x2x81x4xbf16> to vector<2x81x4xbf16>
    "tpu.trace_start"() <{level = 10 : i32, message = "brm,bmc->brc"}> : () -> ()
    %cst_44 = arith.constant dense<0.000000e+00> : vector<2x64x4xf32>
    %49 = tpu.matmul %46, %48, %cst_44 {dimension_numbers = #tpu.dot_dimension_numbers<[2], [1], [1], [2], [0, 0, 0, 1, 1, 2], [0], [0]>} : vector<2x64x81xbf16>, vector<2x81x4xbf16>, vector<2x64x4xf32> -> vector<2x64x4xf32>
    "tpu.trace_stop"() : () -> ()
    %50 = arith.truncf %49 : vector<2x64x4xf32> to vector<2x64x4xbf16>
    %c3 = arith.constant 3 : index
    %c0_45 = arith.constant 0 : index
    %c0_46 = arith.constant 0 : index
    %51 = vector.load %arg2[%c3, %c0_45, %c0_46] : memref<16x4x16xbf16, #tpu.memory_space<vmem>>, vector<1x4x16xbf16>
    %52 = vector.shape_cast %51 : vector<1x4x16xbf16> to vector<4x16xbf16>
    %53 = vector.shape_cast %52 : vector<4x16xbf16> to vector<1x4x16xbf16>
    %54 = vector.broadcast %53 : vector<1x4x16xbf16> to vector<2x4x16xbf16>
    "tpu.trace_start"() <{level = 10 : i32, message = "brc,bcd->brd"}> : () -> ()
    %cst_47 = arith.constant dense<0.000000e+00> : vector<2x64x16xf32>
    %55 = tpu.matmul %50, %54, %cst_47 {dimension_numbers = #tpu.dot_dimension_numbers<[2], [1], [1], [2], [0, 0, 0, 1, 1, 2], [0], [0]>} : vector<2x64x4xbf16>, vector<2x4x16xbf16>, vector<2x64x16xf32> -> vector<2x64x16xf32>
    "tpu.trace_stop"() : () -> ()
    %56 = arith.addf %42, %55 : vector<2x64x16xf32>
    %c0_48 = arith.constant 0 : index
    %c0_49 = arith.constant 0 : index
    %c0_50 = arith.constant 0 : index
    %57 = vector.load %arg1[%c0_48, %c0_49, %c0_50] : memref<4x64x81xbf16, #tpu.memory_space<vmem>>, vector<1x64x81xbf16>
    %58 = vector.shape_cast %57 : vector<1x64x81xbf16> to vector<64x81xbf16>
    %59 = vector.shape_cast %58 : vector<64x81xbf16> to vector<1x64x81xbf16>
    %60 = vector.broadcast %59 : vector<1x64x81xbf16> to vector<2x64x81xbf16>
    %c1_51 = arith.constant 1 : index
    %c0_52 = arith.constant 0 : index
    %c0_53 = arith.constant 0 : index
    %c0_54 = arith.constant 0 : index
    %c0_55 = arith.constant 0 : index
    %61 = vector.load %arg0[%c1_51, %c0_52, %c0_53, %c0_54, %c0_55] : memref<2x2x2x81x4xbf16, #tpu.memory_space<vmem>>, vector<1x1x2x81x4xbf16>
    %62 = vector.shape_cast %61 : vector<1x1x2x81x4xbf16> to vector<2x81x4xbf16>
    "tpu.trace_start"() <{level = 10 : i32, message = "brm,bmc->brc"}> : () -> ()
    %cst_56 = arith.constant dense<0.000000e+00> : vector<2x64x4xf32>
    %63 = tpu.matmul %60, %62, %cst_56 {dimension_numbers = #tpu.dot_dimension_numbers<[2], [1], [1], [2], [0, 0, 0, 1, 1, 2], [0], [0]>} : vector<2x64x81xbf16>, vector<2x81x4xbf16>, vector<2x64x4xf32> -> vector<2x64x4xf32>
    "tpu.trace_stop"() : () -> ()
    %64 = arith.truncf %63 : vector<2x64x4xf32> to vector<2x64x4xbf16>
    %c4 = arith.constant 4 : index
    %c0_57 = arith.constant 0 : index
    %c0_58 = arith.constant 0 : index
    %65 = vector.load %arg2[%c4, %c0_57, %c0_58] : memref<16x4x16xbf16, #tpu.memory_space<vmem>>, vector<1x4x16xbf16>
    %66 = vector.shape_cast %65 : vector<1x4x16xbf16> to vector<4x16xbf16>
    %67 = vector.shape_cast %66 : vector<4x16xbf16> to vector<1x4x16xbf16>
    %68 = vector.broadcast %67 : vector<1x4x16xbf16> to vector<2x4x16xbf16>
    "tpu.trace_start"() <{level = 10 : i32, message = "brc,bcd->brd"}> : () -> ()
    %cst_59 = arith.constant dense<0.000000e+00> : vector<2x64x16xf32>
    %69 = tpu.matmul %64, %68, %cst_59 {dimension_numbers = #tpu.dot_dimension_numbers<[2], [1], [1], [2], [0, 0, 0, 1, 1, 2], [0], [0]>} : vector<2x64x4xbf16>, vector<2x4x16xbf16>, vector<2x64x16xf32> -> vector<2x64x16xf32>
    "tpu.trace_stop"() : () -> ()
    %70 = arith.addf %56, %69 : vector<2x64x16xf32>
    %c0_60 = arith.constant 0 : index
    %c0_61 = arith.constant 0 : index
    %c0_62 = arith.constant 0 : index
    %71 = vector.load %arg1[%c0_60, %c0_61, %c0_62] : memref<4x64x81xbf16, #tpu.memory_space<vmem>>, vector<1x64x81xbf16>
    %72 = vector.shape_cast %71 : vector<1x64x81xbf16> to vector<64x81xbf16>
    %73 = vector.shape_cast %72 : vector<64x81xbf16> to vector<1x64x81xbf16>
    %74 = vector.broadcast %73 : vector<1x64x81xbf16> to vector<2x64x81xbf16>
    %c1_63 = arith.constant 1 : index
    %c1_64 = arith.constant 1 : index
    %c0_65 = arith.constant 0 : index
    %c0_66 = arith.constant 0 : index
    %c0_67 = arith.constant 0 : index
    %75 = vector.load %arg0[%c1_63, %c1_64, %c0_65, %c0_66, %c0_67] : memref<2x2x2x81x4xbf16, #tpu.memory_space<vmem>>, vector<1x1x2x81x4xbf16>
    %76 = vector.shape_cast %75 : vector<1x1x2x81x4xbf16> to vector<2x81x4xbf16>
    "tpu.trace_start"() <{level = 10 : i32, message = "brm,bmc->brc"}> : () -> ()
    %cst_68 = arith.constant dense<0.000000e+00> : vector<2x64x4xf32>
    %77 = tpu.matmul %74, %76, %cst_68 {dimension_numbers = #tpu.dot_dimension_numbers<[2], [1], [1], [2], [0, 0, 0, 1, 1, 2], [0], [0]>} : vector<2x64x81xbf16>, vector<2x81x4xbf16>, vector<2x64x4xf32> -> vector<2x64x4xf32>
    "tpu.trace_stop"() : () -> ()
    %78 = arith.truncf %77 : vector<2x64x4xf32> to vector<2x64x4xbf16>
    %c5 = arith.constant 5 : index
    %c0_69 = arith.constant 0 : index
    %c0_70 = arith.constant 0 : index
    %79 = vector.load %arg2[%c5, %c0_69, %c0_70] : memref<16x4x16xbf16, #tpu.memory_space<vmem>>, vector<1x4x16xbf16>
    %80 = vector.shape_cast %79 : vector<1x4x16xbf16> to vector<4x16xbf16>
    %81 = vector.shape_cast %80 : vector<4x16xbf16> to vector<1x4x16xbf16>
    %82 = vector.broadcast %81 : vector<1x4x16xbf16> to vector<2x4x16xbf16>
    "tpu.trace_start"() <{level = 10 : i32, message = "brc,bcd->brd"}> : () -> ()
    %cst_71 = arith.constant dense<0.000000e+00> : vector<2x64x16xf32>
    %83 = tpu.matmul %78, %82, %cst_71 {dimension_numbers = #tpu.dot_dimension_numbers<[2], [1], [1], [2], [0, 0, 0, 1, 1, 2], [0], [0]>} : vector<2x64x4xbf16>, vector<2x4x16xbf16>, vector<2x64x16xf32> -> vector<2x64x16xf32>
    "tpu.trace_stop"() : () -> ()
    %84 = arith.addf %70, %83 : vector<2x64x16xf32>
    %c1_72 = arith.constant 1 : index
    %c0_73 = arith.constant 0 : index
    %c0_74 = arith.constant 0 : index
    %85 = vector.load %arg1[%c1_72, %c0_73, %c0_74] : memref<4x64x81xbf16, #tpu.memory_space<vmem>>, vector<1x64x81xbf16>
    %86 = vector.shape_cast %85 : vector<1x64x81xbf16> to vector<64x81xbf16>
    %87 = vector.shape_cast %86 : vector<64x81xbf16> to vector<1x64x81xbf16>
    %88 = vector.broadcast %87 : vector<1x64x81xbf16> to vector<2x64x81xbf16>
    %c1_75 = arith.constant 1 : index
    %c0_76 = arith.constant 0 : index
    %c0_77 = arith.constant 0 : index
    %c0_78 = arith.constant 0 : index
    %c0_79 = arith.constant 0 : index
    %89 = vector.load %arg0[%c1_75, %c0_76, %c0_77, %c0_78, %c0_79] : memref<2x2x2x81x4xbf16, #tpu.memory_space<vmem>>, vector<1x1x2x81x4xbf16>
    %90 = vector.shape_cast %89 : vector<1x1x2x81x4xbf16> to vector<2x81x4xbf16>
    "tpu.trace_start"() <{level = 10 : i32, message = "brm,bmc->brc"}> : () -> ()
    %cst_80 = arith.constant dense<0.000000e+00> : vector<2x64x4xf32>
    %91 = tpu.matmul %88, %90, %cst_80 {dimension_numbers = #tpu.dot_dimension_numbers<[2], [1], [1], [2], [0, 0, 0, 1, 1, 2], [0], [0]>} : vector<2x64x81xbf16>, vector<2x81x4xbf16>, vector<2x64x4xf32> -> vector<2x64x4xf32>
    "tpu.trace_stop"() : () -> ()
    %92 = arith.truncf %91 : vector<2x64x4xf32> to vector<2x64x4xbf16>
    %c6 = arith.constant 6 : index
    %c0_81 = arith.constant 0 : index
    %c0_82 = arith.constant 0 : index
    %93 = vector.load %arg2[%c6, %c0_81, %c0_82] : memref<16x4x16xbf16, #tpu.memory_space<vmem>>, vector<1x4x16xbf16>
    %94 = vector.shape_cast %93 : vector<1x4x16xbf16> to vector<4x16xbf16>
    %95 = vector.shape_cast %94 : vector<4x16xbf16> to vector<1x4x16xbf16>
    %96 = vector.broadcast %95 : vector<1x4x16xbf16> to vector<2x4x16xbf16>
    "tpu.trace_start"() <{level = 10 : i32, message = "brc,bcd->brd"}> : () -> ()
    %cst_83 = arith.constant dense<0.000000e+00> : vector<2x64x16xf32>
    %97 = tpu.matmul %92, %96, %cst_83 {dimension_numbers = #tpu.dot_dimension_numbers<[2], [1], [1], [2], [0, 0, 0, 1, 1, 2], [0], [0]>} : vector<2x64x4xbf16>, vector<2x4x16xbf16>, vector<2x64x16xf32> -> vector<2x64x16xf32>
    "tpu.trace_stop"() : () -> ()
    %98 = arith.addf %84, %97 : vector<2x64x16xf32>
    %c1_84 = arith.constant 1 : index
    %c0_85 = arith.constant 0 : index
    %c0_86 = arith.constant 0 : index
    %99 = vector.load %arg1[%c1_84, %c0_85, %c0_86] : memref<4x64x81xbf16, #tpu.memory_space<vmem>>, vector<1x64x81xbf16>
    %100 = vector.shape_cast %99 : vector<1x64x81xbf16> to vector<64x81xbf16>
    %101 = vector.shape_cast %100 : vector<64x81xbf16> to vector<1x64x81xbf16>
    %102 = vector.broadcast %101 : vector<1x64x81xbf16> to vector<2x64x81xbf16>
    %c1_87 = arith.constant 1 : index
    %c1_88 = arith.constant 1 : index
    %c0_89 = arith.constant 0 : index
    %c0_90 = arith.constant 0 : index
    %c0_91 = arith.constant 0 : index
    %103 = vector.load %arg0[%c1_87, %c1_88, %c0_89, %c0_90, %c0_91] : memref<2x2x2x81x4xbf16, #tpu.memory_space<vmem>>, vector<1x1x2x81x4xbf16>
    %104 = vector.shape_cast %103 : vector<1x1x2x81x4xbf16> to vector<2x81x4xbf16>
    "tpu.trace_start"() <{level = 10 : i32, message = "brm,bmc->brc"}> : () -> ()
    %cst_92 = arith.constant dense<0.000000e+00> : vector<2x64x4xf32>
    %105 = tpu.matmul %102, %104, %cst_92 {dimension_numbers = #tpu.dot_dimension_numbers<[2], [1], [1], [2], [0, 0, 0, 1, 1, 2], [0], [0]>} : vector<2x64x81xbf16>, vector<2x81x4xbf16>, vector<2x64x4xf32> -> vector<2x64x4xf32>
    "tpu.trace_stop"() : () -> ()
    %106 = arith.truncf %105 : vector<2x64x4xf32> to vector<2x64x4xbf16>
    %c7 = arith.constant 7 : index
    %c0_93 = arith.constant 0 : index
    %c0_94 = arith.constant 0 : index
    %107 = vector.load %arg2[%c7, %c0_93, %c0_94] : memref<16x4x16xbf16, #tpu.memory_space<vmem>>, vector<1x4x16xbf16>
    %108 = vector.shape_cast %107 : vector<1x4x16xbf16> to vector<4x16xbf16>
    %109 = vector.shape_cast %108 : vector<4x16xbf16> to vector<1x4x16xbf16>
    %110 = vector.broadcast %109 : vector<1x4x16xbf16> to vector<2x4x16xbf16>
    "tpu.trace_start"() <{level = 10 : i32, message = "brc,bcd->brd"}> : () -> ()
    %cst_95 = arith.constant dense<0.000000e+00> : vector<2x64x16xf32>
    %111 = tpu.matmul %106, %110, %cst_95 {dimension_numbers = #tpu.dot_dimension_numbers<[2], [1], [1], [2], [0, 0, 0, 1, 1, 2], [0], [0]>} : vector<2x64x4xbf16>, vector<2x4x16xbf16>, vector<2x64x16xf32> -> vector<2x64x16xf32>
    "tpu.trace_stop"() : () -> ()
    %112 = arith.addf %98, %111 : vector<2x64x16xf32>
    %c2_96 = arith.constant 2 : index
    %c0_97 = arith.constant 0 : index
    %c0_98 = arith.constant 0 : index
    %113 = vector.load %arg1[%c2_96, %c0_97, %c0_98] : memref<4x64x81xbf16, #tpu.memory_space<vmem>>, vector<1x64x81xbf16>
    %114 = vector.shape_cast %113 : vector<1x64x81xbf16> to vector<64x81xbf16>
    %115 = vector.shape_cast %114 : vector<64x81xbf16> to vector<1x64x81xbf16>
    %116 = vector.broadcast %115 : vector<1x64x81xbf16> to vector<2x64x81xbf16>
    %c0_99 = arith.constant 0 : index
    %c0_100 = arith.constant 0 : index
    %c0_101 = arith.constant 0 : index
    %c0_102 = arith.constant 0 : index
    %c0_103 = arith.constant 0 : index
    %117 = vector.load %arg0[%c0_99, %c0_100, %c0_101, %c0_102, %c0_103] : memref<2x2x2x81x4xbf16, #tpu.memory_space<vmem>>, vector<1x1x2x81x4xbf16>
    %118 = vector.shape_cast %117 : vector<1x1x2x81x4xbf16> to vector<2x81x4xbf16>
    "tpu.trace_start"() <{level = 10 : i32, message = "brm,bmc->brc"}> : () -> ()
    %cst_104 = arith.constant dense<0.000000e+00> : vector<2x64x4xf32>
    %119 = tpu.matmul %116, %118, %cst_104 {dimension_numbers = #tpu.dot_dimension_numbers<[2], [1], [1], [2], [0, 0, 0, 1, 1, 2], [0], [0]>} : vector<2x64x81xbf16>, vector<2x81x4xbf16>, vector<2x64x4xf32> -> vector<2x64x4xf32>
    "tpu.trace_stop"() : () -> ()
    %120 = arith.truncf %119 : vector<2x64x4xf32> to vector<2x64x4xbf16>
    %c8 = arith.constant 8 : index
    %c0_105 = arith.constant 0 : index
    %c0_106 = arith.constant 0 : index
    %121 = vector.load %arg2[%c8, %c0_105, %c0_106] : memref<16x4x16xbf16, #tpu.memory_space<vmem>>, vector<1x4x16xbf16>
    %122 = vector.shape_cast %121 : vector<1x4x16xbf16> to vector<4x16xbf16>
    %123 = vector.shape_cast %122 : vector<4x16xbf16> to vector<1x4x16xbf16>
    %124 = vector.broadcast %123 : vector<1x4x16xbf16> to vector<2x4x16xbf16>
    "tpu.trace_start"() <{level = 10 : i32, message = "brc,bcd->brd"}> : () -> ()
    %cst_107 = arith.constant dense<0.000000e+00> : vector<2x64x16xf32>
    %125 = tpu.matmul %120, %124, %cst_107 {dimension_numbers = #tpu.dot_dimension_numbers<[2], [1], [1], [2], [0, 0, 0, 1, 1, 2], [0], [0]>} : vector<2x64x4xbf16>, vector<2x4x16xbf16>, vector<2x64x16xf32> -> vector<2x64x16xf32>
    "tpu.trace_stop"() : () -> ()
    %126 = arith.addf %112, %125 : vector<2x64x16xf32>
    %c2_108 = arith.constant 2 : index
    %c0_109 = arith.constant 0 : index
    %c0_110 = arith.constant 0 : index
    %127 = vector.load %arg1[%c2_108, %c0_109, %c0_110] : memref<4x64x81xbf16, #tpu.memory_space<vmem>>, vector<1x64x81xbf16>
    %128 = vector.shape_cast %127 : vector<1x64x81xbf16> to vector<64x81xbf16>
    %129 = vector.shape_cast %128 : vector<64x81xbf16> to vector<1x64x81xbf16>
    %130 = vector.broadcast %129 : vector<1x64x81xbf16> to vector<2x64x81xbf16>
    %c0_111 = arith.constant 0 : index
    %c1_112 = arith.constant 1 : index
    %c0_113 = arith.constant 0 : index
    %c0_114 = arith.constant 0 : index
    %c0_115 = arith.constant 0 : index
    %131 = vector.load %arg0[%c0_111, %c1_112, %c0_113, %c0_114, %c0_115] : memref<2x2x2x81x4xbf16, #tpu.memory_space<vmem>>, vector<1x1x2x81x4xbf16>
    %132 = vector.shape_cast %131 : vector<1x1x2x81x4xbf16> to vector<2x81x4xbf16>
    "tpu.trace_start"() <{level = 10 : i32, message = "brm,bmc->brc"}> : () -> ()
    %cst_116 = arith.constant dense<0.000000e+00> : vector<2x64x4xf32>
    %133 = tpu.matmul %130, %132, %cst_116 {dimension_numbers = #tpu.dot_dimension_numbers<[2], [1], [1], [2], [0, 0, 0, 1, 1, 2], [0], [0]>} : vector<2x64x81xbf16>, vector<2x81x4xbf16>, vector<2x64x4xf32> -> vector<2x64x4xf32>
    "tpu.trace_stop"() : () -> ()
    %134 = arith.truncf %133 : vector<2x64x4xf32> to vector<2x64x4xbf16>
    %c9 = arith.constant 9 : index
    %c0_117 = arith.constant 0 : index
    %c0_118 = arith.constant 0 : index
    %135 = vector.load %arg2[%c9, %c0_117, %c0_118] : memref<16x4x16xbf16, #tpu.memory_space<vmem>>, vector<1x4x16xbf16>
    %136 = vector.shape_cast %135 : vector<1x4x16xbf16> to vector<4x16xbf16>
    %137 = vector.shape_cast %136 : vector<4x16xbf16> to vector<1x4x16xbf16>
    %138 = vector.broadcast %137 : vector<1x4x16xbf16> to vector<2x4x16xbf16>
    "tpu.trace_start"() <{level = 10 : i32, message = "brc,bcd->brd"}> : () -> ()
    %cst_119 = arith.constant dense<0.000000e+00> : vector<2x64x16xf32>
    %139 = tpu.matmul %134, %138, %cst_119 {dimension_numbers = #tpu.dot_dimension_numbers<[2], [1], [1], [2], [0, 0, 0, 1, 1, 2], [0], [0]>} : vector<2x64x4xbf16>, vector<2x4x16xbf16>, vector<2x64x16xf32> -> vector<2x64x16xf32>
    "tpu.trace_stop"() : () -> ()
    %140 = arith.addf %126, %139 : vector<2x64x16xf32>
    %c3_120 = arith.constant 3 : index
    %c0_121 = arith.constant 0 : index
    %c0_122 = arith.constant 0 : index
    %141 = vector.load %arg1[%c3_120, %c0_121, %c0_122] : memref<4x64x81xbf16, #tpu.memory_space<vmem>>, vector<1x64x81xbf16>
    %142 = vector.shape_cast %141 : vector<1x64x81xbf16> to vector<64x81xbf16>
    %143 = vector.shape_cast %142 : vector<64x81xbf16> to vector<1x64x81xbf16>
    %144 = vector.broadcast %143 : vector<1x64x81xbf16> to vector<2x64x81xbf16>
    %c0_123 = arith.constant 0 : index
    %c0_124 = arith.constant 0 : index
    %c0_125 = arith.constant 0 : index
    %c0_126 = arith.constant 0 : index
    %c0_127 = arith.constant 0 : index
    %145 = vector.load %arg0[%c0_123, %c0_124, %c0_125, %c0_126, %c0_127] : memref<2x2x2x81x4xbf16, #tpu.memory_space<vmem>>, vector<1x1x2x81x4xbf16>
    %146 = vector.shape_cast %145 : vector<1x1x2x81x4xbf16> to vector<2x81x4xbf16>
    "tpu.trace_start"() <{level = 10 : i32, message = "brm,bmc->brc"}> : () -> ()
    %cst_128 = arith.constant dense<0.000000e+00> : vector<2x64x4xf32>
    %147 = tpu.matmul %144, %146, %cst_128 {dimension_numbers = #tpu.dot_dimension_numbers<[2], [1], [1], [2], [0, 0, 0, 1, 1, 2], [0], [0]>} : vector<2x64x81xbf16>, vector<2x81x4xbf16>, vector<2x64x4xf32> -> vector<2x64x4xf32>
    "tpu.trace_stop"() : () -> ()
    %148 = arith.truncf %147 : vector<2x64x4xf32> to vector<2x64x4xbf16>
    %c10 = arith.constant 10 : index
    %c0_129 = arith.constant 0 : index
    %c0_130 = arith.constant 0 : index
    %149 = vector.load %arg2[%c10, %c0_129, %c0_130] : memref<16x4x16xbf16, #tpu.memory_space<vmem>>, vector<1x4x16xbf16>
    %150 = vector.shape_cast %149 : vector<1x4x16xbf16> to vector<4x16xbf16>
    %151 = vector.shape_cast %150 : vector<4x16xbf16> to vector<1x4x16xbf16>
    %152 = vector.broadcast %151 : vector<1x4x16xbf16> to vector<2x4x16xbf16>
    "tpu.trace_start"() <{level = 10 : i32, message = "brc,bcd->brd"}> : () -> ()
    %cst_131 = arith.constant dense<0.000000e+00> : vector<2x64x16xf32>
    %153 = tpu.matmul %148, %152, %cst_131 {dimension_numbers = #tpu.dot_dimension_numbers<[2], [1], [1], [2], [0, 0, 0, 1, 1, 2], [0], [0]>} : vector<2x64x4xbf16>, vector<2x4x16xbf16>, vector<2x64x16xf32> -> vector<2x64x16xf32>
    "tpu.trace_stop"() : () -> ()
    %154 = arith.addf %140, %153 : vector<2x64x16xf32>
    %c3_132 = arith.constant 3 : index
    %c0_133 = arith.constant 0 : index
    %c0_134 = arith.constant 0 : index
    %155 = vector.load %arg1[%c3_132, %c0_133, %c0_134] : memref<4x64x81xbf16, #tpu.memory_space<vmem>>, vector<1x64x81xbf16>
    %156 = vector.shape_cast %155 : vector<1x64x81xbf16> to vector<64x81xbf16>
    %157 = vector.shape_cast %156 : vector<64x81xbf16> to vector<1x64x81xbf16>
    %158 = vector.broadcast %157 : vector<1x64x81xbf16> to vector<2x64x81xbf16>
    %c0_135 = arith.constant 0 : index
    %c1_136 = arith.constant 1 : index
    %c0_137 = arith.constant 0 : index
    %c0_138 = arith.constant 0 : index
    %c0_139 = arith.constant 0 : index
    %159 = vector.load %arg0[%c0_135, %c1_136, %c0_137, %c0_138, %c0_139] : memref<2x2x2x81x4xbf16, #tpu.memory_space<vmem>>, vector<1x1x2x81x4xbf16>
    %160 = vector.shape_cast %159 : vector<1x1x2x81x4xbf16> to vector<2x81x4xbf16>
    "tpu.trace_start"() <{level = 10 : i32, message = "brm,bmc->brc"}> : () -> ()
    %cst_140 = arith.constant dense<0.000000e+00> : vector<2x64x4xf32>
    %161 = tpu.matmul %158, %160, %cst_140 {dimension_numbers = #tpu.dot_dimension_numbers<[2], [1], [1], [2], [0, 0, 0, 1, 1, 2], [0], [0]>} : vector<2x64x81xbf16>, vector<2x81x4xbf16>, vector<2x64x4xf32> -> vector<2x64x4xf32>
    "tpu.trace_stop"() : () -> ()
    %162 = arith.truncf %161 : vector<2x64x4xf32> to vector<2x64x4xbf16>
    %c11 = arith.constant 11 : index
    %c0_141 = arith.constant 0 : index
    %c0_142 = arith.constant 0 : index
    %163 = vector.load %arg2[%c11, %c0_141, %c0_142] : memref<16x4x16xbf16, #tpu.memory_space<vmem>>, vector<1x4x16xbf16>
    %164 = vector.shape_cast %163 : vector<1x4x16xbf16> to vector<4x16xbf16>
    %165 = vector.shape_cast %164 : vector<4x16xbf16> to vector<1x4x16xbf16>
    %166 = vector.broadcast %165 : vector<1x4x16xbf16> to vector<2x4x16xbf16>
    "tpu.trace_start"() <{level = 10 : i32, message = "brc,bcd->brd"}> : () -> ()
    %cst_143 = arith.constant dense<0.000000e+00> : vector<2x64x16xf32>
    %167 = tpu.matmul %162, %166, %cst_143 {dimension_numbers = #tpu.dot_dimension_numbers<[2], [1], [1], [2], [0, 0, 0, 1, 1, 2], [0], [0]>} : vector<2x64x4xbf16>, vector<2x4x16xbf16>, vector<2x64x16xf32> -> vector<2x64x16xf32>
    "tpu.trace_stop"() : () -> ()
    %168 = arith.addf %154, %167 : vector<2x64x16xf32>
    %c2_144 = arith.constant 2 : index
    %c0_145 = arith.constant 0 : index
    %c0_146 = arith.constant 0 : index
    %169 = vector.load %arg1[%c2_144, %c0_145, %c0_146] : memref<4x64x81xbf16, #tpu.memory_space<vmem>>, vector<1x64x81xbf16>
    %170 = vector.shape_cast %169 : vector<1x64x81xbf16> to vector<64x81xbf16>
    %171 = vector.shape_cast %170 : vector<64x81xbf16> to vector<1x64x81xbf16>
    %172 = vector.broadcast %171 : vector<1x64x81xbf16> to vector<2x64x81xbf16>
    %c1_147 = arith.constant 1 : index
    %c0_148 = arith.constant 0 : index
    %c0_149 = arith.constant 0 : index
    %c0_150 = arith.constant 0 : index
    %c0_151 = arith.constant 0 : index
    %173 = vector.load %arg0[%c1_147, %c0_148, %c0_149, %c0_150, %c0_151] : memref<2x2x2x81x4xbf16, #tpu.memory_space<vmem>>, vector<1x1x2x81x4xbf16>
    %174 = vector.shape_cast %173 : vector<1x1x2x81x4xbf16> to vector<2x81x4xbf16>
    "tpu.trace_start"() <{level = 10 : i32, message = "brm,bmc->brc"}> : () -> ()
    %cst_152 = arith.constant dense<0.000000e+00> : vector<2x64x4xf32>
    %175 = tpu.matmul %172, %174, %cst_152 {dimension_numbers = #tpu.dot_dimension_numbers<[2], [1], [1], [2], [0, 0, 0, 1, 1, 2], [0], [0]>} : vector<2x64x81xbf16>, vector<2x81x4xbf16>, vector<2x64x4xf32> -> vector<2x64x4xf32>
    "tpu.trace_stop"() : () -> ()
    %176 = arith.truncf %175 : vector<2x64x4xf32> to vector<2x64x4xbf16>
    %c12 = arith.constant 12 : index
    %c0_153 = arith.constant 0 : index
    %c0_154 = arith.constant 0 : index
    %177 = vector.load %arg2[%c12, %c0_153, %c0_154] : memref<16x4x16xbf16, #tpu.memory_space<vmem>>, vector<1x4x16xbf16>
    %178 = vector.shape_cast %177 : vector<1x4x16xbf16> to vector<4x16xbf16>
    %179 = vector.shape_cast %178 : vector<4x16xbf16> to vector<1x4x16xbf16>
    %180 = vector.broadcast %179 : vector<1x4x16xbf16> to vector<2x4x16xbf16>
    "tpu.trace_start"() <{level = 10 : i32, message = "brc,bcd->brd"}> : () -> ()
    %cst_155 = arith.constant dense<0.000000e+00> : vector<2x64x16xf32>
    %181 = tpu.matmul %176, %180, %cst_155 {dimension_numbers = #tpu.dot_dimension_numbers<[2], [1], [1], [2], [0, 0, 0, 1, 1, 2], [0], [0]>} : vector<2x64x4xbf16>, vector<2x4x16xbf16>, vector<2x64x16xf32> -> vector<2x64x16xf32>
    "tpu.trace_stop"() : () -> ()
    %182 = arith.addf %168, %181 : vector<2x64x16xf32>
    %c2_156 = arith.constant 2 : index
    %c0_157 = arith.constant 0 : index
    %c0_158 = arith.constant 0 : index
    %183 = vector.load %arg1[%c2_156, %c0_157, %c0_158] : memref<4x64x81xbf16, #tpu.memory_space<vmem>>, vector<1x64x81xbf16>
    %184 = vector.shape_cast %183 : vector<1x64x81xbf16> to vector<64x81xbf16>
    %185 = vector.shape_cast %184 : vector<64x81xbf16> to vector<1x64x81xbf16>
    %186 = vector.broadcast %185 : vector<1x64x81xbf16> to vector<2x64x81xbf16>
    %c1_159 = arith.constant 1 : index
    %c1_160 = arith.constant 1 : index
    %c0_161 = arith.constant 0 : index
    %c0_162 = arith.constant 0 : index
    %c0_163 = arith.constant 0 : index
    %187 = vector.load %arg0[%c1_159, %c1_160, %c0_161, %c0_162, %c0_163] : memref<2x2x2x81x4xbf16, #tpu.memory_space<vmem>>, vector<1x1x2x81x4xbf16>
    %188 = vector.shape_cast %187 : vector<1x1x2x81x4xbf16> to vector<2x81x4xbf16>
    "tpu.trace_start"() <{level = 10 : i32, message = "brm,bmc->brc"}> : () -> ()
    %cst_164 = arith.constant dense<0.000000e+00> : vector<2x64x4xf32>
    %189 = tpu.matmul %186, %188, %cst_164 {dimension_numbers = #tpu.dot_dimension_numbers<[2], [1], [1], [2], [0, 0, 0, 1, 1, 2], [0], [0]>} : vector<2x64x81xbf16>, vector<2x81x4xbf16>, vector<2x64x4xf32> -> vector<2x64x4xf32>
    "tpu.trace_stop"() : () -> ()
    %190 = arith.truncf %189 : vector<2x64x4xf32> to vector<2x64x4xbf16>
    %c13 = arith.constant 13 : index
    %c0_165 = arith.constant 0 : index
    %c0_166 = arith.constant 0 : index
    %191 = vector.load %arg2[%c13, %c0_165, %c0_166] : memref<16x4x16xbf16, #tpu.memory_space<vmem>>, vector<1x4x16xbf16>
    %192 = vector.shape_cast %191 : vector<1x4x16xbf16> to vector<4x16xbf16>
    %193 = vector.shape_cast %192 : vector<4x16xbf16> to vector<1x4x16xbf16>
    %194 = vector.broadcast %193 : vector<1x4x16xbf16> to vector<2x4x16xbf16>
    "tpu.trace_start"() <{level = 10 : i32, message = "brc,bcd->brd"}> : () -> ()
    %cst_167 = arith.constant dense<0.000000e+00> : vector<2x64x16xf32>
    %195 = tpu.matmul %190, %194, %cst_167 {dimension_numbers = #tpu.dot_dimension_numbers<[2], [1], [1], [2], [0, 0, 0, 1, 1, 2], [0], [0]>} : vector<2x64x4xbf16>, vector<2x4x16xbf16>, vector<2x64x16xf32> -> vector<2x64x16xf32>
    "tpu.trace_stop"() : () -> ()
    %196 = arith.addf %182, %195 : vector<2x64x16xf32>
    %c3_168 = arith.constant 3 : index
    %c0_169 = arith.constant 0 : index
    %c0_170 = arith.constant 0 : index
    %197 = vector.load %arg1[%c3_168, %c0_169, %c0_170] : memref<4x64x81xbf16, #tpu.memory_space<vmem>>, vector<1x64x81xbf16>
    %198 = vector.shape_cast %197 : vector<1x64x81xbf16> to vector<64x81xbf16>
    %199 = vector.shape_cast %198 : vector<64x81xbf16> to vector<1x64x81xbf16>
    %200 = vector.broadcast %199 : vector<1x64x81xbf16> to vector<2x64x81xbf16>
    %c1_171 = arith.constant 1 : index
    %c0_172 = arith.constant 0 : index
    %c0_173 = arith.constant 0 : index
    %c0_174 = arith.constant 0 : index
    %c0_175 = arith.constant 0 : index
    %201 = vector.load %arg0[%c1_171, %c0_172, %c0_173, %c0_174, %c0_175] : memref<2x2x2x81x4xbf16, #tpu.memory_space<vmem>>, vector<1x1x2x81x4xbf16>
    %202 = vector.shape_cast %201 : vector<1x1x2x81x4xbf16> to vector<2x81x4xbf16>
    "tpu.trace_start"() <{level = 10 : i32, message = "brm,bmc->brc"}> : () -> ()
    %cst_176 = arith.constant dense<0.000000e+00> : vector<2x64x4xf32>
    %203 = tpu.matmul %200, %202, %cst_176 {dimension_numbers = #tpu.dot_dimension_numbers<[2], [1], [1], [2], [0, 0, 0, 1, 1, 2], [0], [0]>} : vector<2x64x81xbf16>, vector<2x81x4xbf16>, vector<2x64x4xf32> -> vector<2x64x4xf32>
    "tpu.trace_stop"() : () -> ()
    %204 = arith.truncf %203 : vector<2x64x4xf32> to vector<2x64x4xbf16>
    %c14 = arith.constant 14 : index
    %c0_177 = arith.constant 0 : index
    %c0_178 = arith.constant 0 : index
    %205 = vector.load %arg2[%c14, %c0_177, %c0_178] : memref<16x4x16xbf16, #tpu.memory_space<vmem>>, vector<1x4x16xbf16>
    %206 = vector.shape_cast %205 : vector<1x4x16xbf16> to vector<4x16xbf16>
    %207 = vector.shape_cast %206 : vector<4x16xbf16> to vector<1x4x16xbf16>
    %208 = vector.broadcast %207 : vector<1x4x16xbf16> to vector<2x4x16xbf16>
    "tpu.trace_start"() <{level = 10 : i32, message = "brc,bcd->brd"}> : () -> ()
    %cst_179 = arith.constant dense<0.000000e+00> : vector<2x64x16xf32>
    %209 = tpu.matmul %204, %208, %cst_179 {dimension_numbers = #tpu.dot_dimension_numbers<[2], [1], [1], [2], [0, 0, 0, 1, 1, 2], [0], [0]>} : vector<2x64x4xbf16>, vector<2x4x16xbf16>, vector<2x64x16xf32> -> vector<2x64x16xf32>
    "tpu.trace_stop"() : () -> ()
    %210 = arith.addf %196, %209 : vector<2x64x16xf32>
    %c3_180 = arith.constant 3 : index
    %c0_181 = arith.constant 0 : index
    %c0_182 = arith.constant 0 : index
    %211 = vector.load %arg1[%c3_180, %c0_181, %c0_182] : memref<4x64x81xbf16, #tpu.memory_space<vmem>>, vector<1x64x81xbf16>
    %212 = vector.shape_cast %211 : vector<1x64x81xbf16> to vector<64x81xbf16>
    %213 = vector.shape_cast %212 : vector<64x81xbf16> to vector<1x64x81xbf16>
    %214 = vector.broadcast %213 : vector<1x64x81xbf16> to vector<2x64x81xbf16>
    %c1_183 = arith.constant 1 : index
    %c1_184 = arith.constant 1 : index
    %c0_185 = arith.constant 0 : index
    %c0_186 = arith.constant 0 : index
    %c0_187 = arith.constant 0 : index
    %215 = vector.load %arg0[%c1_183, %c1_184, %c0_185, %c0_186, %c0_187] : memref<2x2x2x81x4xbf16, #tpu.memory_space<vmem>>, vector<1x1x2x81x4xbf16>
    %216 = vector.shape_cast %215 : vector<1x1x2x81x4xbf16> to vector<2x81x4xbf16>
    "tpu.trace_start"() <{level = 10 : i32, message = "brm,bmc->brc"}> : () -> ()
    %cst_188 = arith.constant dense<0.000000e+00> : vector<2x64x4xf32>
    %217 = tpu.matmul %214, %216, %cst_188 {dimension_numbers = #tpu.dot_dimension_numbers<[2], [1], [1], [2], [0, 0, 0, 1, 1, 2], [0], [0]>} : vector<2x64x81xbf16>, vector<2x81x4xbf16>, vector<2x64x4xf32> -> vector<2x64x4xf32>
    "tpu.trace_stop"() : () -> ()
    %218 = arith.truncf %217 : vector<2x64x4xf32> to vector<2x64x4xbf16>
    %c15 = arith.constant 15 : index
    %c0_189 = arith.constant 0 : index
    %c0_190 = arith.constant 0 : index
    %219 = vector.load %arg2[%c15, %c0_189, %c0_190] : memref<16x4x16xbf16, #tpu.memory_space<vmem>>, vector<1x4x16xbf16>
    %220 = vector.shape_cast %219 : vector<1x4x16xbf16> to vector<4x16xbf16>
    %221 = vector.shape_cast %220 : vector<4x16xbf16> to vector<1x4x16xbf16>
    %222 = vector.broadcast %221 : vector<1x4x16xbf16> to vector<2x4x16xbf16>
    "tpu.trace_start"() <{level = 10 : i32, message = "brc,bcd->brd"}> : () -> ()
    %cst_191 = arith.constant dense<0.000000e+00> : vector<2x64x16xf32>
    %223 = tpu.matmul %218, %222, %cst_191 {dimension_numbers = #tpu.dot_dimension_numbers<[2], [1], [1], [2], [0, 0, 0, 1, 1, 2], [0], [0]>} : vector<2x64x4xbf16>, vector<2x4x16xbf16>, vector<2x64x16xf32> -> vector<2x64x16xf32>
    "tpu.trace_stop"() : () -> ()
    %224 = arith.addf %210, %223 : vector<2x64x16xf32>
    %c0_192 = arith.constant 0 : index
    %c0_193 = arith.constant 0 : index
    %c0_194 = arith.constant 0 : index
    %225 = vector.load %arg3[%c0_192, %c0_193, %c0_194] : memref<1x1x16xf32, #tpu.memory_space<vmem>>, vector<1x1x16xf32>
    %226 = vector.broadcast %225 : vector<1x1x16xf32> to vector<2x64x16xf32>
    %227 = arith.addf %224, %226 : vector<2x64x16xf32>
    %cst_195 = arith.constant 0.000000e+00 : f32
    %228 = vector.broadcast %cst_195 : f32 to vector<2x64x16xf32>
    %229 = arith.cmpf oge, %227, %228 : vector<2x64x16xf32>
    %cst_196 = arith.constant 2.000000e-01 : f32
    %230 = vector.broadcast %cst_196 : f32 to vector<2x64x16xf32>
    %231 = arith.mulf %230, %227 : vector<2x64x16xf32>
    %232 = arith.select %229, %227, %231 : vector<2x64x16xi1>, vector<2x64x16xf32>
    %233 = arith.truncf %232 : vector<2x64x16xf32> to vector<2x64x16xbf16>
    %cst_197 = arith.constant 0.000000e+00 : f32
    %234 = vector.broadcast %cst_197 : f32 to vector<2x16x32xf32>
    %c0_198 = arith.constant 0 : index
    %c0_199 = arith.constant 0 : index
    %c0_200 = arith.constant 0 : index
    %235 = vector.load %arg4[%c0_198, %c0_199, %c0_200] : memref<16x16x64xbf16, #tpu.memory_space<vmem>>, vector<1x16x64xbf16>
    %236 = vector.shape_cast %235 : vector<1x16x64xbf16> to vector<16x64xbf16>
    %237 = vector.shape_cast %236 : vector<16x64xbf16> to vector<1x16x64xbf16>
    %238 = vector.broadcast %237 : vector<1x16x64xbf16> to vector<2x16x64xbf16>
    "tpu.trace_start"() <{level = 10 : i32, message = "brm,bmc->brc"}> : () -> ()
    %cst_201 = arith.constant dense<0.000000e+00> : vector<2x16x16xf32>
    %239 = tpu.matmul %238, %233, %cst_201 {dimension_numbers = #tpu.dot_dimension_numbers<[2], [1], [1], [2], [0, 0, 0, 1, 1, 2], [0], [0]>} : vector<2x16x64xbf16>, vector<2x64x16xbf16>, vector<2x16x16xf32> -> vector<2x16x16xf32>
    "tpu.trace_stop"() : () -> ()
    %240 = arith.truncf %239 : vector<2x16x16xf32> to vector<2x16x16xbf16>
    %c0_202 = arith.constant 0 : index
    %c0_203 = arith.constant 0 : index
    %c0_204 = arith.constant 0 : index
    %241 = vector.load %arg5[%c0_202, %c0_203, %c0_204] : memref<16x16x32xbf16, #tpu.memory_space<vmem>>, vector<1x16x32xbf16>
    %242 = vector.shape_cast %241 : vector<1x16x32xbf16> to vector<16x32xbf16>
    %243 = vector.shape_cast %242 : vector<16x32xbf16> to vector<1x16x32xbf16>
    %244 = vector.broadcast %243 : vector<1x16x32xbf16> to vector<2x16x32xbf16>
    "tpu.trace_start"() <{level = 10 : i32, message = "brc,bcd->brd"}> : () -> ()
    %cst_205 = arith.constant dense<0.000000e+00> : vector<2x16x32xf32>
    %245 = tpu.matmul %240, %244, %cst_205 {dimension_numbers = #tpu.dot_dimension_numbers<[2], [1], [1], [2], [0, 0, 0, 1, 1, 2], [0], [0]>} : vector<2x16x16xbf16>, vector<2x16x32xbf16>, vector<2x16x32xf32> -> vector<2x16x32xf32>
    "tpu.trace_stop"() : () -> ()
    %246 = arith.addf %234, %245 : vector<2x16x32xf32>
    %c1_206 = arith.constant 1 : index
    %c0_207 = arith.constant 0 : index
    %c0_208 = arith.constant 0 : index
    %247 = vector.load %arg4[%c1_206, %c0_207, %c0_208] : memref<16x16x64xbf16, #tpu.memory_space<vmem>>, vector<1x16x64xbf16>
    %248 = vector.shape_cast %247 : vector<1x16x64xbf16> to vector<16x64xbf16>
    %249 = vector.shape_cast %248 : vector<16x64xbf16> to vector<1x16x64xbf16>
    %250 = vector.broadcast %249 : vector<1x16x64xbf16> to vector<2x16x64xbf16>
    "tpu.trace_start"() <{level = 10 : i32, message = "brm,bmc->brc"}> : () -> ()
    %cst_209 = arith.constant dense<0.000000e+00> : vector<2x16x16xf32>
    %251 = tpu.matmul %250, %233, %cst_209 {dimension_numbers = #tpu.dot_dimension_numbers<[2], [1], [1], [2], [0, 0, 0, 1, 1, 2], [0], [0]>} : vector<2x16x64xbf16>, vector<2x64x16xbf16>, vector<2x16x16xf32> -> vector<2x16x16xf32>
    "tpu.trace_stop"() : () -> ()
    %252 = arith.truncf %251 : vector<2x16x16xf32> to vector<2x16x16xbf16>
    %c1_210 = arith.constant 1 : index
    %c0_211 = arith.constant 0 : index
    %c0_212 = arith.constant 0 : index
    %253 = vector.load %arg5[%c1_210, %c0_211, %c0_212] : memref<16x16x32xbf16, #tpu.memory_space<vmem>>, vector<1x16x32xbf16>
    %254 = vector.shape_cast %253 : vector<1x16x32xbf16> to vector<16x32xbf16>
    %255 = vector.shape_cast %254 : vector<16x32xbf16> to vector<1x16x32xbf16>
    %256 = vector.broadcast %255 : vector<1x16x32xbf16> to vector<2x16x32xbf16>
    "tpu.trace_start"() <{level = 10 : i32, message = "brc,bcd->brd"}> : () -> ()
    %cst_213 = arith.constant dense<0.000000e+00> : vector<2x16x32xf32>
    %257 = tpu.matmul %252, %256, %cst_213 {dimension_numbers = #tpu.dot_dimension_numbers<[2], [1], [1], [2], [0, 0, 0, 1, 1, 2], [0], [0]>} : vector<2x16x16xbf16>, vector<2x16x32xbf16>, vector<2x16x32xf32> -> vector<2x16x32xf32>
    "tpu.trace_stop"() : () -> ()
    %258 = arith.addf %246, %257 : vector<2x16x32xf32>
    %c2_214 = arith.constant 2 : index
    %c0_215 = arith.constant 0 : index
    %c0_216 = arith.constant 0 : index
    %259 = vector.load %arg4[%c2_214, %c0_215, %c0_216] : memref<16x16x64xbf16, #tpu.memory_space<vmem>>, vector<1x16x64xbf16>
    %260 = vector.shape_cast %259 : vector<1x16x64xbf16> to vector<16x64xbf16>
    %261 = vector.shape_cast %260 : vector<16x64xbf16> to vector<1x16x64xbf16>
    %262 = vector.broadcast %261 : vector<1x16x64xbf16> to vector<2x16x64xbf16>
    "tpu.trace_start"() <{level = 10 : i32, message = "brm,bmc->brc"}> : () -> ()
    %cst_217 = arith.constant dense<0.000000e+00> : vector<2x16x16xf32>
    %263 = tpu.matmul %262, %233, %cst_217 {dimension_numbers = #tpu.dot_dimension_numbers<[2], [1], [1], [2], [0, 0, 0, 1, 1, 2], [0], [0]>} : vector<2x16x64xbf16>, vector<2x64x16xbf16>, vector<2x16x16xf32> -> vector<2x16x16xf32>
    "tpu.trace_stop"() : () -> ()
    %264 = arith.truncf %263 : vector<2x16x16xf32> to vector<2x16x16xbf16>
    %c2_218 = arith.constant 2 : index
    %c0_219 = arith.constant 0 : index
    %c0_220 = arith.constant 0 : index
    %265 = vector.load %arg5[%c2_218, %c0_219, %c0_220] : memref<16x16x32xbf16, #tpu.memory_space<vmem>>, vector<1x16x32xbf16>
    %266 = vector.shape_cast %265 : vector<1x16x32xbf16> to vector<16x32xbf16>
    %267 = vector.shape_cast %266 : vector<16x32xbf16> to vector<1x16x32xbf16>
    %268 = vector.broadcast %267 : vector<1x16x32xbf16> to vector<2x16x32xbf16>
    "tpu.trace_start"() <{level = 10 : i32, message = "brc,bcd->brd"}> : () -> ()
    %cst_221 = arith.constant dense<0.000000e+00> : vector<2x16x32xf32>
    %269 = tpu.matmul %264, %268, %cst_221 {dimension_numbers = #tpu.dot_dimension_numbers<[2], [1], [1], [2], [0, 0, 0, 1, 1, 2], [0], [0]>} : vector<2x16x16xbf16>, vector<2x16x32xbf16>, vector<2x16x32xf32> -> vector<2x16x32xf32>
    "tpu.trace_stop"() : () -> ()
    %270 = arith.addf %258, %269 : vector<2x16x32xf32>
    %c3_222 = arith.constant 3 : index
    %c0_223 = arith.constant 0 : index
    %c0_224 = arith.constant 0 : index
    %271 = vector.load %arg4[%c3_222, %c0_223, %c0_224] : memref<16x16x64xbf16, #tpu.memory_space<vmem>>, vector<1x16x64xbf16>
    %272 = vector.shape_cast %271 : vector<1x16x64xbf16> to vector<16x64xbf16>
    %273 = vector.shape_cast %272 : vector<16x64xbf16> to vector<1x16x64xbf16>
    %274 = vector.broadcast %273 : vector<1x16x64xbf16> to vector<2x16x64xbf16>
    "tpu.trace_start"() <{level = 10 : i32, message = "brm,bmc->brc"}> : () -> ()
    %cst_225 = arith.constant dense<0.000000e+00> : vector<2x16x16xf32>
    %275 = tpu.matmul %274, %233, %cst_225 {dimension_numbers = #tpu.dot_dimension_numbers<[2], [1], [1], [2], [0, 0, 0, 1, 1, 2], [0], [0]>} : vector<2x16x64xbf16>, vector<2x64x16xbf16>, vector<2x16x16xf32> -> vector<2x16x16xf32>
    "tpu.trace_stop"() : () -> ()
    %276 = arith.truncf %275 : vector<2x16x16xf32> to vector<2x16x16xbf16>
    %c3_226 = arith.constant 3 : index
    %c0_227 = arith.constant 0 : index
    %c0_228 = arith.constant 0 : index
    %277 = vector.load %arg5[%c3_226, %c0_227, %c0_228] : memref<16x16x32xbf16, #tpu.memory_space<vmem>>, vector<1x16x32xbf16>
    %278 = vector.shape_cast %277 : vector<1x16x32xbf16> to vector<16x32xbf16>
    %279 = vector.shape_cast %278 : vector<16x32xbf16> to vector<1x16x32xbf16>
    %280 = vector.broadcast %279 : vector<1x16x32xbf16> to vector<2x16x32xbf16>
    "tpu.trace_start"() <{level = 10 : i32, message = "brc,bcd->brd"}> : () -> ()
    %cst_229 = arith.constant dense<0.000000e+00> : vector<2x16x32xf32>
    %281 = tpu.matmul %276, %280, %cst_229 {dimension_numbers = #tpu.dot_dimension_numbers<[2], [1], [1], [2], [0, 0, 0, 1, 1, 2], [0], [0]>} : vector<2x16x16xbf16>, vector<2x16x32xbf16>, vector<2x16x32xf32> -> vector<2x16x32xf32>
    "tpu.trace_stop"() : () -> ()
    %282 = arith.addf %270, %281 : vector<2x16x32xf32>
    %c4_230 = arith.constant 4 : index
    %c0_231 = arith.constant 0 : index
    %c0_232 = arith.constant 0 : index
    %283 = vector.load %arg4[%c4_230, %c0_231, %c0_232] : memref<16x16x64xbf16, #tpu.memory_space<vmem>>, vector<1x16x64xbf16>
    %284 = vector.shape_cast %283 : vector<1x16x64xbf16> to vector<16x64xbf16>
    %285 = vector.shape_cast %284 : vector<16x64xbf16> to vector<1x16x64xbf16>
    %286 = vector.broadcast %285 : vector<1x16x64xbf16> to vector<2x16x64xbf16>
    "tpu.trace_start"() <{level = 10 : i32, message = "brm,bmc->brc"}> : () -> ()
    %cst_233 = arith.constant dense<0.000000e+00> : vector<2x16x16xf32>
    %287 = tpu.matmul %286, %233, %cst_233 {dimension_numbers = #tpu.dot_dimension_numbers<[2], [1], [1], [2], [0, 0, 0, 1, 1, 2], [0], [0]>} : vector<2x16x64xbf16>, vector<2x64x16xbf16>, vector<2x16x16xf32> -> vector<2x16x16xf32>
    "tpu.trace_stop"() : () -> ()
    %288 = arith.truncf %287 : vector<2x16x16xf32> to vector<2x16x16xbf16>
    %c4_234 = arith.constant 4 : index
    %c0_235 = arith.constant 0 : index
    %c0_236 = arith.constant 0 : index
    %289 = vector.load %arg5[%c4_234, %c0_235, %c0_236] : memref<16x16x32xbf16, #tpu.memory_space<vmem>>, vector<1x16x32xbf16>
    %290 = vector.shape_cast %289 : vector<1x16x32xbf16> to vector<16x32xbf16>
    %291 = vector.shape_cast %290 : vector<16x32xbf16> to vector<1x16x32xbf16>
    %292 = vector.broadcast %291 : vector<1x16x32xbf16> to vector<2x16x32xbf16>
    "tpu.trace_start"() <{level = 10 : i32, message = "brc,bcd->brd"}> : () -> ()
    %cst_237 = arith.constant dense<0.000000e+00> : vector<2x16x32xf32>
    %293 = tpu.matmul %288, %292, %cst_237 {dimension_numbers = #tpu.dot_dimension_numbers<[2], [1], [1], [2], [0, 0, 0, 1, 1, 2], [0], [0]>} : vector<2x16x16xbf16>, vector<2x16x32xbf16>, vector<2x16x32xf32> -> vector<2x16x32xf32>
    "tpu.trace_stop"() : () -> ()
    %294 = arith.addf %282, %293 : vector<2x16x32xf32>
    %c5_238 = arith.constant 5 : index
    %c0_239 = arith.constant 0 : index
    %c0_240 = arith.constant 0 : index
    %295 = vector.load %arg4[%c5_238, %c0_239, %c0_240] : memref<16x16x64xbf16, #tpu.memory_space<vmem>>, vector<1x16x64xbf16>
    %296 = vector.shape_cast %295 : vector<1x16x64xbf16> to vector<16x64xbf16>
    %297 = vector.shape_cast %296 : vector<16x64xbf16> to vector<1x16x64xbf16>
    %298 = vector.broadcast %297 : vector<1x16x64xbf16> to vector<2x16x64xbf16>
    "tpu.trace_start"() <{level = 10 : i32, message = "brm,bmc->brc"}> : () -> ()
    %cst_241 = arith.constant dense<0.000000e+00> : vector<2x16x16xf32>
    %299 = tpu.matmul %298, %233, %cst_241 {dimension_numbers = #tpu.dot_dimension_numbers<[2], [1], [1], [2], [0, 0, 0, 1, 1, 2], [0], [0]>} : vector<2x16x64xbf16>, vector<2x64x16xbf16>, vector<2x16x16xf32> -> vector<2x16x16xf32>
    "tpu.trace_stop"() : () -> ()
    %300 = arith.truncf %299 : vector<2x16x16xf32> to vector<2x16x16xbf16>
    %c5_242 = arith.constant 5 : index
    %c0_243 = arith.constant 0 : index
    %c0_244 = arith.constant 0 : index
    %301 = vector.load %arg5[%c5_242, %c0_243, %c0_244] : memref<16x16x32xbf16, #tpu.memory_space<vmem>>, vector<1x16x32xbf16>
    %302 = vector.shape_cast %301 : vector<1x16x32xbf16> to vector<16x32xbf16>
    %303 = vector.shape_cast %302 : vector<16x32xbf16> to vector<1x16x32xbf16>
    %304 = vector.broadcast %303 : vector<1x16x32xbf16> to vector<2x16x32xbf16>
    "tpu.trace_start"() <{level = 10 : i32, message = "brc,bcd->brd"}> : () -> ()
    %cst_245 = arith.constant dense<0.000000e+00> : vector<2x16x32xf32>
    %305 = tpu.matmul %300, %304, %cst_245 {dimension_numbers = #tpu.dot_dimension_numbers<[2], [1], [1], [2], [0, 0, 0, 1, 1, 2], [0], [0]>} : vector<2x16x16xbf16>, vector<2x16x32xbf16>, vector<2x16x32xf32> -> vector<2x16x32xf32>
    "tpu.trace_stop"() : () -> ()
    %306 = arith.addf %294, %305 : vector<2x16x32xf32>
    %c6_246 = arith.constant 6 : index
    %c0_247 = arith.constant 0 : index
    %c0_248 = arith.constant 0 : index
    %307 = vector.load %arg4[%c6_246, %c0_247, %c0_248] : memref<16x16x64xbf16, #tpu.memory_space<vmem>>, vector<1x16x64xbf16>
    %308 = vector.shape_cast %307 : vector<1x16x64xbf16> to vector<16x64xbf16>
    %309 = vector.shape_cast %308 : vector<16x64xbf16> to vector<1x16x64xbf16>
    %310 = vector.broadcast %309 : vector<1x16x64xbf16> to vector<2x16x64xbf16>
    "tpu.trace_start"() <{level = 10 : i32, message = "brm,bmc->brc"}> : () -> ()
    %cst_249 = arith.constant dense<0.000000e+00> : vector<2x16x16xf32>
    %311 = tpu.matmul %310, %233, %cst_249 {dimension_numbers = #tpu.dot_dimension_numbers<[2], [1], [1], [2], [0, 0, 0, 1, 1, 2], [0], [0]>} : vector<2x16x64xbf16>, vector<2x64x16xbf16>, vector<2x16x16xf32> -> vector<2x16x16xf32>
    "tpu.trace_stop"() : () -> ()
    %312 = arith.truncf %311 : vector<2x16x16xf32> to vector<2x16x16xbf16>
    %c6_250 = arith.constant 6 : index
    %c0_251 = arith.constant 0 : index
    %c0_252 = arith.constant 0 : index
    %313 = vector.load %arg5[%c6_250, %c0_251, %c0_252] : memref<16x16x32xbf16, #tpu.memory_space<vmem>>, vector<1x16x32xbf16>
    %314 = vector.shape_cast %313 : vector<1x16x32xbf16> to vector<16x32xbf16>
    %315 = vector.shape_cast %314 : vector<16x32xbf16> to vector<1x16x32xbf16>
    %316 = vector.broadcast %315 : vector<1x16x32xbf16> to vector<2x16x32xbf16>
    "tpu.trace_start"() <{level = 10 : i32, message = "brc,bcd->brd"}> : () -> ()
    %cst_253 = arith.constant dense<0.000000e+00> : vector<2x16x32xf32>
    %317 = tpu.matmul %312, %316, %cst_253 {dimension_numbers = #tpu.dot_dimension_numbers<[2], [1], [1], [2], [0, 0, 0, 1, 1, 2], [0], [0]>} : vector<2x16x16xbf16>, vector<2x16x32xbf16>, vector<2x16x32xf32> -> vector<2x16x32xf32>
    "tpu.trace_stop"() : () -> ()
    %318 = arith.addf %306, %317 : vector<2x16x32xf32>
    %c7_254 = arith.constant 7 : index
    %c0_255 = arith.constant 0 : index
    %c0_256 = arith.constant 0 : index
    %319 = vector.load %arg4[%c7_254, %c0_255, %c0_256] : memref<16x16x64xbf16, #tpu.memory_space<vmem>>, vector<1x16x64xbf16>
    %320 = vector.shape_cast %319 : vector<1x16x64xbf16> to vector<16x64xbf16>
    %321 = vector.shape_cast %320 : vector<16x64xbf16> to vector<1x16x64xbf16>
    %322 = vector.broadcast %321 : vector<1x16x64xbf16> to vector<2x16x64xbf16>
    "tpu.trace_start"() <{level = 10 : i32, message = "brm,bmc->brc"}> : () -> ()
    %cst_257 = arith.constant dense<0.000000e+00> : vector<2x16x16xf32>
    %323 = tpu.matmul %322, %233, %cst_257 {dimension_numbers = #tpu.dot_dimension_numbers<[2], [1], [1], [2], [0, 0, 0, 1, 1, 2], [0], [0]>} : vector<2x16x64xbf16>, vector<2x64x16xbf16>, vector<2x16x16xf32> -> vector<2x16x16xf32>
    "tpu.trace_stop"() : () -> ()
    %324 = arith.truncf %323 : vector<2x16x16xf32> to vector<2x16x16xbf16>
    %c7_258 = arith.constant 7 : index
    %c0_259 = arith.constant 0 : index
    %c0_260 = arith.constant 0 : index
    %325 = vector.load %arg5[%c7_258, %c0_259, %c0_260] : memref<16x16x32xbf16, #tpu.memory_space<vmem>>, vector<1x16x32xbf16>
    %326 = vector.shape_cast %325 : vector<1x16x32xbf16> to vector<16x32xbf16>
    %327 = vector.shape_cast %326 : vector<16x32xbf16> to vector<1x16x32xbf16>
    %328 = vector.broadcast %327 : vector<1x16x32xbf16> to vector<2x16x32xbf16>
    "tpu.trace_start"() <{level = 10 : i32, message = "brc,bcd->brd"}> : () -> ()
    %cst_261 = arith.constant dense<0.000000e+00> : vector<2x16x32xf32>
    %329 = tpu.matmul %324, %328, %cst_261 {dimension_numbers = #tpu.dot_dimension_numbers<[2], [1], [1], [2], [0, 0, 0, 1, 1, 2], [0], [0]>} : vector<2x16x16xbf16>, vector<2x16x32xbf16>, vector<2x16x32xf32> -> vector<2x16x32xf32>
    "tpu.trace_stop"() : () -> ()
    %330 = arith.addf %318, %329 : vector<2x16x32xf32>
    %c8_262 = arith.constant 8 : index
    %c0_263 = arith.constant 0 : index
    %c0_264 = arith.constant 0 : index
    %331 = vector.load %arg4[%c8_262, %c0_263, %c0_264] : memref<16x16x64xbf16, #tpu.memory_space<vmem>>, vector<1x16x64xbf16>
    %332 = vector.shape_cast %331 : vector<1x16x64xbf16> to vector<16x64xbf16>
    %333 = vector.shape_cast %332 : vector<16x64xbf16> to vector<1x16x64xbf16>
    %334 = vector.broadcast %333 : vector<1x16x64xbf16> to vector<2x16x64xbf16>
    "tpu.trace_start"() <{level = 10 : i32, message = "brm,bmc->brc"}> : () -> ()
    %cst_265 = arith.constant dense<0.000000e+00> : vector<2x16x16xf32>
    %335 = tpu.matmul %334, %233, %cst_265 {dimension_numbers = #tpu.dot_dimension_numbers<[2], [1], [1], [2], [0, 0, 0, 1, 1, 2], [0], [0]>} : vector<2x16x64xbf16>, vector<2x64x16xbf16>, vector<2x16x16xf32> -> vector<2x16x16xf32>
    "tpu.trace_stop"() : () -> ()
    %336 = arith.truncf %335 : vector<2x16x16xf32> to vector<2x16x16xbf16>
    %c8_266 = arith.constant 8 : index
    %c0_267 = arith.constant 0 : index
    %c0_268 = arith.constant 0 : index
    %337 = vector.load %arg5[%c8_266, %c0_267, %c0_268] : memref<16x16x32xbf16, #tpu.memory_space<vmem>>, vector<1x16x32xbf16>
    %338 = vector.shape_cast %337 : vector<1x16x32xbf16> to vector<16x32xbf16>
    %339 = vector.shape_cast %338 : vector<16x32xbf16> to vector<1x16x32xbf16>
    %340 = vector.broadcast %339 : vector<1x16x32xbf16> to vector<2x16x32xbf16>
    "tpu.trace_start"() <{level = 10 : i32, message = "brc,bcd->brd"}> : () -> ()
    %cst_269 = arith.constant dense<0.000000e+00> : vector<2x16x32xf32>
    %341 = tpu.matmul %336, %340, %cst_269 {dimension_numbers = #tpu.dot_dimension_numbers<[2], [1], [1], [2], [0, 0, 0, 1, 1, 2], [0], [0]>} : vector<2x16x16xbf16>, vector<2x16x32xbf16>, vector<2x16x32xf32> -> vector<2x16x32xf32>
    "tpu.trace_stop"() : () -> ()
    %342 = arith.addf %330, %341 : vector<2x16x32xf32>
    %c9_270 = arith.constant 9 : index
    %c0_271 = arith.constant 0 : index
    %c0_272 = arith.constant 0 : index
    %343 = vector.load %arg4[%c9_270, %c0_271, %c0_272] : memref<16x16x64xbf16, #tpu.memory_space<vmem>>, vector<1x16x64xbf16>
    %344 = vector.shape_cast %343 : vector<1x16x64xbf16> to vector<16x64xbf16>
    %345 = vector.shape_cast %344 : vector<16x64xbf16> to vector<1x16x64xbf16>
    %346 = vector.broadcast %345 : vector<1x16x64xbf16> to vector<2x16x64xbf16>
    "tpu.trace_start"() <{level = 10 : i32, message = "brm,bmc->brc"}> : () -> ()
    %cst_273 = arith.constant dense<0.000000e+00> : vector<2x16x16xf32>
    %347 = tpu.matmul %346, %233, %cst_273 {dimension_numbers = #tpu.dot_dimension_numbers<[2], [1], [1], [2], [0, 0, 0, 1, 1, 2], [0], [0]>} : vector<2x16x64xbf16>, vector<2x64x16xbf16>, vector<2x16x16xf32> -> vector<2x16x16xf32>
    "tpu.trace_stop"() : () -> ()
    %348 = arith.truncf %347 : vector<2x16x16xf32> to vector<2x16x16xbf16>
    %c9_274 = arith.constant 9 : index
    %c0_275 = arith.constant 0 : index
    %c0_276 = arith.constant 0 : index
    %349 = vector.load %arg5[%c9_274, %c0_275, %c0_276] : memref<16x16x32xbf16, #tpu.memory_space<vmem>>, vector<1x16x32xbf16>
    %350 = vector.shape_cast %349 : vector<1x16x32xbf16> to vector<16x32xbf16>
    %351 = vector.shape_cast %350 : vector<16x32xbf16> to vector<1x16x32xbf16>
    %352 = vector.broadcast %351 : vector<1x16x32xbf16> to vector<2x16x32xbf16>
    "tpu.trace_start"() <{level = 10 : i32, message = "brc,bcd->brd"}> : () -> ()
    %cst_277 = arith.constant dense<0.000000e+00> : vector<2x16x32xf32>
    %353 = tpu.matmul %348, %352, %cst_277 {dimension_numbers = #tpu.dot_dimension_numbers<[2], [1], [1], [2], [0, 0, 0, 1, 1, 2], [0], [0]>} : vector<2x16x16xbf16>, vector<2x16x32xbf16>, vector<2x16x32xf32> -> vector<2x16x32xf32>
    "tpu.trace_stop"() : () -> ()
    %354 = arith.addf %342, %353 : vector<2x16x32xf32>
    %c10_278 = arith.constant 10 : index
    %c0_279 = arith.constant 0 : index
    %c0_280 = arith.constant 0 : index
    %355 = vector.load %arg4[%c10_278, %c0_279, %c0_280] : memref<16x16x64xbf16, #tpu.memory_space<vmem>>, vector<1x16x64xbf16>
    %356 = vector.shape_cast %355 : vector<1x16x64xbf16> to vector<16x64xbf16>
    %357 = vector.shape_cast %356 : vector<16x64xbf16> to vector<1x16x64xbf16>
    %358 = vector.broadcast %357 : vector<1x16x64xbf16> to vector<2x16x64xbf16>
    "tpu.trace_start"() <{level = 10 : i32, message = "brm,bmc->brc"}> : () -> ()
    %cst_281 = arith.constant dense<0.000000e+00> : vector<2x16x16xf32>
    %359 = tpu.matmul %358, %233, %cst_281 {dimension_numbers = #tpu.dot_dimension_numbers<[2], [1], [1], [2], [0, 0, 0, 1, 1, 2], [0], [0]>} : vector<2x16x64xbf16>, vector<2x64x16xbf16>, vector<2x16x16xf32> -> vector<2x16x16xf32>
    "tpu.trace_stop"() : () -> ()
    %360 = arith.truncf %359 : vector<2x16x16xf32> to vector<2x16x16xbf16>
    %c10_282 = arith.constant 10 : index
    %c0_283 = arith.constant 0 : index
    %c0_284 = arith.constant 0 : index
    %361 = vector.load %arg5[%c10_282, %c0_283, %c0_284] : memref<16x16x32xbf16, #tpu.memory_space<vmem>>, vector<1x16x32xbf16>
    %362 = vector.shape_cast %361 : vector<1x16x32xbf16> to vector<16x32xbf16>
    %363 = vector.shape_cast %362 : vector<16x32xbf16> to vector<1x16x32xbf16>
    %364 = vector.broadcast %363 : vector<1x16x32xbf16> to vector<2x16x32xbf16>
    "tpu.trace_start"() <{level = 10 : i32, message = "brc,bcd->brd"}> : () -> ()
    %cst_285 = arith.constant dense<0.000000e+00> : vector<2x16x32xf32>
    %365 = tpu.matmul %360, %364, %cst_285 {dimension_numbers = #tpu.dot_dimension_numbers<[2], [1], [1], [2], [0, 0, 0, 1, 1, 2], [0], [0]>} : vector<2x16x16xbf16>, vector<2x16x32xbf16>, vector<2x16x32xf32> -> vector<2x16x32xf32>
    "tpu.trace_stop"() : () -> ()
    %366 = arith.addf %354, %365 : vector<2x16x32xf32>
    %c11_286 = arith.constant 11 : index
    %c0_287 = arith.constant 0 : index
    %c0_288 = arith.constant 0 : index
    %367 = vector.load %arg4[%c11_286, %c0_287, %c0_288] : memref<16x16x64xbf16, #tpu.memory_space<vmem>>, vector<1x16x64xbf16>
    %368 = vector.shape_cast %367 : vector<1x16x64xbf16> to vector<16x64xbf16>
    %369 = vector.shape_cast %368 : vector<16x64xbf16> to vector<1x16x64xbf16>
    %370 = vector.broadcast %369 : vector<1x16x64xbf16> to vector<2x16x64xbf16>
    "tpu.trace_start"() <{level = 10 : i32, message = "brm,bmc->brc"}> : () -> ()
    %cst_289 = arith.constant dense<0.000000e+00> : vector<2x16x16xf32>
    %371 = tpu.matmul %370, %233, %cst_289 {dimension_numbers = #tpu.dot_dimension_numbers<[2], [1], [1], [2], [0, 0, 0, 1, 1, 2], [0], [0]>} : vector<2x16x64xbf16>, vector<2x64x16xbf16>, vector<2x16x16xf32> -> vector<2x16x16xf32>
    "tpu.trace_stop"() : () -> ()
    %372 = arith.truncf %371 : vector<2x16x16xf32> to vector<2x16x16xbf16>
    %c11_290 = arith.constant 11 : index
    %c0_291 = arith.constant 0 : index
    %c0_292 = arith.constant 0 : index
    %373 = vector.load %arg5[%c11_290, %c0_291, %c0_292] : memref<16x16x32xbf16, #tpu.memory_space<vmem>>, vector<1x16x32xbf16>
    %374 = vector.shape_cast %373 : vector<1x16x32xbf16> to vector<16x32xbf16>
    %375 = vector.shape_cast %374 : vector<16x32xbf16> to vector<1x16x32xbf16>
    %376 = vector.broadcast %375 : vector<1x16x32xbf16> to vector<2x16x32xbf16>
    "tpu.trace_start"() <{level = 10 : i32, message = "brc,bcd->brd"}> : () -> ()
    %cst_293 = arith.constant dense<0.000000e+00> : vector<2x16x32xf32>
    %377 = tpu.matmul %372, %376, %cst_293 {dimension_numbers = #tpu.dot_dimension_numbers<[2], [1], [1], [2], [0, 0, 0, 1, 1, 2], [0], [0]>} : vector<2x16x16xbf16>, vector<2x16x32xbf16>, vector<2x16x32xf32> -> vector<2x16x32xf32>
    "tpu.trace_stop"() : () -> ()
    %378 = arith.addf %366, %377 : vector<2x16x32xf32>
    %c12_294 = arith.constant 12 : index
    %c0_295 = arith.constant 0 : index
    %c0_296 = arith.constant 0 : index
    %379 = vector.load %arg4[%c12_294, %c0_295, %c0_296] : memref<16x16x64xbf16, #tpu.memory_space<vmem>>, vector<1x16x64xbf16>
    %380 = vector.shape_cast %379 : vector<1x16x64xbf16> to vector<16x64xbf16>
    %381 = vector.shape_cast %380 : vector<16x64xbf16> to vector<1x16x64xbf16>
    %382 = vector.broadcast %381 : vector<1x16x64xbf16> to vector<2x16x64xbf16>
    "tpu.trace_start"() <{level = 10 : i32, message = "brm,bmc->brc"}> : () -> ()
    %cst_297 = arith.constant dense<0.000000e+00> : vector<2x16x16xf32>
    %383 = tpu.matmul %382, %233, %cst_297 {dimension_numbers = #tpu.dot_dimension_numbers<[2], [1], [1], [2], [0, 0, 0, 1, 1, 2], [0], [0]>} : vector<2x16x64xbf16>, vector<2x64x16xbf16>, vector<2x16x16xf32> -> vector<2x16x16xf32>
    "tpu.trace_stop"() : () -> ()
    %384 = arith.truncf %383 : vector<2x16x16xf32> to vector<2x16x16xbf16>
    %c12_298 = arith.constant 12 : index
    %c0_299 = arith.constant 0 : index
    %c0_300 = arith.constant 0 : index
    %385 = vector.load %arg5[%c12_298, %c0_299, %c0_300] : memref<16x16x32xbf16, #tpu.memory_space<vmem>>, vector<1x16x32xbf16>
    %386 = vector.shape_cast %385 : vector<1x16x32xbf16> to vector<16x32xbf16>
    %387 = vector.shape_cast %386 : vector<16x32xbf16> to vector<1x16x32xbf16>
    %388 = vector.broadcast %387 : vector<1x16x32xbf16> to vector<2x16x32xbf16>
    "tpu.trace_start"() <{level = 10 : i32, message = "brc,bcd->brd"}> : () -> ()
    %cst_301 = arith.constant dense<0.000000e+00> : vector<2x16x32xf32>
    %389 = tpu.matmul %384, %388, %cst_301 {dimension_numbers = #tpu.dot_dimension_numbers<[2], [1], [1], [2], [0, 0, 0, 1, 1, 2], [0], [0]>} : vector<2x16x16xbf16>, vector<2x16x32xbf16>, vector<2x16x32xf32> -> vector<2x16x32xf32>
    "tpu.trace_stop"() : () -> ()
    %390 = arith.addf %378, %389 : vector<2x16x32xf32>
    %c13_302 = arith.constant 13 : index
    %c0_303 = arith.constant 0 : index
    %c0_304 = arith.constant 0 : index
    %391 = vector.load %arg4[%c13_302, %c0_303, %c0_304] : memref<16x16x64xbf16, #tpu.memory_space<vmem>>, vector<1x16x64xbf16>
    %392 = vector.shape_cast %391 : vector<1x16x64xbf16> to vector<16x64xbf16>
    %393 = vector.shape_cast %392 : vector<16x64xbf16> to vector<1x16x64xbf16>
    %394 = vector.broadcast %393 : vector<1x16x64xbf16> to vector<2x16x64xbf16>
    "tpu.trace_start"() <{level = 10 : i32, message = "brm,bmc->brc"}> : () -> ()
    %cst_305 = arith.constant dense<0.000000e+00> : vector<2x16x16xf32>
    %395 = tpu.matmul %394, %233, %cst_305 {dimension_numbers = #tpu.dot_dimension_numbers<[2], [1], [1], [2], [0, 0, 0, 1, 1, 2], [0], [0]>} : vector<2x16x64xbf16>, vector<2x64x16xbf16>, vector<2x16x16xf32> -> vector<2x16x16xf32>
    "tpu.trace_stop"() : () -> ()
    %396 = arith.truncf %395 : vector<2x16x16xf32> to vector<2x16x16xbf16>
    %c13_306 = arith.constant 13 : index
    %c0_307 = arith.constant 0 : index
    %c0_308 = arith.constant 0 : index
    %397 = vector.load %arg5[%c13_306, %c0_307, %c0_308] : memref<16x16x32xbf16, #tpu.memory_space<vmem>>, vector<1x16x32xbf16>
    %398 = vector.shape_cast %397 : vector<1x16x32xbf16> to vector<16x32xbf16>
    %399 = vector.shape_cast %398 : vector<16x32xbf16> to vector<1x16x32xbf16>
    %400 = vector.broadcast %399 : vector<1x16x32xbf16> to vector<2x16x32xbf16>
    "tpu.trace_start"() <{level = 10 : i32, message = "brc,bcd->brd"}> : () -> ()
    %cst_309 = arith.constant dense<0.000000e+00> : vector<2x16x32xf32>
    %401 = tpu.matmul %396, %400, %cst_309 {dimension_numbers = #tpu.dot_dimension_numbers<[2], [1], [1], [2], [0, 0, 0, 1, 1, 2], [0], [0]>} : vector<2x16x16xbf16>, vector<2x16x32xbf16>, vector<2x16x32xf32> -> vector<2x16x32xf32>
    "tpu.trace_stop"() : () -> ()
    %402 = arith.addf %390, %401 : vector<2x16x32xf32>
    %c14_310 = arith.constant 14 : index
    %c0_311 = arith.constant 0 : index
    %c0_312 = arith.constant 0 : index
    %403 = vector.load %arg4[%c14_310, %c0_311, %c0_312] : memref<16x16x64xbf16, #tpu.memory_space<vmem>>, vector<1x16x64xbf16>
    %404 = vector.shape_cast %403 : vector<1x16x64xbf16> to vector<16x64xbf16>
    %405 = vector.shape_cast %404 : vector<16x64xbf16> to vector<1x16x64xbf16>
    %406 = vector.broadcast %405 : vector<1x16x64xbf16> to vector<2x16x64xbf16>
    "tpu.trace_start"() <{level = 10 : i32, message = "brm,bmc->brc"}> : () -> ()
    %cst_313 = arith.constant dense<0.000000e+00> : vector<2x16x16xf32>
    %407 = tpu.matmul %406, %233, %cst_313 {dimension_numbers = #tpu.dot_dimension_numbers<[2], [1], [1], [2], [0, 0, 0, 1, 1, 2], [0], [0]>} : vector<2x16x64xbf16>, vector<2x64x16xbf16>, vector<2x16x16xf32> -> vector<2x16x16xf32>
    "tpu.trace_stop"() : () -> ()
    %408 = arith.truncf %407 : vector<2x16x16xf32> to vector<2x16x16xbf16>
    %c14_314 = arith.constant 14 : index
    %c0_315 = arith.constant 0 : index
    %c0_316 = arith.constant 0 : index
    %409 = vector.load %arg5[%c14_314, %c0_315, %c0_316] : memref<16x16x32xbf16, #tpu.memory_space<vmem>>, vector<1x16x32xbf16>
    %410 = vector.shape_cast %409 : vector<1x16x32xbf16> to vector<16x32xbf16>
    %411 = vector.shape_cast %410 : vector<16x32xbf16> to vector<1x16x32xbf16>
    %412 = vector.broadcast %411 : vector<1x16x32xbf16> to vector<2x16x32xbf16>
    "tpu.trace_start"() <{level = 10 : i32, message = "brc,bcd->brd"}> : () -> ()
    %cst_317 = arith.constant dense<0.000000e+00> : vector<2x16x32xf32>
    %413 = tpu.matmul %408, %412, %cst_317 {dimension_numbers = #tpu.dot_dimension_numbers<[2], [1], [1], [2], [0, 0, 0, 1, 1, 2], [0], [0]>} : vector<2x16x16xbf16>, vector<2x16x32xbf16>, vector<2x16x32xf32> -> vector<2x16x32xf32>
    "tpu.trace_stop"() : () -> ()
    %414 = arith.addf %402, %413 : vector<2x16x32xf32>
    %c15_318 = arith.constant 15 : index
    %c0_319 = arith.constant 0 : index
    %c0_320 = arith.constant 0 : index
    %415 = vector.load %arg4[%c15_318, %c0_319, %c0_320] : memref<16x16x64xbf16, #tpu.memory_space<vmem>>, vector<1x16x64xbf16>
    %416 = vector.shape_cast %415 : vector<1x16x64xbf16> to vector<16x64xbf16>
    %417 = vector.shape_cast %416 : vector<16x64xbf16> to vector<1x16x64xbf16>
    %418 = vector.broadcast %417 : vector<1x16x64xbf16> to vector<2x16x64xbf16>
    "tpu.trace_start"() <{level = 10 : i32, message = "brm,bmc->brc"}> : () -> ()
    %cst_321 = arith.constant dense<0.000000e+00> : vector<2x16x16xf32>
    %419 = tpu.matmul %418, %233, %cst_321 {dimension_numbers = #tpu.dot_dimension_numbers<[2], [1], [1], [2], [0, 0, 0, 1, 1, 2], [0], [0]>} : vector<2x16x64xbf16>, vector<2x64x16xbf16>, vector<2x16x16xf32> -> vector<2x16x16xf32>
    "tpu.trace_stop"() : () -> ()
    %420 = arith.truncf %419 : vector<2x16x16xf32> to vector<2x16x16xbf16>
    %c15_322 = arith.constant 15 : index
    %c0_323 = arith.constant 0 : index
    %c0_324 = arith.constant 0 : index
    %421 = vector.load %arg5[%c15_322, %c0_323, %c0_324] : memref<16x16x32xbf16, #tpu.memory_space<vmem>>, vector<1x16x32xbf16>
    %422 = vector.shape_cast %421 : vector<1x16x32xbf16> to vector<16x32xbf16>
    %423 = vector.shape_cast %422 : vector<16x32xbf16> to vector<1x16x32xbf16>
    %424 = vector.broadcast %423 : vector<1x16x32xbf16> to vector<2x16x32xbf16>
    "tpu.trace_start"() <{level = 10 : i32, message = "brc,bcd->brd"}> : () -> ()
    %cst_325 = arith.constant dense<0.000000e+00> : vector<2x16x32xf32>
    %425 = tpu.matmul %420, %424, %cst_325 {dimension_numbers = #tpu.dot_dimension_numbers<[2], [1], [1], [2], [0, 0, 0, 1, 1, 2], [0], [0]>} : vector<2x16x16xbf16>, vector<2x16x32xbf16>, vector<2x16x32xf32> -> vector<2x16x32xf32>
    "tpu.trace_stop"() : () -> ()
    %426 = arith.addf %414, %425 : vector<2x16x32xf32>
    %cst_326 = arith.constant dense<0.000000e+00> : vector<2x32xf32>
    %427 = vector.multi_reduction <add>, %426, %cst_326 [1] : vector<2x16x32xf32> to vector<2x32xf32>
    %428 = vector.shape_cast %427 : vector<2x32xf32> to vector<2x1x32xf32>
    %cst_327 = arith.constant dense<0.000000e+00> : vector<1x32xf32>
    %429 = vector.multi_reduction <add>, %428, %cst_327 [0] : vector<2x1x32xf32> to vector<1x32xf32>
    %430 = vector.shape_cast %429 : vector<1x32xf32> to vector<1x1x32xf32>
    %cst_328 = arith.constant 3.200000e+01 : f32
    %431 = vector.broadcast %cst_328 : f32 to vector<1x1x32xf32>
    %432 = arith.divf %430, %431 : vector<1x1x32xf32>
    %433 = vector.broadcast %432 : vector<1x1x32xf32> to vector<2x16x32xf32>
    %434 = arith.subf %426, %433 : vector<2x16x32xf32>
    %435 = arith.mulf %434, %434 : vector<2x16x32xf32>
    %cst_329 = arith.constant dense<0.000000e+00> : vector<2x32xf32>
    %436 = vector.multi_reduction <add>, %435, %cst_329 [1] : vector<2x16x32xf32> to vector<2x32xf32>
    %437 = vector.shape_cast %436 : vector<2x32xf32> to vector<2x1x32xf32>
    %cst_330 = arith.constant dense<0.000000e+00> : vector<1x32xf32>
    %438 = vector.multi_reduction <add>, %437, %cst_330 [0] : vector<2x1x32xf32> to vector<1x32xf32>
    %439 = vector.shape_cast %438 : vector<1x32xf32> to vector<1x1x32xf32>
    %cst_331 = arith.constant 3.200000e+01 : f32
    %440 = vector.broadcast %cst_331 : f32 to vector<1x1x32xf32>
    %441 = arith.divf %439, %440 : vector<1x1x32xf32>
    %cst_332 = arith.constant 9.99999974E-6 : f32
    %442 = vector.broadcast %cst_332 : f32 to vector<1x1x32xf32>
    %443 = arith.addf %441, %442 : vector<1x1x32xf32>
    %444 = math.rsqrt %443 : vector<1x1x32xf32>
    %445 = vector.broadcast %444 : vector<1x1x32xf32> to vector<2x16x32xf32>
    %446 = arith.mulf %434, %445 : vector<2x16x32xf32>
    %c0_333 = arith.constant 0 : index
    %c0_334 = arith.constant 0 : index
    %c0_335 = arith.constant 0 : index
    %447 = vector.load %arg6[%c0_333, %c0_334, %c0_335] : memref<1x1x32xf32, #tpu.memory_space<vmem>>, vector<1x1x32xf32>
    %448 = vector.broadcast %447 : vector<1x1x32xf32> to vector<2x16x32xf32>
    %449 = arith.mulf %446, %448 : vector<2x16x32xf32>
    %c0_336 = arith.constant 0 : index
    %c0_337 = arith.constant 0 : index
    %c0_338 = arith.constant 0 : index
    %450 = vector.load %arg7[%c0_336, %c0_337, %c0_338] : memref<1x1x32xf32, #tpu.memory_space<vmem>>, vector<1x1x32xf32>
    %451 = vector.broadcast %450 : vector<1x1x32xf32> to vector<2x16x32xf32>
    %452 = arith.addf %449, %451 : vector<2x16x32xf32>
    %cst_339 = arith.constant 0.000000e+00 : f32
    %453 = vector.broadcast %cst_339 : f32 to vector<2x16x32xf32>
    %454 = arith.cmpf oge, %452, %453 : vector<2x16x32xf32>
    %cst_340 = arith.constant 2.000000e-01 : f32
    %455 = vector.broadcast %cst_340 : f32 to vector<2x16x32xf32>
    %456 = arith.mulf %455, %452 : vector<2x16x32xf32>
    %457 = arith.select %454, %452, %456 : vector<2x16x32xi1>, vector<2x16x32xf32>
    %c0_341 = arith.constant 0 : index
    %c0_342 = arith.constant 0 : index
    %458 = vector.load %arg8[%c0_341, %c0_342] : memref<16x32xf32, #tpu.memory_space<vmem>>, vector<16x32xf32>
    %459 = vector.shape_cast %458 : vector<16x32xf32> to vector<1x16x32xf32>
    %460 = vector.broadcast %459 : vector<1x16x32xf32> to vector<2x16x32xf32>
    %461 = arith.mulf %457, %460 : vector<2x16x32xf32>
    %cst_343 = arith.constant dense<0.000000e+00> : vector<2x16xf32>
    %462 = vector.multi_reduction <add>, %461, %cst_343 [2] : vector<2x16x32xf32> to vector<2x16xf32>
    %cst_344 = arith.constant dense<0.000000e+00> : vector<2xf32>
    %463 = vector.multi_reduction <add>, %462, %cst_344 [1] : vector<2x16xf32> to vector<2xf32>
    %464 = vector.shape_cast %463 : vector<2xf32> to vector<1x2xf32>
    %c0_345 = arith.constant 0 : index
    %c0_346 = arith.constant 0 : index
    %465 = vector.load %arg9[%c0_345, %c0_346] : memref<1x1xf32, #tpu.memory_space<vmem>>, vector<1x1xf32>
    %466 = vector.broadcast %465 : vector<1x1xf32> to vector<1x2xf32>
    %467 = arith.addf %464, %466 : vector<1x2xf32>
    %c0_347 = arith.constant 0 : index
    %c0_348 = arith.constant 0 : index
    %468 = vector.load %arg10[%c0_347, %c0_348] : memref<1x2xf32, #tpu.memory_space<vmem>>, vector<1x2xf32>
    tpu.vector_store %arg10[%c0_347, %c0_348], %467 {strides = array<i32>} : memref<1x2xf32, #tpu.memory_space<vmem>>, vector<1x2xf32>,
    return
  }
}

</mosaic_0001>

<bundles_post_ra>
// kernel: discriminator_forward.1
= control target key start
LH: loop header
LB: loop body
LE: loop exit
PB: predicated region body
PF: predicated region fallthrough
CT: control target
= control target key end

     0   :  { %s16778_s0 = inlined_call_operand.vmem [shape: bf16[2,2,2,81,4], index: 0, kind: input, shape index: {}]   ;;  %s16779_s1 = inlined_call_operand.vmem [shape: bf16[4,64,81], index: 1, kind: input, shape index: {}]   ;;  %s16780_s2 = inlined_call_operand.vmem [shape: bf16[16,4,16], index: 2, kind: input, shape index: {}]   ;;  %s16781_s3 = inlined_call_operand.vmem [shape: f32[1,1,16], index: 3, kind: input, shape index: {}]   ;;  %s16782_s4 = inlined_call_operand.vmem [shape: bf16[16,16,64], index: 4, kind: input, shape index: {}]   ;;  %s16783_s5 = inlined_call_operand.vmem [shape: bf16[16,16,32], index: 5, kind: input, shape index: {}]   ;;  %s16784_s6 = inlined_call_operand.vmem [shape: f32[1,1,32], index: 6, kind: input, shape index: {}]   ;;  %s16785_s7 = inlined_call_operand.vmem [shape: f32[1,1,32], index: 7, kind: input, shape index: {}]   ;;  %s16786_s8 = inlined_call_operand.vmem [shape: f32[16,32], index: 8, kind: input, shape index: {}]   ;;  %s16787_s9 = inlined_call_operand.<no memory space> [shape: f32[1,1], index: 9, kind: input, shape index: {}]   ;;  %s16788_s10 = inlined_call_operand.hbm [shape: f32[1,2], index: 10, kind: output, shape index: {}]  }
   0x1   :  { %v15_v0 = vstv %s16787_s9 }
   0x2   :  { %16 = vst [vmem:[#allocation2] sm:$0x1] %v15_v0 }
   0x3   :  { %v13879_v1 = vld [vmem:[%s16778_s0 + $0x28] ss:$0 sps:$4 sm:$0x11]   ;;  %vm135_vm0 = vcmask 1040384   ;;  %v14191_v3 = vmov 0   ;;  %v13881_v5 = vld [vmem:[%s16778_s0 + $0x20] sm:$0xff]  }
   0x4   :  { %v13880_v2 = vld [vmem:[%s16778_s0 + $0x54] ss:$0 sps:$4 sm:$0x11]   ;;  %v14259_v4 = vsel %vm135_vm0, 65535, %v14191_v3  ;;  %13877 = vset.pattern.permute.xlu1 %v14191_v3  ;;  %13878 = vset.pattern.permute.xlu0 %v14191_v3  ;;  %v13882_v8 = vld [vmem:[%s16778_s0 + $0x4c] sm:$0xff]   ;;  %v13883_v9 = vld [vmem:[%s16778_s0 + $0x18] sm:$0xff]  }
   0x5   :  { %v139_v6 = vand.u32 %v13879_v1, %v14259_v4  ;;  %v240_v7 = vand.u32 %v13880_v2, %v14259_v4  ;;  %v13884_v10 = vld [vmem:[%s16778_s0 + $0x44] sm:$0xff]   ;;  %v13885_v11 = vld [vmem:[%s16778_s0 + $0x10] sm:$0xff]   ;;  %v13886_v12 = vld [vmem:[%s16778_s0 + $0x3c] sm:$0xff]   ;;  %vm122_vm1 = vcmask 662528   ;;  %vm604_vm2 = vcmask 1041408  }
   0x6   :  { %v13891_v13 = vld [vmem:[%s16779_s1] sm:$0xff]   ;;  %v13887_v14 = vld [vmem:[%s16778_s0 + $0x8] sm:$0xff]   ;;  %v13888_v15 = vld [vmem:[%s16778_s0 + $0x34] sm:$0xff]  }
   0x7   :  { %12305 = vmatprep.subr.bf16.mxu0 %v139_v6  ;;  %12325 = vmatprep.subr.bf16.mxu1 %v240_v7  ;;  %v13893_v16 = vld [vmem:[%s16778_s0 + $0x80] ss:$0 sps:$4 sm:$0x11]   ;;  %v13894_v17 = vld [vmem:[%s16778_s0 + $0xac] ss:$0 sps:$4 sm:$0x11]  }
   0x8   :  { %12306 = vmatpush3.bf16.msra.mxu0 %v139_v6  ;;  %12326 = vmatpush3.bf16.msra.mxu1 %v240_v7  ;;  %v13889_v18 = vld [vmem:[%s16778_s0] sm:$0xff]   ;;  %v13890_v19 = vld [vmem:[%s16778_s0 + $0x2c] sm:$0xff]   ;;  %v413_v20 = vand.u32 %v13893_v16, %v14259_v4  ;;  %v514_v21 = vand.u32 %v13894_v17, %v14259_v4  ;;  %v13895_v23 = vld [vmem:[%s16778_s0 + $0x78] sm:$0xff]  }
   0x9   :  { %12307 = vmatprep.subr.bf16.mxu0 %v13881_v5  ;;  %12327 = vmatprep.subr.bf16.mxu1 %v13882_v8  ;;  %v13892_v22 = vld [vmem:[%s16779_s1 + $0x8] sm:$0xff]   ;;  %v13899_v25 = vld [vmem:[%s16779_s1 + $0x10] sm:$0xff]   ;;  %v13898_v27 = vld [vmem:[%s16778_s0 + $0x9c] sm:$0xff]  }
   0xa   :  { %12317 = vmatprep.mubr.msk.bf16.mxu0 %vm122_vm1, %v13891_v13  ;;  %12337 = vmatprep.mubr.msk.bf16.mxu1 %vm122_vm1, %v13891_v13  ;;  %v13896_v24 = vld [vmem:[%s16778_s0 + $0xa4] sm:$0xff]   ;;  %v13897_v26 = vld [vmem:[%s16778_s0 + $0x70] sm:$0xff]   ;;  %v13900_v28 = vld [vmem:[%s16779_s1 + $0x18] sm:$0xff]  }
   0xb   :  { %v13901_v29 = vld [vmem:[%s16778_s0 + $0x68] sm:$0xff]   ;;  %v13902_v30 = vld [vmem:[%s16778_s0 + $0x94] sm:$0xff]   ;;  %v13907_v31 = vld [vmem:[%s16779_s1] sm:$0xff]  }
   0xc   :  { %12308 = vmatpush3.bf16.msra.mxu0 %v13881_v5  ;;  %12328 = vmatpush3.bf16.msra.mxu1 %v13882_v8  ;;  %v13903_v32 = vld [vmem:[%s16778_s0 + $0x60] sm:$0xff]   ;;  %v13904_v33 = vld [vmem:[%s16778_s0 + $0x8c] sm:$0xff]   ;;  %v13905_v34 = vld [vmem:[%s16778_s0 + $0x58] sm:$0xff]  }
   0xd   :  { %12309 = vmatprep.subr.bf16.mxu0 %v13883_v9  ;;  %12329 = vmatprep.subr.bf16.mxu1 %v13884_v10  ;;  %v13906_v35 = vld [vmem:[%s16778_s0 + $0x84] sm:$0xff]   ;;  %v13909_v37 = vld [vmem:[%s16779_s1 + $0x10] sm:$0xff]   ;;  %v13910_v38 = vld [vmem:[%s16779_s1 + $0x18] sm:$0xff]  }
   0xe   :  { %v13908_v36 = vld [vmem:[%s16779_s1 + $0x8] sm:$0xff]   ;;  %v10625_v39 = vld [vmem:[%s16780_s2 + $0x2] sm:$0x3]  ;;  %v315_v41 = vld [vmem:[%s16780_s2] sm:$0x3] }
   0xf   :  { %v606_v40 = vsel %vm604_vm2, %v10625_v39, 0 }
  0x10   :  { %12310 = vmatpush3.bf16.msra.mxu0 %v13883_v9  ;;  %12330 = vmatpush3.bf16.msra.mxu1 %v13884_v10 }
  0x11   :  { %12311 = vmatprep.subr.bf16.mxu0 %v13885_v11  ;;  %12331 = vmatprep.subr.bf16.mxu1 %v13886_v12 }
  0x14   :  { %12312 = vmatpush3.bf16.msra.mxu0 %v13885_v11  ;;  %12332 = vmatpush3.bf16.msra.mxu1 %v13886_v12 }
  0x15   :  { %12313 = vmatprep.subr.bf16.mxu0 %v13887_v14  ;;  %12333 = vmatprep.subr.bf16.mxu1 %v13888_v15 }
  0x18   :  { %12314 = vmatpush3.bf16.msra.mxu0 %v13887_v14  ;;  %12334 = vmatpush3.bf16.msra.mxu1 %v13888_v15 }
  0x19   :  { %12315 = vmatprep.subr.bf16.mxu0 %v13889_v18  ;;  %12335 = vmatprep.subr.bf16.mxu1 %v13890_v19 }
  0x1c   :  { %12316 = vmatpush3.bf16.msra.mxu0 %v13889_v18  ;;  %12336 = vmatpush3.bf16.msra.mxu1 %v13890_v19 }
  0x1d   :  { %12345 = vmatprep.subr.bf16.mxu0 %v413_v20  ;;  %12365 = vmatprep.subr.bf16.mxu1 %v514_v21 }
  0x1f   :  { %12318 = vmatmul.mubr.msk.bf16.vlgmr.msra.gmra.mxu0 %vm122_vm1, %v13892_v22  ;;  %12338 = vmatmul.mubr.msk.bf16.vlgmr.msra.gmra.mxu1 %vm122_vm1, %v13892_v22 }
  0x20   :  { %12346 = vmatpush3.bf16.msra.mxu0 %v413_v20  ;;  %12366 = vmatpush3.bf16.msra.mxu1 %v514_v21 }
  0x21   :  { %12347 = vmatprep.subr.bf16.mxu0 %v13895_v23  ;;  %12367 = vmatprep.subr.bf16.mxu1 %v13896_v24 }
  0x22   :  { %12321 = vmatprep.mubr.msk.bf16.mxu0 %vm122_vm1, %v13899_v25  ;;  %12341 = vmatprep.mubr.msk.bf16.mxu1 %vm122_vm1, %v13899_v25 }
  0x24   :  { %12348 = vmatpush3.bf16.msra.mxu0 %v13895_v23  ;;  %12368 = vmatpush3.bf16.msra.mxu1 %v13896_v24 }
  0x25   :  { %12349 = vmatprep.subr.bf16.mxu0 %v13897_v26  ;;  %12369 = vmatprep.subr.bf16.mxu1 %v13898_v27 }
  0x27   :  { %12322 = vmatmul.mubr.msk.bf16.gmra.mxu0 %vm122_vm1, %v13900_v28  ;;  %12342 = vmatmul.mubr.msk.bf16.gmra.mxu1 %vm122_vm1, %v13900_v28 }
  0x28   :  { %12350 = vmatpush3.bf16.msra.mxu0 %v13897_v26  ;;  %12370 = vmatpush3.bf16.msra.mxu1 %v13898_v27 }
  0x29   :  { %12351 = vmatprep.subr.bf16.mxu0 %v13901_v29  ;;  %12371 = vmatprep.subr.bf16.mxu1 %v13902_v30 }
  0x2a   :  { %12357 = vmatprep.mubr.msk.bf16.mxu0 %vm122_vm1, %v13907_v31  ;;  %12377 = vmatprep.mubr.msk.bf16.mxu1 %vm122_vm1, %v13907_v31 }
  0x2c   :  { %12352 = vmatpush3.bf16.msra.mxu0 %v13901_v29  ;;  %12372 = vmatpush3.bf16.msra.mxu1 %v13902_v30 }
  0x2d   :  { %12353 = vmatprep.subr.bf16.mxu0 %v13903_v32  ;;  %12373 = vmatprep.subr.bf16.mxu1 %v13904_v33 }
  0x30   :  { %12354 = vmatpush3.bf16.msra.mxu0 %v13903_v32  ;;  %12374 = vmatpush3.bf16.msra.mxu1 %v13904_v33 }
  0x31   :  { %12355 = vmatprep.subr.bf16.mxu0 %v13905_v34  ;;  %12375 = vmatprep.subr.bf16.mxu1 %v13906_v35 }
  0x34   :  { %12356 = vmatpush3.bf16.msra.mxu0 %v13905_v34  ;;  %12376 = vmatpush3.bf16.msra.mxu1 %v13906_v35 }
  0x35   :  { %13841 = vmatprep.subr.msk.bf16.mxu0 %vm604_vm2, %v10625_v39  ;;  %13842 = vmatprep.subr.msk.bf16.mxu1 %vm604_vm2, %v10625_v39 }
  0x37   :  { %12358 = vmatmul.mubr.msk.bf16.vlgmr.msra.gmra.mxu0 %vm122_vm1, %v13908_v36  ;;  %12378 = vmatmul.mubr.msk.bf16.vlgmr.msra.gmra.mxu1 %vm122_vm1, %v13908_v36 }
  0x38   :  { %12361 = vmatprep.mubr.msk.bf16.mxu0 %vm122_vm1, %v13909_v37  ;;  %12381 = vmatprep.mubr.msk.bf16.mxu1 %vm122_vm1, %v13909_v37 }
  0x39   :  { %12386 = vmatpush3.bf16.msra.mxu0 %v606_v40  ;;  %12396 = vmatpush3.bf16.msra.mxu1 %v606_v40 }
  0x3a   :  { %13843 = vmatprep.subr.msk.bf16.mxu0 %vm604_vm2, %v315_v41  ;;  %13844 = vmatprep.subr.msk.bf16.mxu1 %vm604_vm2, %v315_v41 }
  0x3f   :  { %12362 = vmatmul.mubr.msk.bf16.gmra.mxu0 %vm122_vm1, %v13910_v38  ;;  %12382 = vmatmul.mubr.msk.bf16.gmra.mxu1 %vm122_vm1, %v13910_v38 }
  0x40   :  { %17 = vsyncpa [#allocation4], 0  ;;  %v13911_v0 = vld [vmem:[%s16778_s0 + $0x28] ss:$0 sps:$4 sm:$0x11]   ;;  %vm591_vm3 = vcmask 31744  }
  0x41   :  { %v13912_v1 = vld [vmem:[%s16778_s0 + $0x54] ss:$0 sps:$4 sm:$0x11]   ;;  %v763_v7 = vsel %vm604_vm2, %v315_v41, 0  ;;  %v1004_v12 = vand.u32 %v13911_v0, %v14259_v4  ;;  %v13913_v28 = vld [vmem:[%s16778_s0 + $0x20] sm:$0xff]   ;;  %v13914_v29 = vld [vmem:[%s16778_s0 + $0x4c] sm:$0xff]  }
  0x42   :  { %v1105_v13 = vand.u32 %v13912_v1, %v14259_v4  ;;  %v13915_v32 = vld [vmem:[%s16778_s0 + $0x18] sm:$0xff]   ;;  %v13916_v33 = vld [vmem:[%s16778_s0 + $0x44] sm:$0xff]   ;;  %v13917_v36 = vld [vmem:[%s16778_s0 + $0x10] sm:$0xff]   ;;  %vm14193_vm4 = vmmov 0  }
  0x43   :  { %v13918_v37 = vld [vmem:[%s16778_s0 + $0x3c] sm:$0xff]   ;;  %v13919_v39 = vld [vmem:[%s16778_s0 + $0x8] sm:$0xff]   ;;  %v13920_v40 = vld [vmem:[%s16778_s0 + $0x34] sm:$0xff]  }
  0x44   :  { %v13923_v38 = vld [vmem:[%s16779_s1 + $0x20] sm:$0xff]  }
  0x45   :  { %v13921_v41 = vld [vmem:[%s16778_s0] sm:$0xff]  }
  0xdf   :  { %v14382_v42 = vpop.f32.mrf.mxu0  ;;  %v14384_v43 = vpop.f32.mrf.mxu1 }
  0xe1   :  { %v175_v44 = vpop.f32.mrf.mxu0  ;;  %v276_v45 = vpop.f32.mrf.mxu1 }
  0xe3   :  { %v14386_v46 = vpop.f32.mrf.mxu0  ;;  %v14388_v47 = vpop.f32.mrf.mxu1 }
  0xe4   :  { %v308_v26 = vpack.c.bf16 %v14386_v46, %v14382_v42  ;;  %v312_v27 = vpack.c.bf16 %v14388_v47, %v14384_v43  ;;  %v13922_v42 = vld [vmem:[%s16778_s0 + $0x2c] sm:$0xff]   ;;  %v10674_v46 = vld [vmem:[%s16780_s2 + $0x4] sm:$0x3] }
  0xe5   :  { %v178_v48 = vpop.f32.mrf.mxu0  ;;  %v279_v49 = vpop.f32.mrf.mxu1  ;;  %v13924_v43 = vld [vmem:[%s16779_s1 + $0x28] sm:$0xff]   ;;  %v1195_v47 = vsel %vm604_vm2, %v10674_v46, 0 }
  0xe6   :  { %v307_v24 = vpack.c.bf16 %v178_v48, %v175_v44  ;;  %v311_v25 = vpack.c.bf16 %v279_v49, %v276_v45  ;;  %v13925_v44 = vld [vmem:[%s16779_s1 + $0x30] sm:$0xff]   ;;  %v13926_v45 = vld [vmem:[%s16779_s1 + $0x38] sm:$0xff]   ;;  %v13927_v48 = vld [vmem:[%s16778_s0 + $0x80] ss:$0 sps:$4 sm:$0x11]  }
  0xe7   :  { %v14390_v50 = vpop.f32.mrf.mxu0  ;;  %v14392_v51 = vpop.f32.mrf.mxu1  ;;  %v13928_v49 = vld [vmem:[%s16778_s0 + $0xac] ss:$0 sps:$4 sm:$0x11]  }
  0xe9   :  { %v14394_v52 = vpop.f32.mrf.mxu0  ;;  %v14396_v53 = vpop.f32.mrf.mxu1 }
  0xeb   :  { %v14398_v54 = vpop.f32.mrf.mxu0  ;;  %v14400_v55 = vpop.f32.mrf.mxu1 }
  0xec   :  { %v310_v34 = vpack.c.bf16 %v14398_v54, %v14390_v50  ;;  %v314_v35 = vpack.c.bf16 %v14400_v55, %v14392_v51  ;;  %v14500_v50 = vand.u32 %v13927_v48, %v14259_v4  ;;  %v14503_v51 = vand.u32 %v13928_v49, %v14259_v4  ;;  %v13930_v48 = vld [vmem:[%s16778_s0 + $0xa4] sm:$0xff]  }
  0xed   :  { %v194_v56 = vpop.f32.mrf.mxu0  ;;  %v295_v57 = vpop.f32.mrf.mxu1 }
  0xee   :  { %v309_v30 = vpack.c.bf16 %v194_v56, %v14394_v52  ;;  %v313_v31 = vpack.c.bf16 %v295_v57, %v14396_v53 }
  0xf7   :  { %v12359_v58 = vpop.f32.mrf.mxu0  ;;  %v12379_v59 = vpop.f32.mrf.mxu1 }
  0xf9   :  { %v449_v60 = vpop.f32.mrf.mxu0  ;;  %v550_v61 = vpop.f32.mrf.mxu1 }
  0xfb   :  { %v12360_v62 = vpop.f32.mrf.mxu0  ;;  %v12380_v63 = vpop.f32.mrf.mxu1 }
  0xfc   :  { %v582_v8 = vpack.c.bf16 %v12360_v62, %v12359_v58  ;;  %v586_v9 = vpack.c.bf16 %v12380_v63, %v12379_v59 }
  0xfd   :  { %v452_v2 = vpop.f32.mrf.mxu0  ;;  %v553_v3 = vpop.f32.mrf.mxu1 }
  0xfe   :  { %v581_v5 = vpack.c.bf16 %v452_v2, %v449_v60  ;;  %v585_v6 = vpack.c.bf16 %v553_v3, %v550_v61 }
  0xff   :  { %v12363_v10 = vpop.f32.mrf.mxu0  ;;  %v12383_v11 = vpop.f32.mrf.mxu1 }
 0x100   :  { %12387 = vmatprep.mubr.msk.bf16.mxu0 %vm591_vm3, %v581_v5  ;;  %12397 = vmatprep.mubr.msk.bf16.mxu1 %vm591_vm3, %v585_v6 }
 0x101   :  { %v465_v14 = vpop.f32.mrf.mxu0  ;;  %v566_v15 = vpop.f32.mrf.mxu1  ;;  %12388 = vmatmul.mubr.msk.bf16.vlgmr.msra.gmra.mxu0 %vm591_vm3, %v582_v8  ;;  %12398 = vmatmul.mubr.msk.bf16.vlgmr.msra.gmra.mxu1 %vm591_vm3, %v586_v9 }
 0x102   :  { %12406 = vmatpush3.bf16.msra.mxu0 %v763_v7  ;;  %12416 = vmatpush3.bf16.msra.mxu1 %v763_v7 }
 0x103   :  { %v12364_v16 = vpop.f32.mrf.mxu0  ;;  %v12384_v17 = vpop.f32.mrf.mxu1  ;;  %12425 = vmatprep.subr.bf16.mxu0 %v1004_v12  ;;  %12445 = vmatprep.subr.bf16.mxu1 %v1105_v13 }
 0x104   :  { %v584_v22 = vpack.c.bf16 %v12364_v16, %v12363_v10  ;;  %v588_v23 = vpack.c.bf16 %v12384_v17, %v12383_v11 }
 0x105   :  { %v468_v18 = vpop.f32.mrf.mxu0  ;;  %v569_v19 = vpop.f32.mrf.mxu1 }
 0x106   :  { %v583_v20 = vpack.c.bf16 %v468_v18, %v465_v14  ;;  %v587_v21 = vpack.c.bf16 %v569_v19, %v566_v15 }
 0x108   :  { %12391 = vmatprep.mubr.msk.bf16.mxu0 %vm591_vm3, %v583_v20  ;;  %12401 = vmatprep.mubr.msk.bf16.mxu1 %vm591_vm3, %v587_v21 }
 0x109   :  { %12392 = vmatmul.mubr.msk.bf16.gmra.mxu0 %vm591_vm3, %v584_v22  ;;  %12402 = vmatmul.mubr.msk.bf16.gmra.mxu1 %vm591_vm3, %v588_v23 }
 0x10a   :  { %12407 = vmatprep.mubr.msk.bf16.mxu0 %vm591_vm3, %v307_v24  ;;  %12417 = vmatprep.mubr.msk.bf16.mxu1 %vm591_vm3, %v311_v25 }
 0x111   :  { %12408 = vmatmul.mubr.msk.bf16.vlgmr.msra.gmra.mxu0 %vm591_vm3, %v308_v26  ;;  %12418 = vmatmul.mubr.msk.bf16.vlgmr.msra.gmra.mxu1 %vm591_vm3, %v312_v27 }
 0x112   :  { %12426 = vmatpush3.bf16.msra.mxu0 %v1004_v12  ;;  %12446 = vmatpush3.bf16.msra.mxu1 %v1105_v13 }
 0x113   :  { %12411 = vmatprep.mubr.msk.bf16.mxu0 %vm591_vm3, %v309_v30  ;;  %12421 = vmatprep.mubr.msk.bf16.mxu1 %vm591_vm3, %v313_v31 }
 0x114   :  { %12427 = vmatprep.subr.bf16.mxu0 %v13913_v28  ;;  %12447 = vmatprep.subr.bf16.mxu1 %v13914_v29 }
 0x116   :  { %12428 = vmatpush3.bf16.msra.mxu0 %v13913_v28  ;;  %12448 = vmatpush3.bf16.msra.mxu1 %v13914_v29 }
 0x117   :  { %12429 = vmatprep.subr.bf16.mxu0 %v13915_v32  ;;  %12449 = vmatprep.subr.bf16.mxu1 %v13916_v33 }
 0x119   :  { %12412 = vmatmul.mubr.msk.bf16.gmra.mxu0 %vm591_vm3, %v310_v34  ;;  %12422 = vmatmul.mubr.msk.bf16.gmra.mxu1 %vm591_vm3, %v314_v35 }
 0x11a   :  { %12430 = vmatpush3.bf16.msra.mxu0 %v13915_v32  ;;  %12450 = vmatpush3.bf16.msra.mxu1 %v13916_v33 }
 0x11b   :  { %12431 = vmatprep.subr.bf16.mxu0 %v13917_v36  ;;  %12451 = vmatprep.subr.bf16.mxu1 %v13918_v37 }
 0x11c   :  { %12437 = vmatprep.mubr.msk.bf16.mxu0 %vm122_vm1, %v13923_v38  ;;  %12457 = vmatprep.mubr.msk.bf16.mxu1 %vm122_vm1, %v13923_v38 }
 0x11e   :  { %12432 = vmatpush3.bf16.msra.mxu0 %v13917_v36  ;;  %12452 = vmatpush3.bf16.msra.mxu1 %v13918_v37 }
 0x11f   :  { %12433 = vmatprep.subr.bf16.mxu0 %v13919_v39  ;;  %12453 = vmatprep.subr.bf16.mxu1 %v13920_v40 }
 0x122   :  { %12434 = vmatpush3.bf16.msra.mxu0 %v13919_v39  ;;  %12454 = vmatpush3.bf16.msra.mxu1 %v13920_v40 }
 0x123   :  { %12435 = vmatprep.subr.bf16.mxu0 %v13921_v41  ;;  %12455 = vmatprep.subr.bf16.mxu1 %v13922_v42 }
 0x126   :  { %12436 = vmatpush3.bf16.msra.mxu0 %v13921_v41  ;;  %12456 = vmatpush3.bf16.msra.mxu1 %v13922_v42 }
 0x127   :  { %13845 = vmatprep.subr.msk.bf16.mxu0 %vm604_vm2, %v10674_v46  ;;  %13846 = vmatprep.subr.msk.bf16.mxu1 %vm604_vm2, %v10674_v46 }
 0x129   :  { %12438 = vmatmul.mubr.msk.bf16.vlgmr.msra.gmra.mxu0 %vm122_vm1, %v13924_v43  ;;  %12458 = vmatmul.mubr.msk.bf16.vlgmr.msra.gmra.mxu1 %vm122_vm1, %v13924_v43 }
 0x12a   :  { %12441 = vmatprep.mubr.msk.bf16.mxu0 %vm122_vm1, %v13925_v44  ;;  %12461 = vmatprep.mubr.msk.bf16.mxu1 %vm122_vm1, %v13925_v44 }
 0x12b   :  { %12466 = vmatpush3.bf16.msra.mxu0 %v1195_v47  ;;  %12476 = vmatpush3.bf16.msra.mxu1 %v1195_v47  ;;  %v13929_v47 = vld [vmem:[%s16778_s0 + $0x78] sm:$0xff]  }
 0x12c   :  { %12485 = vmatprep.subr.bf16.mxu0 %v14500_v50  ;;  %12505 = vmatprep.subr.bf16.mxu1 %v14503_v51 }
 0x131   :  { %12442 = vmatmul.mubr.msk.bf16.gmra.mxu0 %vm122_vm1, %v13926_v45  ;;  %12462 = vmatmul.mubr.msk.bf16.gmra.mxu1 %vm122_vm1, %v13926_v45 }
 0x1c1   :  { %v12389_v52 = vpop.f32.mrf.mxu0  ;;  %v12399_v53 = vpop.f32.mrf.mxu1 }
 0x1c3   :  { %v642_v54 = vpop.f32.mrf.mxu0  ;;  %v719_v55 = vpop.f32.mrf.mxu1 }
 0x1c5   :  { %v12390_v56 = vpop.f32.mrf.mxu0  ;;  %v12400_v57 = vpop.f32.mrf.mxu1 }
 0x1c7   :  { %v14507_v58 = vpop.f32.mrf.mxu0  ;;  %v14509_v59 = vpop.f32.mrf.mxu1 }
 0x1c9   :  { %v12393_v60 = vpop.f32.mrf.mxu0  ;;  %v12403_v61 = vpop.f32.mrf.mxu1 }
 0x1cb   :  { %v658_v62 = vpop.f32.mrf.mxu0  ;;  %v735_v63 = vpop.f32.mrf.mxu1 }
 0x1cd   :  { %v12394_v0 = vpop.f32.mrf.mxu0  ;;  %v12404_v1 = vpop.f32.mrf.mxu1 }
 0x1cf   :  { %v14511_v2 = vpop.f32.mrf.mxu0  ;;  %v14513_v3 = vpop.f32.mrf.mxu1 }
 0x1d1   :  { %v12409_v5 = vpop.f32.mrf.mxu0  ;;  %v12419_v6 = vpop.f32.mrf.mxu1 }
 0x1d2   :  { %v14515_v7 = vadd.f32 %v12409_v5, %v12389_v52  ;;  %v14517_v8 = vadd.f32 %v12419_v6, %v12399_v53  ;;  %v13935_v5 = vld [vmem:[%s16778_s0 + $0x60] sm:$0xff]   ;;  %v13936_v6 = vld [vmem:[%s16778_s0 + $0x8c] sm:$0xff]  }
 0x1d3   :  { %v799_v9 = vpop.f32.mrf.mxu0  ;;  %v876_v10 = vpop.f32.mrf.mxu1 }
 0x1d4   :  { %v14519_v11 = vadd.f32 %v799_v9, %v642_v54  ;;  %v14521_v12 = vadd.f32 %v876_v10, %v719_v55  ;;  %v13931_v55 = vld [vmem:[%s16778_s0 + $0x70] sm:$0xff]   ;;  %v13937_v9 = vld [vmem:[%s16778_s0 + $0x58] sm:$0xff]   ;;  %v13938_v10 = vld [vmem:[%s16778_s0 + $0x84] sm:$0xff]  }
 0x1d5   :  { %v12410_v13 = vpop.f32.mrf.mxu0  ;;  %v12420_v14 = vpop.f32.mrf.mxu1 }
 0x1d6   :  { %v14523_v15 = vadd.f32 %v12410_v13, %v12390_v56  ;;  %v14525_v16 = vadd.f32 %v12420_v14, %v12400_v57  ;;  %v13932_v56 = vld [vmem:[%s16778_s0 + $0x9c] sm:$0xff]   ;;  %v13940_v13 = vld [vmem:[%s16779_s1 + $0x28] sm:$0xff]   ;;  %v13941_v14 = vld [vmem:[%s16779_s1 + $0x30] sm:$0xff]  }
 0x1d7   :  { %v14527_v17 = vpop.f32.mrf.mxu0  ;;  %v14529_v18 = vpop.f32.mrf.mxu1 }
 0x1d9   :  { %v12413_v19 = vpop.f32.mrf.mxu0  ;;  %v12423_v20 = vpop.f32.mrf.mxu1 }
 0x1da   :  { %v14531_v21 = vadd.f32 %v12413_v19, %v12393_v60  ;;  %v14533_v22 = vadd.f32 %v12423_v20, %v12403_v61  ;;  %v13942_v19 = vld [vmem:[%s16779_s1 + $0x38] sm:$0xff]   ;;  %v10737_v20 = vld [vmem:[%s16780_s2 + $0x6] sm:$0x3] }
 0x1db   :  { %v815_v23 = vpop.f32.mrf.mxu0  ;;  %v892_v24 = vpop.f32.mrf.mxu1 }
 0x1dc   :  { %v14535_v25 = vadd.f32 %v815_v23, %v658_v62  ;;  %v14537_v26 = vadd.f32 %v892_v24, %v735_v63  ;;  %v1642_v23 = vsel %vm604_vm2, %v10737_v20, 0  ;;  %v13943_v24 = vld [vmem:[%s16778_s0 + $0xd8] ss:$0 sps:$4 sm:$0x11]  }
 0x1dd   :  { %v12414_v27 = vpop.f32.mrf.mxu0  ;;  %v12424_v28 = vpop.f32.mrf.mxu1 }
 0x1de   :  { %v14539_v29 = vadd.f32 %v12414_v27, %v12394_v0  ;;  %v14541_v30 = vadd.f32 %v12424_v28, %v12404_v1  ;;  %v13934_v0 = vld [vmem:[%s16778_s0 + $0x94] sm:$0xff]   ;;  %v13939_v1 = vld [vmem:[%s16779_s1 + $0x20] sm:$0xff]   ;;  %v1899_v28 = vand.u32 %v13943_v24, %v14259_v4 }
 0x1df   :  { %v14543_v31 = vpop.f32.mrf.mxu0  ;;  %v14545_v32 = vpop.f32.mrf.mxu1  ;;  %v13944_v27 = vld [vmem:[%s16778_s0 + $0x104] ss:$0 sps:$4 sm:$0x11]  }
 0x1e9   :  { %v12439_v33 = vpop.f32.mrf.mxu0  ;;  %v12459_v34 = vpop.f32.mrf.mxu1 }
 0x1eb   :  { %v1040_v35 = vpop.f32.mrf.mxu0  ;;  %v1141_v36 = vpop.f32.mrf.mxu1 }
 0x1ed   :  { %v12440_v37 = vpop.f32.mrf.mxu0  ;;  %v12460_v38 = vpop.f32.mrf.mxu1 }
 0x1ee   :  { %v1173_v43 = vpack.c.bf16 %v12440_v37, %v12439_v33  ;;  %v1177_v44 = vpack.c.bf16 %v12460_v38, %v12459_v34  ;;  %v2000_v33 = vand.u32 %v13944_v27, %v14259_v4 }
 0x1ef   :  { %v1043_v39 = vpop.f32.mrf.mxu0  ;;  %v1144_v40 = vpop.f32.mrf.mxu1 }
 0x1f0   :  { %v1172_v41 = vpack.c.bf16 %v1043_v39, %v1040_v35  ;;  %v1176_v42 = vpack.c.bf16 %v1144_v40, %v1141_v36 }
 0x1f1   :  { %v12443_v45 = vpop.f32.mrf.mxu0  ;;  %v12463_v46 = vpop.f32.mrf.mxu1 }
 0x1f2   :  { %12467 = vmatprep.mubr.msk.bf16.mxu0 %vm591_vm3, %v1172_v41  ;;  %12477 = vmatprep.mubr.msk.bf16.mxu1 %vm591_vm3, %v1176_v42 }
 0x1f3   :  { %v1056_v49 = vpop.f32.mrf.mxu0  ;;  %v1157_v52 = vpop.f32.mrf.mxu1  ;;  %12468 = vmatmul.mubr.msk.bf16.vlgmr.msra.gmra.mxu0 %vm591_vm3, %v1173_v43  ;;  %12478 = vmatmul.mubr.msk.bf16.vlgmr.msra.gmra.mxu1 %vm591_vm3, %v1177_v44 }
 0x1f4   :  { %12486 = vmatpush3.bf16.msra.mxu0 %v14500_v50  ;;  %12506 = vmatpush3.bf16.msra.mxu1 %v14503_v51  ;;  %v13933_v51 = vld [vmem:[%s16778_s0 + $0x68] sm:$0xff]  }
 0x1f5   :  { %v12444_v53 = vpop.f32.mrf.mxu0  ;;  %v12464_v54 = vpop.f32.mrf.mxu1  ;;  %12487 = vmatprep.subr.bf16.mxu0 %v13929_v47  ;;  %12507 = vmatprep.subr.bf16.mxu1 %v13930_v48 }
 0x1f6   :  { %v1175_v57 = vpack.c.bf16 %v12444_v53, %v12443_v45  ;;  %v1179_v60 = vpack.c.bf16 %v12464_v54, %v12463_v46 }
 0x1f7   :  { %v1059_v61 = vpop.f32.mrf.mxu0  ;;  %v1160_v62 = vpop.f32.mrf.mxu1 }
 0x1f8   :  { %v1174_v63 = vpack.c.bf16 %v1059_v61, %v1056_v49  ;;  %v1178_v50 = vpack.c.bf16 %v1160_v62, %v1157_v52  ;;  %12488 = vmatpush3.bf16.msra.mxu0 %v13929_v47  ;;  %12508 = vmatpush3.bf16.msra.mxu1 %v13930_v48 }
 0x1f9   :  { %12489 = vmatprep.subr.bf16.mxu0 %v13931_v55  ;;  %12509 = vmatprep.subr.bf16.mxu1 %v13932_v56 }
 0x1fa   :  { %12471 = vmatprep.mubr.msk.bf16.mxu0 %vm591_vm3, %v1174_v63  ;;  %12481 = vmatprep.mubr.msk.bf16.mxu1 %vm591_vm3, %v1178_v50 }
 0x1fb   :  { %12472 = vmatmul.mubr.msk.bf16.gmra.mxu0 %vm591_vm3, %v1175_v57  ;;  %12482 = vmatmul.mubr.msk.bf16.gmra.mxu1 %vm591_vm3, %v1179_v60 }
 0x1fc   :  { %12490 = vmatpush3.bf16.msra.mxu0 %v13931_v55  ;;  %12510 = vmatpush3.bf16.msra.mxu1 %v13932_v56 }
 0x1fd   :  { %12491 = vmatprep.subr.bf16.mxu0 %v13933_v51  ;;  %12511 = vmatprep.subr.bf16.mxu1 %v13934_v0 }
 0x1fe   :  { %12497 = vmatprep.mubr.msk.bf16.mxu0 %vm122_vm1, %v13939_v1  ;;  %12517 = vmatprep.mubr.msk.bf16.mxu1 %vm122_vm1, %v13939_v1 }
 0x200   :  { %12492 = vmatpush3.bf16.msra.mxu0 %v13933_v51  ;;  %12512 = vmatpush3.bf16.msra.mxu1 %v13934_v0 }
 0x201   :  { %12493 = vmatprep.subr.bf16.mxu0 %v13935_v5  ;;  %12513 = vmatprep.subr.bf16.mxu1 %v13936_v6 }
 0x204   :  { %12494 = vmatpush3.bf16.msra.mxu0 %v13935_v5  ;;  %12514 = vmatpush3.bf16.msra.mxu1 %v13936_v6  ;;  %v13946_v6 = vld [vmem:[%s16778_s0 + $0xfc] sm:$0xff]  }
 0x205   :  { %12495 = vmatprep.subr.bf16.mxu0 %v13937_v9  ;;  %12515 = vmatprep.subr.bf16.mxu1 %v13938_v10 }
 0x208   :  { %12496 = vmatpush3.bf16.msra.mxu0 %v13937_v9  ;;  %12516 = vmatpush3.bf16.msra.mxu1 %v13938_v10 }
 0x209   :  { %13847 = vmatprep.subr.msk.bf16.mxu0 %vm604_vm2, %v10737_v20  ;;  %13848 = vmatprep.subr.msk.bf16.mxu1 %vm604_vm2, %v10737_v20  ;;  %v13948_v20 = vld [vmem:[%s16778_s0 + $0xf4] sm:$0xff]  }
 0x20b   :  { %12498 = vmatmul.mubr.msk.bf16.vlgmr.msra.gmra.mxu0 %vm122_vm1, %v13940_v13  ;;  %12518 = vmatmul.mubr.msk.bf16.vlgmr.msra.gmra.mxu1 %vm122_vm1, %v13940_v13 }
 0x20c   :  { %12501 = vmatprep.mubr.msk.bf16.mxu0 %vm122_vm1, %v13941_v14  ;;  %12521 = vmatprep.mubr.msk.bf16.mxu1 %vm122_vm1, %v13941_v14 }
 0x20d   :  { %12526 = vmatpush3.bf16.msra.mxu0 %v1642_v23  ;;  %12536 = vmatpush3.bf16.msra.mxu1 %v1642_v23 }
 0x20e   :  { %12545 = vmatprep.subr.bf16.mxu0 %v1899_v28  ;;  %12565 = vmatprep.subr.bf16.mxu1 %v2000_v33 }
 0x213   :  { %12502 = vmatmul.mubr.msk.bf16.gmra.mxu0 %vm122_vm1, %v13942_v19  ;;  %12522 = vmatmul.mubr.msk.bf16.gmra.mxu1 %vm122_vm1, %v13942_v19  ;;  %v13947_v19 = vld [vmem:[%s16778_s0 + $0xc8] sm:$0xff]  }
 0x2b3   :  { %v12469_v34 = vpop.f32.mrf.mxu0  ;;  %v12479_v35 = vpop.f32.mrf.mxu1 }
 0x2b4   :  { %v14622_v36 = vadd.f32 %v12469_v34, %v14515_v7  ;;  %v14625_v37 = vadd.f32 %v12479_v35, %v14517_v8 }
 0x2b5   :  { %v1231_v38 = vpop.f32.mrf.mxu0  ;;  %v1308_v39 = vpop.f32.mrf.mxu1 }
 0x2b6   :  { %v14628_v40 = vadd.f32 %v1231_v38, %v14519_v11  ;;  %v14631_v41 = vadd.f32 %v1308_v39, %v14521_v12  ;;  %v13955_v39 = vld [vmem:[%s16779_s1] sm:$0xff]  }
 0x2b7   :  { %v12470_v42 = vpop.f32.mrf.mxu0  ;;  %v12480_v43 = vpop.f32.mrf.mxu1 }
 0x2b8   :  { %v14634_v44 = vadd.f32 %v12470_v42, %v14523_v15  ;;  %v14637_v45 = vadd.f32 %v12480_v43, %v14525_v16  ;;  %v13951_v42 = vld [vmem:[%s16778_s0 + $0xb8] sm:$0xff]   ;;  %v13952_v43 = vld [vmem:[%s16778_s0 + $0xe4] sm:$0xff]  }
 0x2b9   :  { %v14639_v7 = vpop.f32.mrf.mxu0  ;;  %v14641_v8 = vpop.f32.mrf.mxu1 }
 0x2bb   :  { %v12473_v46 = vpop.f32.mrf.mxu0  ;;  %v12483_v47 = vpop.f32.mrf.mxu1 }
 0x2bc   :  { %v14644_v11 = vadd.f32 %v12473_v46, %v14531_v21  ;;  %v14647_v12 = vadd.f32 %v12483_v47, %v14533_v22  ;;  %v13953_v46 = vld [vmem:[%s16778_s0 + $0xb0] sm:$0xff]   ;;  %v13954_v47 = vld [vmem:[%s16778_s0 + $0xdc] sm:$0xff]  }
 0x2bd   :  { %v1247_v48 = vpop.f32.mrf.mxu0  ;;  %v1324_v49 = vpop.f32.mrf.mxu1 }
 0x2be   :  { %v14650_v15 = vadd.f32 %v1247_v48, %v14535_v25  ;;  %v14653_v16 = vadd.f32 %v1324_v49, %v14537_v26  ;;  %v13956_v48 = vld [vmem:[%s16779_s1 + $0x8] sm:$0xff]   ;;  %v13957_v49 = vld [vmem:[%s16779_s1 + $0x10] sm:$0xff]  }
 0x2bf   :  { %v12474_v52 = vpop.f32.mrf.mxu0  ;;  %v12484_v53 = vpop.f32.mrf.mxu1 }
 0x2c0   :  { %v14656_v54 = vadd.f32 %v12474_v52, %v14539_v29  ;;  %v14659_v55 = vadd.f32 %v12484_v53, %v14541_v30  ;;  %v13945_v30 = vld [vmem:[%s16778_s0 + $0xd0] sm:$0xff]   ;;  %v13958_v52 = vld [vmem:[%s16779_s1 + $0x18] sm:$0xff]   ;;  %v10792_v53 = vld [vmem:[%s16780_s2 + $0x8] sm:$0x3] }
 0x2c1   :  { %v14661_v21 = vpop.f32.mrf.mxu0  ;;  %v14663_v22 = vpop.f32.mrf.mxu1 }
 0x2cb   :  { %v12499_v56 = vpop.f32.mrf.mxu0  ;;  %v12519_v57 = vpop.f32.mrf.mxu1 }
 0x2cd   :  { %v1487_v60 = vpop.f32.mrf.mxu0  ;;  %v1588_v25 = vpop.f32.mrf.mxu1 }
 0x2cf   :  { %v12500_v61 = vpop.f32.mrf.mxu0  ;;  %v12520_v62 = vpop.f32.mrf.mxu1 }
 0x2d0   :  { %v1620_v0 = vpack.c.bf16 %v12500_v61, %v12499_v56  ;;  %v1624_v29 = vpack.c.bf16 %v12520_v62, %v12519_v57  ;;  %v2090_v56 = vsel %vm604_vm2, %v10792_v53, 0  ;;  %v13959_v57 = vld [vmem:[%s16778_s0 + $0x130] ss:$0 sps:$4 sm:$0x11]  }
 0x2d1   :  { %v1490_v26 = vpop.f32.mrf.mxu0  ;;  %v1591_v63 = vpop.f32.mrf.mxu1 }
 0x2d2   :  { %v1619_v50 = vpack.c.bf16 %v1490_v26, %v1487_v60  ;;  %v1623_v51 = vpack.c.bf16 %v1591_v63, %v1588_v25  ;;  %v13960_v60 = vld [vmem:[%s16778_s0 + $0x15c] ss:$0 sps:$4 sm:$0x11]   ;;  %v2347_v25 = vand.u32 %v13959_v57, %v14259_v4 }
 0x2d3   :  { %v12503_v1 = vpop.f32.mrf.mxu0  ;;  %v12523_v5 = vpop.f32.mrf.mxu1  ;;  %v2448_v61 = vand.u32 %v13960_v60, %v14259_v4  ;;  %v13963_v60 = vld [vmem:[%s16778_s0 + $0x120] sm:$0xff]  }
 0x2d4   :  { %12527 = vmatprep.mubr.msk.bf16.mxu0 %vm591_vm3, %v1619_v50  ;;  %12537 = vmatprep.mubr.msk.bf16.mxu1 %vm591_vm3, %v1623_v51 }
 0x2d5   :  { %v1503_v9 = vpop.f32.mrf.mxu0  ;;  %v1604_v10 = vpop.f32.mrf.mxu1  ;;  %12528 = vmatmul.mubr.msk.bf16.vlgmr.msra.gmra.mxu0 %vm591_vm3, %v1620_v0  ;;  %12538 = vmatmul.mubr.msk.bf16.vlgmr.msra.gmra.mxu1 %vm591_vm3, %v1624_v29 }
 0x2d6   :  { %12546 = vmatpush3.bf16.msra.mxu0 %v1899_v28  ;;  %12566 = vmatpush3.bf16.msra.mxu1 %v2000_v33  ;;  %v13949_v28 = vld [vmem:[%s16778_s0 + $0xc0] sm:$0xff]   ;;  %v13950_v33 = vld [vmem:[%s16778_s0 + $0xec] sm:$0xff]  }
 0x2d7   :  { %v12504_v13 = vpop.f32.mrf.mxu0  ;;  %v12524_v14 = vpop.f32.mrf.mxu1  ;;  %12547 = vmatprep.subr.bf16.mxu0 %v13945_v30  ;;  %12567 = vmatprep.subr.bf16.mxu1 %v13946_v6 }
 0x2d8   :  { %v1622_v23 = vpack.c.bf16 %v12504_v13, %v12503_v1  ;;  %v1626_v24 = vpack.c.bf16 %v12524_v14, %v12523_v5 }
 0x2d9   :  { %v1506_v27 = vpop.f32.mrf.mxu0  ;;  %v1607_v34 = vpop.f32.mrf.mxu1 }
 0x2da   :  { %v1621_v35 = vpack.c.bf16 %v1506_v27, %v1503_v9  ;;  %v1625_v38 = vpack.c.bf16 %v1607_v34, %v1604_v10  ;;  %12548 = vmatpush3.bf16.msra.mxu0 %v13945_v30  ;;  %12568 = vmatpush3.bf16.msra.mxu1 %v13946_v6 }
 0x2db   :  { %12549 = vmatprep.subr.bf16.mxu0 %v13947_v19  ;;  %12569 = vmatprep.subr.bf16.mxu1 %v13948_v20 }
 0x2dc   :  { %12531 = vmatprep.mubr.msk.bf16.mxu0 %vm591_vm3, %v1621_v35  ;;  %12541 = vmatprep.mubr.msk.bf16.mxu1 %vm591_vm3, %v1625_v38 }
 0x2dd   :  { %12532 = vmatmul.mubr.msk.bf16.gmra.mxu0 %vm591_vm3, %v1622_v23  ;;  %12542 = vmatmul.mubr.msk.bf16.gmra.mxu1 %vm591_vm3, %v1626_v24 }
 0x2de   :  { %12550 = vmatpush3.bf16.msra.mxu0 %v13947_v19  ;;  %12570 = vmatpush3.bf16.msra.mxu1 %v13948_v20 }
 0x2df   :  { %12551 = vmatprep.subr.bf16.mxu0 %v13949_v28  ;;  %12571 = vmatprep.subr.bf16.mxu1 %v13950_v33 }
 0x2e0   :  { %12557 = vmatprep.mubr.msk.bf16.mxu0 %vm122_vm1, %v13955_v39  ;;  %12577 = vmatprep.mubr.msk.bf16.mxu1 %vm122_vm1, %v13955_v39 }
 0x2e2   :  { %12552 = vmatpush3.bf16.msra.mxu0 %v13949_v28  ;;  %12572 = vmatpush3.bf16.msra.mxu1 %v13950_v33 }
 0x2e3   :  { %12553 = vmatprep.subr.bf16.mxu0 %v13951_v42  ;;  %12573 = vmatprep.subr.bf16.mxu1 %v13952_v43 }
 0x2e6   :  { %12554 = vmatpush3.bf16.msra.mxu0 %v13951_v42  ;;  %12574 = vmatpush3.bf16.msra.mxu1 %v13952_v43 }
 0x2e7   :  { %12555 = vmatprep.subr.bf16.mxu0 %v13953_v46  ;;  %12575 = vmatprep.subr.bf16.mxu1 %v13954_v47 }
 0x2ea   :  { %12556 = vmatpush3.bf16.msra.mxu0 %v13953_v46  ;;  %12576 = vmatpush3.bf16.msra.mxu1 %v13954_v47 }
 0x2eb   :  { %13849 = vmatprep.subr.msk.bf16.mxu0 %vm604_vm2, %v10792_v53  ;;  %13850 = vmatprep.subr.msk.bf16.mxu1 %vm604_vm2, %v10792_v53 }
 0x2ed   :  { %12558 = vmatmul.mubr.msk.bf16.vlgmr.msra.gmra.mxu0 %vm122_vm1, %v13956_v48  ;;  %12578 = vmatmul.mubr.msk.bf16.vlgmr.msra.gmra.mxu1 %vm122_vm1, %v13956_v48 }
 0x2ee   :  { %12561 = vmatprep.mubr.msk.bf16.mxu0 %vm122_vm1, %v13957_v49  ;;  %12581 = vmatprep.mubr.msk.bf16.mxu1 %vm122_vm1, %v13957_v49  ;;  %v13962_v49 = vld [vmem:[%s16778_s0 + $0x154] sm:$0xff]  }
 0x2ef   :  { %12586 = vmatpush3.bf16.msra.mxu0 %v2090_v56  ;;  %12596 = vmatpush3.bf16.msra.mxu1 %v2090_v56 }
 0x2f0   :  { %12605 = vmatprep.subr.bf16.mxu0 %v2347_v25  ;;  %12625 = vmatprep.subr.bf16.mxu1 %v2448_v61 }
 0x2f5   :  { %12562 = vmatmul.mubr.msk.bf16.gmra.mxu0 %vm122_vm1, %v13958_v52  ;;  %12582 = vmatmul.mubr.msk.bf16.gmra.mxu1 %vm122_vm1, %v13958_v52 }
 0x395   :  { %v12529_v62 = vpop.f32.mrf.mxu0  ;;  %v12539_v26 = vpop.f32.mrf.mxu1 }
 0x396   :  { %v14738_v63 = vadd.f32 %v12529_v62, %v14622_v36  ;;  %v14741_v50 = vadd.f32 %v12539_v26, %v14625_v37  ;;  %v13964_v62 = vld [vmem:[%s16778_s0 + $0x14c] sm:$0xff]  }
 0x397   :  { %v1678_v51 = vpop.f32.mrf.mxu0  ;;  %v1755_v0 = vpop.f32.mrf.mxu1 }
 0x398   :  { %v14744_v29 = vadd.f32 %v1678_v51, %v14628_v40  ;;  %v14747_v1 = vadd.f32 %v1755_v0, %v14631_v41 }
 0x399   :  { %v12530_v5 = vpop.f32.mrf.mxu0  ;;  %v12540_v30 = vpop.f32.mrf.mxu1 }
 0x39a   :  { %v14750_v6 = vadd.f32 %v12530_v5, %v14634_v44  ;;  %v14753_v9 = vadd.f32 %v12540_v30, %v14637_v45 }
 0x39b   :  { %v14755_v36 = vpop.f32.mrf.mxu0  ;;  %v14757_v37 = vpop.f32.mrf.mxu1 }
 0x39d   :  { %v12533_v10 = vpop.f32.mrf.mxu0  ;;  %v12543_v13 = vpop.f32.mrf.mxu1 }
 0x39e   :  { %v14760_v40 = vadd.f32 %v12533_v10, %v14644_v11  ;;  %v14763_v41 = vadd.f32 %v12543_v13, %v14647_v12  ;;  %v13971_v13 = vld [vmem:[%s16779_s1] sm:$0xff]  }
 0x39f   :  { %v1694_v14 = vpop.f32.mrf.mxu0  ;;  %v1771_v19 = vpop.f32.mrf.mxu1 }
 0x3a0   :  { %v14766_v44 = vadd.f32 %v1694_v14, %v14650_v15  ;;  %v14769_v45 = vadd.f32 %v1771_v19, %v14653_v16  ;;  %v13967_v14 = vld [vmem:[%s16778_s0 + $0x110] sm:$0xff]   ;;  %v13968_v19 = vld [vmem:[%s16778_s0 + $0x13c] sm:$0xff]  }
 0x3a1   :  { %v12534_v20 = vpop.f32.mrf.mxu0  ;;  %v12544_v23 = vpop.f32.mrf.mxu1 }
 0x3a2   :  { %v14772_v24 = vadd.f32 %v12534_v20, %v14656_v54  ;;  %v14775_v27 = vadd.f32 %v12544_v23, %v14659_v55  ;;  %v13961_v55 = vld [vmem:[%s16778_s0 + $0x128] sm:$0xff]   ;;  %v13970_v23 = vld [vmem:[%s16778_s0 + $0x134] sm:$0xff]  }
 0x3a3   :  { %v14777_v11 = vpop.f32.mrf.mxu0  ;;  %v14779_v12 = vpop.f32.mrf.mxu1  ;;  %v13969_v20 = vld [vmem:[%s16778_s0 + $0x108] sm:$0xff]  }
 0x3ad   :  { %v12559_v34 = vpop.f32.mrf.mxu0  ;;  %v12579_v35 = vpop.f32.mrf.mxu1 }
 0x3af   :  { %v1935_v38 = vpop.f32.mrf.mxu0  ;;  %v2036_v15 = vpop.f32.mrf.mxu1 }
 0x3b1   :  { %v12560_v28 = vpop.f32.mrf.mxu0  ;;  %v12580_v33 = vpop.f32.mrf.mxu1 }
 0x3b2   :  { %v2068_v46 = vpack.c.bf16 %v12560_v28, %v12559_v34  ;;  %v2072_v54 = vpack.c.bf16 %v12580_v33, %v12579_v35  ;;  %v13972_v34 = vld [vmem:[%s16779_s1 + $0x8] sm:$0xff]   ;;  %v13973_v35 = vld [vmem:[%s16779_s1 + $0x10] sm:$0xff]   ;;  %v13975_v33 = vld [vmem:[%s16778_s0 + $0xd8] ss:$0 sps:$4 sm:$0x11]  }
 0x3b3   :  { %v1938_v16 = vpop.f32.mrf.mxu0  ;;  %v2039_v39 = vpop.f32.mrf.mxu1 }
 0x3b4   :  { %v2067_v42 = vpack.c.bf16 %v1938_v16, %v1935_v38  ;;  %v2071_v43 = vpack.c.bf16 %v2039_v39, %v2036_v15  ;;  %v13974_v38 = vld [vmem:[%s16779_s1 + $0x18] sm:$0xff]   ;;  %v10847_v15 = vld [vmem:[%s16780_s2 + $0xa] sm:$0x3]  ;;  %v13976_v16 = vld [vmem:[%s16778_s0 + $0x104] ss:$0 sps:$4 sm:$0x11]   ;;  %v2794_v39 = vand.u32 %v13975_v33, %v14259_v4 }
 0x3b5   :  { %v12563_v47 = vpop.f32.mrf.mxu0  ;;  %v12583_v48 = vpop.f32.mrf.mxu1  ;;  %v2538_v28 = vsel %vm604_vm2, %v10847_v15, 0  ;;  %v13978_v33 = vld [vmem:[%s16778_s0 + $0xfc] sm:$0xff]  }
 0x3b6   :  { %12587 = vmatprep.mubr.msk.bf16.mxu0 %vm591_vm3, %v2067_v42  ;;  %12597 = vmatprep.mubr.msk.bf16.mxu1 %vm591_vm3, %v2071_v43  ;;  %v2895_v42 = vand.u32 %v13976_v16, %v14259_v4 }
 0x3b7   :  { %v1951_v52 = vpop.f32.mrf.mxu0  ;;  %v2052_v53 = vpop.f32.mrf.mxu1  ;;  %12588 = vmatmul.mubr.msk.bf16.vlgmr.msra.gmra.mxu0 %vm591_vm3, %v2068_v46  ;;  %12598 = vmatmul.mubr.msk.bf16.vlgmr.msra.gmra.mxu1 %vm591_vm3, %v2072_v54 }
 0x3b8   :  { %12606 = vmatpush3.bf16.msra.mxu0 %v2347_v25  ;;  %12626 = vmatpush3.bf16.msra.mxu1 %v2448_v61  ;;  %v13965_v25 = vld [vmem:[%s16778_s0 + $0x118] sm:$0xff]   ;;  %v13966_v61 = vld [vmem:[%s16778_s0 + $0x144] sm:$0xff]  }
 0x3b9   :  { %v12564_v56 = vpop.f32.mrf.mxu0  ;;  %v12584_v57 = vpop.f32.mrf.mxu1  ;;  %12607 = vmatprep.subr.bf16.mxu0 %v13961_v55  ;;  %12627 = vmatprep.subr.bf16.mxu1 %v13962_v49 }
 0x3ba   :  { %v2070_v26 = vpack.c.bf16 %v12564_v56, %v12563_v47  ;;  %v2074_v51 = vpack.c.bf16 %v12584_v57, %v12583_v48 }
 0x3bb   :  { %v1954_v0 = vpop.f32.mrf.mxu0  ;;  %v2055_v5 = vpop.f32.mrf.mxu1 }
 0x3bc   :  { %v2069_v30 = vpack.c.bf16 %v1954_v0, %v1951_v52  ;;  %v2073_v10 = vpack.c.bf16 %v2055_v5, %v2052_v53  ;;  %12608 = vmatpush3.bf16.msra.mxu0 %v13961_v55  ;;  %12628 = vmatpush3.bf16.msra.mxu1 %v13962_v49 }
 0x3bd   :  { %12609 = vmatprep.subr.bf16.mxu0 %v13963_v60  ;;  %12629 = vmatprep.subr.bf16.mxu1 %v13964_v62 }
 0x3be   :  { %12591 = vmatprep.mubr.msk.bf16.mxu0 %vm591_vm3, %v2069_v30  ;;  %12601 = vmatprep.mubr.msk.bf16.mxu1 %vm591_vm3, %v2073_v10 }
 0x3bf   :  { %12592 = vmatmul.mubr.msk.bf16.gmra.mxu0 %vm591_vm3, %v2070_v26  ;;  %12602 = vmatmul.mubr.msk.bf16.gmra.mxu1 %vm591_vm3, %v2074_v51 }
 0x3c0   :  { %12610 = vmatpush3.bf16.msra.mxu0 %v13963_v60  ;;  %12630 = vmatpush3.bf16.msra.mxu1 %v13964_v62 }
 0x3c1   :  { %12611 = vmatprep.subr.bf16.mxu0 %v13965_v25  ;;  %12631 = vmatprep.subr.bf16.mxu1 %v13966_v61 }
 0x3c2   :  { %12617 = vmatprep.mubr.msk.bf16.mxu0 %vm122_vm1, %v13971_v13  ;;  %12637 = vmatprep.mubr.msk.bf16.mxu1 %vm122_vm1, %v13971_v13 }
 0x3c4   :  { %12612 = vmatpush3.bf16.msra.mxu0 %v13965_v25  ;;  %12632 = vmatpush3.bf16.msra.mxu1 %v13966_v61 }
 0x3c5   :  { %12613 = vmatprep.subr.bf16.mxu0 %v13967_v14  ;;  %12633 = vmatprep.subr.bf16.mxu1 %v13968_v19 }
 0x3c8   :  { %12614 = vmatpush3.bf16.msra.mxu0 %v13967_v14  ;;  %12634 = vmatpush3.bf16.msra.mxu1 %v13968_v19 }
 0x3c9   :  { %12615 = vmatprep.subr.bf16.mxu0 %v13969_v20  ;;  %12635 = vmatprep.subr.bf16.mxu1 %v13970_v23 }
 0x3cc   :  { %12616 = vmatpush3.bf16.msra.mxu0 %v13969_v20  ;;  %12636 = vmatpush3.bf16.msra.mxu1 %v13970_v23 }
 0x3cd   :  { %13851 = vmatprep.subr.msk.bf16.mxu0 %vm604_vm2, %v10847_v15  ;;  %13852 = vmatprep.subr.msk.bf16.mxu1 %vm604_vm2, %v10847_v15 }
 0x3cf   :  { %12618 = vmatmul.mubr.msk.bf16.vlgmr.msra.gmra.mxu0 %vm122_vm1, %v13972_v34  ;;  %12638 = vmatmul.mubr.msk.bf16.vlgmr.msra.gmra.mxu1 %vm122_vm1, %v13972_v34 }
 0x3d0   :  { %12621 = vmatprep.mubr.msk.bf16.mxu0 %vm122_vm1, %v13973_v35  ;;  %12641 = vmatprep.mubr.msk.bf16.mxu1 %vm122_vm1, %v13973_v35 }
 0x3d1   :  { %12646 = vmatpush3.bf16.msra.mxu0 %v2538_v28  ;;  %12656 = vmatpush3.bf16.msra.mxu1 %v2538_v28 }
 0x3d2   :  { %12665 = vmatprep.subr.bf16.mxu0 %v2794_v39  ;;  %12685 = vmatprep.subr.bf16.mxu1 %v2895_v42 }
 0x3d7   :  { %12622 = vmatmul.mubr.msk.bf16.gmra.mxu0 %vm122_vm1, %v13974_v38  ;;  %12642 = vmatmul.mubr.msk.bf16.gmra.mxu1 %vm122_vm1, %v13974_v38 }
 0x477   :  { %v12589_v43 = vpop.f32.mrf.mxu0  ;;  %v12599_v46 = vpop.f32.mrf.mxu1 }
 0x478   :  { %v14854_v54 = vadd.f32 %v12589_v43, %v14738_v63  ;;  %v14857_v47 = vadd.f32 %v12599_v46, %v14741_v50 }
 0x479   :  { %v2126_v48 = vpop.f32.mrf.mxu0  ;;  %v2203_v55 = vpop.f32.mrf.mxu1 }
 0x47a   :  { %v14860_v49 = vadd.f32 %v2126_v48, %v14744_v29  ;;  %v14863_v52 = vadd.f32 %v2203_v55, %v14747_v1  ;;  %v13979_v55 = vld [vmem:[%s16778_s0 + $0xc8] sm:$0xff]  }
 0x47b   :  { %v12590_v53 = vpop.f32.mrf.mxu0  ;;  %v12600_v56 = vpop.f32.mrf.mxu1 }
 0x47c   :  { %v14866_v57 = vadd.f32 %v12590_v53, %v14750_v6  ;;  %v14869_v60 = vadd.f32 %v12600_v56, %v14753_v9  ;;  %v13980_v53 = vld [vmem:[%s16778_s0 + $0xf4] sm:$0xff]  }
 0x47d   :  { %v14871_v63 = vpop.f32.mrf.mxu0  ;;  %v14873_v50 = vpop.f32.mrf.mxu1 }
 0x47f   :  { %v12593_v62 = vpop.f32.mrf.mxu0  ;;  %v12603_v26 = vpop.f32.mrf.mxu1 }
 0x480   :  { %v14876_v29 = vadd.f32 %v12593_v62, %v14760_v40  ;;  %v14879_v1 = vadd.f32 %v12603_v26, %v14763_v41 }
 0x481   :  { %v2142_v51 = vpop.f32.mrf.mxu0  ;;  %v2219_v0 = vpop.f32.mrf.mxu1 }
 0x482   :  { %v14882_v6 = vadd.f32 %v2142_v51, %v14766_v44  ;;  %v14885_v9 = vadd.f32 %v2219_v0, %v14769_v45 }
 0x483   :  { %v12594_v5 = vpop.f32.mrf.mxu0  ;;  %v12604_v30 = vpop.f32.mrf.mxu1 }
 0x484   :  { %v14888_v10 = vadd.f32 %v12594_v5, %v14772_v24  ;;  %v14891_v25 = vadd.f32 %v12604_v30, %v14775_v27  ;;  %v13977_v27 = vld [vmem:[%s16778_s0 + $0xd0] sm:$0xff]   ;;  %v13987_v30 = vld [vmem:[%s16779_s1 + $0x20] sm:$0xff]  }
 0x485   :  { %v14893_v40 = vpop.f32.mrf.mxu0  ;;  %v14895_v41 = vpop.f32.mrf.mxu1 }
 0x48f   :  { %v12619_v61 = vpop.f32.mrf.mxu0  ;;  %v12639_v13 = vpop.f32.mrf.mxu1 }
 0x491   :  { %v2383_v14 = vpop.f32.mrf.mxu0  ;;  %v2484_v44 = vpop.f32.mrf.mxu1 }
 0x493   :  { %v12620_v19 = vpop.f32.mrf.mxu0  ;;  %v12640_v20 = vpop.f32.mrf.mxu1 }
 0x494   :  { %v2516_v38 = vpack.c.bf16 %v12620_v19, %v12619_v61  ;;  %v2520_v24 = vpack.c.bf16 %v12640_v20, %v12639_v13  ;;  %v13983_v61 = vld [vmem:[%s16778_s0 + $0xb8] sm:$0xff]   ;;  %v13984_v13 = vld [vmem:[%s16778_s0 + $0xe4] sm:$0xff]   ;;  %v13989_v20 = vld [vmem:[%s16779_s1 + $0x30] sm:$0xff]  }
 0x495   :  { %v2386_v45 = vpop.f32.mrf.mxu0  ;;  %v2487_v23 = vpop.f32.mrf.mxu1  ;;  %v13988_v19 = vld [vmem:[%s16779_s1 + $0x28] sm:$0xff]  }
 0x496   :  { %v2515_v34 = vpack.c.bf16 %v2386_v45, %v2383_v14  ;;  %v2519_v35 = vpack.c.bf16 %v2487_v23, %v2484_v44  ;;  %v13985_v14 = vld [vmem:[%s16778_s0 + $0xb0] sm:$0xff]   ;;  %v13986_v44 = vld [vmem:[%s16778_s0 + $0xdc] sm:$0xff]   ;;  %v10910_v23 = vld [vmem:[%s16780_s2 + $0xc] sm:$0x3] }
 0x497   :  { %v12623_v15 = vpop.f32.mrf.mxu0  ;;  %v12643_v28 = vpop.f32.mrf.mxu1  ;;  %v13990_v45 = vld [vmem:[%s16779_s1 + $0x38] sm:$0xff]  }
 0x498   :  { %12647 = vmatprep.mubr.msk.bf16.mxu0 %vm591_vm3, %v2515_v34  ;;  %12657 = vmatprep.mubr.msk.bf16.mxu1 %vm591_vm3, %v2519_v35  ;;  %v2985_v34 = vsel %vm604_vm2, %v10910_v23, 0  ;;  %v13991_v35 = vld [vmem:[%s16778_s0 + $0x130] ss:$0 sps:$4 sm:$0x11]  }
 0x499   :  { %v2399_v16 = vpop.f32.mrf.mxu0  ;;  %v2500_v43 = vpop.f32.mrf.mxu1  ;;  %12648 = vmatmul.mubr.msk.bf16.vlgmr.msra.gmra.mxu0 %vm591_vm3, %v2516_v38  ;;  %12658 = vmatmul.mubr.msk.bf16.vlgmr.msra.gmra.mxu1 %vm591_vm3, %v2520_v24  ;;  %v13992_v38 = vld [vmem:[%s16778_s0 + $0x15c] ss:$0 sps:$4 sm:$0x11]   ;;  %v3241_v24 = vand.u32 %v13991_v35, %v14259_v4 }
 0x49a   :  { %12666 = vmatpush3.bf16.msra.mxu0 %v2794_v39  ;;  %12686 = vmatpush3.bf16.msra.mxu1 %v2895_v42  ;;  %v13981_v39 = vld [vmem:[%s16778_s0 + $0xc0] sm:$0xff]   ;;  %v13982_v42 = vld [vmem:[%s16778_s0 + $0xec] sm:$0xff]  }
 0x49b   :  { %v12624_v46 = vpop.f32.mrf.mxu0  ;;  %v12644_v48 = vpop.f32.mrf.mxu1  ;;  %12667 = vmatprep.subr.bf16.mxu0 %v13977_v27  ;;  %12687 = vmatprep.subr.bf16.mxu1 %v13978_v33 }
 0x49c   :  { %v2518_v56 = vpack.c.bf16 %v12624_v46, %v12623_v15  ;;  %v2522_v62 = vpack.c.bf16 %v12644_v48, %v12643_v28  ;;  %v3342_v15 = vand.u32 %v13992_v38, %v14259_v4 }
 0x49d   :  { %v2402_v26 = vpop.f32.mrf.mxu0  ;;  %v2503_v51 = vpop.f32.mrf.mxu1 }
 0x49e   :  { %v2517_v0 = vpack.c.bf16 %v2402_v26, %v2399_v16  ;;  %v2521_v5 = vpack.c.bf16 %v2503_v51, %v2500_v43  ;;  %12668 = vmatpush3.bf16.msra.mxu0 %v13977_v27  ;;  %12688 = vmatpush3.bf16.msra.mxu1 %v13978_v33 }
 0x49f   :  { %12669 = vmatprep.subr.bf16.mxu0 %v13979_v55  ;;  %12689 = vmatprep.subr.bf16.mxu1 %v13980_v53 }
 0x4a0   :  { %12651 = vmatprep.mubr.msk.bf16.mxu0 %vm591_vm3, %v2517_v0  ;;  %12661 = vmatprep.mubr.msk.bf16.mxu1 %vm591_vm3, %v2521_v5 }
 0x4a1   :  { %12652 = vmatmul.mubr.msk.bf16.gmra.mxu0 %vm591_vm3, %v2518_v56  ;;  %12662 = vmatmul.mubr.msk.bf16.gmra.mxu1 %vm591_vm3, %v2522_v62 }
 0x4a2   :  { %12670 = vmatpush3.bf16.msra.mxu0 %v13979_v55  ;;  %12690 = vmatpush3.bf16.msra.mxu1 %v13980_v53 }
 0x4a3   :  { %12671 = vmatprep.subr.bf16.mxu0 %v13981_v39  ;;  %12691 = vmatprep.subr.bf16.mxu1 %v13982_v42 }
 0x4a4   :  { %12677 = vmatprep.mubr.msk.bf16.mxu0 %vm122_vm1, %v13987_v30  ;;  %12697 = vmatprep.mubr.msk.bf16.mxu1 %vm122_vm1, %v13987_v30 }
 0x4a6   :  { %12672 = vmatpush3.bf16.msra.mxu0 %v13981_v39  ;;  %12692 = vmatpush3.bf16.msra.mxu1 %v13982_v42 }
 0x4a7   :  { %12673 = vmatprep.subr.bf16.mxu0 %v13983_v61  ;;  %12693 = vmatprep.subr.bf16.mxu1 %v13984_v13 }
 0x4aa   :  { %12674 = vmatpush3.bf16.msra.mxu0 %v13983_v61  ;;  %12694 = vmatpush3.bf16.msra.mxu1 %v13984_v13 }
 0x4ab   :  { %12675 = vmatprep.subr.bf16.mxu0 %v13985_v14  ;;  %12695 = vmatprep.subr.bf16.mxu1 %v13986_v44 }
 0x4ae   :  { %12676 = vmatpush3.bf16.msra.mxu0 %v13985_v14  ;;  %12696 = vmatpush3.bf16.msra.mxu1 %v13986_v44 }
 0x4af   :  { %13853 = vmatprep.subr.msk.bf16.mxu0 %vm604_vm2, %v10910_v23  ;;  %13854 = vmatprep.subr.msk.bf16.mxu1 %vm604_vm2, %v10910_v23 }
 0x4b1   :  { %12678 = vmatmul.mubr.msk.bf16.vlgmr.msra.gmra.mxu0 %vm122_vm1, %v13988_v19  ;;  %12698 = vmatmul.mubr.msk.bf16.vlgmr.msra.gmra.mxu1 %vm122_vm1, %v13988_v19 }
 0x4b2   :  { %12681 = vmatprep.mubr.msk.bf16.mxu0 %vm122_vm1, %v13989_v20  ;;  %12701 = vmatprep.mubr.msk.bf16.mxu1 %vm122_vm1, %v13989_v20 }
 0x4b3   :  { %12706 = vmatpush3.bf16.msra.mxu0 %v2985_v34  ;;  %12716 = vmatpush3.bf16.msra.mxu1 %v2985_v34 }
 0x4b4   :  { %12725 = vmatprep.subr.bf16.mxu0 %v3241_v24  ;;  %12745 = vmatprep.subr.bf16.mxu1 %v3342_v15 }
 0x4b9   :  { %12682 = vmatmul.mubr.msk.bf16.gmra.mxu0 %vm122_vm1, %v13990_v45  ;;  %12702 = vmatmul.mubr.msk.bf16.gmra.mxu1 %vm122_vm1, %v13990_v45 }
 0x559   :  { %v12649_v28 = vpop.f32.mrf.mxu0  ;;  %v12659_v27 = vpop.f32.mrf.mxu1 }
 0x55a   :  { %v14970_v33 = vadd.f32 %v12649_v28, %v14854_v54  ;;  %v14973_v16 = vadd.f32 %v12659_v27, %v14857_v47 }
 0x55b   :  { %v2574_v43 = vpop.f32.mrf.mxu0  ;;  %v2651_v46 = vpop.f32.mrf.mxu1 }
 0x55c   :  { %v14976_v48 = vadd.f32 %v2574_v43, %v14860_v49  ;;  %v14979_v55 = vadd.f32 %v2651_v46, %v14863_v52  ;;  %v13994_v43 = vld [vmem:[%s16778_s0 + $0x154] sm:$0xff]  }
 0x55d   :  { %v12650_v53 = vpop.f32.mrf.mxu0  ;;  %v12660_v56 = vpop.f32.mrf.mxu1 }
 0x55e   :  { %v14982_v62 = vadd.f32 %v12650_v53, %v14866_v57  ;;  %v14985_v26 = vadd.f32 %v12660_v56, %v14869_v60 }
 0x55f   :  { %v14987_v54 = vpop.f32.mrf.mxu0  ;;  %v14989_v47 = vpop.f32.mrf.mxu1 }
 0x561   :  { %v12653_v51 = vpop.f32.mrf.mxu0  ;;  %v12663_v0 = vpop.f32.mrf.mxu1 }
 0x562   :  { %v14992_v49 = vadd.f32 %v12653_v51, %v14876_v29  ;;  %v14995_v52 = vadd.f32 %v12663_v0, %v14879_v1  ;;  %v13995_v0 = vld [vmem:[%s16778_s0 + $0x120] sm:$0xff]  }
 0x563   :  { %v2590_v5 = vpop.f32.mrf.mxu0  ;;  %v2667_v39 = vpop.f32.mrf.mxu1 }
 0x564   :  { %v14998_v57 = vadd.f32 %v2590_v5, %v14882_v6  ;;  %v15001_v60 = vadd.f32 %v2667_v39, %v14885_v9  ;;  %v13996_v5 = vld [vmem:[%s16778_s0 + $0x14c] sm:$0xff]  }
 0x565   :  { %v12654_v42 = vpop.f32.mrf.mxu0  ;;  %v12664_v30 = vpop.f32.mrf.mxu1 }
 0x566   :  { %v15004_v61 = vadd.f32 %v12654_v42, %v14888_v10  ;;  %v15007_v13 = vadd.f32 %v12664_v30, %v14891_v25  ;;  %v13993_v25 = vld [vmem:[%s16778_s0 + $0x128] sm:$0xff]  }
 0x567   :  { %v15009_v29 = vpop.f32.mrf.mxu0  ;;  %v15011_v1 = vpop.f32.mrf.mxu1 }
 0x571   :  { %v12679_v14 = vpop.f32.mrf.mxu0  ;;  %v12699_v44 = vpop.f32.mrf.mxu1 }
 0x573   :  { %v2830_v19 = vpop.f32.mrf.mxu0  ;;  %v2931_v6 = vpop.f32.mrf.mxu1 }
 0x575   :  { %v12680_v20 = vpop.f32.mrf.mxu0  ;;  %v12700_v45 = vpop.f32.mrf.mxu1 }
 0x576   :  { %v2963_v38 = vpack.c.bf16 %v12680_v20, %v12679_v14  ;;  %v2967_v10 = vpack.c.bf16 %v12700_v45, %v12699_v44  ;;  %v13999_v20 = vld [vmem:[%s16778_s0 + $0x110] sm:$0xff]   ;;  %v14000_v45 = vld [vmem:[%s16778_s0 + $0x13c] sm:$0xff]  }
 0x577   :  { %v2833_v9 = vpop.f32.mrf.mxu0  ;;  %v2934_v23 = vpop.f32.mrf.mxu1 }
 0x578   :  { %v2962_v34 = vpack.c.bf16 %v2833_v9, %v2830_v19  ;;  %v2966_v35 = vpack.c.bf16 %v2934_v23, %v2931_v6  ;;  %v14003_v6 = vld [vmem:[%s16779_s1 + $0x20] sm:$0xff]   ;;  %v14001_v9 = vld [vmem:[%s16778_s0 + $0x108] sm:$0xff]   ;;  %v14002_v23 = vld [vmem:[%s16778_s0 + $0x134] sm:$0xff]  }
 0x579   :  { %v12683_v28 = vpop.f32.mrf.mxu0  ;;  %v12703_v27 = vpop.f32.mrf.mxu1 }
 0x57a   :  { %12707 = vmatprep.mubr.msk.bf16.mxu0 %vm591_vm3, %v2962_v34  ;;  %12717 = vmatprep.mubr.msk.bf16.mxu1 %vm591_vm3, %v2966_v35  ;;  %v14004_v34 = vld [vmem:[%s16779_s1 + $0x28] sm:$0xff]   ;;  %v14005_v35 = vld [vmem:[%s16779_s1 + $0x30] sm:$0xff]  }
 0x57b   :  { %v2846_v46 = vpop.f32.mrf.mxu0  ;;  %v2947_v53 = vpop.f32.mrf.mxu1  ;;  %12708 = vmatmul.mubr.msk.bf16.vlgmr.msra.gmra.mxu0 %vm591_vm3, %v2963_v38  ;;  %12718 = vmatmul.mubr.msk.bf16.vlgmr.msra.gmra.mxu1 %vm591_vm3, %v2967_v10  ;;  %v14006_v38 = vld [vmem:[%s16779_s1 + $0x38] sm:$0xff]   ;;  %v10973_v10 = vld [vmem:[%s16780_s2 + $0xe] sm:$0x3] }
 0x57c   :  { %12726 = vmatpush3.bf16.msra.mxu0 %v3241_v24  ;;  %12746 = vmatpush3.bf16.msra.mxu1 %v3342_v15  ;;  %v13997_v24 = vld [vmem:[%s16778_s0 + $0x118] sm:$0xff]   ;;  %v13998_v15 = vld [vmem:[%s16778_s0 + $0x144] sm:$0xff]  }
 0x57d   :  { %v12684_v56 = vpop.f32.mrf.mxu0  ;;  %v12704_v51 = vpop.f32.mrf.mxu1  ;;  %12727 = vmatprep.subr.bf16.mxu0 %v13993_v25  ;;  %12747 = vmatprep.subr.bf16.mxu1 %v13994_v43 }
 0x57e   :  { %v2965_v39 = vpack.c.bf16 %v12684_v56, %v12683_v28  ;;  %v2969_v42 = vpack.c.bf16 %v12704_v51, %v12703_v27  ;;  %v3432_v28 = vsel %vm604_vm2, %v10973_v10, 0  ;;  %v14007_v27 = vld [vmem:[%s16778_s0 + $0x28] ss:$0 sps:$4 sm:$0x11]  }
 0x57f   :  { %v2849_v30 = vpop.f32.mrf.mxu0  ;;  %v2950_v14 = vpop.f32.mrf.mxu1 }
 0x580   :  { %v2964_v44 = vpack.c.bf16 %v2849_v30, %v2846_v46  ;;  %v2968_v19 = vpack.c.bf16 %v2950_v14, %v2947_v53  ;;  %12728 = vmatpush3.bf16.msra.mxu0 %v13993_v25  ;;  %12748 = vmatpush3.bf16.msra.mxu1 %v13994_v43  ;;  %v14008_v25 = vld [vmem:[%s16778_s0 + $0x54] ss:$0 sps:$4 sm:$0x11]   ;;  %v3689_v43 = vand.u32 %v14007_v27, %v14259_v4 }
 0x581   :  { %12729 = vmatprep.subr.bf16.mxu0 %v13995_v0  ;;  %12749 = vmatprep.subr.bf16.mxu1 %v13996_v5  ;;  %v3790_v46 = vand.u32 %v14008_v25, %v14259_v4 }
 0x582   :  { %12711 = vmatprep.mubr.msk.bf16.mxu0 %vm591_vm3, %v2964_v44  ;;  %12721 = vmatprep.mubr.msk.bf16.mxu1 %vm591_vm3, %v2968_v19 }
 0x583   :  { %12712 = vmatmul.mubr.msk.bf16.gmra.mxu0 %vm591_vm3, %v2965_v39  ;;  %12722 = vmatmul.mubr.msk.bf16.gmra.mxu1 %vm591_vm3, %v2969_v42 }
 0x584   :  { %12730 = vmatpush3.bf16.msra.mxu0 %v13995_v0  ;;  %12750 = vmatpush3.bf16.msra.mxu1 %v13996_v5 }
 0x585   :  { %12731 = vmatprep.subr.bf16.mxu0 %v13997_v24  ;;  %12751 = vmatprep.subr.bf16.mxu1 %v13998_v15 }
 0x586   :  { %12737 = vmatprep.mubr.msk.bf16.mxu0 %vm122_vm1, %v14003_v6  ;;  %12757 = vmatprep.mubr.msk.bf16.mxu1 %vm122_vm1, %v14003_v6 }
 0x588   :  { %12732 = vmatpush3.bf16.msra.mxu0 %v13997_v24  ;;  %12752 = vmatpush3.bf16.msra.mxu1 %v13998_v15 }
 0x589   :  { %12733 = vmatprep.subr.bf16.mxu0 %v13999_v20  ;;  %12753 = vmatprep.subr.bf16.mxu1 %v14000_v45 }
 0x58c   :  { %12734 = vmatpush3.bf16.msra.mxu0 %v13999_v20  ;;  %12754 = vmatpush3.bf16.msra.mxu1 %v14000_v45 }
 0x58d   :  { %12735 = vmatprep.subr.bf16.mxu0 %v14001_v9  ;;  %12755 = vmatprep.subr.bf16.mxu1 %v14002_v23 }
 0x590   :  { %12736 = vmatpush3.bf16.msra.mxu0 %v14001_v9  ;;  %12756 = vmatpush3.bf16.msra.mxu1 %v14002_v23 }
 0x591   :  { %13855 = vmatprep.subr.msk.bf16.mxu0 %vm604_vm2, %v10973_v10  ;;  %13856 = vmatprep.subr.msk.bf16.mxu1 %vm604_vm2, %v10973_v10 }
 0x593   :  { %12738 = vmatmul.mubr.msk.bf16.vlgmr.msra.gmra.mxu0 %vm122_vm1, %v14004_v34  ;;  %12758 = vmatmul.mubr.msk.bf16.vlgmr.msra.gmra.mxu1 %vm122_vm1, %v14004_v34 }
 0x594   :  { %12741 = vmatprep.mubr.msk.bf16.mxu0 %vm122_vm1, %v14005_v35  ;;  %12761 = vmatprep.mubr.msk.bf16.mxu1 %vm122_vm1, %v14005_v35 }
 0x595   :  { %12766 = vmatpush3.bf16.msra.mxu0 %v3432_v28  ;;  %12776 = vmatpush3.bf16.msra.mxu1 %v3432_v28 }
 0x596   :  { %12785 = vmatprep.subr.bf16.mxu0 %v3689_v43  ;;  %12805 = vmatprep.subr.bf16.mxu1 %v3790_v46 }
 0x59b   :  { %12742 = vmatmul.mubr.msk.bf16.gmra.mxu0 %vm122_vm1, %v14006_v38  ;;  %12762 = vmatmul.mubr.msk.bf16.gmra.mxu1 %vm122_vm1, %v14006_v38 }
 0x63b   :  { %v12709_v53 = vpop.f32.mrf.mxu0  ;;  %v12719_v56 = vpop.f32.mrf.mxu1 }
 0x63c   :  { %v15086_v51 = vadd.f32 %v12709_v53, %v14970_v33  ;;  %v15089_v0 = vadd.f32 %v12719_v56, %v14973_v16 }
 0x63d   :  { %v3021_v5 = vpop.f32.mrf.mxu0  ;;  %v3098_v39 = vpop.f32.mrf.mxu1 }
 0x63e   :  { %v15092_v42 = vadd.f32 %v3021_v5, %v14976_v48  ;;  %v15095_v30 = vadd.f32 %v3098_v39, %v14979_v55 }
 0x63f   :  { %v12710_v14 = vpop.f32.mrf.mxu0  ;;  %v12720_v44 = vpop.f32.mrf.mxu1 }
 0x640   :  { %v15098_v19 = vadd.f32 %v12710_v14, %v14982_v62  ;;  %v15101_v24 = vadd.f32 %v12720_v44, %v14985_v26 }
 0x641   :  { %v15103_v33 = vpop.f32.mrf.mxu0  ;;  %v15105_v16 = vpop.f32.mrf.mxu1 }
 0x643   :  { %v12713_v15 = vpop.f32.mrf.mxu0  ;;  %v12723_v6 = vpop.f32.mrf.mxu1 }
 0x644   :  { %v15108_v48 = vadd.f32 %v12713_v15, %v14992_v49  ;;  %v15111_v55 = vadd.f32 %v12723_v6, %v14995_v52  ;;  %v14010_v15 = vld [vmem:[%s16778_s0 + $0x4c] sm:$0xff]  }
 0x645   :  { %v3037_v20 = vpop.f32.mrf.mxu0  ;;  %v3114_v45 = vpop.f32.mrf.mxu1 }
 0x646   :  { %v15114_v62 = vadd.f32 %v3037_v20, %v14998_v57  ;;  %v15117_v26 = vadd.f32 %v3114_v45, %v15001_v60 }
 0x647   :  { %v12714_v9 = vpop.f32.mrf.mxu0  ;;  %v12724_v23 = vpop.f32.mrf.mxu1 }
 0x648   :  { %v15120_v34 = vadd.f32 %v12714_v9, %v15004_v61  ;;  %v15123_v35 = vadd.f32 %v12724_v23, %v15007_v13  ;;  %v14009_v13 = vld [vmem:[%s16778_s0 + $0x20] sm:$0xff]   ;;  %v14011_v23 = vld [vmem:[%s16778_s0 + $0x18] sm:$0xff]  }
 0x649   :  { %v15125_v49 = vpop.f32.mrf.mxu0  ;;  %v15127_v52 = vpop.f32.mrf.mxu1 }
 0x653   :  { %v12739_v38 = vpop.f32.mrf.mxu0  ;;  %v12759_v10 = vpop.f32.mrf.mxu1 }
 0x655   :  { %v3277_v28 = vpop.f32.mrf.mxu0  ;;  %v3378_v57 = vpop.f32.mrf.mxu1 }
 0x657   :  { %v12740_v27 = vpop.f32.mrf.mxu0  ;;  %v12760_v25 = vpop.f32.mrf.mxu1 }
 0x658   :  { %v3410_v39 = vpack.c.bf16 %v12740_v27, %v12739_v38  ;;  %v3414_v61 = vpack.c.bf16 %v12760_v25, %v12759_v10  ;;  %v14012_v38 = vld [vmem:[%s16778_s0 + $0x44] sm:$0xff]  }
 0x659   :  { %v3280_v60 = vpop.f32.mrf.mxu0  ;;  %v3381_v53 = vpop.f32.mrf.mxu1 }
 0x65a   :  { %v3409_v56 = vpack.c.bf16 %v3280_v60, %v3277_v28  ;;  %v3413_v5 = vpack.c.bf16 %v3381_v53, %v3378_v57  ;;  %v14019_v53 = vld [vmem:[%s16779_s1 + $0x40] sm:$0xff]  }
 0x65b   :  { %v12743_v14 = vpop.f32.mrf.mxu0  ;;  %v12763_v44 = vpop.f32.mrf.mxu1 }
 0x65c   :  { %12767 = vmatprep.mubr.msk.bf16.mxu0 %vm591_vm3, %v3409_v56  ;;  %12777 = vmatprep.mubr.msk.bf16.mxu1 %vm591_vm3, %v3413_v5  ;;  %v14015_v56 = vld [vmem:[%s16778_s0 + $0x8] sm:$0xff]   ;;  %v14016_v5 = vld [vmem:[%s16778_s0 + $0x34] sm:$0xff]  }
 0x65d   :  { %v3293_v6 = vpop.f32.mrf.mxu0  ;;  %v3394_v20 = vpop.f32.mrf.mxu1  ;;  %12768 = vmatmul.mubr.msk.bf16.vlgmr.msra.gmra.mxu0 %vm591_vm3, %v3410_v39  ;;  %12778 = vmatmul.mubr.msk.bf16.vlgmr.msra.gmra.mxu1 %vm591_vm3, %v3414_v61  ;;  %v14017_v39 = vld [vmem:[%s16778_s0] sm:$0xff]   ;;  %v14018_v61 = vld [vmem:[%s16778_s0 + $0x2c] sm:$0xff]  }
 0x65e   :  { %12786 = vmatpush3.bf16.msra.mxu0 %v3689_v43  ;;  %12806 = vmatpush3.bf16.msra.mxu1 %v3790_v46  ;;  %v14013_v43 = vld [vmem:[%s16778_s0 + $0x10] sm:$0xff]   ;;  %v14014_v46 = vld [vmem:[%s16778_s0 + $0x3c] sm:$0xff]  }
 0x65f   :  { %v12744_v45 = vpop.f32.mrf.mxu0  ;;  %v12764_v9 = vpop.f32.mrf.mxu1  ;;  %12787 = vmatprep.subr.bf16.mxu0 %v14009_v13  ;;  %12807 = vmatprep.subr.bf16.mxu1 %v14010_v15 }
 0x660   :  { %v3412_v10 = vpack.c.bf16 %v12744_v45, %v12743_v14  ;;  %v3416_v28 = vpack.c.bf16 %v12764_v9, %v12763_v44  ;;  %v14020_v14 = vld [vmem:[%s16779_s1 + $0x48] sm:$0xff]   ;;  %v14021_v44 = vld [vmem:[%s16779_s1 + $0x50] sm:$0xff]  }
 0x661   :  { %v3296_v57 = vpop.f32.mrf.mxu0  ;;  %v3397_v27 = vpop.f32.mrf.mxu1  ;;  %v14024_v45 = vld [vmem:[%s16778_s0 + $0xac] ss:$0 sps:$4 sm:$0x11]  }
 0x662   :  { %v3411_v25 = vpack.c.bf16 %v3296_v57, %v3293_v6  ;;  %v3415_v60 = vpack.c.bf16 %v3397_v27, %v3394_v20  ;;  %12788 = vmatpush3.bf16.msra.mxu0 %v14009_v13  ;;  %12808 = vmatpush3.bf16.msra.mxu1 %v14010_v15  ;;  %v14022_v13 = vld [vmem:[%s16779_s1 + $0x58] sm:$0xff]   ;;  %v11014_v15 = vld [vmem:[%s16780_s2 + $0x10] sm:$0x3]  ;;  %v14023_v20 = vld [vmem:[%s16778_s0 + $0x80] ss:$0 sps:$4 sm:$0x11]  }
 0x663   :  { %12789 = vmatprep.subr.bf16.mxu0 %v14011_v23  ;;  %12809 = vmatprep.subr.bf16.mxu1 %v14012_v38  ;;  %v3880_v6 = vsel %vm604_vm2, %v11014_v15, 0  ;;  %v4136_v9 = vand.u32 %v14023_v20, %v14259_v4 }
 0x664   :  { %12771 = vmatprep.mubr.msk.bf16.mxu0 %vm591_vm3, %v3411_v25  ;;  %12781 = vmatprep.mubr.msk.bf16.mxu1 %vm591_vm3, %v3415_v60 }
 0x665   :  { %12772 = vmatmul.mubr.msk.bf16.gmra.mxu0 %vm591_vm3, %v3412_v10  ;;  %12782 = vmatmul.mubr.msk.bf16.gmra.mxu1 %vm591_vm3, %v3416_v28 }
 0x666   :  { %12790 = vmatpush3.bf16.msra.mxu0 %v14011_v23  ;;  %12810 = vmatpush3.bf16.msra.mxu1 %v14012_v38  ;;  %v4237_v23 = vand.u32 %v14024_v45, %v14259_v4 }
 0x667   :  { %12791 = vmatprep.subr.bf16.mxu0 %v14013_v43  ;;  %12811 = vmatprep.subr.bf16.mxu1 %v14014_v46 }
 0x668   :  { %12797 = vmatprep.mubr.msk.bf16.mxu0 %vm122_vm1, %v14019_v53  ;;  %12817 = vmatprep.mubr.msk.bf16.mxu1 %vm122_vm1, %v14019_v53 }
 0x66a   :  { %12792 = vmatpush3.bf16.msra.mxu0 %v14013_v43  ;;  %12812 = vmatpush3.bf16.msra.mxu1 %v14014_v46 }
 0x66b   :  { %12793 = vmatprep.subr.bf16.mxu0 %v14015_v56  ;;  %12813 = vmatprep.subr.bf16.mxu1 %v14016_v5 }
 0x66e   :  { %12794 = vmatpush3.bf16.msra.mxu0 %v14015_v56  ;;  %12814 = vmatpush3.bf16.msra.mxu1 %v14016_v5 }
 0x66f   :  { %12795 = vmatprep.subr.bf16.mxu0 %v14017_v39  ;;  %12815 = vmatprep.subr.bf16.mxu1 %v14018_v61 }
 0x672   :  { %12796 = vmatpush3.bf16.msra.mxu0 %v14017_v39  ;;  %12816 = vmatpush3.bf16.msra.mxu1 %v14018_v61 }
 0x673   :  { %13857 = vmatprep.subr.msk.bf16.mxu0 %vm604_vm2, %v11014_v15  ;;  %13858 = vmatprep.subr.msk.bf16.mxu1 %vm604_vm2, %v11014_v15 }
 0x675   :  { %12798 = vmatmul.mubr.msk.bf16.vlgmr.msra.gmra.mxu0 %vm122_vm1, %v14020_v14  ;;  %12818 = vmatmul.mubr.msk.bf16.vlgmr.msra.gmra.mxu1 %vm122_vm1, %v14020_v14 }
 0x676   :  { %12801 = vmatprep.mubr.msk.bf16.mxu0 %vm122_vm1, %v14021_v44  ;;  %12821 = vmatprep.mubr.msk.bf16.mxu1 %vm122_vm1, %v14021_v44 }
 0x677   :  { %12826 = vmatpush3.bf16.msra.mxu0 %v3880_v6  ;;  %12836 = vmatpush3.bf16.msra.mxu1 %v3880_v6 }
 0x678   :  { %12845 = vmatprep.subr.bf16.mxu0 %v4136_v9  ;;  %12865 = vmatprep.subr.bf16.mxu1 %v4237_v23 }
 0x67d   :  { %12802 = vmatmul.mubr.msk.bf16.gmra.mxu0 %vm122_vm1, %v14022_v13  ;;  %12822 = vmatmul.mubr.msk.bf16.gmra.mxu1 %vm122_vm1, %v14022_v13 }
 0x71d   :  { %v12769_v38 = vpop.f32.mrf.mxu0  ;;  %v12779_v10 = vpop.f32.mrf.mxu1 }
 0x71e   :  { %v15202_v28 = vadd.f32 %v12769_v38, %v15086_v51  ;;  %v15205_v57 = vadd.f32 %v12779_v10, %v15089_v0 }
 0x71f   :  { %v3468_v27 = vpop.f32.mrf.mxu0  ;;  %v3545_v25 = vpop.f32.mrf.mxu1 }
 0x720   :  { %v15208_v60 = vadd.f32 %v3468_v27, %v15092_v42  ;;  %v15211_v43 = vadd.f32 %v3545_v25, %v15095_v30 }
 0x721   :  { %v12770_v46 = vpop.f32.mrf.mxu0  ;;  %v12780_v53 = vpop.f32.mrf.mxu1 }
 0x722   :  { %v15214_v56 = vadd.f32 %v12770_v46, %v15098_v19  ;;  %v15217_v5 = vadd.f32 %v12780_v53, %v15101_v24 }
 0x723   :  { %v15219_v51 = vpop.f32.mrf.mxu0  ;;  %v15221_v0 = vpop.f32.mrf.mxu1 }
 0x725   :  { %v12773_v39 = vpop.f32.mrf.mxu0  ;;  %v12783_v61 = vpop.f32.mrf.mxu1 }
 0x726   :  { %v15224_v42 = vadd.f32 %v12773_v39, %v15108_v48  ;;  %v15227_v30 = vadd.f32 %v12783_v61, %v15111_v55 }
 0x727   :  { %v3484_v14 = vpop.f32.mrf.mxu0  ;;  %v3561_v44 = vpop.f32.mrf.mxu1 }
 0x728   :  { %v15230_v19 = vadd.f32 %v3484_v14, %v15114_v62  ;;  %v15233_v24 = vadd.f32 %v3561_v44, %v15117_v26 }
 0x729   :  { %v12774_v13 = vpop.f32.mrf.mxu0  ;;  %v12784_v15 = vpop.f32.mrf.mxu1 }
 0x72a   :  { %v15236_v6 = vadd.f32 %v12774_v13, %v15120_v34  ;;  %v15239_v20 = vadd.f32 %v12784_v15, %v15123_v35  ;;  %v14025_v35 = vld [vmem:[%s16778_s0 + $0x78] sm:$0xff]   ;;  %v14026_v13 = vld [vmem:[%s16778_s0 + $0xa4] sm:$0xff]  }
 0x72b   :  { %v15241_v48 = vpop.f32.mrf.mxu0  ;;  %v15243_v55 = vpop.f32.mrf.mxu1 }
 0x72c   :  { %16789 = vst [vmem:[#allocation6_spill] sm:$0xff] %v15243_v55 }
 0x735   :  { %v12799_v45 = vpop.f32.mrf.mxu0  ;;  %v12819_v38 = vpop.f32.mrf.mxu1 }
 0x737   :  { %v3725_v10 = vpop.f32.mrf.mxu0  ;;  %v3826_v62 = vpop.f32.mrf.mxu1 }
 0x739   :  { %v12800_v27 = vpop.f32.mrf.mxu0  ;;  %v12820_v25 = vpop.f32.mrf.mxu1 }
 0x73a   :  { %v3858_v61 = vpack.c.bf16 %v12800_v27, %v12799_v45  ;;  %v3862_v34 = vpack.c.bf16 %v12820_v25, %v12819_v38 }
 0x73b   :  { %v3728_v26 = vpop.f32.mrf.mxu0  ;;  %v3829_v46 = vpop.f32.mrf.mxu1 }
 0x73c   :  { %v3857_v53 = vpack.c.bf16 %v3728_v26, %v3725_v10  ;;  %v3861_v39 = vpack.c.bf16 %v3829_v46, %v3826_v62  ;;  %v14027_v10 = vld [vmem:[%s16778_s0 + $0x70] sm:$0xff]   ;;  %v14028_v62 = vld [vmem:[%s16778_s0 + $0x9c] sm:$0xff]  }
 0x73d   :  { %v12803_v14 = vpop.f32.mrf.mxu0  ;;  %v12823_v44 = vpop.f32.mrf.mxu1 }
 0x73e   :  { %12827 = vmatprep.mubr.msk.bf16.mxu0 %vm591_vm3, %v3857_v53  ;;  %12837 = vmatprep.mubr.msk.bf16.mxu1 %vm591_vm3, %v3861_v39 }
 0x73f   :  { %v3741_v15 = vpop.f32.mrf.mxu0  ;;  %v3842_v55 = vpop.f32.mrf.mxu1  ;;  %12828 = vmatmul.mubr.msk.bf16.vlgmr.msra.gmra.mxu0 %vm591_vm3, %v3858_v61  ;;  %12838 = vmatmul.mubr.msk.bf16.vlgmr.msra.gmra.mxu1 %vm591_vm3, %v3862_v34  ;;  %v14031_v61 = vld [vmem:[%s16778_s0 + $0x60] sm:$0xff]   ;;  %v14032_v34 = vld [vmem:[%s16778_s0 + $0x8c] sm:$0xff]  }
 0x740   :  { %12846 = vmatpush3.bf16.msra.mxu0 %v4136_v9  ;;  %12866 = vmatpush3.bf16.msra.mxu1 %v4237_v23  ;;  %v14029_v9 = vld [vmem:[%s16778_s0 + $0x68] sm:$0xff]   ;;  %v14030_v23 = vld [vmem:[%s16778_s0 + $0x94] sm:$0xff]  }
 0x741   :  { %v12804_v45 = vpop.f32.mrf.mxu0  ;;  %v12824_v38 = vpop.f32.mrf.mxu1  ;;  %12847 = vmatprep.subr.bf16.mxu0 %v14025_v35  ;;  %12867 = vmatprep.subr.bf16.mxu1 %v14026_v13 }
 0x742   :  { %v3860_v27 = vpack.c.bf16 %v12804_v45, %v12803_v14  ;;  %v3864_v25 = vpack.c.bf16 %v12824_v38, %v12823_v44  ;;  %v14033_v14 = vld [vmem:[%s16778_s0 + $0x58] sm:$0xff]   ;;  %v14034_v44 = vld [vmem:[%s16778_s0 + $0x84] sm:$0xff]   ;;  %v11077_v45 = vld [vmem:[%s16780_s2 + $0x12] sm:$0x3] }
 0x743   :  { %v3744_v26 = vpop.f32.mrf.mxu0  ;;  %v3845_v46 = vpop.f32.mrf.mxu1  ;;  %v4327_v38 = vsel %vm604_vm2, %v11077_v45, 0 }
 0x744   :  { %v3859_v53 = vpack.c.bf16 %v3744_v26, %v3741_v15  ;;  %v3863_v39 = vpack.c.bf16 %v3845_v46, %v3842_v55  ;;  %12848 = vmatpush3.bf16.msra.mxu0 %v14025_v35  ;;  %12868 = vmatpush3.bf16.msra.mxu1 %v14026_v13  ;;  %v14035_v55 = vld [vmem:[%s16779_s1 + $0x40] sm:$0xff]   ;;  %v14036_v35 = vld [vmem:[%s16779_s1 + $0x48] sm:$0xff]   ;;  %v14037_v13 = vld [vmem:[%s16779_s1 + $0x50] sm:$0xff]  }
 0x745   :  { %12849 = vmatprep.subr.bf16.mxu0 %v14027_v10  ;;  %12869 = vmatprep.subr.bf16.mxu1 %v14028_v62  ;;  %v14038_v15 = vld [vmem:[%s16779_s1 + $0x58] sm:$0xff]  }
 0x746   :  { %12831 = vmatprep.mubr.msk.bf16.mxu0 %vm591_vm3, %v3859_v53  ;;  %12841 = vmatprep.mubr.msk.bf16.mxu1 %vm591_vm3, %v3863_v39 }
 0x747   :  { %12832 = vmatmul.mubr.msk.bf16.gmra.mxu0 %vm591_vm3, %v3860_v27  ;;  %12842 = vmatmul.mubr.msk.bf16.gmra.mxu1 %vm591_vm3, %v3864_v25 }
 0x748   :  { %12850 = vmatpush3.bf16.msra.mxu0 %v14027_v10  ;;  %12870 = vmatpush3.bf16.msra.mxu1 %v14028_v62  ;;  %v14039_v10 = vld [vmem:[%s16778_s0 + $0x28] ss:$0 sps:$4 sm:$0x11]   ;;  %v14040_v62 = vld [vmem:[%s16778_s0 + $0x54] ss:$0 sps:$4 sm:$0x11]  }
 0x749   :  { %12851 = vmatprep.subr.bf16.mxu0 %v14029_v9  ;;  %12871 = vmatprep.subr.bf16.mxu1 %v14030_v23  ;;  %v4584_v27 = vand.u32 %v14039_v10, %v14259_v4  ;;  %v4685_v25 = vand.u32 %v14040_v62, %v14259_v4 }
 0x74a   :  { %12857 = vmatprep.mubr.msk.bf16.mxu0 %vm122_vm1, %v14035_v55  ;;  %12877 = vmatprep.mubr.msk.bf16.mxu1 %vm122_vm1, %v14035_v55 }
 0x74c   :  { %12852 = vmatpush3.bf16.msra.mxu0 %v14029_v9  ;;  %12872 = vmatpush3.bf16.msra.mxu1 %v14030_v23 }
 0x74d   :  { %12853 = vmatprep.subr.bf16.mxu0 %v14031_v61  ;;  %12873 = vmatprep.subr.bf16.mxu1 %v14032_v34 }
 0x750   :  { %12854 = vmatpush3.bf16.msra.mxu0 %v14031_v61  ;;  %12874 = vmatpush3.bf16.msra.mxu1 %v14032_v34 }
 0x751   :  { %12855 = vmatprep.subr.bf16.mxu0 %v14033_v14  ;;  %12875 = vmatprep.subr.bf16.mxu1 %v14034_v44 }
 0x754   :  { %12856 = vmatpush3.bf16.msra.mxu0 %v14033_v14  ;;  %12876 = vmatpush3.bf16.msra.mxu1 %v14034_v44 }
 0x755   :  { %13859 = vmatprep.subr.msk.bf16.mxu0 %vm604_vm2, %v11077_v45  ;;  %13860 = vmatprep.subr.msk.bf16.mxu1 %vm604_vm2, %v11077_v45 }
 0x757   :  { %12858 = vmatmul.mubr.msk.bf16.vlgmr.msra.gmra.mxu0 %vm122_vm1, %v14036_v35  ;;  %12878 = vmatmul.mubr.msk.bf16.vlgmr.msra.gmra.mxu1 %vm122_vm1, %v14036_v35 }
 0x758   :  { %12861 = vmatprep.mubr.msk.bf16.mxu0 %vm122_vm1, %v14037_v13  ;;  %12881 = vmatprep.mubr.msk.bf16.mxu1 %vm122_vm1, %v14037_v13 }
 0x759   :  { %12886 = vmatpush3.bf16.msra.mxu0 %v4327_v38  ;;  %12896 = vmatpush3.bf16.msra.mxu1 %v4327_v38 }
 0x75a   :  { %12905 = vmatprep.subr.bf16.mxu0 %v4584_v27  ;;  %12925 = vmatprep.subr.bf16.mxu1 %v4685_v25 }
 0x75f   :  { %12862 = vmatmul.mubr.msk.bf16.gmra.mxu0 %vm122_vm1, %v14038_v15  ;;  %12882 = vmatmul.mubr.msk.bf16.gmra.mxu1 %vm122_vm1, %v14038_v15 }
 0x7ff   :  { %v12829_v26 = vpop.f32.mrf.mxu0  ;;  %v12839_v46 = vpop.f32.mrf.mxu1 }
 0x800   :  { %v15318_v53 = vadd.f32 %v12829_v26, %v15202_v28  ;;  %v15321_v39 = vadd.f32 %v12839_v46, %v15205_v57 }
 0x801   :  { %v3916_v9 = vpop.f32.mrf.mxu0  ;;  %v3993_v23 = vpop.f32.mrf.mxu1 }
 0x802   :  { %v15324_v55 = vadd.f32 %v3916_v9, %v15208_v60  ;;  %v15327_v61 = vadd.f32 %v3993_v23, %v15211_v43 }
 0x803   :  { %v12830_v34 = vpop.f32.mrf.mxu0  ;;  %v12840_v14 = vpop.f32.mrf.mxu1 }
 0x804   :  { %v15330_v44 = vadd.f32 %v12830_v34, %v15214_v56  ;;  %v15333_v35 = vadd.f32 %v12840_v14, %v15217_v5 }
 0x805   :  { %v15335_v28 = vpop.f32.mrf.mxu0  ;;  %v15337_v57 = vpop.f32.mrf.mxu1 }
 0x806   :  { %16790 = vst [vmem:[#allocation7_spill] sm:$0xff] %v15335_v28  ;;  %16791 = vst [vmem:[#allocation8_spill] sm:$0xff] %v15337_v57 }
 0x807   :  { %v12833_v13 = vpop.f32.mrf.mxu0  ;;  %v12843_v15 = vpop.f32.mrf.mxu1 }
 0x808   :  { %v15340_v60 = vadd.f32 %v12833_v13, %v15224_v42  ;;  %v15343_v43 = vadd.f32 %v12843_v15, %v15227_v30 }
 0x809   :  { %v3932_v45 = vpop.f32.mrf.mxu0  ;;  %v4009_v38 = vpop.f32.mrf.mxu1 }
 0x80a   :  { %v15346_v56 = vadd.f32 %v3932_v45, %v15230_v19  ;;  %v15349_v5 = vadd.f32 %v4009_v38, %v15233_v24 }
 0x80b   :  { %v12834_v10 = vpop.f32.mrf.mxu0  ;;  %v12844_v62 = vpop.f32.mrf.mxu1 }
 0x80c   :  { %v15352_v26 = vadd.f32 %v12834_v10, %v15236_v6  ;;  %v15355_v46 = vadd.f32 %v12844_v62, %v15239_v20  ;;  %v14041_v20 = vld [vmem:[%s16778_s0 + $0x20] sm:$0xff]   ;;  %v14042_v62 = vld [vmem:[%s16778_s0 + $0x4c] sm:$0xff]  }
 0x80d   :  { %v15357_v42 = vpop.f32.mrf.mxu0  ;;  %v15359_v30 = vpop.f32.mrf.mxu1 }
 0x80e   :  { %16792 = vst [vmem:[#allocation9_spill] sm:$0xff] %v15357_v42  ;;  %16793 = vst [vmem:[#allocation10_spill] sm:$0xff] %v15359_v30 }
 0x817   :  { %v12859_v9 = vpop.f32.mrf.mxu0  ;;  %v12879_v23 = vpop.f32.mrf.mxu1 }
 0x819   :  { %v4172_v34 = vpop.f32.mrf.mxu0  ;;  %v4273_v19 = vpop.f32.mrf.mxu1 }
 0x81b   :  { %v12860_v14 = vpop.f32.mrf.mxu0  ;;  %v12880_v13 = vpop.f32.mrf.mxu1 }
 0x81c   :  { %v4305_v57 = vpack.c.bf16 %v12860_v14, %v12859_v9  ;;  %v4309_v6 = vpack.c.bf16 %v12880_v13, %v12879_v23 }
 0x81d   :  { %v4175_v24 = vpop.f32.mrf.mxu0  ;;  %v4276_v15 = vpop.f32.mrf.mxu1 }
 0x81e   :  { %v4304_v45 = vpack.c.bf16 %v4175_v24, %v4172_v34  ;;  %v4308_v38 = vpack.c.bf16 %v4276_v15, %v4273_v19  ;;  %v14043_v34 = vld [vmem:[%s16778_s0 + $0x18] sm:$0xff]   ;;  %v14044_v19 = vld [vmem:[%s16778_s0 + $0x44] sm:$0xff]  }
 0x81f   :  { %v12863_v10 = vpop.f32.mrf.mxu0  ;;  %v12883_v28 = vpop.f32.mrf.mxu1 }
 0x820   :  { %12887 = vmatprep.mubr.msk.bf16.mxu0 %vm591_vm3, %v4304_v45  ;;  %12897 = vmatprep.mubr.msk.bf16.mxu1 %vm591_vm3, %v4308_v38  ;;  %v14049_v38 = vld [vmem:[%s16778_s0] sm:$0xff]  }
 0x821   :  { %v4188_v30 = vpop.f32.mrf.mxu0  ;;  %v4289_v42 = vpop.f32.mrf.mxu1  ;;  %12888 = vmatmul.mubr.msk.bf16.vlgmr.msra.gmra.mxu0 %vm591_vm3, %v4305_v57  ;;  %12898 = vmatmul.mubr.msk.bf16.vlgmr.msra.gmra.mxu1 %vm591_vm3, %v4309_v6  ;;  %v14050_v6 = vld [vmem:[%s16778_s0 + $0x2c] sm:$0xff]  }
 0x822   :  { %12906 = vmatpush3.bf16.msra.mxu0 %v4584_v27  ;;  %12926 = vmatpush3.bf16.msra.mxu1 %v4685_v25  ;;  %v14045_v27 = vld [vmem:[%s16778_s0 + $0x10] sm:$0xff]   ;;  %v14046_v25 = vld [vmem:[%s16778_s0 + $0x3c] sm:$0xff]  }
 0x823   :  { %v12864_v9 = vpop.f32.mrf.mxu0  ;;  %v12884_v23 = vpop.f32.mrf.mxu1  ;;  %12907 = vmatprep.subr.bf16.mxu0 %v14041_v20  ;;  %12927 = vmatprep.subr.bf16.mxu1 %v14042_v62 }
 0x824   :  { %v4307_v14 = vpack.c.bf16 %v12864_v9, %v12863_v10  ;;  %v4311_v13 = vpack.c.bf16 %v12884_v23, %v12883_v28  ;;  %v14051_v28 = vld [vmem:[%s16779_s1 + $0x60] sm:$0xff]   ;;  %v14052_v10 = vld [vmem:[%s16779_s1 + $0x68] sm:$0xff]   ;;  %v11118_v9 = vld [vmem:[%s16780_s2 + $0x14] sm:$0x3] }
 0x825   :  { %v4191_v24 = vpop.f32.mrf.mxu0  ;;  %v4292_v57 = vpop.f32.mrf.mxu1  ;;  %v4775_v23 = vsel %vm604_vm2, %v11118_v9, 0 }
 0x826   :  { %v4306_v15 = vpack.c.bf16 %v4191_v24, %v4188_v30  ;;  %v4310_v45 = vpack.c.bf16 %v4292_v57, %v4289_v42  ;;  %12908 = vmatpush3.bf16.msra.mxu0 %v14041_v20  ;;  %12928 = vmatpush3.bf16.msra.mxu1 %v14042_v62  ;;  %v14047_v42 = vld [vmem:[%s16778_s0 + $0x8] sm:$0xff]   ;;  %v14048_v30 = vld [vmem:[%s16778_s0 + $0x34] sm:$0xff]  }
 0x827   :  { %12909 = vmatprep.subr.bf16.mxu0 %v14043_v34  ;;  %12929 = vmatprep.subr.bf16.mxu1 %v14044_v19  ;;  %v14053_v20 = vld [vmem:[%s16779_s1 + $0x70] sm:$0xff]   ;;  %v14054_v62 = vld [vmem:[%s16779_s1 + $0x78] sm:$0xff]  }
 0x828   :  { %12891 = vmatprep.mubr.msk.bf16.mxu0 %vm591_vm3, %v4306_v15  ;;  %12901 = vmatprep.mubr.msk.bf16.mxu1 %vm591_vm3, %v4310_v45 }
 0x829   :  { %12892 = vmatmul.mubr.msk.bf16.gmra.mxu0 %vm591_vm3, %v4307_v14  ;;  %12902 = vmatmul.mubr.msk.bf16.gmra.mxu1 %vm591_vm3, %v4311_v13 }
 0x82a   :  { %12910 = vmatpush3.bf16.msra.mxu0 %v14043_v34  ;;  %12930 = vmatpush3.bf16.msra.mxu1 %v14044_v19  ;;  %v14055_v34 = vld [vmem:[%s16778_s0 + $0x80] ss:$0 sps:$4 sm:$0x11]   ;;  %v14056_v19 = vld [vmem:[%s16778_s0 + $0xac] ss:$0 sps:$4 sm:$0x11]  }
 0x82b   :  { %12911 = vmatprep.subr.bf16.mxu0 %v14045_v27  ;;  %12931 = vmatprep.subr.bf16.mxu1 %v14046_v25  ;;  %v5031_v14 = vand.u32 %v14055_v34, %v14259_v4  ;;  %v5132_v13 = vand.u32 %v14056_v19, %v14259_v4 }
 0x82c   :  { %12917 = vmatprep.mubr.msk.bf16.mxu0 %vm122_vm1, %v14051_v28  ;;  %12937 = vmatprep.mubr.msk.bf16.mxu1 %vm122_vm1, %v14051_v28 }
 0x82e   :  { %12912 = vmatpush3.bf16.msra.mxu0 %v14045_v27  ;;  %12932 = vmatpush3.bf16.msra.mxu1 %v14046_v25 }
 0x82f   :  { %12913 = vmatprep.subr.bf16.mxu0 %v14047_v42  ;;  %12933 = vmatprep.subr.bf16.mxu1 %v14048_v30 }
 0x832   :  { %12914 = vmatpush3.bf16.msra.mxu0 %v14047_v42  ;;  %12934 = vmatpush3.bf16.msra.mxu1 %v14048_v30 }
 0x833   :  { %12915 = vmatprep.subr.bf16.mxu0 %v14049_v38  ;;  %12935 = vmatprep.subr.bf16.mxu1 %v14050_v6 }
 0x836   :  { %12916 = vmatpush3.bf16.msra.mxu0 %v14049_v38  ;;  %12936 = vmatpush3.bf16.msra.mxu1 %v14050_v6 }
 0x837   :  { %13861 = vmatprep.subr.msk.bf16.mxu0 %vm604_vm2, %v11118_v9  ;;  %13862 = vmatprep.subr.msk.bf16.mxu1 %vm604_vm2, %v11118_v9 }
 0x839   :  { %12918 = vmatmul.mubr.msk.bf16.vlgmr.msra.gmra.mxu0 %vm122_vm1, %v14052_v10  ;;  %12938 = vmatmul.mubr.msk.bf16.vlgmr.msra.gmra.mxu1 %vm122_vm1, %v14052_v10 }
 0x83a   :  { %12921 = vmatprep.mubr.msk.bf16.mxu0 %vm122_vm1, %v14053_v20  ;;  %12941 = vmatprep.mubr.msk.bf16.mxu1 %vm122_vm1, %v14053_v20 }
 0x83b   :  { %12946 = vmatpush3.bf16.msra.mxu0 %v4775_v23  ;;  %12956 = vmatpush3.bf16.msra.mxu1 %v4775_v23 }
 0x83c   :  { %12965 = vmatprep.subr.bf16.mxu0 %v5031_v14  ;;  %12985 = vmatprep.subr.bf16.mxu1 %v5132_v13 }
 0x841   :  { %12922 = vmatmul.mubr.msk.bf16.gmra.mxu0 %vm122_vm1, %v14054_v62  ;;  %12942 = vmatmul.mubr.msk.bf16.gmra.mxu1 %vm122_vm1, %v14054_v62 }
 0x8e1   :  { %v12889_v24 = vpop.f32.mrf.mxu0  ;;  %v12899_v57 = vpop.f32.mrf.mxu1 }
 0x8e2   :  { %v15434_v15 = vadd.f32 %v12889_v24, %v15318_v53  ;;  %v15437_v45 = vadd.f32 %v12899_v57, %v15321_v39 }
 0x8e3   :  { %v4363_v27 = vpop.f32.mrf.mxu0  ;;  %v4440_v25 = vpop.f32.mrf.mxu1 }
 0x8e4   :  { %v15440_v28 = vadd.f32 %v4363_v27, %v15324_v55  ;;  %v15443_v42 = vadd.f32 %v4440_v25, %v15327_v61 }
 0x8e5   :  { %v12890_v30 = vpop.f32.mrf.mxu0  ;;  %v12900_v38 = vpop.f32.mrf.mxu1 }
 0x8e6   :  { %v15446_v6 = vadd.f32 %v12890_v30, %v15330_v44  ;;  %v15449_v10 = vadd.f32 %v12900_v38, %v15333_v35 }
 0x8e7   :  { %v15451_v53 = vpop.f32.mrf.mxu0  ;;  %v15453_v39 = vpop.f32.mrf.mxu1 }
 0x8e8   :  { %16794 = vst [vmem:[#allocation11_spill] sm:$0xff] %v15451_v53  ;;  %16795 = vst [vmem:[#allocation12_spill] sm:$0xff] %v15453_v39 }
 0x8e9   :  { %v12893_v20 = vpop.f32.mrf.mxu0  ;;  %v12903_v62 = vpop.f32.mrf.mxu1 }
 0x8ea   :  { %v15456_v55 = vadd.f32 %v12893_v20, %v15340_v60  ;;  %v15459_v61 = vadd.f32 %v12903_v62, %v15343_v43 }
 0x8eb   :  { %v4379_v9 = vpop.f32.mrf.mxu0  ;;  %v4456_v23 = vpop.f32.mrf.mxu1 }
 0x8ec   :  { %v15462_v44 = vadd.f32 %v4379_v9, %v15346_v56  ;;  %v15465_v35 = vadd.f32 %v4456_v23, %v15349_v5 }
 0x8ed   :  { %v12894_v34 = vpop.f32.mrf.mxu0  ;;  %v12904_v19 = vpop.f32.mrf.mxu1 }
 0x8ee   :  { %v15468_v24 = vadd.f32 %v12894_v34, %v15352_v26  ;;  %v15471_v57 = vadd.f32 %v12904_v19, %v15355_v46  ;;  %v14057_v46 = vld [vmem:[%s16778_s0 + $0x78] sm:$0xff]   ;;  %v14058_v19 = vld [vmem:[%s16778_s0 + $0xa4] sm:$0xff]  }
 0x8ef   :  { %v15473_v60 = vpop.f32.mrf.mxu0  ;;  %v15475_v43 = vpop.f32.mrf.mxu1 }
 0x8f0   :  { %16796 = vst [vmem:[#allocation13_spill] sm:$0xff] %v15473_v60  ;;  %16797 = vst [vmem:[#allocation14_spill] sm:$0xff] %v15475_v43 }
 0x8f9   :  { %v12919_v27 = vpop.f32.mrf.mxu0  ;;  %v12939_v25 = vpop.f32.mrf.mxu1 }
 0x8fb   :  { %v4620_v30 = vpop.f32.mrf.mxu0  ;;  %v4721_v56 = vpop.f32.mrf.mxu1 }
 0x8fd   :  { %v12920_v38 = vpop.f32.mrf.mxu0  ;;  %v12940_v20 = vpop.f32.mrf.mxu1 }
 0x8fe   :  { %v4753_v39 = vpack.c.bf16 %v12920_v38, %v12919_v27  ;;  %v4757_v26 = vpack.c.bf16 %v12940_v20, %v12939_v25 }
 0x8ff   :  { %v4623_v5 = vpop.f32.mrf.mxu0  ;;  %v4724_v62 = vpop.f32.mrf.mxu1 }
 0x900   :  { %v4752_v9 = vpack.c.bf16 %v4623_v5, %v4620_v30  ;;  %v4756_v23 = vpack.c.bf16 %v4724_v62, %v4721_v56  ;;  %v14059_v30 = vld [vmem:[%s16778_s0 + $0x70] sm:$0xff]   ;;  %v14060_v56 = vld [vmem:[%s16778_s0 + $0x9c] sm:$0xff]  }
 0x901   :  { %v12923_v34 = vpop.f32.mrf.mxu0  ;;  %v12943_v53 = vpop.f32.mrf.mxu1 }
 0x902   :  { %12947 = vmatprep.mubr.msk.bf16.mxu0 %vm591_vm3, %v4752_v9  ;;  %12957 = vmatprep.mubr.msk.bf16.mxu1 %vm591_vm3, %v4756_v23  ;;  %v14065_v23 = vld [vmem:[%s16778_s0 + $0x58] sm:$0xff]  }
 0x903   :  { %v4636_v43 = vpop.f32.mrf.mxu0  ;;  %v4737_v60 = vpop.f32.mrf.mxu1  ;;  %12948 = vmatmul.mubr.msk.bf16.vlgmr.msra.gmra.mxu0 %vm591_vm3, %v4753_v39  ;;  %12958 = vmatmul.mubr.msk.bf16.vlgmr.msra.gmra.mxu1 %vm591_vm3, %v4757_v26  ;;  %v14066_v26 = vld [vmem:[%s16778_s0 + $0x84] sm:$0xff]  }
 0x904   :  { %12966 = vmatpush3.bf16.msra.mxu0 %v5031_v14  ;;  %12986 = vmatpush3.bf16.msra.mxu1 %v5132_v13  ;;  %v14061_v14 = vld [vmem:[%s16778_s0 + $0x68] sm:$0xff]   ;;  %v14062_v13 = vld [vmem:[%s16778_s0 + $0x94] sm:$0xff]  }
 0x905   :  { %v12924_v27 = vpop.f32.mrf.mxu0  ;;  %v12944_v25 = vpop.f32.mrf.mxu1  ;;  %12967 = vmatprep.subr.bf16.mxu0 %v14057_v46  ;;  %12987 = vmatprep.subr.bf16.mxu1 %v14058_v19 }
 0x906   :  { %v4755_v38 = vpack.c.bf16 %v12924_v27, %v12923_v34  ;;  %v4759_v20 = vpack.c.bf16 %v12944_v25, %v12943_v53  ;;  %v14067_v53 = vld [vmem:[%s16779_s1 + $0x60] sm:$0xff]   ;;  %v14068_v34 = vld [vmem:[%s16779_s1 + $0x68] sm:$0xff]   ;;  %v11181_v27 = vld [vmem:[%s16780_s2 + $0x16] sm:$0x3] }
 0x907   :  { %v4639_v5 = vpop.f32.mrf.mxu0  ;;  %v4740_v39 = vpop.f32.mrf.mxu1  ;;  %v5222_v25 = vsel %vm604_vm2, %v11181_v27, 0 }
 0x908   :  { %v4754_v62 = vpack.c.bf16 %v4639_v5, %v4636_v43  ;;  %v4758_v9 = vpack.c.bf16 %v4740_v39, %v4737_v60  ;;  %12968 = vmatpush3.bf16.msra.mxu0 %v14057_v46  ;;  %12988 = vmatpush3.bf16.msra.mxu1 %v14058_v19  ;;  %v14063_v60 = vld [vmem:[%s16778_s0 + $0x60] sm:$0xff]   ;;  %v14064_v43 = vld [vmem:[%s16778_s0 + $0x8c] sm:$0xff]   ;;  %v14070_v19 = vld [vmem:[%s16779_s1 + $0x78] sm:$0xff]  }
 0x909   :  { %12969 = vmatprep.subr.bf16.mxu0 %v14059_v30  ;;  %12989 = vmatprep.subr.bf16.mxu1 %v14060_v56  ;;  %v14069_v46 = vld [vmem:[%s16779_s1 + $0x70] sm:$0xff]  }
 0x90a   :  { %12951 = vmatprep.mubr.msk.bf16.mxu0 %vm591_vm3, %v4754_v62  ;;  %12961 = vmatprep.mubr.msk.bf16.mxu1 %vm591_vm3, %v4758_v9 }
 0x90b   :  { %12952 = vmatmul.mubr.msk.bf16.gmra.mxu0 %vm591_vm3, %v4755_v38  ;;  %12962 = vmatmul.mubr.msk.bf16.gmra.mxu1 %vm591_vm3, %v4759_v20 }
 0x90c   :  { %12970 = vmatpush3.bf16.msra.mxu0 %v14059_v30  ;;  %12990 = vmatpush3.bf16.msra.mxu1 %v14060_v56  ;;  %v14071_v30 = vld [vmem:[%s16778_s0 + $0xd8] ss:$0 sps:$4 sm:$0x11]   ;;  %v14072_v56 = vld [vmem:[%s16778_s0 + $0x104] ss:$0 sps:$4 sm:$0x11]  }
 0x90d   :  { %12971 = vmatprep.subr.bf16.mxu0 %v14061_v14  ;;  %12991 = vmatprep.subr.bf16.mxu1 %v14062_v13  ;;  %v5478_v38 = vand.u32 %v14071_v30, %v14259_v4  ;;  %v5579_v20 = vand.u32 %v14072_v56, %v14259_v4 }
 0x90e   :  { %12977 = vmatprep.mubr.msk.bf16.mxu0 %vm122_vm1, %v14067_v53  ;;  %12997 = vmatprep.mubr.msk.bf16.mxu1 %vm122_vm1, %v14067_v53 }
 0x910   :  { %12972 = vmatpush3.bf16.msra.mxu0 %v14061_v14  ;;  %12992 = vmatpush3.bf16.msra.mxu1 %v14062_v13 }
 0x911   :  { %12973 = vmatprep.subr.bf16.mxu0 %v14063_v60  ;;  %12993 = vmatprep.subr.bf16.mxu1 %v14064_v43 }
 0x914   :  { %12974 = vmatpush3.bf16.msra.mxu0 %v14063_v60  ;;  %12994 = vmatpush3.bf16.msra.mxu1 %v14064_v43 }
 0x915   :  { %12975 = vmatprep.subr.bf16.mxu0 %v14065_v23  ;;  %12995 = vmatprep.subr.bf16.mxu1 %v14066_v26 }
 0x918   :  { %12976 = vmatpush3.bf16.msra.mxu0 %v14065_v23  ;;  %12996 = vmatpush3.bf16.msra.mxu1 %v14066_v26 }
 0x919   :  { %13863 = vmatprep.subr.msk.bf16.mxu0 %vm604_vm2, %v11181_v27  ;;  %13864 = vmatprep.subr.msk.bf16.mxu1 %vm604_vm2, %v11181_v27 }
 0x91b   :  { %12978 = vmatmul.mubr.msk.bf16.vlgmr.msra.gmra.mxu0 %vm122_vm1, %v14068_v34  ;;  %12998 = vmatmul.mubr.msk.bf16.vlgmr.msra.gmra.mxu1 %vm122_vm1, %v14068_v34 }
 0x91c   :  { %12981 = vmatprep.mubr.msk.bf16.mxu0 %vm122_vm1, %v14069_v46  ;;  %13001 = vmatprep.mubr.msk.bf16.mxu1 %vm122_vm1, %v14069_v46 }
 0x91d   :  { %13006 = vmatpush3.bf16.msra.mxu0 %v5222_v25  ;;  %13016 = vmatpush3.bf16.msra.mxu1 %v5222_v25 }
 0x91e   :  { %13025 = vmatprep.subr.bf16.mxu0 %v5478_v38  ;;  %13045 = vmatprep.subr.bf16.mxu1 %v5579_v20 }
 0x923   :  { %12982 = vmatmul.mubr.msk.bf16.gmra.mxu0 %vm122_vm1, %v14070_v19  ;;  %13002 = vmatmul.mubr.msk.bf16.gmra.mxu1 %vm122_vm1, %v14070_v19 }
 0x9c3   :  { %v12949_v5 = vpop.f32.mrf.mxu0  ;;  %v12959_v39 = vpop.f32.mrf.mxu1 }
 0x9c4   :  { %v15550_v62 = vadd.f32 %v12949_v5, %v15434_v15  ;;  %v15553_v9 = vadd.f32 %v12959_v39, %v15437_v45 }
 0x9c5   :  { %v4811_v14 = vpop.f32.mrf.mxu0  ;;  %v4888_v13 = vpop.f32.mrf.mxu1 }
 0x9c6   :  { %v15556_v53 = vadd.f32 %v4811_v14, %v15440_v28  ;;  %v15559_v60 = vadd.f32 %v4888_v13, %v15443_v42 }
 0x9c7   :  { %v12950_v43 = vpop.f32.mrf.mxu0  ;;  %v12960_v23 = vpop.f32.mrf.mxu1 }
 0x9c8   :  { %v15562_v26 = vadd.f32 %v12950_v43, %v15446_v6  ;;  %v15565_v34 = vadd.f32 %v12960_v23, %v15449_v10 }
 0x9c9   :  { %v15567_v15 = vpop.f32.mrf.mxu0  ;;  %v15569_v45 = vpop.f32.mrf.mxu1 }
 0x9ca   :  { %16798 = vst [vmem:[#allocation15_spill] sm:$0xff] %v15567_v15  ;;  %16799 = vst [vmem:[#allocation16_spill] sm:$0xff] %v15569_v45 }
 0x9cb   :  { %v12953_v46 = vpop.f32.mrf.mxu0  ;;  %v12963_v19 = vpop.f32.mrf.mxu1 }
 0x9cc   :  { %v15572_v28 = vadd.f32 %v12953_v46, %v15456_v55  ;;  %v15575_v42 = vadd.f32 %v12963_v19, %v15459_v61 }
 0x9cd   :  { %v4827_v27 = vpop.f32.mrf.mxu0  ;;  %v4904_v25 = vpop.f32.mrf.mxu1 }
 0x9ce   :  { %v15578_v6 = vadd.f32 %v4827_v27, %v15462_v44  ;;  %v15581_v10 = vadd.f32 %v4904_v25, %v15465_v35 }
 0x9cf   :  { %v12954_v30 = vpop.f32.mrf.mxu0  ;;  %v12964_v56 = vpop.f32.mrf.mxu1 }
 0x9d0   :  { %v15584_v5 = vadd.f32 %v12954_v30, %v15468_v24  ;;  %v15587_v39 = vadd.f32 %v12964_v56, %v15471_v57  ;;  %v14073_v57 = vld [vmem:[%s16778_s0 + $0xd0] sm:$0xff]   ;;  %v14074_v56 = vld [vmem:[%s16778_s0 + $0xfc] sm:$0xff]  }
 0x9d1   :  { %v15589_v55 = vpop.f32.mrf.mxu0  ;;  %v15591_v61 = vpop.f32.mrf.mxu1 }
 0x9d2   :  { %16800 = vst [vmem:[#allocation17_spill] sm:$0xff] %v15589_v55  ;;  %16801 = vst [vmem:[#allocation18_spill] sm:$0xff] %v15591_v61 }
 0x9db   :  { %v12979_v14 = vpop.f32.mrf.mxu0  ;;  %v12999_v13 = vpop.f32.mrf.mxu1 }
 0x9dd   :  { %v5067_v43 = vpop.f32.mrf.mxu0  ;;  %v5168_v44 = vpop.f32.mrf.mxu1 }
 0x9df   :  { %v12980_v23 = vpop.f32.mrf.mxu0  ;;  %v13000_v46 = vpop.f32.mrf.mxu1 }
 0x9e0   :  { %v5200_v45 = vpack.c.bf16 %v12980_v23, %v12979_v14  ;;  %v5204_v24 = vpack.c.bf16 %v13000_v46, %v12999_v13 }
 0x9e1   :  { %v5070_v35 = vpop.f32.mrf.mxu0  ;;  %v5171_v19 = vpop.f32.mrf.mxu1 }
 0x9e2   :  { %v5199_v27 = vpack.c.bf16 %v5070_v35, %v5067_v43  ;;  %v5203_v25 = vpack.c.bf16 %v5171_v19, %v5168_v44  ;;  %v14075_v43 = vld [vmem:[%s16778_s0 + $0xc8] sm:$0xff]   ;;  %v14076_v44 = vld [vmem:[%s16778_s0 + $0xf4] sm:$0xff]  }
 0x9e3   :  { %v12983_v30 = vpop.f32.mrf.mxu0  ;;  %v13003_v15 = vpop.f32.mrf.mxu1 }
 0x9e4   :  { %13007 = vmatprep.mubr.msk.bf16.mxu0 %vm591_vm3, %v5199_v27  ;;  %13017 = vmatprep.mubr.msk.bf16.mxu1 %vm591_vm3, %v5203_v25  ;;  %v14081_v25 = vld [vmem:[%s16778_s0 + $0xb0] sm:$0xff]  }
 0x9e5   :  { %v5083_v61 = vpop.f32.mrf.mxu0  ;;  %v5184_v55 = vpop.f32.mrf.mxu1  ;;  %13008 = vmatmul.mubr.msk.bf16.vlgmr.msra.gmra.mxu0 %vm591_vm3, %v5200_v45  ;;  %13018 = vmatmul.mubr.msk.bf16.vlgmr.msra.gmra.mxu1 %vm591_vm3, %v5204_v24  ;;  %v14082_v24 = vld [vmem:[%s16778_s0 + $0xdc] sm:$0xff]  }
 0x9e6   :  { %13026 = vmatpush3.bf16.msra.mxu0 %v5478_v38  ;;  %13046 = vmatpush3.bf16.msra.mxu1 %v5579_v20  ;;  %v14077_v38 = vld [vmem:[%s16778_s0 + $0xc0] sm:$0xff]   ;;  %v14078_v20 = vld [vmem:[%s16778_s0 + $0xec] sm:$0xff]  }
 0x9e7   :  { %v12984_v14 = vpop.f32.mrf.mxu0  ;;  %v13004_v13 = vpop.f32.mrf.mxu1  ;;  %13027 = vmatprep.subr.bf16.mxu0 %v14073_v57  ;;  %13047 = vmatprep.subr.bf16.mxu1 %v14074_v56 }
 0x9e8   :  { %v5202_v23 = vpack.c.bf16 %v12984_v14, %v12983_v30  ;;  %v5206_v46 = vpack.c.bf16 %v13004_v13, %v13003_v15  ;;  %v14083_v15 = vld [vmem:[%s16779_s1 + $0x40] sm:$0xff]   ;;  %v14084_v30 = vld [vmem:[%s16779_s1 + $0x48] sm:$0xff]   ;;  %v11244_v14 = vld [vmem:[%s16780_s2 + $0x18] sm:$0x3] }
 0x9e9   :  { %v5086_v35 = vpop.f32.mrf.mxu0  ;;  %v5187_v45 = vpop.f32.mrf.mxu1  ;;  %v5669_v13 = vsel %vm604_vm2, %v11244_v14, 0 }
 0x9ea   :  { %v5201_v19 = vpack.c.bf16 %v5086_v35, %v5083_v61  ;;  %v5205_v27 = vpack.c.bf16 %v5187_v45, %v5184_v55  ;;  %13028 = vmatpush3.bf16.msra.mxu0 %v14073_v57  ;;  %13048 = vmatpush3.bf16.msra.mxu1 %v14074_v56  ;;  %v14079_v55 = vld [vmem:[%s16778_s0 + $0xb8] sm:$0xff]   ;;  %v14080_v61 = vld [vmem:[%s16778_s0 + $0xe4] sm:$0xff]   ;;  %v14085_v57 = vld [vmem:[%s16779_s1 + $0x50] sm:$0xff]  }
 0x9eb   :  { %13029 = vmatprep.subr.bf16.mxu0 %v14075_v43  ;;  %13049 = vmatprep.subr.bf16.mxu1 %v14076_v44  ;;  %v14086_v56 = vld [vmem:[%s16779_s1 + $0x58] sm:$0xff]  }
 0x9ec   :  { %13011 = vmatprep.mubr.msk.bf16.mxu0 %vm591_vm3, %v5201_v19  ;;  %13021 = vmatprep.mubr.msk.bf16.mxu1 %vm591_vm3, %v5205_v27 }
 0x9ed   :  { %13012 = vmatmul.mubr.msk.bf16.gmra.mxu0 %vm591_vm3, %v5202_v23  ;;  %13022 = vmatmul.mubr.msk.bf16.gmra.mxu1 %vm591_vm3, %v5206_v46 }
 0x9ee   :  { %13030 = vmatpush3.bf16.msra.mxu0 %v14075_v43  ;;  %13050 = vmatpush3.bf16.msra.mxu1 %v14076_v44  ;;  %v14087_v43 = vld [vmem:[%s16778_s0 + $0x130] ss:$0 sps:$4 sm:$0x11]   ;;  %v14088_v44 = vld [vmem:[%s16778_s0 + $0x15c] ss:$0 sps:$4 sm:$0x11]  }
 0x9ef   :  { %13031 = vmatprep.subr.bf16.mxu0 %v14077_v38  ;;  %13051 = vmatprep.subr.bf16.mxu1 %v14078_v20  ;;  %v5925_v23 = vand.u32 %v14087_v43, %v14259_v4  ;;  %v6026_v46 = vand.u32 %v14088_v44, %v14259_v4 }
 0x9f0   :  { %13037 = vmatprep.mubr.msk.bf16.mxu0 %vm122_vm1, %v14083_v15  ;;  %13057 = vmatprep.mubr.msk.bf16.mxu1 %vm122_vm1, %v14083_v15 }
 0x9f2   :  { %13032 = vmatpush3.bf16.msra.mxu0 %v14077_v38  ;;  %13052 = vmatpush3.bf16.msra.mxu1 %v14078_v20 }
 0x9f3   :  { %13033 = vmatprep.subr.bf16.mxu0 %v14079_v55  ;;  %13053 = vmatprep.subr.bf16.mxu1 %v14080_v61 }
 0x9f6   :  { %13034 = vmatpush3.bf16.msra.mxu0 %v14079_v55  ;;  %13054 = vmatpush3.bf16.msra.mxu1 %v14080_v61 }
 0x9f7   :  { %13035 = vmatprep.subr.bf16.mxu0 %v14081_v25  ;;  %13055 = vmatprep.subr.bf16.mxu1 %v14082_v24 }
 0x9fa   :  { %13036 = vmatpush3.bf16.msra.mxu0 %v14081_v25  ;;  %13056 = vmatpush3.bf16.msra.mxu1 %v14082_v24 }
 0x9fb   :  { %13865 = vmatprep.subr.msk.bf16.mxu0 %vm604_vm2, %v11244_v14  ;;  %13866 = vmatprep.subr.msk.bf16.mxu1 %vm604_vm2, %v11244_v14 }
 0x9fd   :  { %13038 = vmatmul.mubr.msk.bf16.vlgmr.msra.gmra.mxu0 %vm122_vm1, %v14084_v30  ;;  %13058 = vmatmul.mubr.msk.bf16.vlgmr.msra.gmra.mxu1 %vm122_vm1, %v14084_v30 }
 0x9fe   :  { %13041 = vmatprep.mubr.msk.bf16.mxu0 %vm122_vm1, %v14085_v57  ;;  %13061 = vmatprep.mubr.msk.bf16.mxu1 %vm122_vm1, %v14085_v57 }
 0x9ff   :  { %13066 = vmatpush3.bf16.msra.mxu0 %v5669_v13  ;;  %13076 = vmatpush3.bf16.msra.mxu1 %v5669_v13 }
 0xa00   :  { %13085 = vmatprep.subr.bf16.mxu0 %v5925_v23  ;;  %13105 = vmatprep.subr.bf16.mxu1 %v6026_v46 }
 0xa05   :  { %13042 = vmatmul.mubr.msk.bf16.gmra.mxu0 %vm122_vm1, %v14086_v56  ;;  %13062 = vmatmul.mubr.msk.bf16.gmra.mxu1 %vm122_vm1, %v14086_v56 }
 0xaa5   :  { %v13009_v35 = vpop.f32.mrf.mxu0  ;;  %v13019_v45 = vpop.f32.mrf.mxu1 }
 0xaa6   :  { %v15666_v19 = vadd.f32 %v13009_v35, %v15550_v62  ;;  %v15669_v27 = vadd.f32 %v13019_v45, %v15553_v9 }
 0xaa7   :  { %v5258_v38 = vpop.f32.mrf.mxu0  ;;  %v5335_v20 = vpop.f32.mrf.mxu1 }
 0xaa8   :  { %v15672_v15 = vadd.f32 %v5258_v38, %v15556_v53  ;;  %v15675_v55 = vadd.f32 %v5335_v20, %v15559_v60 }
 0xaa9   :  { %v13010_v61 = vpop.f32.mrf.mxu0  ;;  %v13020_v25 = vpop.f32.mrf.mxu1 }
 0xaaa   :  { %v15678_v24 = vadd.f32 %v13010_v61, %v15562_v26  ;;  %v15681_v30 = vadd.f32 %v13020_v25, %v15565_v34 }
 0xaab   :  { %v15683_v62 = vpop.f32.mrf.mxu0  ;;  %v15685_v9 = vpop.f32.mrf.mxu1 }
 0xaac   :  { %16802 = vst [vmem:[#allocation19_spill] sm:$0xff] %v15683_v62  ;;  %16803 = vst [vmem:[#allocation20_spill] sm:$0xff] %v15685_v9 }
 0xaad   :  { %v13013_v57 = vpop.f32.mrf.mxu0  ;;  %v13023_v56 = vpop.f32.mrf.mxu1 }
 0xaae   :  { %v15688_v53 = vadd.f32 %v13013_v57, %v15572_v28  ;;  %v15691_v60 = vadd.f32 %v13023_v56, %v15575_v42 }
 0xaaf   :  { %v5274_v14 = vpop.f32.mrf.mxu0  ;;  %v5351_v13 = vpop.f32.mrf.mxu1 }
 0xab0   :  { %v15694_v26 = vadd.f32 %v5274_v14, %v15578_v6  ;;  %v15697_v34 = vadd.f32 %v5351_v13, %v15581_v10 }
 0xab1   :  { %v13014_v43 = vpop.f32.mrf.mxu0  ;;  %v13024_v44 = vpop.f32.mrf.mxu1 }
 0xab2   :  { %v15700_v35 = vadd.f32 %v13014_v43, %v15584_v5  ;;  %v15703_v45 = vadd.f32 %v13024_v44, %v15587_v39  ;;  %v14089_v39 = vld [vmem:[%s16778_s0 + $0x128] sm:$0xff]   ;;  %v14090_v44 = vld [vmem:[%s16778_s0 + $0x154] sm:$0xff]  }
 0xab3   :  { %v15705_v28 = vpop.f32.mrf.mxu0  ;;  %v15707_v42 = vpop.f32.mrf.mxu1 }
 0xab4   :  { %16804 = vst [vmem:[#allocation21_spill] sm:$0xff] %v15705_v28  ;;  %16805 = vst [vmem:[#allocation22_spill] sm:$0xff] %v15707_v42 }
 0xabd   :  { %v13039_v38 = vpop.f32.mrf.mxu0  ;;  %v13059_v20 = vpop.f32.mrf.mxu1 }
 0xabf   :  { %v5514_v61 = vpop.f32.mrf.mxu0  ;;  %v5615_v6 = vpop.f32.mrf.mxu1 }
 0xac1   :  { %v13040_v25 = vpop.f32.mrf.mxu0  ;;  %v13060_v57 = vpop.f32.mrf.mxu1 }
 0xac2   :  { %v5647_v9 = vpack.c.bf16 %v13040_v25, %v13039_v38  ;;  %v5651_v5 = vpack.c.bf16 %v13060_v57, %v13059_v20 }
 0xac3   :  { %v5517_v10 = vpop.f32.mrf.mxu0  ;;  %v5618_v56 = vpop.f32.mrf.mxu1 }
 0xac4   :  { %v5646_v14 = vpack.c.bf16 %v5517_v10, %v5514_v61  ;;  %v5650_v13 = vpack.c.bf16 %v5618_v56, %v5615_v6  ;;  %v14091_v61 = vld [vmem:[%s16778_s0 + $0x120] sm:$0xff]   ;;  %v14092_v6 = vld [vmem:[%s16778_s0 + $0x14c] sm:$0xff]  }
 0xac5   :  { %v13043_v43 = vpop.f32.mrf.mxu0  ;;  %v13063_v62 = vpop.f32.mrf.mxu1 }
 0xac6   :  { %13067 = vmatprep.mubr.msk.bf16.mxu0 %vm591_vm3, %v5646_v14  ;;  %13077 = vmatprep.mubr.msk.bf16.mxu1 %vm591_vm3, %v5650_v13  ;;  %v14097_v13 = vld [vmem:[%s16778_s0 + $0x108] sm:$0xff]  }
 0xac7   :  { %v5530_v42 = vpop.f32.mrf.mxu0  ;;  %v5631_v28 = vpop.f32.mrf.mxu1  ;;  %13068 = vmatmul.mubr.msk.bf16.vlgmr.msra.gmra.mxu0 %vm591_vm3, %v5647_v9  ;;  %13078 = vmatmul.mubr.msk.bf16.vlgmr.msra.gmra.mxu1 %vm591_vm3, %v5651_v5  ;;  %v14098_v5 = vld [vmem:[%s16778_s0 + $0x134] sm:$0xff]  }
 0xac8   :  { %13086 = vmatpush3.bf16.msra.mxu0 %v5925_v23  ;;  %13106 = vmatpush3.bf16.msra.mxu1 %v6026_v46  ;;  %v14093_v23 = vld [vmem:[%s16778_s0 + $0x118] sm:$0xff]   ;;  %v14094_v46 = vld [vmem:[%s16778_s0 + $0x144] sm:$0xff]  }
 0xac9   :  { %v13044_v38 = vpop.f32.mrf.mxu0  ;;  %v13064_v20 = vpop.f32.mrf.mxu1  ;;  %13087 = vmatprep.subr.bf16.mxu0 %v14089_v39  ;;  %13107 = vmatprep.subr.bf16.mxu1 %v14090_v44 }
 0xaca   :  { %v5649_v25 = vpack.c.bf16 %v13044_v38, %v13043_v43  ;;  %v5653_v57 = vpack.c.bf16 %v13064_v20, %v13063_v62  ;;  %v14099_v62 = vld [vmem:[%s16779_s1 + $0x40] sm:$0xff]   ;;  %v14100_v43 = vld [vmem:[%s16779_s1 + $0x48] sm:$0xff]   ;;  %v11307_v38 = vld [vmem:[%s16780_s2 + $0x1a] sm:$0x3] }
 0xacb   :  { %v5533_v10 = vpop.f32.mrf.mxu0  ;;  %v5634_v9 = vpop.f32.mrf.mxu1  ;;  %v6116_v20 = vsel %vm604_vm2, %v11307_v38, 0 }
 0xacc   :  { %v5648_v56 = vpack.c.bf16 %v5533_v10, %v5530_v42  ;;  %v5652_v14 = vpack.c.bf16 %v5634_v9, %v5631_v28  ;;  %13088 = vmatpush3.bf16.msra.mxu0 %v14089_v39  ;;  %13108 = vmatpush3.bf16.msra.mxu1 %v14090_v44  ;;  %v14095_v28 = vld [vmem:[%s16778_s0 + $0x110] sm:$0xff]   ;;  %v14096_v42 = vld [vmem:[%s16778_s0 + $0x13c] sm:$0xff]  }
 0xacd   :  { %13089 = vmatprep.subr.bf16.mxu0 %v14091_v61  ;;  %13109 = vmatprep.subr.bf16.mxu1 %v14092_v6  ;;  %v14101_v39 = vld [vmem:[%s16779_s1 + $0x50] sm:$0xff]   ;;  %v14102_v44 = vld [vmem:[%s16779_s1 + $0x58] sm:$0xff]  }
 0xace   :  { %13071 = vmatprep.mubr.msk.bf16.mxu0 %vm591_vm3, %v5648_v56  ;;  %13081 = vmatprep.mubr.msk.bf16.mxu1 %vm591_vm3, %v5652_v14 }
 0xacf   :  { %13072 = vmatmul.mubr.msk.bf16.gmra.mxu0 %vm591_vm3, %v5649_v25  ;;  %13082 = vmatmul.mubr.msk.bf16.gmra.mxu1 %vm591_vm3, %v5653_v57 }
 0xad0   :  { %13090 = vmatpush3.bf16.msra.mxu0 %v14091_v61  ;;  %13110 = vmatpush3.bf16.msra.mxu1 %v14092_v6  ;;  %v14103_v61 = vld [vmem:[%s16778_s0 + $0xd8] ss:$0 sps:$4 sm:$0x11]   ;;  %v14104_v6 = vld [vmem:[%s16778_s0 + $0x104] ss:$0 sps:$4 sm:$0x11]  }
 0xad1   :  { %13091 = vmatprep.subr.bf16.mxu0 %v14093_v23  ;;  %13111 = vmatprep.subr.bf16.mxu1 %v14094_v46  ;;  %v6372_v25 = vand.u32 %v14103_v61, %v14259_v4  ;;  %v6473_v57 = vand.u32 %v14104_v6, %v14259_v4 }
 0xad2   :  { %13097 = vmatprep.mubr.msk.bf16.mxu0 %vm122_vm1, %v14099_v62  ;;  %13117 = vmatprep.mubr.msk.bf16.mxu1 %vm122_vm1, %v14099_v62 }
 0xad4   :  { %13092 = vmatpush3.bf16.msra.mxu0 %v14093_v23  ;;  %13112 = vmatpush3.bf16.msra.mxu1 %v14094_v46 }
 0xad5   :  { %13093 = vmatprep.subr.bf16.mxu0 %v14095_v28  ;;  %13113 = vmatprep.subr.bf16.mxu1 %v14096_v42 }
 0xad8   :  { %13094 = vmatpush3.bf16.msra.mxu0 %v14095_v28  ;;  %13114 = vmatpush3.bf16.msra.mxu1 %v14096_v42 }
 0xad9   :  { %13095 = vmatprep.subr.bf16.mxu0 %v14097_v13  ;;  %13115 = vmatprep.subr.bf16.mxu1 %v14098_v5 }
 0xadc   :  { %13096 = vmatpush3.bf16.msra.mxu0 %v14097_v13  ;;  %13116 = vmatpush3.bf16.msra.mxu1 %v14098_v5 }
 0xadd   :  { %13867 = vmatprep.subr.msk.bf16.mxu0 %vm604_vm2, %v11307_v38  ;;  %13868 = vmatprep.subr.msk.bf16.mxu1 %vm604_vm2, %v11307_v38 }
 0xadf   :  { %13098 = vmatmul.mubr.msk.bf16.vlgmr.msra.gmra.mxu0 %vm122_vm1, %v14100_v43  ;;  %13118 = vmatmul.mubr.msk.bf16.vlgmr.msra.gmra.mxu1 %vm122_vm1, %v14100_v43 }
 0xae0   :  { %13101 = vmatprep.mubr.msk.bf16.mxu0 %vm122_vm1, %v14101_v39  ;;  %13121 = vmatprep.mubr.msk.bf16.mxu1 %vm122_vm1, %v14101_v39 }
 0xae1   :  { %13126 = vmatpush3.bf16.msra.mxu0 %v6116_v20  ;;  %13136 = vmatpush3.bf16.msra.mxu1 %v6116_v20 }
 0xae2   :  { %13145 = vmatprep.subr.bf16.mxu0 %v6372_v25  ;;  %13165 = vmatprep.subr.bf16.mxu1 %v6473_v57 }
 0xae7   :  { %13102 = vmatmul.mubr.msk.bf16.gmra.mxu0 %vm122_vm1, %v14102_v44  ;;  %13122 = vmatmul.mubr.msk.bf16.gmra.mxu1 %vm122_vm1, %v14102_v44 }
 0xb87   :  { %v13069_v10 = vpop.f32.mrf.mxu0  ;;  %v13079_v9 = vpop.f32.mrf.mxu1 }
 0xb88   :  { %v15782_v56 = vadd.f32 %v13069_v10, %v15666_v19  ;;  %v15785_v14 = vadd.f32 %v13079_v9, %v15669_v27 }
 0xb89   :  { %v5705_v23 = vpop.f32.mrf.mxu0  ;;  %v5782_v46 = vpop.f32.mrf.mxu1 }
 0xb8a   :  { %v15788_v62 = vadd.f32 %v5705_v23, %v15672_v15  ;;  %v15791_v28 = vadd.f32 %v5782_v46, %v15675_v55 }
 0xb8b   :  { %v13070_v42 = vpop.f32.mrf.mxu0  ;;  %v13080_v13 = vpop.f32.mrf.mxu1 }
 0xb8c   :  { %v15794_v5 = vadd.f32 %v13070_v42, %v15678_v24  ;;  %v15797_v43 = vadd.f32 %v13080_v13, %v15681_v30 }
 0xb8d   :  { %v15799_v19 = vpop.f32.mrf.mxu0  ;;  %v15801_v27 = vpop.f32.mrf.mxu1 }
 0xb8e   :  { %16806 = vst [vmem:[#allocation23_spill] sm:$0xff] %v15799_v19  ;;  %16807 = vst [vmem:[#allocation24_spill] sm:$0xff] %v15801_v27 }
 0xb8f   :  { %v13073_v39 = vpop.f32.mrf.mxu0  ;;  %v13083_v44 = vpop.f32.mrf.mxu1 }
 0xb90   :  { %v15804_v15 = vadd.f32 %v13073_v39, %v15688_v53  ;;  %v15807_v55 = vadd.f32 %v13083_v44, %v15691_v60 }
 0xb91   :  { %v5721_v38 = vpop.f32.mrf.mxu0  ;;  %v5798_v20 = vpop.f32.mrf.mxu1 }
 0xb92   :  { %v15810_v24 = vadd.f32 %v5721_v38, %v15694_v26  ;;  %v15813_v30 = vadd.f32 %v5798_v20, %v15697_v34 }
 0xb93   :  { %v13074_v61 = vpop.f32.mrf.mxu0  ;;  %v13084_v6 = vpop.f32.mrf.mxu1 }
 0xb94   :  { %v15816_v10 = vadd.f32 %v13074_v61, %v15700_v35  ;;  %v15819_v9 = vadd.f32 %v13084_v6, %v15703_v45  ;;  %v14105_v45 = vld [vmem:[%s16778_s0 + $0xd0] sm:$0xff]   ;;  %v14106_v6 = vld [vmem:[%s16778_s0 + $0xfc] sm:$0xff]  }
 0xb95   :  { %v15821_v53 = vpop.f32.mrf.mxu0  ;;  %v15823_v60 = vpop.f32.mrf.mxu1 }
 0xb96   :  { %16808 = vst [vmem:[#allocation25_spill] sm:$0xff] %v15821_v53  ;;  %16809 = vst [vmem:[#allocation26_spill] sm:$0xff] %v15823_v60 }
 0xb9f   :  { %v13099_v23 = vpop.f32.mrf.mxu0  ;;  %v13119_v46 = vpop.f32.mrf.mxu1 }
 0xba1   :  { %v5961_v42 = vpop.f32.mrf.mxu0  ;;  %v6062_v26 = vpop.f32.mrf.mxu1 }
 0xba3   :  { %v13100_v13 = vpop.f32.mrf.mxu0  ;;  %v13120_v39 = vpop.f32.mrf.mxu1 }
 0xba4   :  { %v6094_v27 = vpack.c.bf16 %v13100_v13, %v13099_v23  ;;  %v6098_v35 = vpack.c.bf16 %v13120_v39, %v13119_v46 }
 0xba5   :  { %v5964_v34 = vpop.f32.mrf.mxu0  ;;  %v6065_v44 = vpop.f32.mrf.mxu1 }
 0xba6   :  { %v6093_v38 = vpack.c.bf16 %v5964_v34, %v5961_v42  ;;  %v6097_v20 = vpack.c.bf16 %v6065_v44, %v6062_v26  ;;  %v14107_v42 = vld [vmem:[%s16778_s0 + $0xc8] sm:$0xff]   ;;  %v14108_v26 = vld [vmem:[%s16778_s0 + $0xf4] sm:$0xff]  }
 0xba7   :  { %v13103_v61 = vpop.f32.mrf.mxu0  ;;  %v13123_v19 = vpop.f32.mrf.mxu1 }
 0xba8   :  { %13127 = vmatprep.mubr.msk.bf16.mxu0 %vm591_vm3, %v6093_v38  ;;  %13137 = vmatprep.mubr.msk.bf16.mxu1 %vm591_vm3, %v6097_v20  ;;  %v14113_v20 = vld [vmem:[%s16778_s0 + $0xb0] sm:$0xff]  }
 0xba9   :  { %v5977_v60 = vpop.f32.mrf.mxu0  ;;  %v6078_v53 = vpop.f32.mrf.mxu1  ;;  %13128 = vmatmul.mubr.msk.bf16.vlgmr.msra.gmra.mxu0 %vm591_vm3, %v6094_v27  ;;  %13138 = vmatmul.mubr.msk.bf16.vlgmr.msra.gmra.mxu1 %vm591_vm3, %v6098_v35  ;;  %v14114_v35 = vld [vmem:[%s16778_s0 + $0xdc] sm:$0xff]  }
 0xbaa   :  { %13146 = vmatpush3.bf16.msra.mxu0 %v6372_v25  ;;  %13166 = vmatpush3.bf16.msra.mxu1 %v6473_v57  ;;  %v14109_v25 = vld [vmem:[%s16778_s0 + $0xc0] sm:$0xff]   ;;  %v14110_v57 = vld [vmem:[%s16778_s0 + $0xec] sm:$0xff]  }
 0xbab   :  { %v13104_v23 = vpop.f32.mrf.mxu0  ;;  %v13124_v46 = vpop.f32.mrf.mxu1  ;;  %13147 = vmatprep.subr.bf16.mxu0 %v14105_v45  ;;  %13167 = vmatprep.subr.bf16.mxu1 %v14106_v6 }
 0xbac   :  { %v6096_v13 = vpack.c.bf16 %v13104_v23, %v13103_v61  ;;  %v6100_v39 = vpack.c.bf16 %v13124_v46, %v13123_v19  ;;  %v14115_v19 = vld [vmem:[%s16779_s1 + $0x60] sm:$0xff]   ;;  %v14116_v61 = vld [vmem:[%s16779_s1 + $0x68] sm:$0xff]   ;;  %v11370_v23 = vld [vmem:[%s16780_s2 + $0x1c] sm:$0x3] }
 0xbad   :  { %v5980_v34 = vpop.f32.mrf.mxu0  ;;  %v6081_v27 = vpop.f32.mrf.mxu1  ;;  %v6563_v46 = vsel %vm604_vm2, %v11370_v23, 0 }
 0xbae   :  { %v6095_v44 = vpack.c.bf16 %v5980_v34, %v5977_v60  ;;  %v6099_v38 = vpack.c.bf16 %v6081_v27, %v6078_v53  ;;  %13148 = vmatpush3.bf16.msra.mxu0 %v14105_v45  ;;  %13168 = vmatpush3.bf16.msra.mxu1 %v14106_v6  ;;  %v14111_v53 = vld [vmem:[%s16778_s0 + $0xb8] sm:$0xff]   ;;  %v14112_v60 = vld [vmem:[%s16778_s0 + $0xe4] sm:$0xff]   ;;  %v14117_v45 = vld [vmem:[%s16779_s1 + $0x70] sm:$0xff]  }
 0xbaf   :  { %13149 = vmatprep.subr.bf16.mxu0 %v14107_v42  ;;  %13169 = vmatprep.subr.bf16.mxu1 %v14108_v26  ;;  %v14118_v6 = vld [vmem:[%s16779_s1 + $0x78] sm:$0xff]  }
 0xbb0   :  { %13131 = vmatprep.mubr.msk.bf16.mxu0 %vm591_vm3, %v6095_v44  ;;  %13141 = vmatprep.mubr.msk.bf16.mxu1 %vm591_vm3, %v6099_v38 }
 0xbb1   :  { %13132 = vmatmul.mubr.msk.bf16.gmra.mxu0 %vm591_vm3, %v6096_v13  ;;  %13142 = vmatmul.mubr.msk.bf16.gmra.mxu1 %vm591_vm3, %v6100_v39 }
 0xbb2   :  { %13150 = vmatpush3.bf16.msra.mxu0 %v14107_v42  ;;  %13170 = vmatpush3.bf16.msra.mxu1 %v14108_v26  ;;  %v14119_v42 = vld [vmem:[%s16778_s0 + $0x130] ss:$0 sps:$4 sm:$0x11]   ;;  %v14120_v26 = vld [vmem:[%s16778_s0 + $0x15c] ss:$0 sps:$4 sm:$0x11]  }
 0xbb3   :  { %13151 = vmatprep.subr.bf16.mxu0 %v14109_v25  ;;  %13171 = vmatprep.subr.bf16.mxu1 %v14110_v57  ;;  %v6819_v13 = vand.u32 %v14119_v42, %v14259_v4  ;;  %v6920_v39 = vand.u32 %v14120_v26, %v14259_v4 }
 0xbb4   :  { %13157 = vmatprep.mubr.msk.bf16.mxu0 %vm122_vm1, %v14115_v19  ;;  %13177 = vmatprep.mubr.msk.bf16.mxu1 %vm122_vm1, %v14115_v19 }
 0xbb6   :  { %13152 = vmatpush3.bf16.msra.mxu0 %v14109_v25  ;;  %13172 = vmatpush3.bf16.msra.mxu1 %v14110_v57 }
 0xbb7   :  { %13153 = vmatprep.subr.bf16.mxu0 %v14111_v53  ;;  %13173 = vmatprep.subr.bf16.mxu1 %v14112_v60 }
 0xbba   :  { %13154 = vmatpush3.bf16.msra.mxu0 %v14111_v53  ;;  %13174 = vmatpush3.bf16.msra.mxu1 %v14112_v60 }
 0xbbb   :  { %13155 = vmatprep.subr.bf16.mxu0 %v14113_v20  ;;  %13175 = vmatprep.subr.bf16.mxu1 %v14114_v35 }
 0xbbe   :  { %13156 = vmatpush3.bf16.msra.mxu0 %v14113_v20  ;;  %13176 = vmatpush3.bf16.msra.mxu1 %v14114_v35 }
 0xbbf   :  { %13869 = vmatprep.subr.msk.bf16.mxu0 %vm604_vm2, %v11370_v23  ;;  %13870 = vmatprep.subr.msk.bf16.mxu1 %vm604_vm2, %v11370_v23 }
 0xbc1   :  { %13158 = vmatmul.mubr.msk.bf16.vlgmr.msra.gmra.mxu0 %vm122_vm1, %v14116_v61  ;;  %13178 = vmatmul.mubr.msk.bf16.vlgmr.msra.gmra.mxu1 %vm122_vm1, %v14116_v61 }
 0xbc2   :  { %13161 = vmatprep.mubr.msk.bf16.mxu0 %vm122_vm1, %v14117_v45  ;;  %13181 = vmatprep.mubr.msk.bf16.mxu1 %vm122_vm1, %v14117_v45 }
 0xbc3   :  { %13186 = vmatpush3.bf16.msra.mxu0 %v6563_v46  ;;  %13196 = vmatpush3.bf16.msra.mxu1 %v6563_v46 }
 0xbc4   :  { %13205 = vmatprep.subr.bf16.mxu0 %v6819_v13  ;;  %13225 = vmatprep.subr.bf16.mxu1 %v6920_v39 }
 0xbc9   :  { %13162 = vmatmul.mubr.msk.bf16.gmra.mxu0 %vm122_vm1, %v14118_v6  ;;  %13182 = vmatmul.mubr.msk.bf16.gmra.mxu1 %vm122_vm1, %v14118_v6 }
 0xc69   :  { %v13129_v34 = vpop.f32.mrf.mxu0  ;;  %v13139_v27 = vpop.f32.mrf.mxu1 }
 0xc6a   :  { %v15898_v44 = vadd.f32 %v13129_v34, %v15782_v56  ;;  %v15901_v38 = vadd.f32 %v13139_v27, %v15785_v14 }
 0xc6b   :  { %v6152_v25 = vpop.f32.mrf.mxu0  ;;  %v6229_v57 = vpop.f32.mrf.mxu1 }
 0xc6c   :  { %v15904_v19 = vadd.f32 %v6152_v25, %v15788_v62  ;;  %v15907_v53 = vadd.f32 %v6229_v57, %v15791_v28 }
 0xc6d   :  { %v13130_v60 = vpop.f32.mrf.mxu0  ;;  %v13140_v4 = vpop.f32.mrf.mxu1 }
 0xc6e   :  { %v15910_v20 = vadd.f32 %v13130_v60, %v15794_v5  ;;  %v15913_v35 = vadd.f32 %v13140_v4, %v15797_v43 }
 0xc6f   :  { %v15915_v56 = vpop.f32.mrf.mxu0  ;;  %v15917_v14 = vpop.f32.mrf.mxu1 }
 0xc70   :  { %16810 = vst [vmem:[#allocation27_spill] sm:$0xff] %v15917_v14 }
 0xc71   :  { %v13133_v61 = vpop.f32.mrf.mxu0  ;;  %v13143_v45 = vpop.f32.mrf.mxu1 }
 0xc72   :  { %v15920_v62 = vadd.f32 %v13133_v61, %v15804_v15  ;;  %v15923_v28 = vadd.f32 %v13143_v45, %v15807_v55 }
 0xc73   :  { %v6168_v6 = vpop.f32.mrf.mxu0  ;;  %v6245_v23 = vpop.f32.mrf.mxu1 }
 0xc74   :  { %v15926_v5 = vadd.f32 %v6168_v6, %v15810_v24  ;;  %v15929_v43 = vadd.f32 %v6245_v23, %v15813_v30 }
 0xc75   :  { %v13134_v46 = vpop.f32.mrf.mxu0  ;;  %v13144_v42 = vpop.f32.mrf.mxu1 }
 0xc76   :  { %v15932_v26 = vadd.f32 %v13134_v46, %v15816_v10  ;;  %v15935_v34 = vadd.f32 %v13144_v42, %v15819_v9  ;;  %v14121_v9 = vld [vmem:[%s16778_s0 + $0x128] sm:$0xff]   ;;  %v14122_v42 = vld [vmem:[%s16778_s0 + $0x154] sm:$0xff]  }
 0xc77   :  { %v15937_v15 = vpop.f32.mrf.mxu0  ;;  %v15939_v55 = vpop.f32.mrf.mxu1 }
 0xc78   :  { %16811 = vst [vmem:[#allocation28_spill] sm:$0xff] %v15937_v15  ;;  %16812 = vst [vmem:[#allocation29_spill] sm:$0xff] %v15939_v55 }
 0xc81   :  { %v13159_v27 = vpop.f32.mrf.mxu0  ;;  %v13179_v25 = vpop.f32.mrf.mxu1 }
 0xc83   :  { %v6408_v57 = vpop.f32.mrf.mxu0  ;;  %v6509_v24 = vpop.f32.mrf.mxu1 }
 0xc85   :  { %v13160_v60 = vpop.f32.mrf.mxu0  ;;  %v13180_v4 = vpop.f32.mrf.mxu1 }
 0xc86   :  { %v6541_v23 = vpack.c.bf16 %v13160_v60, %v13159_v27  ;;  %v6545_v10 = vpack.c.bf16 %v13180_v4, %v13179_v25 }
 0xc87   :  { %v6411_v30 = vpop.f32.mrf.mxu0  ;;  %v6512_v61 = vpop.f32.mrf.mxu1 }
 0xc88   :  { %v6540_v45 = vpack.c.bf16 %v6411_v30, %v6408_v57  ;;  %v6544_v6 = vpack.c.bf16 %v6512_v61, %v6509_v24  ;;  %v14123_v57 = vld [vmem:[%s16778_s0 + $0x120] sm:$0xff]   ;;  %v14124_v24 = vld [vmem:[%s16778_s0 + $0x14c] sm:$0xff]  }
 0xc89   :  { %v13163_v46 = vpop.f32.mrf.mxu0  ;;  %v13183_v14 = vpop.f32.mrf.mxu1 }
 0xc8a   :  { %13187 = vmatprep.mubr.msk.bf16.mxu0 %vm591_vm3, %v6540_v45  ;;  %13197 = vmatprep.mubr.msk.bf16.mxu1 %vm591_vm3, %v6544_v6 }
 0xc8b   :  { %v6424_v55 = vpop.f32.mrf.mxu0  ;;  %v6525_v15 = vpop.f32.mrf.mxu1  ;;  %13188 = vmatmul.mubr.msk.bf16.vlgmr.msra.gmra.mxu0 %vm591_vm3, %v6541_v23  ;;  %13198 = vmatmul.mubr.msk.bf16.vlgmr.msra.gmra.mxu1 %vm591_vm3, %v6545_v10  ;;  %v14129_v23 = vld [vmem:[%s16778_s0 + $0x108] sm:$0xff]   ;;  %v14130_v10 = vld [vmem:[%s16778_s0 + $0x134] sm:$0xff]  }
 0xc8c   :  { %13206 = vmatpush3.bf16.msra.mxu0 %v6819_v13  ;;  %13226 = vmatpush3.bf16.msra.mxu1 %v6920_v39  ;;  %v14125_v13 = vld [vmem:[%s16778_s0 + $0x118] sm:$0xff]   ;;  %v14126_v39 = vld [vmem:[%s16778_s0 + $0x144] sm:$0xff]  }
 0xc8d   :  { %v13164_v27 = vpop.f32.mrf.mxu0  ;;  %v13184_v25 = vpop.f32.mrf.mxu1  ;;  %13207 = vmatprep.subr.bf16.mxu0 %v14121_v9  ;;  %13227 = vmatprep.subr.bf16.mxu1 %v14122_v42 }
 0xc8e   :  { %v6543_v60 = vpack.c.bf16 %v13164_v27, %v13163_v46  ;;  %v6547_v4 = vpack.c.bf16 %v13184_v25, %v13183_v14  ;;  %v14131_v14 = vld [vmem:[%s16779_s1 + $0x60] sm:$0xff]   ;;  %v14132_v46 = vld [vmem:[%s16779_s1 + $0x68] sm:$0xff]   ;;  %v11433_v27 = vld [vmem:[%s16780_s2 + $0x1e] sm:$0x3] }
 0xc8f   :  { %v6427_v30 = vpop.f32.mrf.mxu0  ;;  %v6528_v61 = vpop.f32.mrf.mxu1  ;;  %v7010_v25 = vsel %vm604_vm2, %v11433_v27, 0 }
 0xc90   :  { %v6542_v45 = vpack.c.bf16 %v6427_v30, %v6424_v55  ;;  %v6546_v6 = vpack.c.bf16 %v6528_v61, %v6525_v15  ;;  %13208 = vmatpush3.bf16.msra.mxu0 %v14121_v9  ;;  %13228 = vmatpush3.bf16.msra.mxu1 %v14122_v42  ;;  %v14127_v15 = vld [vmem:[%s16778_s0 + $0x110] sm:$0xff]   ;;  %v14128_v55 = vld [vmem:[%s16778_s0 + $0x13c] sm:$0xff]  }
 0xc91   :  { %13209 = vmatprep.subr.bf16.mxu0 %v14123_v57  ;;  %13229 = vmatprep.subr.bf16.mxu1 %v14124_v24  ;;  %v14133_v9 = vld [vmem:[%s16779_s1 + $0x70] sm:$0xff]   ;;  %v14134_v42 = vld [vmem:[%s16779_s1 + $0x78] sm:$0xff]  }
 0xc92   :  { %13191 = vmatprep.mubr.msk.bf16.mxu0 %vm591_vm3, %v6542_v45  ;;  %13201 = vmatprep.mubr.msk.bf16.mxu1 %vm591_vm3, %v6546_v6 }
 0xc93   :  { %13192 = vmatmul.mubr.msk.bf16.gmra.mxu0 %vm591_vm3, %v6543_v60  ;;  %13202 = vmatmul.mubr.msk.bf16.gmra.mxu1 %vm591_vm3, %v6547_v4 }
 0xc94   :  { %13210 = vmatpush3.bf16.msra.mxu0 %v14123_v57  ;;  %13230 = vmatpush3.bf16.msra.mxu1 %v14124_v24 }
 0xc95   :  { %13211 = vmatprep.subr.bf16.mxu0 %v14125_v13  ;;  %13231 = vmatprep.subr.bf16.mxu1 %v14126_v39 }
 0xc96   :  { %13217 = vmatprep.mubr.msk.bf16.mxu0 %vm122_vm1, %v14131_v14  ;;  %13237 = vmatprep.mubr.msk.bf16.mxu1 %vm122_vm1, %v14131_v14 }
 0xc98   :  { %13212 = vmatpush3.bf16.msra.mxu0 %v14125_v13  ;;  %13232 = vmatpush3.bf16.msra.mxu1 %v14126_v39 }
 0xc99   :  { %13213 = vmatprep.subr.bf16.mxu0 %v14127_v15  ;;  %13233 = vmatprep.subr.bf16.mxu1 %v14128_v55 }
 0xc9c   :  { %13214 = vmatpush3.bf16.msra.mxu0 %v14127_v15  ;;  %13234 = vmatpush3.bf16.msra.mxu1 %v14128_v55 }
 0xc9d   :  { %13215 = vmatprep.subr.bf16.mxu0 %v14129_v23  ;;  %13235 = vmatprep.subr.bf16.mxu1 %v14130_v10 }
 0xca0   :  { %13216 = vmatpush3.bf16.msra.mxu0 %v14129_v23  ;;  %13236 = vmatpush3.bf16.msra.mxu1 %v14130_v10 }
 0xca1   :  { %13871 = vmatprep.subr.msk.bf16.mxu0 %vm604_vm2, %v11433_v27  ;;  %13872 = vmatprep.subr.msk.bf16.mxu1 %vm604_vm2, %v11433_v27 }
 0xca3   :  { %13218 = vmatmul.mubr.msk.bf16.vlgmr.msra.gmra.mxu0 %vm122_vm1, %v14132_v46  ;;  %13238 = vmatmul.mubr.msk.bf16.vlgmr.msra.gmra.mxu1 %vm122_vm1, %v14132_v46 }
 0xca4   :  { %13221 = vmatprep.mubr.msk.bf16.mxu0 %vm122_vm1, %v14133_v9  ;;  %13241 = vmatprep.mubr.msk.bf16.mxu1 %vm122_vm1, %v14133_v9 }
 0xca5   :  { %13246 = vmatpush3.bf16.msra.mxu0 %v7010_v25  ;;  %13256 = vmatpush3.bf16.msra.mxu1 %v7010_v25 }
 0xcab   :  { %13222 = vmatmul.mubr.msk.bf16.gmra.mxu0 %vm122_vm1, %v14134_v42  ;;  %13242 = vmatmul.mubr.msk.bf16.gmra.mxu1 %vm122_vm1, %v14134_v42 }
 0xd4b   :  { %v13189_v57 = vpop.f32.mrf.mxu0  ;;  %v13199_v24 = vpop.f32.mrf.mxu1 }
 0xd4c   :  { %v16006_v60 = vadd.f32 %v13189_v57, %v15898_v44  ;;  %v16009_v4 = vadd.f32 %v13199_v24, %v15901_v38 }
 0xd4d   :  { %v6599_v30 = vpop.f32.mrf.mxu0  ;;  %v6676_v61 = vpop.f32.mrf.mxu1 }
 0xd4e   :  { %v16012_v45 = vadd.f32 %v6599_v30, %v15904_v19  ;;  %v16015_v6 = vadd.f32 %v6676_v61, %v15907_v53 }
 0xd4f   :  { %v13190_v13 = vpop.f32.mrf.mxu0  ;;  %v13200_v39 = vpop.f32.mrf.mxu1 }
 0xd50   :  { %16813 = vst [vmem:[#allocation30_spill] sm:$0xff] %v16015_v6  ;;  %v16018_v14 = vadd.f32 %v13190_v13, %v15910_v20  ;;  %v16021_v15 = vadd.f32 %v13200_v39, %v15913_v35 }
 0xd51   :  { %v16023_v44 = vpop.f32.mrf.mxu0  ;;  %v16025_v38 = vpop.f32.mrf.mxu1 }
 0xd53   :  { %v13193_v55 = vpop.f32.mrf.mxu0  ;;  %v13203_v23 = vpop.f32.mrf.mxu1 }
 0xd54   :  { %v16028_v19 = vadd.f32 %v13193_v55, %v15920_v62  ;;  %v16031_v53 = vadd.f32 %v13203_v23, %v15923_v28 }
 0xd55   :  { %v6615_v10 = vpop.f32.mrf.mxu0  ;;  %v6692_v46 = vpop.f32.mrf.mxu1 }
 0xd56   :  { %v16034_v20 = vadd.f32 %v6615_v10, %v15926_v5  ;;  %v16037_v35 = vadd.f32 %v6692_v46, %v15929_v43 }
 0xd57   :  { %v13194_v9 = vpop.f32.mrf.mxu0  ;;  %v13204_v42 = vpop.f32.mrf.mxu1 }
 0xd58   :  { %16814 = vst [vmem:[#allocation31_spill] sm:$0xff] %v16037_v35  ;;  %v16040_v27 = vadd.f32 %v13194_v9, %v15932_v26  ;;  %v16043_v25 = vadd.f32 %v13204_v42, %v15935_v34 }
 0xd59   :  { %v16045_v62 = vpop.f32.mrf.mxu0  ;;  %v16047_v28 = vpop.f32.mrf.mxu1 }
 0xd5a   :  { %16815 = vst [vmem:[#allocation32_spill] sm:$0xff] %v16040_v27  ;;  %16816 = vst [vmem:[#allocation33_spill] sm:$0xff] %v16043_v25 }
 0xd63   :  { %v13219_v57 = vpop.f32.mrf.mxu0  ;;  %v13239_v24 = vpop.f32.mrf.mxu1 }
 0xd65   :  { %v6855_v30 = vpop.f32.mrf.mxu0  ;;  %v6956_v5 = vpop.f32.mrf.mxu1 }
 0xd67   :  { %v13220_v61 = vpop.f32.mrf.mxu0  ;;  %v13240_v13 = vpop.f32.mrf.mxu1 }
 0xd68   :  { %v6988_v10 = vpack.c.bf16 %v13220_v61, %v13219_v57  ;;  %v6992_v26 = vpack.c.bf16 %v13240_v13, %v13239_v24  ;;  %v14192_v61 = vmov 0.0  }
 0xd69   :  { %v6858_v43 = vpop.f32.mrf.mxu0  ;;  %v6959_v39 = vpop.f32.mrf.mxu1  ;;  %13265 = vmatprep.subr.bf16.mxu0 %v14192_v61  ;;  %13277 = vmatprep.subr.bf16.mxu1 %v14192_v61 }
 0xd6a   :  { %v6987_v55 = vpack.c.bf16 %v6858_v43, %v6855_v30  ;;  %v6991_v23 = vpack.c.bf16 %v6959_v39, %v6956_v5 }
 0xd6b   :  { %v13223_v46 = vpop.f32.mrf.mxu0  ;;  %v13243_v9 = vpop.f32.mrf.mxu1 }
 0xd6c   :  { %13247 = vmatprep.mubr.msk.bf16.mxu0 %vm591_vm3, %v6987_v55  ;;  %13257 = vmatprep.mubr.msk.bf16.mxu1 %vm591_vm3, %v6991_v23 }
 0xd6d   :  { %v6871_v34 = vpop.f32.mrf.mxu0  ;;  %v6972_v42 = vpop.f32.mrf.mxu1  ;;  %13248 = vmatmul.mubr.msk.bf16.vlgmr.msra.gmra.mxu0 %vm591_vm3, %v6988_v10  ;;  %13258 = vmatmul.mubr.msk.bf16.vlgmr.msra.gmra.mxu1 %vm591_vm3, %v6992_v26  ;;  %v16820_v10 = vld [vmem:[#allocation9_spill] sm:$0xff]  ;;  %v16821_v26 = vld [vmem:[#allocation10_spill] sm:$0xff] }
 0xd6f   :  { %v13224_v6 = vpop.f32.mrf.mxu0  ;;  %v13244_v25 = vpop.f32.mrf.mxu1 }
 0xd70   :  { %v6990_v57 = vpack.c.bf16 %v13224_v6, %v13223_v46  ;;  %v6994_v24 = vpack.c.bf16 %v13244_v25, %v13243_v9  ;;  %v803_v6 = vadd.f32 %v14527_v17, %v14507_v58  ;;  %v896_v25 = vadd.f32 %v14545_v32, %v14513_v3  ;;  %v16822_v9 = vld [vmem:[#allocation11_spill] sm:$0xff] }
 0xd71   :  { %v6874_v27 = vpop.f32.mrf.mxu0  ;;  %v6975_v35 = vpop.f32.mrf.mxu1 }
 0xd72   :  { %v6989_v30 = vpack.c.bf16 %v6874_v27, %v6871_v34  ;;  %v6993_v5 = vpack.c.bf16 %v6975_v35, %v6972_v42  ;;  %v880_v35 = vadd.f32 %v14529_v18, %v14509_v59  ;;  %v819_v27 = vadd.f32 %v14543_v31, %v14511_v2  ;;  %v16823_v34 = vld [vmem:[#allocation12_spill] sm:$0xff] }
 0xd73   :  { %v1340_v13 = vadd.f32 %v14639_v7, %v803_v6  ;;  %v1352_v55 = vadd.f32 %v14663_v22, %v896_v25 }
 0xd74   :  { %13251 = vmatprep.mubr.msk.bf16.mxu0 %vm591_vm3, %v6989_v30  ;;  %13261 = vmatprep.mubr.msk.bf16.mxu1 %vm591_vm3, %v6993_v5  ;;  %v1348_v43 = vadd.f32 %v14641_v8, %v880_v35  ;;  %v1344_v39 = vadd.f32 %v14661_v21, %v819_v27  ;;  %v16824_v30 = vld [vmem:[#allocation13_spill] sm:$0xff]  ;;  %v16826_v27 = vld [vmem:[#allocation15_spill] sm:$0xff] }
 0xd75   :  { %13252 = vmatmul.mubr.msk.bf16.gmra.mxu0 %vm591_vm3, %v6990_v57  ;;  %13262 = vmatmul.mubr.msk.bf16.gmra.mxu1 %vm591_vm3, %v6994_v24  ;;  %v1787_v23 = vadd.f32 %v14755_v36, %v1340_v13  ;;  %v1799_v17 = vadd.f32 %v14779_v12, %v1352_v55  ;;  %v16825_v57 = vld [vmem:[#allocation14_spill] sm:$0xff]  ;;  %v16827_v13 = vld [vmem:[#allocation16_spill] sm:$0xff] }
 0xd76   :  { %13273 = vmatprep.mubr.msk.bf16.mxu0 %vm14193_vm4, %v14192_v61  ;;  %13285 = vmatprep.mubr.msk.bf16.mxu1 %vm14193_vm4, %v14192_v61  ;;  %v1795_v58 = vadd.f32 %v14757_v37, %v1348_v43  ;;  %v1791_v59 = vadd.f32 %v14777_v11, %v1344_v39  ;;  %v16828_v39 = vld [vmem:[#allocation17_spill] sm:$0xff]  ;;  %v16829_v55 = vld [vmem:[#allocation18_spill] sm:$0xff] }
 0xd77   :  { %v2235_v2 = vadd.f32 %v14871_v63, %v1787_v23  ;;  %v2247_v31 = vadd.f32 %v14895_v41, %v1799_v17 }
 0xd78   :  { %v2243_v3 = vadd.f32 %v14873_v50, %v1795_v58  ;;  %v2239_v18 = vadd.f32 %v14893_v40, %v1791_v59  ;;  %v16817_v40 = vld [vmem:[#allocation6_spill] sm:$0xff] }
 0xd79   :  { %v2683_v32 = vadd.f32 %v14987_v54, %v2235_v2  ;;  %v2695_v21 = vadd.f32 %v15011_v1, %v2247_v31  ;;  %v16818_v54 = vld [vmem:[#allocation7_spill] sm:$0xff] }
 0xd7a   :  { %v2691_v7 = vadd.f32 %v14989_v47, %v2243_v3  ;;  %v2687_v8 = vadd.f32 %v15009_v29, %v2239_v18  ;;  %v16819_v29 = vld [vmem:[#allocation8_spill] sm:$0xff] }
 0xd7b   :  { %v3130_v22 = vadd.f32 %v15103_v33, %v2683_v32  ;;  %v3142_v11 = vadd.f32 %v15127_v52, %v2695_v21  ;;  %v16831_v3 = vld [vmem:[#allocation20_spill] sm:$0xff]  ;;  %v16832_v32 = vld [vmem:[#allocation21_spill] sm:$0xff] }
 0xd7c   :  { %v3138_v36 = vadd.f32 %v15105_v16, %v2691_v7  ;;  %v3134_v37 = vadd.f32 %v15125_v49, %v2687_v8  ;;  %v16833_v8 = vld [vmem:[#allocation22_spill] sm:$0xff] }
 0xd7d   :  { %v3577_v12 = vadd.f32 %v15219_v51, %v3130_v22  ;;  %v3589_v41 = vadd.f32 %v16817_v40, %v3142_v11 }
 0xd7e   :  { %v3585_v63 = vadd.f32 %v15221_v0, %v3138_v36  ;;  %v3581_v50 = vadd.f32 %v15241_v48, %v3134_v37  ;;  %v16105_v48 = vld [vmem:[%s16781_s3] ss:$0 sm:$0xff] }
 0xd7f   :  { %v4025_v47 = vadd.f32 %v16818_v54, %v3577_v12  ;;  %v4037_v16 = vadd.f32 %v16821_v26, %v3589_v41  ;;  %v16834_v12 = vld [vmem:[#allocation23_spill] sm:$0xff]  ;;  %v16836_v41 = vld [vmem:[#allocation25_spill] sm:$0xff] }
 0xd80   :  { %v4033_v1 = vadd.f32 %v16819_v29, %v3585_v63  ;;  %v4029_v33 = vadd.f32 %v16820_v10, %v3581_v50  ;;  %v16835_v50 = vld [vmem:[#allocation24_spill] sm:$0xff] }
 0xd81   :  { %v4472_v52 = vadd.f32 %v16822_v9, %v4025_v47  ;;  %v4484_v24 = vadd.f32 %v16825_v57, %v4037_v16  ;;  %v16837_v47 = vld [vmem:[#allocation26_spill] sm:$0xff]  ;;  %v16840_v57 = vld [vmem:[#allocation29_spill] sm:$0xff] }
 0xd82   :  { %v4480_v51 = vadd.f32 %v16823_v34, %v4033_v1  ;;  %v4476_v5 = vadd.f32 %v16824_v30, %v4029_v33  ;;  %v16839_v30 = vld [vmem:[#allocation28_spill] sm:$0xff] }
 0xd83   :  { %v4920_v25 = vadd.f32 %v16826_v27, %v4472_v52  ;;  %v4932_v23 = vadd.f32 %v16829_v55, %v4484_v24 }
 0xd84   :  { %v4928_v43 = vadd.f32 %v16827_v13, %v4480_v51 }
 0xd85   :  { %v5379_v21 = vadd.f32 %v16833_v8, %v4932_v23  ;;  %v16842_v8 = vld [vmem:[#allocation32_spill] sm:$0xff] }
 0xd86   :  { %v5375_v18 = vadd.f32 %v16831_v3, %v4928_v43 }
 0xd87   :  { %v5826_v29 = vadd.f32 %v16837_v47, %v5379_v21 }
 0xd88   :  { %v5822_v40 = vadd.f32 %v16835_v50, %v5375_v18 }
 0xd89   :  { %v6273_v24 = vadd.f32 %v16840_v57, %v5826_v29 }
 0xe2d   :  { %v13249_v46 = vpop.f32.mrf.mxu0  ;;  %v13259_v49 = vpop.f32.mrf.mxu1 }
 0xe2e   :  { %v7156_v0 = vadd.f32 %v13249_v46, %v16006_v60  ;;  %v7164_v42 = vadd.f32 %v13259_v49, %v16009_v4  ;;  %v4924_v60 = vadd.f32 %v16828_v39, %v4476_v5  ;;  %v16830_v4 = vld [vmem:[#allocation19_spill] sm:$0xff] }
 0xe2f   :  { %v7046_v6 = vpop.f32.mrf.mxu0  ;;  %v16110_v35 = vpop.f32.mrf.mxu1  ;;  %v5367_v2 = vadd.f32 %v16830_v4, %v4920_v25  ;;  %v6720_v4 = vadd.f32 %v16047_v28, %v6273_v24 }
 0xe30   :  { %v7179_v58 = vadd.f32 %v16105_v48, %v7156_v0  ;;  %v7187_v31 = vadd.f32 %v16105_v48, %v7164_v42  ;;  %v5371_v7 = vadd.f32 %v16832_v32, %v4924_v60  ;;  %v16838_v0 = vld [vmem:[#allocation27_spill] sm:$0xff] }
 0xe31   :  { %v13250_v59 = vpop.f32.mrf.mxu0  ;;  %v13260_v17 = vpop.f32.mrf.mxu1  ;;  %v5814_v63 = vadd.f32 %v16834_v12, %v5367_v2  ;;  %v6269_v42 = vadd.f32 %v16838_v0, %v5822_v40  ;;  %v7154_v2 = vadd.f32 %v7046_v6, %v16012_v45 }
 0xe32   :  { %v7157_v22 = vadd.f32 %v13250_v59, %v16018_v14  ;;  %v7165_v36 = vadd.f32 %v13260_v17, %v16021_v15  ;;  %v5818_v54 = vadd.f32 %v16836_v41, %v5371_v7  ;;  %v7211_v1 = vmul.f32 0.2, %v7179_v58 }
 0xe33   :  { %v7049_v37 = vpop.f32.mrf.mxu0  ;;  %v7126_v11 = vpop.f32.mrf.mxu1  ;;  %vm7195_vm5 = vcmp.ge.f32.partialorder %v7179_v58, 0.0  ;;  %v7219_v26 = vmul.f32 0.2, %v7187_v31  ;;  %v6261_v15 = vadd.f32 %v15915_v56, %v5814_v63  ;;  %vm7203_vm6 = vcmp.ge.f32.partialorder %v7187_v31, 0.0  ;;  %v16844_v63 = vld [vmem:[#allocation30_spill] sm:$0xff] }
 0xe34   :  { %v7180_v16 = vadd.f32 %v16105_v48, %v7157_v22  ;;  %v7188_v14 = vadd.f32 %v16105_v48, %v7165_v36  ;;  %v6265_v5 = vadd.f32 %v16839_v30, %v5818_v54  ;;  %v7227_v27 = vsel %vm7195_vm5, %v7179_v58, %v7211_v1  ;;  %v16843_v22 = vld [vmem:[#allocation33_spill] sm:$0xff] }
 0xe35   :  { %v13253_v10 = vpop.f32.mrf.mxu0  ;;  %v13263_v33 = vpop.f32.mrf.mxu1  ;;  %v7235_v13 = vsel %vm7203_vm6, %v7187_v31, %v7219_v26  ;;  %v6708_v39 = vadd.f32 %v16023_v44, %v6261_v15  ;;  %v6716_v17 = vadd.f32 %v16025_v38, %v6269_v42  ;;  %v16841_v44 = vld [vmem:[#allocation31_spill] sm:$0xff]  ;;  %v7162_v50 = vadd.f32 %v16110_v35, %v16844_v63 }
 0xe36   :  { %v7160_v46 = vadd.f32 %v13253_v10, %v16028_v19  ;;  %v7168_v49 = vadd.f32 %v13263_v33, %v16031_v53  ;;  %vm7196_vm7 = vcmp.ge.f32.partialorder %v7180_v16, 0.0  ;;  %v7212_v34 = vmul.f32 0.2, %v7180_v16  ;;  %v14140_v63 = vld [vmem:[%s16783_s5 + $0x10] sm:$0xff]  }
 0xe37   :  { %v7062_v9 = vpop.f32.mrf.mxu0  ;;  %v7139_v52 = vpop.f32.mrf.mxu1  ;;  %vm7204_vm8 = vcmp.ge.f32.partialorder %v7188_v14, 0.0  ;;  %v7220_v51 = vmul.f32 0.2, %v7188_v14  ;;  %v6712_v58 = vadd.f32 %v16045_v62, %v6265_v5  ;;  %v7155_v3 = vadd.f32 %v7049_v37, %v6708_v39  ;;  %v14135_v39 = vld [vmem:[%s16782_s4] sm:$0xff]  }
 0xe38   :  { %v7228_v19 = vsel %vm7196_vm7, %v7180_v16, %v7212_v34  ;;  %v7183_v53 = vadd.f32 %v16105_v48, %v7160_v46  ;;  %v7191_v23 = vadd.f32 %v16105_v48, %v7168_v49  ;;  %v7158_v31 = vadd.f32 %v7062_v9, %v16034_v20 }
 0xe39   :  { %v13254_v56 = vpop.f32.mrf.mxu0  ;;  %v13264_v25 = vpop.f32.mrf.mxu1  ;;  %v7236_v43 = vsel %vm7204_vm8, %v7188_v14, %v7220_v51  ;;  %v16139_v60 = vpack.c.bf16 %v7228_v19, %v7227_v27  ;;  %v7166_v32 = vadd.f32 %v7139_v52, %v16841_v44  ;;  %v7178_v40 = vadd.f32 %v16105_v48, %v7155_v3 }
 0xe3a   :  { %v16141_v55 = vpack.c.bf16 %v7236_v43, %v7235_v13  ;;  %v7215_v18 = vmul.f32 0.2, %v7183_v53  ;;  %vm7199_vm9 = vcmp.ge.f32.partialorder %v7183_v53, 0.0  ;;  %v7161_v21 = vadd.f32 %v13254_v56, %v16842_v8 }
 0xe3b   :  { %v7065_v59 = vpop.f32.mrf.mxu0  ;;  %v7142_v7 = vpop.f32.mrf.mxu1  ;;  %v7169_v36 = vadd.f32 %v13264_v25, %v16843_v22  ;;  %vm7207_vm10 = vcmp.ge.f32.partialorder %v7191_v23, 0.0  ;;  %v7223_v38 = vmul.f32 0.2, %v7191_v23  ;;  %v7181_v62 = vadd.f32 %v16105_v48, %v7158_v31 }
 0xe3c   :  { %v7159_v12 = vadd.f32 %v7065_v59, %v6712_v58  ;;  %v7189_v28 = vadd.f32 %v16105_v48, %v7166_v32  ;;  %v7184_v45 = vadd.f32 %v16105_v48, %v7161_v21  ;;  %v7167_v37 = vadd.f32 %v7142_v7, %v6720_v4  ;;  %v14137_v59 = vld [vmem:[%s16783_s5 + $0x8] sm:$0xff]  }
 0xe3d   :  { %v7192_v6 = vadd.f32 %v16105_v48, %v7169_v36  ;;  %v7163_v41 = vadd.f32 %v7126_v11, %v6716_v17  ;;  %v7231_v54 = vsel %vm7199_vm9, %v7183_v53, %v7215_v18  ;;  %v7239_v1 = vsel %vm7207_vm10, %v7191_v23, %v7223_v38  ;;  %v14136_v23 = vld [vmem:[%s16782_s4 + $0x8] sm:$0xff]  }
 0xe3e   :  { %v7182_v20 = vadd.f32 %v16105_v48, %v7159_v12  ;;  %vm7200_vm11 = vcmp.ge.f32.partialorder %v7184_v45, 0.0  ;;  %v7216_v47 = vmul.f32 0.2, %v7184_v45  ;;  %v7213_v10 = vmul.f32 0.2, %v7181_v62  ;;  %v14138_v12 = vld [vmem:[%s16783_s5] sm:$0xff]  }
 0xe3f   :  { %vm7208_vm12 = vcmp.ge.f32.partialorder %v7192_v6, 0.0  ;;  %v7224_v29 = vmul.f32 0.2, %v7192_v6  ;;  %v7221_v26 = vmul.f32 0.2, %v7189_v28  ;;  %v7190_v15 = vadd.f32 %v16105_v48, %v7167_v37  ;;  %v14139_v37 = vld [vmem:[%s16782_s4 + $0x10] sm:$0xff]  }
 0xe40   :  { %vm7198_vm13 = vcmp.ge.f32.partialorder %v7182_v20, 0.0  ;;  %v7214_v33 = vmul.f32 0.2, %v7182_v20  ;;  %v7232_v16 = vsel %vm7200_vm11, %v7184_v45, %v7216_v47  ;;  %vm7197_vm14 = vcmp.ge.f32.partialorder %v7181_v62, 0.0 }
 0xe41   :  { %v7240_v14 = vsel %vm7208_vm12, %v7192_v6, %v7224_v29  ;;  %vm7205_vm15 = vcmp.ge.f32.partialorder %v7189_v28, 0.0  ;;  %v16162_v35 = vpack.c.bf16 %v7232_v16, %v7231_v54  ;;  %v7186_v46 = vadd.f32 %v16105_v48, %v7163_v41 }
 0xe42   :  { %v16164_v11 = vpack.c.bf16 %v7240_v14, %v7239_v1  ;;  %v7230_v49 = vsel %vm7198_vm13, %v7182_v20, %v7214_v33  ;;  %vm7206_vm0 = vcmp.ge.f32.partialorder %v7190_v15, 0.0  ;;  %v7222_v9 = vmul.f32 0.2, %v7190_v15 }
 0xe43   :  { %v7177_v52 = vadd.f32 %v16105_v48, %v7154_v2  ;;  %v7185_v34 = vadd.f32 %v16105_v48, %v7162_v50  ;;  %13266 = vmatpush3.bf16.msra.mxu0 %v16162_v35  ;;  %v7229_v51 = vsel %vm7197_vm14, %v7181_v62, %v7213_v10  ;;  %v7237_v0 = vsel %vm7205_vm15, %v7189_v28, %v7221_v26 }
 0xe44   :  { %13278 = vmatpush3.bf16.msra.mxu1 %v16164_v11  ;;  %v7238_v42 = vsel %vm7206_vm0, %v7190_v15, %v7222_v9  ;;  %13267 = vmatprep.subr.bf16.mxu0 %v14192_v61  ;;  %v16173_v30 = vpack.c.bf16 %v7230_v49, %v7229_v51  ;;  %v7210_v57 = vmul.f32 0.2, %v7178_v40  ;;  %v7218_v24 = vmul.f32 0.2, %v7186_v46 }
 0xe45   :  { %13279 = vmatprep.subr.bf16.mxu1 %v14192_v61  ;;  %v16175_v5 = vpack.c.bf16 %v7238_v42, %v7237_v0  ;;  %vm7194_vm1 = vcmp.ge.f32.partialorder %v7178_v40, 0.0  ;;  %vm7202_vm2 = vcmp.ge.f32.partialorder %v7186_v46, 0.0  ;;  %v7209_v48 = vmul.f32 0.2, %v7177_v52 }
 0xe46   :  { %v7217_v27 = vmul.f32 0.2, %v7185_v34  ;;  %vm7193_vm3 = vcmp.ge.f32.partialorder %v7177_v52, 0.0  ;;  %vm7201_vm5 = vcmp.ge.f32.partialorder %v7185_v34, 0.0  ;;  %v7226_v56 = vsel %vm7194_vm1, %v7178_v40, %v7210_v57 }
 0xe47   :  { %13268 = vmatpush3.bf16.msra.mxu0 %v16173_v30  ;;  %v7234_v25 = vsel %vm7202_vm2, %v7186_v46, %v7218_v24  ;;  %v7225_v13 = vsel %vm7193_vm3, %v7177_v52, %v7209_v48  ;;  %vm7256_vm6 = vcmask 523264   ;;  %vm7450_vm7 = vcmask 130048  }
 0xe48   :  { %13280 = vmatpush3.bf16.msra.mxu1 %v16175_v5  ;;  %13269 = vmatprep.subr.bf16.mxu0 %v14192_v61  ;;  %v7233_v19 = vsel %vm7201_vm5, %v7185_v34, %v7217_v27  ;;  %v16185_v43 = vpack.c.bf16 %v7226_v56, %v7225_v13  ;;  %vm10504_vm12 = vcmask 130112   ;;  %vm10515_vm13 = vcmask 1041409  }
 0xe49   :  { %13281 = vmatprep.subr.bf16.mxu1 %v14192_v61  ;;  %v16187_v53 = vpack.c.bf16 %v7234_v25, %v7233_v19  ;;  %vm10518_vm14 = vcmask 123904   ;;  %vm10539_vm15 = vcmask 8192  }
 0xe4b   :  { %13270 = vmatpush3.bf16.msra.mxu0 %v16139_v60 }
 0xe4c   :  { %13282 = vmatpush3.bf16.msra.mxu1 %v16141_v55  ;;  %13271 = vmatprep.subr.bf16.mxu0 %v14192_v61 }
 0xe4d   :  { %13283 = vmatprep.subr.bf16.mxu1 %v14192_v61 }
 0xe4f   :  { %13272 = vmatpush3.bf16.msra.mxu0 %v16185_v43 }
 0xe50   :  { %13284 = vmatpush3.bf16.msra.mxu1 %v16187_v53  ;;  %13289 = vmatprep.subr.bf16.mxu0 %v14192_v61 }
 0xe51   :  { %13301 = vmatprep.subr.bf16.mxu1 %v14192_v61 }
 0xe52   :  { %13274 = vmatmul.mubr.msk.bf16.vlgmr.msra.gmra.mxu0 %vm7256_vm6, %v14135_v39 }
 0xe53   :  { %13286 = vmatmul.mubr.msk.bf16.vlgmr.msra.gmra.mxu1 %vm7256_vm6, %v14135_v39  ;;  %13290 = vmatpush3.bf16.msra.mxu0 %v16162_v35 }
 0xe54   :  { %13302 = vmatpush3.bf16.msra.mxu1 %v16164_v11  ;;  %13291 = vmatprep.subr.bf16.mxu0 %v14192_v61 }
 0xe55   :  { %13303 = vmatprep.subr.bf16.mxu1 %v14192_v61  ;;  %13297 = vmatprep.mubr.msk.bf16.mxu0 %vm14193_vm4, %v14192_v61 }
 0xe56   :  { %13309 = vmatprep.mubr.msk.bf16.mxu1 %vm14193_vm4, %v14192_v61 }
 0xe57   :  { %13292 = vmatpush3.bf16.msra.mxu0 %v16173_v30 }
 0xe58   :  { %13304 = vmatpush3.bf16.msra.mxu1 %v16175_v5  ;;  %13293 = vmatprep.subr.bf16.mxu0 %v14192_v61 }
 0xe59   :  { %13305 = vmatprep.subr.bf16.mxu1 %v14192_v61 }
 0xe5b   :  { %13294 = vmatpush3.bf16.msra.mxu0 %v16139_v60 }
 0xe5c   :  { %13306 = vmatpush3.bf16.msra.mxu1 %v16141_v55  ;;  %13295 = vmatprep.subr.bf16.mxu0 %v14192_v61 }
 0xe5d   :  { %13307 = vmatprep.subr.bf16.mxu1 %v14192_v61 }
 0xe5f   :  { %13296 = vmatpush3.bf16.msra.mxu0 %v16185_v43 }
 0xe60   :  { %13308 = vmatpush3.bf16.msra.mxu1 %v16187_v53  ;;  %13313 = vmatprep.subr.bf16.mxu0 %v14192_v61 }
 0xe61   :  { %13319 = vmatprep.subr.bf16.mxu1 %v14192_v61 }
 0xe62   :  { %13298 = vmatmul.mubr.msk.bf16.vlgmr.msra.gmra.mxu0 %vm7256_vm6, %v14136_v23 }
 0xe63   :  { %13310 = vmatmul.mubr.msk.bf16.vlgmr.msra.gmra.mxu1 %vm7256_vm6, %v14136_v23  ;;  %13315 = vmatprep.mubr.msk.bf16.mxu0 %vm14193_vm4, %v14192_v61  ;;  %v14141_v23 = vld [vmem:[%s16782_s4 + $0x18] sm:$0xff]  }
 0xe64   :  { %13321 = vmatprep.mubr.msk.bf16.mxu1 %vm14193_vm4, %v14192_v61  ;;  %13314 = vmatpush3.bf16.msra.mxu0 %v14137_v59 }
 0xe65   :  { %13320 = vmatpush3.bf16.msra.mxu1 %v14137_v59  ;;  %13325 = vmatprep.subr.bf16.mxu0 %v14192_v61  ;;  %v14142_v59 = vld [vmem:[%s16783_s5 + $0x18] sm:$0xff]  }
 0xe66   :  { %13331 = vmatprep.subr.bf16.mxu1 %v14192_v61 }
 0xf12   :  { %v7294_v17 = vpop.f32.mrf.mxu0 }
 0xf13   :  { %v7335_v58 = vpop.f32.mrf.mxu1 }
 0xf14   :  { %v13275_v4 = vpop.f32.mrf.mxu0 }
 0xf15   :  { %v13287_v2 = vpop.f32.mrf.mxu1 }
 0xf16   :  { %v7297_v3 = vpop.f32.mrf.mxu0 }
 0xf17   :  { %v7338_v18 = vpop.f32.mrf.mxu1  ;;  %v7342_v6 = vpack.c.bf16 %v7297_v3, %v7294_v17 }
 0xf18   :  { %v13276_v31 = vpop.f32.mrf.mxu0  ;;  %v7343_v20 = vpack.c.bf16 %v7338_v18, %v7335_v58 }
 0xf19   :  { %v13288_v44 = vpop.f32.mrf.mxu1 }
 0xf22   :  { %v7391_v32 = vpop.f32.mrf.mxu0 }
 0xf23   :  { %v7432_v7 = vpop.f32.mrf.mxu1 }
 0xf24   :  { %v13299_v8 = vpop.f32.mrf.mxu0 }
 0xf25   :  { %v13311_v21 = vpop.f32.mrf.mxu1 }
 0xf26   :  { %v7394_v22 = vpop.f32.mrf.mxu0 }
 0xf27   :  { %v7435_v36 = vpop.f32.mrf.mxu1  ;;  %v7439_v38 = vpack.c.bf16 %v7394_v22, %v7391_v32 }
 0xf28   :  { %v7440_v62 = vpack.c.bf16 %v7435_v36, %v7432_v7  ;;  %v13300_v28 = vpop.f32.mrf.mxu0 }
 0xf29   :  { %v13312_v45 = vpop.f32.mrf.mxu1  ;;  %13316 = vmatmul.mubr.msk.bf16.vlgmr.msra.gmra.mxu0 %vm7450_vm7, %v7439_v38 }
 0xf2a   :  { %13322 = vmatmul.mubr.msk.bf16.vlgmr.msra.gmra.mxu1 %vm7450_vm7, %v7440_v62  ;;  %13326 = vmatpush3.bf16.msra.mxu0 %v14138_v12 }
 0xf2b   :  { %13332 = vmatpush3.bf16.msra.mxu1 %v14138_v12  ;;  %13327 = vmatprep.mubr.msk.bf16.mxu0 %vm14193_vm4, %v14192_v61 }
 0xf2c   :  { %13333 = vmatprep.mubr.msk.bf16.mxu1 %vm14193_vm4, %v14192_v61  ;;  %13337 = vmatprep.subr.bf16.mxu0 %v14192_v61 }
 0xf2d   :  { %13349 = vmatprep.subr.bf16.mxu1 %v14192_v61 }
 0xf31   :  { %13328 = vmatmul.mubr.msk.bf16.vlgmr.msra.gmra.mxu0 %vm7450_vm7, %v7342_v6 }
 0xf32   :  { %13334 = vmatmul.mubr.msk.bf16.vlgmr.msra.gmra.mxu1 %vm7450_vm7, %v7343_v20  ;;  %13338 = vmatpush3.bf16.msra.mxu0 %v16162_v35 }
 0xf33   :  { %13350 = vmatpush3.bf16.msra.mxu1 %v16164_v11  ;;  %13339 = vmatprep.subr.bf16.mxu0 %v14192_v61 }
 0xf34   :  { %13351 = vmatprep.subr.bf16.mxu1 %v14192_v61  ;;  %13345 = vmatprep.mubr.msk.bf16.mxu0 %vm14193_vm4, %v14192_v61 }
 0xf35   :  { %13357 = vmatprep.mubr.msk.bf16.mxu1 %vm14193_vm4, %v14192_v61 }
 0xf36   :  { %13340 = vmatpush3.bf16.msra.mxu0 %v16173_v30 }
 0xf37   :  { %13352 = vmatpush3.bf16.msra.mxu1 %v16175_v5  ;;  %13341 = vmatprep.subr.bf16.mxu0 %v14192_v61 }
 0xf38   :  { %13353 = vmatprep.subr.bf16.mxu1 %v14192_v61 }
 0xf3a   :  { %13342 = vmatpush3.bf16.msra.mxu0 %v16139_v60 }
 0xf3b   :  { %13354 = vmatpush3.bf16.msra.mxu1 %v16141_v55  ;;  %13343 = vmatprep.subr.bf16.mxu0 %v14192_v61 }
 0xf3c   :  { %13355 = vmatprep.subr.bf16.mxu1 %v14192_v61 }
 0xf3e   :  { %13344 = vmatpush3.bf16.msra.mxu0 %v16185_v43 }
 0xf3f   :  { %13356 = vmatpush3.bf16.msra.mxu1 %v16187_v53  ;;  %13361 = vmatprep.subr.bf16.mxu0 %v14192_v61 }
 0xf40   :  { %13367 = vmatprep.subr.bf16.mxu1 %v14192_v61 }
 0xf41   :  { %13346 = vmatmul.mubr.msk.bf16.vlgmr.msra.gmra.mxu0 %vm7256_vm6, %v14139_v37 }
 0xf42   :  { %13358 = vmatmul.mubr.msk.bf16.vlgmr.msra.gmra.mxu1 %vm7256_vm6, %v14139_v37  ;;  %13363 = vmatprep.mubr.msk.bf16.mxu0 %vm14193_vm4, %v14192_v61 }
 0xf43   :  { %13369 = vmatprep.mubr.msk.bf16.mxu1 %vm14193_vm4, %v14192_v61  ;;  %13362 = vmatpush3.bf16.msra.mxu0 %v14140_v63 }
 0xf44   :  { %13368 = vmatpush3.bf16.msra.mxu1 %v14140_v63  ;;  %13373 = vmatprep.subr.bf16.mxu0 %v14192_v61  ;;  %v14143_v63 = vld [vmem:[%s16782_s4 + $0x20] sm:$0xff]  }
 0xf45   :  { %13385 = vmatprep.subr.bf16.mxu1 %v14192_v61 }
 0xfe9   :  { %v7488_v50 = vpop.f32.mrf.mxu0 }
 0xfea   :  { %v7532_v40 = vpop.f32.mrf.mxu1 }
 0xfeb   :  { %v13317_v41 = vpop.f32.mrf.mxu0 }
 0xfec   :  { %v13323_v54 = vpop.f32.mrf.mxu1 }
 0xfed   :  { %v7491_v47 = vpop.f32.mrf.mxu0 }
 0xfee   :  { %v7535_v29 = vpop.f32.mrf.mxu1 }
 0xfef   :  { %v13318_v1 = vpop.f32.mrf.mxu0 }
 0xff0   :  { %v13324_v10 = vpop.f32.mrf.mxu1 }
 0xff1   :  { %v7582_v33 = vpop.f32.mrf.mxu0 }
 0xff2   :  { %v7626_v26 = vpop.f32.mrf.mxu1  ;;  %v7583_v16 = vadd.f32 %v7582_v33, %v7488_v50  ;;  %v14144_v50 = vld [vmem:[%s16783_s5 + $0x20] sm:$0xff]  }
 0xff3   :  { %v7627_v14 = vadd.f32 %v7626_v26, %v7532_v40  ;;  %v13329_v15 = vpop.f32.mrf.mxu0 }
 0xff4   :  { %v13335_v46 = vpop.f32.mrf.mxu1 }
 0xff5   :  { %v7585_v49 = vpop.f32.mrf.mxu0 }
 0xff6   :  { %v7629_v9 = vpop.f32.mrf.mxu1  ;;  %v7586_v52 = vadd.f32 %v7585_v49, %v7491_v47 }
 0xff7   :  { %v7630_v34 = vadd.f32 %v7629_v9, %v7535_v29  ;;  %v13330_v51 = vpop.f32.mrf.mxu0 }
 0xff8   :  { %v13336_v0 = vpop.f32.mrf.mxu1 }
0x1001   :  { %v7678_v42 = vpop.f32.mrf.mxu0 }
0x1002   :  { %v7719_v57 = vpop.f32.mrf.mxu1 }
0x1003   :  { %v13347_v24 = vpop.f32.mrf.mxu0 }
0x1004   :  { %v13359_v48 = vpop.f32.mrf.mxu1 }
0x1005   :  { %v7681_v27 = vpop.f32.mrf.mxu0  ;;  %v14145_v48 = vld [vmem:[%s16782_s4 + $0x28] sm:$0xff]  }
0x1006   :  { %v7722_v56 = vpop.f32.mrf.mxu1  ;;  %v7726_v25 = vpack.c.bf16 %v7681_v27, %v7678_v42  ;;  %v14146_v27 = vld [vmem:[%s16783_s5 + $0x28] sm:$0xff]  }
0x1007   :  { %v7727_v13 = vpack.c.bf16 %v7722_v56, %v7719_v57  ;;  %v13348_v19 = vpop.f32.mrf.mxu0 }
0x1008   :  { %v13360_v39 = vpop.f32.mrf.mxu1  ;;  %13364 = vmatmul.mubr.msk.bf16.vlgmr.msra.gmra.mxu0 %vm7450_vm7, %v7726_v25 }
0x1009   :  { %13370 = vmatmul.mubr.msk.bf16.vlgmr.msra.gmra.mxu1 %vm7450_vm7, %v7727_v13  ;;  %13374 = vmatpush3.bf16.msra.mxu0 %v16162_v35 }
0x100a   :  { %13386 = vmatpush3.bf16.msra.mxu1 %v16164_v11  ;;  %13375 = vmatprep.subr.bf16.mxu0 %v14192_v61 }
0x100b   :  { %13387 = vmatprep.subr.bf16.mxu1 %v14192_v61  ;;  %13381 = vmatprep.mubr.msk.bf16.mxu0 %vm14193_vm4, %v14192_v61 }
0x100c   :  { %13393 = vmatprep.mubr.msk.bf16.mxu1 %vm14193_vm4, %v14192_v61 }
0x100d   :  { %13376 = vmatpush3.bf16.msra.mxu0 %v16173_v30 }
0x100e   :  { %13388 = vmatpush3.bf16.msra.mxu1 %v16175_v5  ;;  %13377 = vmatprep.subr.bf16.mxu0 %v14192_v61 }
0x100f   :  { %13389 = vmatprep.subr.bf16.mxu1 %v14192_v61 }
0x1011   :  { %13378 = vmatpush3.bf16.msra.mxu0 %v16139_v60 }
0x1012   :  { %13390 = vmatpush3.bf16.msra.mxu1 %v16141_v55  ;;  %13379 = vmatprep.subr.bf16.mxu0 %v14192_v61 }
0x1013   :  { %13391 = vmatprep.subr.bf16.mxu1 %v14192_v61 }
0x1015   :  { %13380 = vmatpush3.bf16.msra.mxu0 %v16185_v43 }
0x1016   :  { %13392 = vmatpush3.bf16.msra.mxu1 %v16187_v53  ;;  %13397 = vmatprep.subr.bf16.mxu0 %v14192_v61 }
0x1017   :  { %13403 = vmatprep.subr.bf16.mxu1 %v14192_v61 }
0x1018   :  { %13382 = vmatmul.mubr.msk.bf16.vlgmr.msra.gmra.mxu0 %vm7256_vm6, %v14141_v23 }
0x1019   :  { %13394 = vmatmul.mubr.msk.bf16.vlgmr.msra.gmra.mxu1 %vm7256_vm6, %v14141_v23  ;;  %13399 = vmatprep.mubr.msk.bf16.mxu0 %vm14193_vm4, %v14192_v61 }
0x101a   :  { %13405 = vmatprep.mubr.msk.bf16.mxu1 %vm14193_vm4, %v14192_v61  ;;  %13398 = vmatpush3.bf16.msra.mxu0 %v14142_v59 }
0x101b   :  { %13404 = vmatpush3.bf16.msra.mxu1 %v14142_v59  ;;  %13409 = vmatprep.subr.bf16.mxu0 %v14192_v61 }
0x101c   :  { %13421 = vmatprep.subr.bf16.mxu1 %v14192_v61 }
0x10c8   :  { %v7774_v17 = vpop.f32.mrf.mxu0 }
0x10c9   :  { %v7818_v58 = vpop.f32.mrf.mxu1  ;;  %v7825_v4 = vadd.f32 %v7774_v17, %v7583_v16 }
0x10ca   :  { %v7827_v2 = vadd.f32 %v7818_v58, %v7627_v14  ;;  %v13365_v3 = vpop.f32.mrf.mxu0 }
0x10cb   :  { %v13371_v18 = vpop.f32.mrf.mxu1 }
0x10cc   :  { %v7777_v31 = vpop.f32.mrf.mxu0 }
0x10cd   :  { %v7821_v44 = vpop.f32.mrf.mxu1  ;;  %v7826_v32 = vadd.f32 %v7777_v31, %v7586_v52 }
0x10ce   :  { %v7828_v7 = vadd.f32 %v7821_v44, %v7630_v34  ;;  %v13366_v8 = vpop.f32.mrf.mxu0 }
0x10cf   :  { %v13372_v21 = vpop.f32.mrf.mxu1 }
0x10d8   :  { %v7874_v22 = vpop.f32.mrf.mxu0 }
0x10d9   :  { %v7915_v36 = vpop.f32.mrf.mxu1 }
0x10da   :  { %v13383_v12 = vpop.f32.mrf.mxu0 }
0x10db   :  { %v13395_v38 = vpop.f32.mrf.mxu1 }
0x10dc   :  { %v7877_v62 = vpop.f32.mrf.mxu0  ;;  %v14147_v38 = vld [vmem:[%s16782_s4 + $0x30] sm:$0xff]  }
0x10dd   :  { %v7918_v28 = vpop.f32.mrf.mxu1  ;;  %v7922_v45 = vpack.c.bf16 %v7877_v62, %v7874_v22  ;;  %v14148_v62 = vld [vmem:[%s16783_s5 + $0x30] sm:$0xff]  }
0x10de   :  { %v7923_v6 = vpack.c.bf16 %v7918_v28, %v7915_v36  ;;  %v13384_v20 = vpop.f32.mrf.mxu0 }
0x10df   :  { %v13396_v37 = vpop.f32.mrf.mxu1  ;;  %13400 = vmatmul.mubr.msk.bf16.vlgmr.msra.gmra.mxu0 %vm7450_vm7, %v7922_v45 }
0x10e0   :  { %13406 = vmatmul.mubr.msk.bf16.vlgmr.msra.gmra.mxu1 %vm7450_vm7, %v7923_v6  ;;  %13410 = vmatpush3.bf16.msra.mxu0 %v16162_v35 }
0x10e1   :  { %13422 = vmatpush3.bf16.msra.mxu1 %v16164_v11  ;;  %13411 = vmatprep.subr.bf16.mxu0 %v14192_v61 }
0x10e2   :  { %13423 = vmatprep.subr.bf16.mxu1 %v14192_v61  ;;  %13417 = vmatprep.mubr.msk.bf16.mxu0 %vm14193_vm4, %v14192_v61 }
0x10e3   :  { %13429 = vmatprep.mubr.msk.bf16.mxu1 %vm14193_vm4, %v14192_v61 }
0x10e4   :  { %13412 = vmatpush3.bf16.msra.mxu0 %v16173_v30 }
0x10e5   :  { %13424 = vmatpush3.bf16.msra.mxu1 %v16175_v5  ;;  %13413 = vmatprep.subr.bf16.mxu0 %v14192_v61 }
0x10e6   :  { %13425 = vmatprep.subr.bf16.mxu1 %v14192_v61 }
0x10e8   :  { %13414 = vmatpush3.bf16.msra.mxu0 %v16139_v60 }
0x10e9   :  { %13426 = vmatpush3.bf16.msra.mxu1 %v16141_v55  ;;  %13415 = vmatprep.subr.bf16.mxu0 %v14192_v61 }
0x10ea   :  { %13427 = vmatprep.subr.bf16.mxu1 %v14192_v61 }
0x10ec   :  { %13416 = vmatpush3.bf16.msra.mxu0 %v16185_v43 }
0x10ed   :  { %13428 = vmatpush3.bf16.msra.mxu1 %v16187_v53  ;;  %13433 = vmatprep.subr.bf16.mxu0 %v14192_v61 }
0x10ee   :  { %13439 = vmatprep.subr.bf16.mxu1 %v14192_v61 }
0x10ef   :  { %13418 = vmatmul.mubr.msk.bf16.vlgmr.msra.gmra.mxu0 %vm7256_vm6, %v14143_v63 }
0x10f0   :  { %13430 = vmatmul.mubr.msk.bf16.vlgmr.msra.gmra.mxu1 %vm7256_vm6, %v14143_v63  ;;  %13435 = vmatprep.mubr.msk.bf16.mxu0 %vm14193_vm4, %v14192_v61 }
0x10f1   :  { %13441 = vmatprep.mubr.msk.bf16.mxu1 %vm14193_vm4, %v14192_v61  ;;  %13434 = vmatpush3.bf16.msra.mxu0 %v14144_v50 }
0x10f2   :  { %13440 = vmatpush3.bf16.msra.mxu1 %v14144_v50  ;;  %13445 = vmatprep.subr.bf16.mxu0 %v14192_v61 }
0x10f3   :  { %13457 = vmatprep.subr.bf16.mxu1 %v14192_v61 }
0x119f   :  { %v7970_v40 = vpop.f32.mrf.mxu0 }
0x11a0   :  { %v8014_v41 = vpop.f32.mrf.mxu1  ;;  %v8021_v54 = vadd.f32 %v7970_v40, %v7825_v4 }
0x11a1   :  { %v8023_v47 = vadd.f32 %v8014_v41, %v7827_v2  ;;  %v13401_v29 = vpop.f32.mrf.mxu0 }
0x11a2   :  { %v13407_v1 = vpop.f32.mrf.mxu1 }
0x11a3   :  { %v7973_v10 = vpop.f32.mrf.mxu0 }
0x11a4   :  { %v8017_v33 = vpop.f32.mrf.mxu1  ;;  %v8022_v26 = vadd.f32 %v7973_v10, %v7826_v32 }
0x11a5   :  { %v8024_v16 = vadd.f32 %v8017_v33, %v7828_v7  ;;  %v13402_v14 = vpop.f32.mrf.mxu0 }
0x11a6   :  { %v13408_v15 = vpop.f32.mrf.mxu1 }
0x11af   :  { %v8070_v46 = vpop.f32.mrf.mxu0 }
0x11b0   :  { %v8111_v49 = vpop.f32.mrf.mxu1 }
0x11b1   :  { %v13419_v9 = vpop.f32.mrf.mxu0 }
0x11b2   :  { %v13431_v52 = vpop.f32.mrf.mxu1 }
0x11b3   :  { %v8073_v34 = vpop.f32.mrf.mxu0  ;;  %v14149_v52 = vld [vmem:[%s16782_s4 + $0x38] sm:$0xff]  }
0x11b4   :  { %v8114_v51 = vpop.f32.mrf.mxu1  ;;  %v8118_v0 = vpack.c.bf16 %v8073_v34, %v8070_v46  ;;  %v14150_v34 = vld [vmem:[%s16783_s5 + $0x38] sm:$0xff]  }
0x11b5   :  { %v8119_v42 = vpack.c.bf16 %v8114_v51, %v8111_v49  ;;  %v13420_v57 = vpop.f32.mrf.mxu0 }
0x11b6   :  { %v13432_v24 = vpop.f32.mrf.mxu1  ;;  %13436 = vmatmul.mubr.msk.bf16.vlgmr.msra.gmra.mxu0 %vm7450_vm7, %v8118_v0 }
0x11b7   :  { %13442 = vmatmul.mubr.msk.bf16.vlgmr.msra.gmra.mxu1 %vm7450_vm7, %v8119_v42  ;;  %13446 = vmatpush3.bf16.msra.mxu0 %v16162_v35 }
0x11b8   :  { %13458 = vmatpush3.bf16.msra.mxu1 %v16164_v11  ;;  %13447 = vmatprep.subr.bf16.mxu0 %v14192_v61 }
0x11b9   :  { %13459 = vmatprep.subr.bf16.mxu1 %v14192_v61  ;;  %13453 = vmatprep.mubr.msk.bf16.mxu0 %vm14193_vm4, %v14192_v61 }
0x11ba   :  { %13465 = vmatprep.mubr.msk.bf16.mxu1 %vm14193_vm4, %v14192_v61 }
0x11bb   :  { %13448 = vmatpush3.bf16.msra.mxu0 %v16173_v30 }
0x11bc   :  { %13460 = vmatpush3.bf16.msra.mxu1 %v16175_v5  ;;  %13449 = vmatprep.subr.bf16.mxu0 %v14192_v61 }
0x11bd   :  { %13461 = vmatprep.subr.bf16.mxu1 %v14192_v61 }
0x11bf   :  { %13450 = vmatpush3.bf16.msra.mxu0 %v16139_v60 }
0x11c0   :  { %13462 = vmatpush3.bf16.msra.mxu1 %v16141_v55  ;;  %13451 = vmatprep.subr.bf16.mxu0 %v14192_v61 }
0x11c1   :  { %13463 = vmatprep.subr.bf16.mxu1 %v14192_v61 }
0x11c3   :  { %13452 = vmatpush3.bf16.msra.mxu0 %v16185_v43 }
0x11c4   :  { %13464 = vmatpush3.bf16.msra.mxu1 %v16187_v53  ;;  %13469 = vmatprep.subr.bf16.mxu0 %v14192_v61 }
0x11c5   :  { %13475 = vmatprep.subr.bf16.mxu1 %v14192_v61 }
0x11c6   :  { %13454 = vmatmul.mubr.msk.bf16.vlgmr.msra.gmra.mxu0 %vm7256_vm6, %v14145_v48 }
0x11c7   :  { %13466 = vmatmul.mubr.msk.bf16.vlgmr.msra.gmra.mxu1 %vm7256_vm6, %v14145_v48  ;;  %13471 = vmatprep.mubr.msk.bf16.mxu0 %vm14193_vm4, %v14192_v61 }
0x11c8   :  { %13477 = vmatprep.mubr.msk.bf16.mxu1 %vm14193_vm4, %v14192_v61  ;;  %13470 = vmatpush3.bf16.msra.mxu0 %v14146_v27 }
0x11c9   :  { %13476 = vmatpush3.bf16.msra.mxu1 %v14146_v27  ;;  %13481 = vmatprep.subr.bf16.mxu0 %v14192_v61 }
0x11ca   :  { %13493 = vmatprep.subr.bf16.mxu1 %v14192_v61 }
0x1276   :  { %v8166_v56 = vpop.f32.mrf.mxu0 }
0x1277   :  { %v8210_v25 = vpop.f32.mrf.mxu1  ;;  %v8217_v13 = vadd.f32 %v8166_v56, %v8021_v54 }
0x1278   :  { %v8219_v19 = vadd.f32 %v8210_v25, %v8023_v47  ;;  %v13437_v39 = vpop.f32.mrf.mxu0 }
0x1279   :  { %v13443_v23 = vpop.f32.mrf.mxu1 }
0x127a   :  { %v8169_v59 = vpop.f32.mrf.mxu0 }
0x127b   :  { %v8213_v17 = vpop.f32.mrf.mxu1  ;;  %v8218_v58 = vadd.f32 %v8169_v59, %v8022_v26 }
0x127c   :  { %v8220_v4 = vadd.f32 %v8213_v17, %v8024_v16  ;;  %v13438_v2 = vpop.f32.mrf.mxu0 }
0x127d   :  { %v13444_v3 = vpop.f32.mrf.mxu1 }
0x1286   :  { %v8266_v18 = vpop.f32.mrf.mxu0 }
0x1287   :  { %v8307_v31 = vpop.f32.mrf.mxu1 }
0x1288   :  { %v13455_v44 = vpop.f32.mrf.mxu0 }
0x1289   :  { %v13467_v32 = vpop.f32.mrf.mxu1 }
0x128a   :  { %v8269_v7 = vpop.f32.mrf.mxu0  ;;  %v14151_v32 = vld [vmem:[%s16782_s4 + $0x40] sm:$0xff]  }
0x128b   :  { %v8310_v8 = vpop.f32.mrf.mxu1  ;;  %v8314_v21 = vpack.c.bf16 %v8269_v7, %v8266_v18  ;;  %v14152_v7 = vld [vmem:[%s16783_s5 + $0x40] sm:$0xff]  }
0x128c   :  { %v8315_v22 = vpack.c.bf16 %v8310_v8, %v8307_v31  ;;  %v13456_v36 = vpop.f32.mrf.mxu0 }
0x128d   :  { %v13468_v12 = vpop.f32.mrf.mxu1  ;;  %13472 = vmatmul.mubr.msk.bf16.vlgmr.msra.gmra.mxu0 %vm7450_vm7, %v8314_v21 }
0x128e   :  { %13478 = vmatmul.mubr.msk.bf16.vlgmr.msra.gmra.mxu1 %vm7450_vm7, %v8315_v22  ;;  %13482 = vmatpush3.bf16.msra.mxu0 %v16162_v35 }
0x128f   :  { %13494 = vmatpush3.bf16.msra.mxu1 %v16164_v11  ;;  %13483 = vmatprep.subr.bf16.mxu0 %v14192_v61 }
0x1290   :  { %13495 = vmatprep.subr.bf16.mxu1 %v14192_v61  ;;  %13489 = vmatprep.mubr.msk.bf16.mxu0 %vm14193_vm4, %v14192_v61 }
0x1291   :  { %13501 = vmatprep.mubr.msk.bf16.mxu1 %vm14193_vm4, %v14192_v61 }
0x1292   :  { %13484 = vmatpush3.bf16.msra.mxu0 %v16173_v30 }
0x1293   :  { %13496 = vmatpush3.bf16.msra.mxu1 %v16175_v5  ;;  %13485 = vmatprep.subr.bf16.mxu0 %v14192_v61 }
0x1294   :  { %13497 = vmatprep.subr.bf16.mxu1 %v14192_v61 }
0x1296   :  { %13486 = vmatpush3.bf16.msra.mxu0 %v16139_v60 }
0x1297   :  { %13498 = vmatpush3.bf16.msra.mxu1 %v16141_v55  ;;  %13487 = vmatprep.subr.bf16.mxu0 %v14192_v61 }
0x1298   :  { %13499 = vmatprep.subr.bf16.mxu1 %v14192_v61 }
0x129a   :  { %13488 = vmatpush3.bf16.msra.mxu0 %v16185_v43 }
0x129b   :  { %13500 = vmatpush3.bf16.msra.mxu1 %v16187_v53  ;;  %13505 = vmatprep.subr.bf16.mxu0 %v14192_v61 }
0x129c   :  { %13511 = vmatprep.subr.bf16.mxu1 %v14192_v61 }
0x129d   :  { %13490 = vmatmul.mubr.msk.bf16.vlgmr.msra.gmra.mxu0 %vm7256_vm6, %v14147_v38 }
0x129e   :  { %13502 = vmatmul.mubr.msk.bf16.vlgmr.msra.gmra.mxu1 %vm7256_vm6, %v14147_v38  ;;  %13507 = vmatprep.mubr.msk.bf16.mxu0 %vm14193_vm4, %v14192_v61 }
0x129f   :  { %13513 = vmatprep.mubr.msk.bf16.mxu1 %vm14193_vm4, %v14192_v61  ;;  %13506 = vmatpush3.bf16.msra.mxu0 %v14148_v62 }
0x12a0   :  { %13512 = vmatpush3.bf16.msra.mxu1 %v14148_v62  ;;  %13517 = vmatprep.subr.bf16.mxu0 %v14192_v61 }
0x12a1   :  { %13529 = vmatprep.subr.bf16.mxu1 %v14192_v61 }
0x134d   :  { %v8362_v28 = vpop.f32.mrf.mxu0 }
0x134e   :  { %v8406_v45 = vpop.f32.mrf.mxu1  ;;  %v8413_v6 = vadd.f32 %v8362_v28, %v8217_v13 }
0x134f   :  { %v8415_v20 = vadd.f32 %v8406_v45, %v8219_v19  ;;  %v13473_v37 = vpop.f32.mrf.mxu0 }
0x1350   :  { %v13479_v63 = vpop.f32.mrf.mxu1 }
0x1351   :  { %v8365_v50 = vpop.f32.mrf.mxu0 }
0x1352   :  { %v8409_v40 = vpop.f32.mrf.mxu1  ;;  %v8414_v41 = vadd.f32 %v8365_v50, %v8218_v58 }
0x1353   :  { %v8416_v54 = vadd.f32 %v8409_v40, %v8220_v4  ;;  %v13474_v47 = vpop.f32.mrf.mxu0 }
0x1354   :  { %v13480_v29 = vpop.f32.mrf.mxu1 }
0x135d   :  { %v8462_v1 = vpop.f32.mrf.mxu0 }
0x135e   :  { %v8503_v10 = vpop.f32.mrf.mxu1 }
0x135f   :  { %v13491_v33 = vpop.f32.mrf.mxu0 }
0x1360   :  { %v13503_v26 = vpop.f32.mrf.mxu1 }
0x1361   :  { %v8465_v16 = vpop.f32.mrf.mxu0  ;;  %v14153_v26 = vld [vmem:[%s16782_s4 + $0x48] sm:$0xff]  }
0x1362   :  { %v8506_v14 = vpop.f32.mrf.mxu1  ;;  %v8510_v15 = vpack.c.bf16 %v8465_v16, %v8462_v1  ;;  %v14154_v16 = vld [vmem:[%s16783_s5 + $0x48] sm:$0xff]  }
0x1363   :  { %v8511_v46 = vpack.c.bf16 %v8506_v14, %v8503_v10  ;;  %v13492_v49 = vpop.f32.mrf.mxu0 }
0x1364   :  { %v13504_v9 = vpop.f32.mrf.mxu1  ;;  %13508 = vmatmul.mubr.msk.bf16.vlgmr.msra.gmra.mxu0 %vm7450_vm7, %v8510_v15 }
0x1365   :  { %13514 = vmatmul.mubr.msk.bf16.vlgmr.msra.gmra.mxu1 %vm7450_vm7, %v8511_v46  ;;  %13518 = vmatpush3.bf16.msra.mxu0 %v16162_v35 }
0x1366   :  { %13530 = vmatpush3.bf16.msra.mxu1 %v16164_v11  ;;  %13519 = vmatprep.subr.bf16.mxu0 %v14192_v61 }
0x1367   :  { %13531 = vmatprep.subr.bf16.mxu1 %v14192_v61  ;;  %13525 = vmatprep.mubr.msk.bf16.mxu0 %vm14193_vm4, %v14192_v61 }
0x1368   :  { %13537 = vmatprep.mubr.msk.bf16.mxu1 %vm14193_vm4, %v14192_v61 }
0x1369   :  { %13520 = vmatpush3.bf16.msra.mxu0 %v16173_v30 }
0x136a   :  { %13532 = vmatpush3.bf16.msra.mxu1 %v16175_v5  ;;  %13521 = vmatprep.subr.bf16.mxu0 %v14192_v61 }
0x136b   :  { %13533 = vmatprep.subr.bf16.mxu1 %v14192_v61 }
0x136d   :  { %13522 = vmatpush3.bf16.msra.mxu0 %v16139_v60 }
0x136e   :  { %13534 = vmatpush3.bf16.msra.mxu1 %v16141_v55  ;;  %13523 = vmatprep.subr.bf16.mxu0 %v14192_v61 }
0x136f   :  { %13535 = vmatprep.subr.bf16.mxu1 %v14192_v61 }
0x1371   :  { %13524 = vmatpush3.bf16.msra.mxu0 %v16185_v43 }
0x1372   :  { %13536 = vmatpush3.bf16.msra.mxu1 %v16187_v53  ;;  %13541 = vmatprep.subr.bf16.mxu0 %v14192_v61 }
0x1373   :  { %13547 = vmatprep.subr.bf16.mxu1 %v14192_v61 }
0x1374   :  { %13526 = vmatmul.mubr.msk.bf16.vlgmr.msra.gmra.mxu0 %vm7256_vm6, %v14149_v52 }
0x1375   :  { %13538 = vmatmul.mubr.msk.bf16.vlgmr.msra.gmra.mxu1 %vm7256_vm6, %v14149_v52  ;;  %13543 = vmatprep.mubr.msk.bf16.mxu0 %vm14193_vm4, %v14192_v61 }
0x1376   :  { %13549 = vmatprep.mubr.msk.bf16.mxu1 %vm14193_vm4, %v14192_v61  ;;  %13542 = vmatpush3.bf16.msra.mxu0 %v14150_v34 }
0x1377   :  { %13548 = vmatpush3.bf16.msra.mxu1 %v14150_v34  ;;  %13553 = vmatprep.subr.bf16.mxu0 %v14192_v61 }
0x1378   :  { %13565 = vmatprep.subr.bf16.mxu1 %v14192_v61 }
0x1424   :  { %v8558_v51 = vpop.f32.mrf.mxu0 }
0x1425   :  { %v8602_v0 = vpop.f32.mrf.mxu1  ;;  %v8609_v42 = vadd.f32 %v8558_v51, %v8413_v6 }
0x1426   :  { %v8611_v57 = vadd.f32 %v8602_v0, %v8415_v20  ;;  %v13509_v24 = vpop.f32.mrf.mxu0 }
0x1427   :  { %v13515_v48 = vpop.f32.mrf.mxu1 }
0x1428   :  { %v8561_v27 = vpop.f32.mrf.mxu0 }
0x1429   :  { %v8605_v56 = vpop.f32.mrf.mxu1  ;;  %v8610_v25 = vadd.f32 %v8561_v27, %v8414_v41 }
0x142a   :  { %v8612_v13 = vadd.f32 %v8605_v56, %v8416_v54  ;;  %v13510_v19 = vpop.f32.mrf.mxu0 }
0x142b   :  { %v13516_v39 = vpop.f32.mrf.mxu1 }
0x1434   :  { %v8658_v23 = vpop.f32.mrf.mxu0 }
0x1435   :  { %v8699_v59 = vpop.f32.mrf.mxu1 }
0x1436   :  { %v13527_v17 = vpop.f32.mrf.mxu0 }
0x1437   :  { %v13539_v58 = vpop.f32.mrf.mxu1 }
0x1438   :  { %v8661_v4 = vpop.f32.mrf.mxu0  ;;  %v14155_v58 = vld [vmem:[%s16782_s4 + $0x50] sm:$0xff]  }
0x1439   :  { %v8702_v2 = vpop.f32.mrf.mxu1  ;;  %v8706_v3 = vpack.c.bf16 %v8661_v4, %v8658_v23  ;;  %v14156_v4 = vld [vmem:[%s16783_s5 + $0x50] sm:$0xff]  }
0x143a   :  { %v8707_v18 = vpack.c.bf16 %v8702_v2, %v8699_v59  ;;  %v13528_v31 = vpop.f32.mrf.mxu0 }
0x143b   :  { %v13540_v44 = vpop.f32.mrf.mxu1  ;;  %13544 = vmatmul.mubr.msk.bf16.vlgmr.msra.gmra.mxu0 %vm7450_vm7, %v8706_v3 }
0x143c   :  { %13550 = vmatmul.mubr.msk.bf16.vlgmr.msra.gmra.mxu1 %vm7450_vm7, %v8707_v18  ;;  %13554 = vmatpush3.bf16.msra.mxu0 %v16162_v35 }
0x143d   :  { %13566 = vmatpush3.bf16.msra.mxu1 %v16164_v11  ;;  %13555 = vmatprep.subr.bf16.mxu0 %v14192_v61 }
0x143e   :  { %13567 = vmatprep.subr.bf16.mxu1 %v14192_v61  ;;  %13561 = vmatprep.mubr.msk.bf16.mxu0 %vm14193_vm4, %v14192_v61 }
0x143f   :  { %13573 = vmatprep.mubr.msk.bf16.mxu1 %vm14193_vm4, %v14192_v61 }
0x1440   :  { %13556 = vmatpush3.bf16.msra.mxu0 %v16173_v30 }
0x1441   :  { %13568 = vmatpush3.bf16.msra.mxu1 %v16175_v5  ;;  %13557 = vmatprep.subr.bf16.mxu0 %v14192_v61 }
0x1442   :  { %13569 = vmatprep.subr.bf16.mxu1 %v14192_v61 }
0x1444   :  { %13558 = vmatpush3.bf16.msra.mxu0 %v16139_v60 }
0x1445   :  { %13570 = vmatpush3.bf16.msra.mxu1 %v16141_v55  ;;  %13559 = vmatprep.subr.bf16.mxu0 %v14192_v61 }
0x1446   :  { %13571 = vmatprep.subr.bf16.mxu1 %v14192_v61 }
0x1448   :  { %13560 = vmatpush3.bf16.msra.mxu0 %v16185_v43 }
0x1449   :  { %13572 = vmatpush3.bf16.msra.mxu1 %v16187_v53  ;;  %13577 = vmatprep.subr.bf16.mxu0 %v14192_v61 }
0x144a   :  { %13583 = vmatprep.subr.bf16.mxu1 %v14192_v61 }
0x144b   :  { %13562 = vmatmul.mubr.msk.bf16.vlgmr.msra.gmra.mxu0 %vm7256_vm6, %v14151_v32 }
0x144c   :  { %13574 = vmatmul.mubr.msk.bf16.vlgmr.msra.gmra.mxu1 %vm7256_vm6, %v14151_v32  ;;  %13579 = vmatprep.mubr.msk.bf16.mxu0 %vm14193_vm4, %v14192_v61 }
0x144d   :  { %13585 = vmatprep.mubr.msk.bf16.mxu1 %vm14193_vm4, %v14192_v61  ;;  %13578 = vmatpush3.bf16.msra.mxu0 %v14152_v7 }
0x144e   :  { %13584 = vmatpush3.bf16.msra.mxu1 %v14152_v7  ;;  %13589 = vmatprep.subr.bf16.mxu0 %v14192_v61 }
0x144f   :  { %13601 = vmatprep.subr.bf16.mxu1 %v14192_v61 }
0x14fb   :  { %v8754_v8 = vpop.f32.mrf.mxu0 }
0x14fc   :  { %v8798_v21 = vpop.f32.mrf.mxu1  ;;  %v8805_v22 = vadd.f32 %v8754_v8, %v8609_v42 }
0x14fd   :  { %v8807_v36 = vadd.f32 %v8798_v21, %v8611_v57  ;;  %v13545_v12 = vpop.f32.mrf.mxu0 }
0x14fe   :  { %v13551_v38 = vpop.f32.mrf.mxu1 }
0x14ff   :  { %v8757_v62 = vpop.f32.mrf.mxu0 }
0x1500   :  { %v8801_v28 = vpop.f32.mrf.mxu1  ;;  %v8806_v45 = vadd.f32 %v8757_v62, %v8610_v25 }
0x1501   :  { %v8808_v6 = vadd.f32 %v8801_v28, %v8612_v13  ;;  %v13546_v20 = vpop.f32.mrf.mxu0 }
0x1502   :  { %v13552_v37 = vpop.f32.mrf.mxu1 }
0x150b   :  { %v8854_v63 = vpop.f32.mrf.mxu0 }
0x150c   :  { %v8895_v50 = vpop.f32.mrf.mxu1 }
0x150d   :  { %v13563_v40 = vpop.f32.mrf.mxu0 }
0x150e   :  { %v13575_v41 = vpop.f32.mrf.mxu1 }
0x150f   :  { %v8857_v54 = vpop.f32.mrf.mxu0  ;;  %v14157_v41 = vld [vmem:[%s16782_s4 + $0x58] sm:$0xff]  }
0x1510   :  { %v8898_v47 = vpop.f32.mrf.mxu1  ;;  %v8902_v29 = vpack.c.bf16 %v8857_v54, %v8854_v63  ;;  %v14158_v54 = vld [vmem:[%s16783_s5 + $0x58] sm:$0xff]  }
0x1511   :  { %v8903_v1 = vpack.c.bf16 %v8898_v47, %v8895_v50  ;;  %v13564_v10 = vpop.f32.mrf.mxu0 }
0x1512   :  { %v13576_v33 = vpop.f32.mrf.mxu1  ;;  %13580 = vmatmul.mubr.msk.bf16.vlgmr.msra.gmra.mxu0 %vm7450_vm7, %v8902_v29 }
0x1513   :  { %13586 = vmatmul.mubr.msk.bf16.vlgmr.msra.gmra.mxu1 %vm7450_vm7, %v8903_v1  ;;  %13590 = vmatpush3.bf16.msra.mxu0 %v16162_v35 }
0x1514   :  { %13602 = vmatpush3.bf16.msra.mxu1 %v16164_v11  ;;  %13591 = vmatprep.subr.bf16.mxu0 %v14192_v61 }
0x1515   :  { %13603 = vmatprep.subr.bf16.mxu1 %v14192_v61  ;;  %13597 = vmatprep.mubr.msk.bf16.mxu0 %vm14193_vm4, %v14192_v61 }
0x1516   :  { %13609 = vmatprep.mubr.msk.bf16.mxu1 %vm14193_vm4, %v14192_v61 }
0x1517   :  { %13592 = vmatpush3.bf16.msra.mxu0 %v16173_v30 }
0x1518   :  { %13604 = vmatpush3.bf16.msra.mxu1 %v16175_v5  ;;  %13593 = vmatprep.subr.bf16.mxu0 %v14192_v61 }
0x1519   :  { %13605 = vmatprep.subr.bf16.mxu1 %v14192_v61 }
0x151b   :  { %13594 = vmatpush3.bf16.msra.mxu0 %v16139_v60 }
0x151c   :  { %13606 = vmatpush3.bf16.msra.mxu1 %v16141_v55  ;;  %13595 = vmatprep.subr.bf16.mxu0 %v14192_v61 }
0x151d   :  { %13607 = vmatprep.subr.bf16.mxu1 %v14192_v61 }
0x151f   :  { %13596 = vmatpush3.bf16.msra.mxu0 %v16185_v43 }
0x1520   :  { %13608 = vmatpush3.bf16.msra.mxu1 %v16187_v53  ;;  %13613 = vmatprep.subr.bf16.mxu0 %v14192_v61 }
0x1521   :  { %13619 = vmatprep.subr.bf16.mxu1 %v14192_v61 }
0x1522   :  { %13598 = vmatmul.mubr.msk.bf16.vlgmr.msra.gmra.mxu0 %vm7256_vm6, %v14153_v26 }
0x1523   :  { %13610 = vmatmul.mubr.msk.bf16.vlgmr.msra.gmra.mxu1 %vm7256_vm6, %v14153_v26  ;;  %13615 = vmatprep.mubr.msk.bf16.mxu0 %vm14193_vm4, %v14192_v61 }
0x1524   :  { %13621 = vmatprep.mubr.msk.bf16.mxu1 %vm14193_vm4, %v14192_v61  ;;  %13614 = vmatpush3.bf16.msra.mxu0 %v14154_v16 }
0x1525   :  { %13620 = vmatpush3.bf16.msra.mxu1 %v14154_v16  ;;  %13625 = vmatprep.subr.bf16.mxu0 %v14192_v61 }
0x1526   :  { %13637 = vmatprep.subr.bf16.mxu1 %v14192_v61 }
0x15d2   :  { %v8950_v14 = vpop.f32.mrf.mxu0 }
0x15d3   :  { %v8994_v15 = vpop.f32.mrf.mxu1  ;;  %v9001_v46 = vadd.f32 %v8950_v14, %v8805_v22 }
0x15d4   :  { %v9003_v49 = vadd.f32 %v8994_v15, %v8807_v36  ;;  %v13581_v9 = vpop.f32.mrf.mxu0 }
0x15d5   :  { %v13587_v52 = vpop.f32.mrf.mxu1 }
0x15d6   :  { %v8953_v34 = vpop.f32.mrf.mxu0 }
0x15d7   :  { %v8997_v51 = vpop.f32.mrf.mxu1  ;;  %v9002_v0 = vadd.f32 %v8953_v34, %v8806_v45 }
0x15d8   :  { %v9004_v42 = vadd.f32 %v8997_v51, %v8808_v6  ;;  %v13582_v57 = vpop.f32.mrf.mxu0 }
0x15d9   :  { %v13588_v24 = vpop.f32.mrf.mxu1 }
0x15e2   :  { %v9050_v48 = vpop.f32.mrf.mxu0 }
0x15e3   :  { %v9091_v27 = vpop.f32.mrf.mxu1 }
0x15e4   :  { %v13599_v56 = vpop.f32.mrf.mxu0 }
0x15e5   :  { %v13611_v25 = vpop.f32.mrf.mxu1 }
0x15e6   :  { %v9053_v13 = vpop.f32.mrf.mxu0  ;;  %v14159_v25 = vld [vmem:[%s16782_s4 + $0x60] sm:$0xff]  }
0x15e7   :  { %v9094_v19 = vpop.f32.mrf.mxu1  ;;  %v9098_v39 = vpack.c.bf16 %v9053_v13, %v9050_v48  ;;  %v14160_v13 = vld [vmem:[%s16783_s5 + $0x60] sm:$0xff]  }
0x15e8   :  { %v9099_v23 = vpack.c.bf16 %v9094_v19, %v9091_v27  ;;  %v13600_v59 = vpop.f32.mrf.mxu0 }
0x15e9   :  { %v13612_v17 = vpop.f32.mrf.mxu1  ;;  %13616 = vmatmul.mubr.msk.bf16.vlgmr.msra.gmra.mxu0 %vm7450_vm7, %v9098_v39 }
0x15ea   :  { %13622 = vmatmul.mubr.msk.bf16.vlgmr.msra.gmra.mxu1 %vm7450_vm7, %v9099_v23  ;;  %13626 = vmatpush3.bf16.msra.mxu0 %v16162_v35 }
0x15eb   :  { %13638 = vmatpush3.bf16.msra.mxu1 %v16164_v11  ;;  %13627 = vmatprep.subr.bf16.mxu0 %v14192_v61 }
0x15ec   :  { %13639 = vmatprep.subr.bf16.mxu1 %v14192_v61  ;;  %13633 = vmatprep.mubr.msk.bf16.mxu0 %vm14193_vm4, %v14192_v61 }
0x15ed   :  { %13645 = vmatprep.mubr.msk.bf16.mxu1 %vm14193_vm4, %v14192_v61 }
0x15ee   :  { %13628 = vmatpush3.bf16.msra.mxu0 %v16173_v30 }
0x15ef   :  { %13640 = vmatpush3.bf16.msra.mxu1 %v16175_v5  ;;  %13629 = vmatprep.subr.bf16.mxu0 %v14192_v61 }
0x15f0   :  { %13641 = vmatprep.subr.bf16.mxu1 %v14192_v61 }
0x15f2   :  { %13630 = vmatpush3.bf16.msra.mxu0 %v16139_v60 }
0x15f3   :  { %13642 = vmatpush3.bf16.msra.mxu1 %v16141_v55  ;;  %13631 = vmatprep.subr.bf16.mxu0 %v14192_v61 }
0x15f4   :  { %13643 = vmatprep.subr.bf16.mxu1 %v14192_v61 }
0x15f6   :  { %13632 = vmatpush3.bf16.msra.mxu0 %v16185_v43 }
0x15f7   :  { %13644 = vmatpush3.bf16.msra.mxu1 %v16187_v53  ;;  %13649 = vmatprep.subr.bf16.mxu0 %v14192_v61 }
0x15f8   :  { %13655 = vmatprep.subr.bf16.mxu1 %v14192_v61 }
0x15f9   :  { %13634 = vmatmul.mubr.msk.bf16.vlgmr.msra.gmra.mxu0 %vm7256_vm6, %v14155_v58 }
0x15fa   :  { %13646 = vmatmul.mubr.msk.bf16.vlgmr.msra.gmra.mxu1 %vm7256_vm6, %v14155_v58  ;;  %13651 = vmatprep.mubr.msk.bf16.mxu0 %vm14193_vm4, %v14192_v61 }
0x15fb   :  { %13657 = vmatprep.mubr.msk.bf16.mxu1 %vm14193_vm4, %v14192_v61  ;;  %13650 = vmatpush3.bf16.msra.mxu0 %v14156_v4 }
0x15fc   :  { %13656 = vmatpush3.bf16.msra.mxu1 %v14156_v4  ;;  %13661 = vmatprep.subr.bf16.mxu0 %v14192_v61 }
0x15fd   :  { %13673 = vmatprep.subr.bf16.mxu1 %v14192_v61 }
0x16a9   :  { %v9146_v2 = vpop.f32.mrf.mxu0 }
0x16aa   :  { %v9190_v3 = vpop.f32.mrf.mxu1  ;;  %v9197_v18 = vadd.f32 %v9146_v2, %v9001_v46 }
0x16ab   :  { %v9199_v31 = vadd.f32 %v9190_v3, %v9003_v49  ;;  %v13617_v44 = vpop.f32.mrf.mxu0 }
0x16ac   :  { %v13623_v32 = vpop.f32.mrf.mxu1 }
0x16ad   :  { %v9149_v7 = vpop.f32.mrf.mxu0 }
0x16ae   :  { %v9193_v8 = vpop.f32.mrf.mxu1  ;;  %v9198_v21 = vadd.f32 %v9149_v7, %v9002_v0 }
0x16af   :  { %v9200_v22 = vadd.f32 %v9193_v8, %v9004_v42  ;;  %v13618_v36 = vpop.f32.mrf.mxu0 }
0x16b0   :  { %v13624_v12 = vpop.f32.mrf.mxu1 }
0x16b9   :  { %v9246_v38 = vpop.f32.mrf.mxu0 }
0x16ba   :  { %v9287_v62 = vpop.f32.mrf.mxu1 }
0x16bb   :  { %v13635_v28 = vpop.f32.mrf.mxu0 }
0x16bc   :  { %v13647_v45 = vpop.f32.mrf.mxu1 }
0x16bd   :  { %v9249_v6 = vpop.f32.mrf.mxu0  ;;  %v14161_v45 = vld [vmem:[%s16782_s4 + $0x68] sm:$0xff]  }
0x16be   :  { %v9290_v20 = vpop.f32.mrf.mxu1  ;;  %v9294_v37 = vpack.c.bf16 %v9249_v6, %v9246_v38  ;;  %v14162_v6 = vld [vmem:[%s16783_s5 + $0x68] sm:$0xff]  }
0x16bf   :  { %v9295_v63 = vpack.c.bf16 %v9290_v20, %v9287_v62  ;;  %v13636_v50 = vpop.f32.mrf.mxu0 }
0x16c0   :  { %v13648_v40 = vpop.f32.mrf.mxu1  ;;  %13652 = vmatmul.mubr.msk.bf16.vlgmr.msra.gmra.mxu0 %vm7450_vm7, %v9294_v37 }
0x16c1   :  { %13658 = vmatmul.mubr.msk.bf16.vlgmr.msra.gmra.mxu1 %vm7450_vm7, %v9295_v63  ;;  %13662 = vmatpush3.bf16.msra.mxu0 %v16162_v35 }
0x16c2   :  { %13674 = vmatpush3.bf16.msra.mxu1 %v16164_v11  ;;  %13663 = vmatprep.subr.bf16.mxu0 %v14192_v61 }
0x16c3   :  { %13675 = vmatprep.subr.bf16.mxu1 %v14192_v61  ;;  %13669 = vmatprep.mubr.msk.bf16.mxu0 %vm14193_vm4, %v14192_v61 }
0x16c4   :  { %13681 = vmatprep.mubr.msk.bf16.mxu1 %vm14193_vm4, %v14192_v61 }
0x16c5   :  { %13664 = vmatpush3.bf16.msra.mxu0 %v16173_v30 }
0x16c6   :  { %13676 = vmatpush3.bf16.msra.mxu1 %v16175_v5  ;;  %13665 = vmatprep.subr.bf16.mxu0 %v14192_v61 }
0x16c7   :  { %13677 = vmatprep.subr.bf16.mxu1 %v14192_v61 }
0x16c9   :  { %13666 = vmatpush3.bf16.msra.mxu0 %v16139_v60 }
0x16ca   :  { %13678 = vmatpush3.bf16.msra.mxu1 %v16141_v55  ;;  %13667 = vmatprep.subr.bf16.mxu0 %v14192_v61 }
0x16cb   :  { %13679 = vmatprep.subr.bf16.mxu1 %v14192_v61 }
0x16cd   :  { %13668 = vmatpush3.bf16.msra.mxu0 %v16185_v43 }
0x16ce   :  { %13680 = vmatpush3.bf16.msra.mxu1 %v16187_v53  ;;  %13685 = vmatprep.subr.bf16.mxu0 %v14192_v61 }
0x16cf   :  { %13691 = vmatprep.subr.bf16.mxu1 %v14192_v61 }
0x16d0   :  { %13670 = vmatmul.mubr.msk.bf16.vlgmr.msra.gmra.mxu0 %vm7256_vm6, %v14157_v41 }
0x16d1   :  { %13682 = vmatmul.mubr.msk.bf16.vlgmr.msra.gmra.mxu1 %vm7256_vm6, %v14157_v41  ;;  %13687 = vmatprep.mubr.msk.bf16.mxu0 %vm14193_vm4, %v14192_v61 }
0x16d2   :  { %13693 = vmatprep.mubr.msk.bf16.mxu1 %vm14193_vm4, %v14192_v61  ;;  %13686 = vmatpush3.bf16.msra.mxu0 %v14158_v54 }
0x16d3   :  { %13692 = vmatpush3.bf16.msra.mxu1 %v14158_v54  ;;  %13697 = vmatprep.subr.bf16.mxu0 %v14192_v61 }
0x16d4   :  { %13709 = vmatprep.subr.bf16.mxu1 %v14192_v61 }
0x1780   :  { %v9342_v47 = vpop.f32.mrf.mxu0 }
0x1781   :  { %v9386_v29 = vpop.f32.mrf.mxu1  ;;  %v9393_v1 = vadd.f32 %v9342_v47, %v9197_v18 }
0x1782   :  { %v9395_v10 = vadd.f32 %v9386_v29, %v9199_v31  ;;  %v13653_v33 = vpop.f32.mrf.mxu0 }
0x1783   :  { %v13659_v26 = vpop.f32.mrf.mxu1 }
0x1784   :  { %v9345_v16 = vpop.f32.mrf.mxu0 }
0x1785   :  { %v9389_v14 = vpop.f32.mrf.mxu1  ;;  %v9394_v15 = vadd.f32 %v9345_v16, %v9198_v21 }
0x1786   :  { %v9396_v46 = vadd.f32 %v9389_v14, %v9200_v22  ;;  %v13654_v49 = vpop.f32.mrf.mxu0 }
0x1787   :  { %v13660_v9 = vpop.f32.mrf.mxu1 }
0x1790   :  { %v9442_v52 = vpop.f32.mrf.mxu0 }
0x1791   :  { %v9483_v34 = vpop.f32.mrf.mxu1 }
0x1792   :  { %v13671_v51 = vpop.f32.mrf.mxu0 }
0x1793   :  { %v13683_v0 = vpop.f32.mrf.mxu1 }
0x1794   :  { %v9445_v42 = vpop.f32.mrf.mxu0  ;;  %v14163_v0 = vld [vmem:[%s16782_s4 + $0x70] sm:$0xff]  }
0x1795   :  { %v9486_v57 = vpop.f32.mrf.mxu1  ;;  %v9490_v24 = vpack.c.bf16 %v9445_v42, %v9442_v52  ;;  %v14164_v42 = vld [vmem:[%s16783_s5 + $0x70] sm:$0xff]  }
0x1796   :  { %v9491_v48 = vpack.c.bf16 %v9486_v57, %v9483_v34  ;;  %v13672_v27 = vpop.f32.mrf.mxu0 }
0x1797   :  { %v13684_v56 = vpop.f32.mrf.mxu1  ;;  %13688 = vmatmul.mubr.msk.bf16.vlgmr.msra.gmra.mxu0 %vm7450_vm7, %v9490_v24 }
0x1798   :  { %13694 = vmatmul.mubr.msk.bf16.vlgmr.msra.gmra.mxu1 %vm7450_vm7, %v9491_v48  ;;  %13698 = vmatpush3.bf16.msra.mxu0 %v16162_v35 }
0x1799   :  { %13710 = vmatpush3.bf16.msra.mxu1 %v16164_v11  ;;  %13699 = vmatprep.subr.bf16.mxu0 %v14192_v61 }
0x179a   :  { %13711 = vmatprep.subr.bf16.mxu1 %v14192_v61  ;;  %13705 = vmatprep.mubr.msk.bf16.mxu0 %vm14193_vm4, %v14192_v61 }
0x179b   :  { %13717 = vmatprep.mubr.msk.bf16.mxu1 %vm14193_vm4, %v14192_v61 }
0x179c   :  { %13700 = vmatpush3.bf16.msra.mxu0 %v16173_v30 }
0x179d   :  { %13712 = vmatpush3.bf16.msra.mxu1 %v16175_v5  ;;  %13701 = vmatprep.subr.bf16.mxu0 %v14192_v61 }
0x179e   :  { %13713 = vmatprep.subr.bf16.mxu1 %v14192_v61 }
0x17a0   :  { %13702 = vmatpush3.bf16.msra.mxu0 %v16139_v60 }
0x17a1   :  { %13714 = vmatpush3.bf16.msra.mxu1 %v16141_v55  ;;  %13703 = vmatprep.subr.bf16.mxu0 %v14192_v61 }
0x17a2   :  { %13715 = vmatprep.subr.bf16.mxu1 %v14192_v61 }
0x17a4   :  { %13704 = vmatpush3.bf16.msra.mxu0 %v16185_v43 }
0x17a5   :  { %13716 = vmatpush3.bf16.msra.mxu1 %v16187_v53  ;;  %13721 = vmatprep.subr.bf16.mxu0 %v14192_v61 }
0x17a6   :  { %13727 = vmatprep.subr.bf16.mxu1 %v14192_v61 }
0x17a7   :  { %13706 = vmatmul.mubr.msk.bf16.vlgmr.msra.gmra.mxu0 %vm7256_vm6, %v14159_v25 }
0x17a8   :  { %13718 = vmatmul.mubr.msk.bf16.vlgmr.msra.gmra.mxu1 %vm7256_vm6, %v14159_v25  ;;  %13723 = vmatprep.mubr.msk.bf16.mxu0 %vm14193_vm4, %v14192_v61 }
0x17a9   :  { %13729 = vmatprep.mubr.msk.bf16.mxu1 %vm14193_vm4, %v14192_v61  ;;  %13722 = vmatpush3.bf16.msra.mxu0 %v14160_v13 }
0x17aa   :  { %13728 = vmatpush3.bf16.msra.mxu1 %v14160_v13  ;;  %13733 = vmatprep.subr.bf16.mxu0 %v14192_v61 }
0x17ab   :  { %13745 = vmatprep.subr.bf16.mxu1 %v14192_v61 }
0x1857   :  { %v9538_v19 = vpop.f32.mrf.mxu0 }
0x1858   :  { %v9582_v39 = vpop.f32.mrf.mxu1  ;;  %v9589_v23 = vadd.f32 %v9538_v19, %v9393_v1 }
0x1859   :  { %v9591_v59 = vadd.f32 %v9582_v39, %v9395_v10  ;;  %v13689_v17 = vpop.f32.mrf.mxu0 }
0x185a   :  { %v13695_v58 = vpop.f32.mrf.mxu1 }
0x185b   :  { %v9541_v4 = vpop.f32.mrf.mxu0 }
0x185c   :  { %v9585_v2 = vpop.f32.mrf.mxu1  ;;  %v9590_v3 = vadd.f32 %v9541_v4, %v9394_v15 }
0x185d   :  { %v9592_v18 = vadd.f32 %v9585_v2, %v9396_v46  ;;  %v13690_v31 = vpop.f32.mrf.mxu0 }
0x185e   :  { %v13696_v44 = vpop.f32.mrf.mxu1 }
0x1867   :  { %v9638_v32 = vpop.f32.mrf.mxu0 }
0x1868   :  { %v9679_v7 = vpop.f32.mrf.mxu1 }
0x1869   :  { %v13707_v8 = vpop.f32.mrf.mxu0 }
0x186a   :  { %v13719_v21 = vpop.f32.mrf.mxu1 }
0x186b   :  { %v9641_v22 = vpop.f32.mrf.mxu0 }
0x186c   :  { %v9682_v36 = vpop.f32.mrf.mxu1  ;;  %v9686_v12 = vpack.c.bf16 %v9641_v22, %v9638_v32 }
0x186d   :  { %v9687_v38 = vpack.c.bf16 %v9682_v36, %v9679_v7  ;;  %v13708_v62 = vpop.f32.mrf.mxu0 }
0x186e   :  { %v13720_v28 = vpop.f32.mrf.mxu1  ;;  %13724 = vmatmul.mubr.msk.bf16.vlgmr.msra.gmra.mxu0 %vm7450_vm7, %v9686_v12 }
0x186f   :  { %13730 = vmatmul.mubr.msk.bf16.vlgmr.msra.gmra.mxu1 %vm7450_vm7, %v9687_v38  ;;  %13734 = vmatpush3.bf16.msra.mxu0 %v16162_v35 }
0x1870   :  { %13746 = vmatpush3.bf16.msra.mxu1 %v16164_v11  ;;  %13735 = vmatprep.subr.bf16.mxu0 %v14192_v61 }
0x1871   :  { %13747 = vmatprep.subr.bf16.mxu1 %v14192_v61  ;;  %13741 = vmatprep.mubr.msk.bf16.mxu0 %vm14193_vm4, %v14192_v61 }
0x1872   :  { %13753 = vmatprep.mubr.msk.bf16.mxu1 %vm14193_vm4, %v14192_v61 }
0x1873   :  { %13736 = vmatpush3.bf16.msra.mxu0 %v16173_v30 }
0x1874   :  { %13748 = vmatpush3.bf16.msra.mxu1 %v16175_v5  ;;  %13737 = vmatprep.subr.bf16.mxu0 %v14192_v61 }
0x1875   :  { %13749 = vmatprep.subr.bf16.mxu1 %v14192_v61 }
0x1877   :  { %13738 = vmatpush3.bf16.msra.mxu0 %v16139_v60 }
0x1878   :  { %13750 = vmatpush3.bf16.msra.mxu1 %v16141_v55  ;;  %13739 = vmatprep.subr.bf16.mxu0 %v14192_v61 }
0x1879   :  { %13751 = vmatprep.subr.bf16.mxu1 %v14192_v61 }
0x187b   :  { %13740 = vmatpush3.bf16.msra.mxu0 %v16185_v43 }
0x187c   :  { %13752 = vmatpush3.bf16.msra.mxu1 %v16187_v53  ;;  %13757 = vmatprep.subr.bf16.mxu0 %v14192_v61 }
0x187d   :  { %13763 = vmatprep.subr.bf16.mxu1 %v14192_v61 }
0x187e   :  { %13742 = vmatmul.mubr.msk.bf16.vlgmr.msra.gmra.mxu0 %vm7256_vm6, %v14161_v45 }
0x187f   :  { %13754 = vmatmul.mubr.msk.bf16.vlgmr.msra.gmra.mxu1 %vm7256_vm6, %v14161_v45  ;;  %13759 = vmatprep.mubr.msk.bf16.mxu0 %vm14193_vm4, %v14192_v61 }
0x1880   :  { %13765 = vmatprep.mubr.msk.bf16.mxu1 %vm14193_vm4, %v14192_v61  ;;  %13758 = vmatpush3.bf16.msra.mxu0 %v14162_v6 }
0x1881   :  { %13764 = vmatpush3.bf16.msra.mxu1 %v14162_v6  ;;  %13769 = vmatprep.subr.bf16.mxu0 %v14192_v61 }
0x1882   :  { %13781 = vmatprep.subr.bf16.mxu1 %v14192_v61 }
0x192e   :  { %v9734_v20 = vpop.f32.mrf.mxu0 }
0x192f   :  { %v9778_v37 = vpop.f32.mrf.mxu1  ;;  %v9785_v63 = vadd.f32 %v9734_v20, %v9589_v23 }
0x1930   :  { %v9787_v50 = vadd.f32 %v9778_v37, %v9591_v59  ;;  %v13725_v40 = vpop.f32.mrf.mxu0 }
0x1931   :  { %v13731_v41 = vpop.f32.mrf.mxu1 }
0x1932   :  { %v9737_v54 = vpop.f32.mrf.mxu0 }
0x1933   :  { %v9781_v47 = vpop.f32.mrf.mxu1  ;;  %v9786_v29 = vadd.f32 %v9737_v54, %v9590_v3 }
0x1934   :  { %v9788_v1 = vadd.f32 %v9781_v47, %v9592_v18  ;;  %v13726_v10 = vpop.f32.mrf.mxu0 }
0x1935   :  { %v13732_v33 = vpop.f32.mrf.mxu1 }
0x193e   :  { %v9834_v26 = vpop.f32.mrf.mxu0 }
0x193f   :  { %v9875_v16 = vpop.f32.mrf.mxu1 }
0x1940   :  { %v13743_v14 = vpop.f32.mrf.mxu0 }
0x1941   :  { %v13755_v15 = vpop.f32.mrf.mxu1 }
0x1942   :  { %v9837_v46 = vpop.f32.mrf.mxu0 }
0x1943   :  { %v9878_v49 = vpop.f32.mrf.mxu1  ;;  %v9882_v9 = vpack.c.bf16 %v9837_v46, %v9834_v26 }
0x1944   :  { %v9883_v52 = vpack.c.bf16 %v9878_v49, %v9875_v16  ;;  %v13744_v34 = vpop.f32.mrf.mxu0 }
0x1945   :  { %v13756_v51 = vpop.f32.mrf.mxu1  ;;  %13760 = vmatmul.mubr.msk.bf16.vlgmr.msra.gmra.mxu0 %vm7450_vm7, %v9882_v9 }
0x1946   :  { %13766 = vmatmul.mubr.msk.bf16.vlgmr.msra.gmra.mxu1 %vm7450_vm7, %v9883_v52  ;;  %13770 = vmatpush3.bf16.msra.mxu0 %v16162_v35 }
0x1947   :  { %13782 = vmatpush3.bf16.msra.mxu1 %v16164_v11  ;;  %13771 = vmatprep.subr.bf16.mxu0 %v14192_v61 }
0x1948   :  { %13783 = vmatprep.subr.bf16.mxu1 %v14192_v61  ;;  %13777 = vmatprep.mubr.msk.bf16.mxu0 %vm14193_vm4, %v14192_v61 }
0x1949   :  { %13789 = vmatprep.mubr.msk.bf16.mxu1 %vm14193_vm4, %v14192_v61 }
0x194a   :  { %13772 = vmatpush3.bf16.msra.mxu0 %v16173_v30 }
0x194b   :  { %13784 = vmatpush3.bf16.msra.mxu1 %v16175_v5  ;;  %13773 = vmatprep.subr.bf16.mxu0 %v14192_v61 }
0x194c   :  { %13785 = vmatprep.subr.bf16.mxu1 %v14192_v61 }
0x194e   :  { %13774 = vmatpush3.bf16.msra.mxu0 %v16139_v60 }
0x194f   :  { %13786 = vmatpush3.bf16.msra.mxu1 %v16141_v55  ;;  %13775 = vmatprep.subr.bf16.mxu0 %v14192_v61 }
0x1950   :  { %13787 = vmatprep.subr.bf16.mxu1 %v14192_v61 }
0x1952   :  { %13776 = vmatpush3.bf16.msra.mxu0 %v16185_v43 }
0x1953   :  { %13788 = vmatpush3.bf16.msra.mxu1 %v16187_v53  ;;  %13793 = vmatprep.subr.bf16.mxu0 %v14192_v61 }
0x1954   :  { %13799 = vmatprep.subr.bf16.mxu1 %v14192_v61 }
0x1955   :  { %13778 = vmatmul.mubr.msk.bf16.vlgmr.msra.gmra.mxu0 %vm7256_vm6, %v14163_v0 }
0x1956   :  { %13790 = vmatmul.mubr.msk.bf16.vlgmr.msra.gmra.mxu1 %vm7256_vm6, %v14163_v0  ;;  %13795 = vmatprep.mubr.msk.bf16.mxu0 %vm14193_vm4, %v14192_v61 }
0x1957   :  { %13801 = vmatprep.mubr.msk.bf16.mxu1 %vm14193_vm4, %v14192_v61  ;;  %13794 = vmatpush3.bf16.msra.mxu0 %v14164_v42 }
0x1958   :  { %13800 = vmatpush3.bf16.msra.mxu1 %v14164_v42  ;;  %13805 = vmatprep.subr.bf16.mxu0 %v14192_v61 }
0x1959   :  { %13817 = vmatprep.subr.bf16.mxu1 %v14192_v61 }
0x1a05   :  { %v9930_v57 = vpop.f32.mrf.mxu0 }
0x1a06   :  { %v9974_v24 = vpop.f32.mrf.mxu1  ;;  %v9981_v48 = vadd.f32 %v9930_v57, %v9785_v63 }
0x1a07   :  { %v9983_v27 = vadd.f32 %v9974_v24, %v9787_v50  ;;  %v13761_v56 = vpop.f32.mrf.mxu0 }
0x1a08   :  { %v13767_v25 = vpop.f32.mrf.mxu1 }
0x1a09   :  { %v9933_v13 = vpop.f32.mrf.mxu0 }
0x1a0a   :  { %v9977_v19 = vpop.f32.mrf.mxu1  ;;  %v9982_v39 = vadd.f32 %v9933_v13, %v9786_v29 }
0x1a0b   :  { %v9984_v23 = vadd.f32 %v9977_v19, %v9788_v1  ;;  %v13762_v59 = vpop.f32.mrf.mxu0 }
0x1a0c   :  { %v13768_v17 = vpop.f32.mrf.mxu1 }
0x1a15   :  { %v10030_v58 = vpop.f32.mrf.mxu0 }
0x1a16   :  { %v10071_v4 = vpop.f32.mrf.mxu1 }
0x1a17   :  { %v13779_v2 = vpop.f32.mrf.mxu0 }
0x1a18   :  { %v13791_v3 = vpop.f32.mrf.mxu1 }
0x1a19   :  { %v10033_v18 = vpop.f32.mrf.mxu0 }
0x1a1a   :  { %v10074_v31 = vpop.f32.mrf.mxu1  ;;  %v10078_v44 = vpack.c.bf16 %v10033_v18, %v10030_v58 }
0x1a1b   :  { %v10079_v32 = vpack.c.bf16 %v10074_v31, %v10071_v4  ;;  %v13780_v7 = vpop.f32.mrf.mxu0 }
0x1a1c   :  { %v13792_v8 = vpop.f32.mrf.mxu1  ;;  %13796 = vmatmul.mubr.msk.bf16.vlgmr.msra.gmra.mxu0 %vm7450_vm7, %v10078_v44 }
0x1a1d   :  { %13802 = vmatmul.mubr.msk.bf16.vlgmr.msra.gmra.mxu1 %vm7450_vm7, %v10079_v32  ;;  %13806 = vmatpush3.bf16.msra.mxu0 %v16162_v35  ;;  %v14165_v35 = vld [vmem:[%s16782_s4 + $0x78] sm:$0xff]  }
0x1a1e   :  { %13818 = vmatpush3.bf16.msra.mxu1 %v16164_v11  ;;  %13807 = vmatprep.subr.bf16.mxu0 %v14192_v61 }
0x1a1f   :  { %13819 = vmatprep.subr.bf16.mxu1 %v14192_v61  ;;  %13813 = vmatprep.mubr.msk.bf16.mxu0 %vm14193_vm4, %v14192_v61 }
0x1a20   :  { %13825 = vmatprep.mubr.msk.bf16.mxu1 %vm14193_vm4, %v14192_v61 }
0x1a21   :  { %13808 = vmatpush3.bf16.msra.mxu0 %v16173_v30 }
0x1a22   :  { %13820 = vmatpush3.bf16.msra.mxu1 %v16175_v5  ;;  %13809 = vmatprep.subr.bf16.mxu0 %v14192_v61 }
0x1a23   :  { %13821 = vmatprep.subr.bf16.mxu1 %v14192_v61 }
0x1a25   :  { %13810 = vmatpush3.bf16.msra.mxu0 %v16139_v60  ;;  %v14166_v60 = vld [vmem:[%s16783_s5 + $0x78] sm:$0xff]  }
0x1a26   :  { %13822 = vmatpush3.bf16.msra.mxu1 %v16141_v55  ;;  %13811 = vmatprep.subr.bf16.mxu0 %v14192_v61 }
0x1a27   :  { %13823 = vmatprep.subr.bf16.mxu1 %v14192_v61 }
0x1a29   :  { %13812 = vmatpush3.bf16.msra.mxu0 %v16185_v43 }
0x1a2a   :  { %13824 = vmatpush3.bf16.msra.mxu1 %v16187_v53  ;;  %13829 = vmatprep.subr.bf16.mxu0 %v14192_v61 }
0x1a2b   :  { %13835 = vmatprep.subr.bf16.mxu1 %v14192_v61 }
0x1a2c   :  { %13814 = vmatmul.mubr.msk.bf16.vlgmr.msra.gmra.mxu0 %vm7256_vm6, %v14165_v35 }
0x1a2d   :  { %13826 = vmatmul.mubr.msk.bf16.vlgmr.msra.gmra.mxu1 %vm7256_vm6, %v14165_v35  ;;  %13831 = vmatprep.mubr.msk.bf16.mxu0 %vm14193_vm4, %v14192_v61 }
0x1a2e   :  { %13837 = vmatprep.mubr.msk.bf16.mxu1 %vm14193_vm4, %v14192_v61  ;;  %13830 = vmatpush3.bf16.msra.mxu0 %v14166_v60  ;;  %vm10377_vm4 = vcmask 261120  }
0x1a2f   :  { %13836 = vmatpush3.bf16.msra.mxu1 %v14166_v60 }
0x1adc   :  { %v10126_v55 = vpop.f32.mrf.mxu0 }
0x1add   :  { %v10170_v11 = vpop.f32.mrf.mxu1  ;;  %v10177_v30 = vadd.f32 %v10126_v55, %v9981_v48 }
0x1ade   :  { %v10179_v5 = vadd.f32 %v10170_v11, %v9983_v27  ;;  %v13797_v43 = vpop.f32.mrf.mxu0 }
0x1adf   :  { %v13803_v53 = vpop.f32.mrf.mxu1 }
0x1ae0   :  { %v10129_v21 = vpop.f32.mrf.mxu0 }
0x1ae1   :  { %v10173_v22 = vpop.f32.mrf.mxu1  ;;  %v10178_v36 = vadd.f32 %v10129_v21, %v9982_v39 }
0x1ae2   :  { %v10180_v12 = vadd.f32 %v10173_v22, %v9984_v23  ;;  %v13798_v38 = vpop.f32.mrf.mxu0 }
0x1ae3   :  { %v13804_v62 = vpop.f32.mrf.mxu1 }
0x1aec   :  { %v10226_v28 = vpop.f32.mrf.mxu0 }
0x1aed   :  { %v10267_v61 = vpop.f32.mrf.mxu1 }
0x1aee   :  { %v13815_v45 = vpop.f32.mrf.mxu0 }
0x1aef   :  { %v13827_v6 = vpop.f32.mrf.mxu1 }
0x1af0   :  { %v10229_v20 = vpop.f32.mrf.mxu0 }
0x1af1   :  { %v10270_v37 = vpop.f32.mrf.mxu1  ;;  %v10274_v63 = vpack.c.bf16 %v10229_v20, %v10226_v28 }
0x1af2   :  { %v10275_v50 = vpack.c.bf16 %v10270_v37, %v10267_v61  ;;  %v13816_v40 = vpop.f32.mrf.mxu0 }
0x1af3   :  { %v13828_v41 = vpop.f32.mrf.mxu1  ;;  %13832 = vmatmul.mubr.msk.bf16.vlgmr.msra.gmra.mxu0 %vm7450_vm7, %v10274_v63 }
0x1af4   :  { %13838 = vmatmul.mubr.msk.bf16.vlgmr.msra.gmra.mxu1 %vm7450_vm7, %v10275_v50 }
0x1bb3   :  { %v10322_v54 = vpop.f32.mrf.mxu0 }
0x1bb4   :  { %v10366_v47 = vpop.f32.mrf.mxu1  ;;  %v10373_v10 = vadd.f32 %v10322_v54, %v10177_v30 }
0x1bb5   :  { %v13833_v29 = vpop.f32.mrf.mxu0  ;;  %v10375_v33 = vadd.f32 %v10366_v47, %v10179_v5 }
0x1bb6   :  { %v13839_v1 = vpop.f32.mrf.mxu1  ;;  %v10378_v9 = vsel %vm10377_vm4, %v10373_v10, 0.0  ;;  %v11599_v29 = vld [vmem:[%s16784_s6] ss:$0 sm:$0xff] }
0x1bb7   :  { %v10325_v26 = vpop.f32.mrf.mxu0  ;;  %v10387_v52 = vsel %vm10377_vm4, %v10375_v33, 0.0 }
0x1bb8   :  { %v10369_v16 = vpop.f32.mrf.mxu1  ;;  %v10374_v14 = vadd.f32 %v10325_v26, %v10178_v36 }
0x1bb9   :  { %v10376_v15 = vadd.f32 %v10369_v16, %v10180_v12  ;;  %v13834_v46 = vpop.f32.mrf.mxu0  ;;  %v11600_v16 = vld [vmem:[%s16785_s7] ss:$0 sm:$0xff] }
0x1bba   :  { %v13840_v49 = vpop.f32.mrf.mxu1  ;;  %v10379_v34 = vsel %vm10377_vm4, %v10374_v14, 0.0 }
0x1bbb   :  { %v10388_v51 = vsel %vm10377_vm4, %v10376_v15, 0.0  ;;  %v10380_v0 = vadd.f32 %v10379_v34, %v10378_v9 }
0x1bbc   :  { %v10389_v42 = vadd.f32 %v10388_v51, %v10387_v52 }
0x1bbd   :  { %v10381_v57 = vrot.slane %v10380_v0, 4 }
0x1bbe   :  { %v10390_v24 = vrot.slane %v10389_v42, 4 }
0x1bbf   :  { %v10382_v48 = vadd.f32 %v10381_v57, %v10380_v0  ;;  %v10471_v0 = vld [vmem:[%s16786_s8] sm:$0xff] }
0x1bc0   :  { %v10391_v27 = vadd.f32 %v10390_v24, %v10389_v42 }
0x1bc1   :  { %v10383_v56 = vrot.slane %v10382_v48, 2 }
0x1bc2   :  { %v10392_v25 = vrot.slane %v10391_v27, 2 }
0x1bc3   :  { %v10384_v13 = vadd.f32 %v10383_v56, %v10382_v48 }
0x1bc4   :  { %v10393_v19 = vadd.f32 %v10392_v25, %v10391_v27  ;;  %v10472_v25 = vld [vmem:[%s16786_s8 + $0x8] sm:$0xff]  ;;  %s14194_s8 = smov [#allocation3]  }
0x1bc5   :  { %v10385_v39 = vrot.slane %v10384_v13, 1  ;;  %s10547_s28 = sshll.u32 %s14194_s8, 4  ;;  %s10548_s28 = int_to_ptr.vmem [resolvable:$true] %s10547_s28 }
0x1bc6   :  { %v10394_v23 = vrot.slane %v10393_v19, 1  ;;  %s14169_s0 = scalar_lea.vmem %s10548_s28, 16  ;;  %s14173_s29 = scalar_lea.vmem %s10548_s28, 32 }
0x1bc7   :  { %v10386_v59 = vadd.f32 %v10385_v39, %v10384_v13  ;;  %p14170_p0 = scmp.ne.s32.totalorder %s10548_s28, %s14169_s0  ;;  %p14174_p1 = scmp.lt.s32.totalorder %s10548_s28, %s10548_s28 }
0x1bc8   :  { %v10395_v17 = vadd.f32 %v10394_v23, %v10393_v19  ;;  %p14175_p2 = scmp.lt.s32.totalorder %s14173_s29, %s14169_s0 }
0x1bc9   :  { %v10396_v58 = vsel %vm10377_vm4, %v10386_v59, 0.0 }
0x1bca   :  { %v10397_v4 = vsel %vm10377_vm4, %v10395_v17, 0.0  ;;  %p14176_p3 = por %p14175_p2, %p14174_p1 }
0x1bcb   :  { %v10398_v2 = vadd.f32 %v10397_v4, %v10396_v58 }
0x1bcc   :  { %p14177_p4 = pnand %p14176_p3, %p14170_p0 }
0x1bcd   :  { %v10400_v3 = vmul.f32 0.03125, %v10398_v2 }
0x1bcf   :  { %v10401_v18 = vsub.f32 %v10373_v10, %v10400_v3  ;;  %v10402_v31 = vsub.f32 %v10374_v14, %v10400_v3  ;;  %v10403_v44 = vsub.f32 %v10375_v33, %v10400_v3  ;;  %v10404_v32 = vsub.f32 %v10376_v15, %v10400_v3 }
0x1bd1   :  { %v10405_v7 = vmul.f32 %v10401_v18, %v10401_v18  ;;  %v10406_v8 = vmul.f32 %v10402_v31, %v10402_v31  ;;  %v10407_v35 = vmul.f32 %v10403_v44, %v10403_v44  ;;  %v10408_v60 = vmul.f32 %v10404_v32, %v10404_v32 }
0x1bd3   :  { %v10409_v55 = vsel %vm10377_vm4, %v10405_v7, 0.0  ;;  %v10410_v11 = vsel %vm10377_vm4, %v10406_v8, 0.0  ;;  %v10418_v30 = vsel %vm10377_vm4, %v10407_v35, 0.0  ;;  %v10419_v5 = vsel %vm10377_vm4, %v10408_v60, 0.0 }
0x1bd4   :  { %v10411_v43 = vadd.f32 %v10410_v11, %v10409_v55  ;;  %v10420_v53 = vadd.f32 %v10419_v5, %v10418_v30 }
0x1bd6   :  { %v10412_v21 = vrot.slane %v10411_v43, 4  ;;  %v10421_v22 = vrot.slane %v10420_v53, 4 }
0x1bd8   :  { %v10413_v36 = vadd.f32 %v10412_v21, %v10411_v43  ;;  %v10422_v12 = vadd.f32 %v10421_v22, %v10420_v53 }
0x1bda   :  { %v10414_v38 = vrot.slane %v10413_v36, 2  ;;  %v10423_v62 = vrot.slane %v10422_v12, 2 }
0x1bdc   :  { %v10415_v28 = vadd.f32 %v10414_v38, %v10413_v36  ;;  %v10424_v61 = vadd.f32 %v10423_v62, %v10422_v12 }
0x1bde   :  { %v10416_v45 = vrot.slane %v10415_v28, 1  ;;  %v10425_v6 = vrot.slane %v10424_v61, 1 }
0x1be0   :  { %v10417_v20 = vadd.f32 %v10416_v45, %v10415_v28  ;;  %v10426_v37 = vadd.f32 %v10425_v6, %v10424_v61 }
0x1be2   :  { %v10427_v63 = vsel %vm10377_vm4, %v10417_v20, 0.0  ;;  %v10428_v50 = vsel %vm10377_vm4, %v10426_v37, 0.0 }
0x1be3   :  { %v10429_v40 = vadd.f32 %v10428_v50, %v10427_v63 }
0x1be5   :  { %v10430_v41 = vmul.f32 0.03125, %v10429_v40 }
0x1be7   :  { %v10431_v54 = vadd.f32 1e-05, %v10430_v41 }
0x1be9   :  { %14167 = vrsqrt.f32 %v10431_v54 }
0x1bf6   :  { %v14168_v47 = vpop.eup %14167 }
0x1bf7   :  { %v10436_v1 = vmul.f32 %v14168_v47, %v10404_v32  ;;  %v10435_v10 = vmul.f32 %v14168_v47, %v10403_v44  ;;  %v10433_v33 = vmul.f32 %v14168_v47, %v10401_v18  ;;  %v10434_v26 = vmul.f32 %v14168_v47, %v10402_v31  ;;  %v10522_v18 = vld [vmem:[#allocation2] sm:$0x1] }
0x1bf8   :  { %v10493_v31 = vlaneseq }
0x1bf9   :  { %v10447_v14 = vmul.f32 %v11599_v29, %v10436_v1  ;;  %v10446_v15 = vmul.f32 %v11599_v29, %v10435_v10  ;;  %v10444_v46 = vmul.f32 %v11599_v29, %v10433_v33  ;;  %v10445_v49 = vmul.f32 %v11599_v29, %v10434_v26 }
0x1bfa   :  { %v10494_v44 = vand.u32 127, %v10493_v31  ;;  %v10496_v32 = vshrl.u32 %v10493_v31, 7 }
0x1bfb   :  { %v10457_v9 = vadd.f32 %v11600_v16, %v10446_v15  ;;  %v10455_v52 = vadd.f32 %v11600_v16, %v10444_v46  ;;  %v10458_v34 = vadd.f32 %v11600_v16, %v10447_v14  ;;  %v10456_v51 = vadd.f32 %v11600_v16, %v10445_v49 }
0x1bfc   :  { %v10499_v7 = vadd.s32 4294967288, %v10494_v44  ;;  %v10497_v60 = vsub.s32 %v10494_v44, %v10496_v32  ;;  %v10530_v62 = vsub.s32 0, %v10496_v32 }
0x1bfd   :  { %vm10461_vm8 = vcmp.ge.f32.partialorder %v10457_v9, 0.0  ;;  %v10465_v42 = vmul.f32 0.2, %v10457_v9  ;;  %vm10459_vm9 = vcmp.ge.f32.partialorder %v10455_v52, 0.0  ;;  %v10463_v57 = vmul.f32 0.2, %v10455_v52 }
0x1bfe   :  { %vm10462_vm10 = vcmp.ge.f32.partialorder %v10458_v34, 0.0  ;;  %v10466_v24 = vmul.f32 0.2, %v10458_v34  ;;  %vm10460_vm11 = vcmp.ge.f32.partialorder %v10456_v51, 0.0  ;;  %v10464_v48 = vmul.f32 0.2, %v10456_v51 }
0x1bff   :  { %v10469_v27 = vsel %vm10461_vm8, %v10457_v9, %v10465_v42  ;;  %v10467_v56 = vsel %vm10459_vm9, %v10455_v52, %v10463_v57  ;;  %v10502_v55 = vsub.s32 %v10499_v7, %v10496_v32 }
0x1c00   :  { %v10475_v13 = vmul.f32 %v10471_v0, %v10469_v27  ;;  %v10473_v19 = vmul.f32 %v10471_v0, %v10467_v56  ;;  %v10470_v39 = vsel %vm10462_vm10, %v10458_v34, %v10466_v24  ;;  %v10468_v23 = vsel %vm10460_vm11, %v10456_v51, %v10464_v48 }
0x1c01   :  { %v10476_v58 = vmul.f32 %v10472_v25, %v10470_v39  ;;  %v10474_v4 = vmul.f32 %v10472_v25, %v10468_v23 }
0x1c02   :  { %v10483_v59 = vsel %vm10377_vm4, %v10475_v13, 0.0  ;;  %v10477_v17 = vsel %vm10377_vm4, %v10473_v19, 0.0 }
0x1c03   :  { %10484 = vadd.xlane.f32.xlu1 %v10483_v59  ;;  %10478 = vadd.xlane.f32.xlu0 %v10477_v17  ;;  %v10486_v2 = vsel %vm10377_vm4, %v10476_v58, 0.0  ;;  %v10480_v3 = vsel %vm10377_vm4, %v10474_v4, 0.0 }
0x1c07   :  { %10487 = vadd.xlane.f32.xlu1 %v10486_v2  ;;  %10481 = vadd.xlane.f32.xlu0 %v10480_v3 }
0x1c18   :  { %10525 = vperm.xlu1 %13877, %v10522_v18  }
0x1c8c   :  { %v10485_v8 = vpop.xlane.xlu1 %10484  ;;  %v10479_v35 = vpop.xlane.xlu0 %10478 }
0x1c8d   :  { %v10509_v5 = vrot.slane %v10485_v8, %v10497_v60  ;;  %v10498_v43 = vrot.slane %v10479_v35, %v10497_v60 }
0x1c90   :  { %v10488_v11 = vpop.xlane.xlu1 %10487  ;;  %v10482_v30 = vpop.xlane.xlu0 %10481 }
0x1c91   :  { %v10513_v53 = vrot.slane %v10488_v11, %v10502_v55  ;;  %v10503_v21 = vrot.slane %v10482_v30, %v10502_v55 }
0x1c93   :  { %v10505_v22 = vsel %vm10504_vm12, %v10503_v21, %v10498_v43  ;;  %v10514_v36 = vsel %vm10504_vm12, %v10513_v53, %v10509_v5 }
0x1c94   :  { %v10516_v12 = vsel %vm10515_vm13, %v10514_v36, %v10505_v22  ;;  %v10526_v28 = vpop.permute.xlu1 %10525 }
0x1c95   :  { %v10519_v38 = vsel %vm10518_vm14, %v10516_v12, 0.0  ;;  %v10531_v61 = vrot.slane %v10526_v28, %v10530_v62 }
0x1c96   :  { %10520 = vadd.xlane.f32.xlu0 %v10519_v38 }
0x1d1f   :  { %v10521_v45 = vpop.xlane.xlu0 %10520 }
0x1d20   :  { %v10532_v6 = vadd.f32 %v10531_v61, %v10521_v45 }
0x1d22   :  { %v10537_v20 = vrot.slane %v10532_v6, %v10497_v60 }
0x1d24   :  { %10540 = vst.msk [vmem:[#allocation3] sm:$0x1] %vm10539_vm15, %v10537_v20 }
0x1d25   :  { %14180 = shalt.err (!%p14177_p4)
}
0x1d26   :  { %10550 = dma.vmem_to_hbm [thread:$0]  %s10548_s28, 16, %s16788_s10, [#allocation4]  }
0x1d27   :  { %14189 = dma.done.wait [#allocation4], 16  }
0x1d28   :  { %14190 = vsyncadd [#allocation4], 4294967280 }
0x1d29   :  { %10554 = vsyncpa [#allocation4], 1 }

</bundles_post_ra>
